<compile_context>
chip_gen: v7x
topology: tpu7x:2x2x1
jax: 0.10.0
libtpu: 0.0.40
codegen_flags: <defaults>
</compile_context>

<pallas_src>
import functools

import jax
import jax.numpy as jnp
import numpy as np
from jax import lax
from jax.experimental import pallas as pl
from jax.experimental.pallas import tpu as pltpu

# NT matmul (contract last dims): energy[i, j] = sum_c q[i, c] * k[j, c]
_NT_DIMS = (((1,), (1,)), ((), ()))


def _mish(x):
    # x * tanh(softplus(x)) with a single exp:
    #   u = e^x ; tanh(log(1 + u)) = (u^2 + 2u) / (u^2 + 2u + 2)
    # Guarded for large x (mish(x) -> x); the clamp keeps the unused branch finite.
    u = jnp.exp(jnp.minimum(x, 20.0))
    num = u * (u + 2.0)
    y = x * num * pl.reciprocal(num + 2.0, approx=True)
    return jnp.where(x > 20.0, x, y)


def _fused_kernel(x_ref, masks_ref, w21_ref, w222_ref, w223_ref, w224_ref,
                  wqkv_ref, vec24_ref, vec6_ref, bqkv_ref, o_ref, *, B, H, W):
    N = H * W
    BN = B * N
    PAD = W + 1                 # max |row shift| of a 3x3 tap on the flattened image

    # ---- conv21 (1,1,2) + folded BN21 + mish: two VPU broadcast FMAs ----
    x = x_ref[...]                                                # (BN, 2)
    w21 = w21_ref[...]                                            # (2, 24)
    y = x[:, 0:1] * w21[0:1, :] + x[:, 1:2] * w21[1:2, :] + vec24_ref[0:1, :]
    x21 = _mish(y)                                                # (BN, 24)

    # torch.chunk(X21, 4, dim=1) -> lane slices
    x221 = x21[:, 0:6]
    c1 = x21[:, 6:12]
    c2 = x21[:, 12:18]
    c3 = x21[:, 18:24]

    def conv3x3(val, w_ref, b_row):
        # 'same' 3x3 conv on the flattened (BN, cin) activation:
        #   ONE matmul against all 9 taps' packed/folded weights -> (BN, 54),
        #   then per-tap row shifts via static slices of a zero-row-extended
        #   copy + precomputed border masks.  No pad scratch, no 3D reshapes.
        ko = w_ref.shape[1]                                       # 9 * 6
        co = ko // 9
        prod = jnp.dot(val, w_ref[...], preferred_element_type=jnp.float32)
        zpad = jnp.zeros((PAD, ko), jnp.float32)
        ext = jnp.concatenate([zpad, prod, zpad], axis=0)         # (BN + 2*PAD, 54)
        acc = prod[:, 4 * co:5 * co] + b_row                      # center tap, mask == 1
        for t in range(9):
            if t == 4:
                continue
            dy, dx = t // 3 - 1, t % 3 - 1
            off = PAD + dy * W + dx                               # static, in [0, 2*PAD]
            piece = ext[off:off + BN, t * co:(t + 1) * co]
            acc = acc + piece * masks_ref[t * BN:(t + 1) * BN, :]
        return acc

    x222 = _mish(conv3x3(c1, w222_ref, vec6_ref[0:1, :]))
    x223 = _mish(conv3x3(jnp.concatenate([x222, c2], axis=-1),
                         w223_ref, vec6_ref[1:2, :]))
    x224 = conv3x3(jnp.concatenate([x223, c3], axis=-1),
                   w224_ref, vec6_ref[2:3, :])                    # no BN/act here

    x22 = jnp.concatenate([x221, x222, x223, x224], axis=-1)      # (BN, 24)
    x22 = _mish(x22 * vec24_ref[1:2, :] + vec24_ref[2:3, :])      # BN22 + mish

    # ---- PAM attention: fused QKV projection (gamma folded into V) ----
    qkv = jnp.dot(x22, wqkv_ref[...],
                  preferred_element_type=jnp.float32) + bqkv_ref[...]   # (BN, 30)
    ssp = vec24_ref[3:4, :]
    shsp = vec24_ref[4:5, :]
    rows = []
    for b in range(B):                                            # B = 2, static unroll
        q = qkv[b * N:(b + 1) * N, 0:3]
        k = qkv[b * N:(b + 1) * N, 3:6]
        v = qkv[b * N:(b + 1) * N, 6:30]
        energy = lax.dot_general(q, k, _NT_DIMS,
                                 preferred_element_type=jnp.float32)    # (N, N)
        energy = energy - jnp.max(energy, axis=-1, keepdims=True)
        p = jnp.exp(energy)
        attn = p * pl.reciprocal(jnp.sum(p, axis=-1, keepdims=True), approx=True)
        out = jnp.dot(attn, v, preferred_element_type=jnp.float32)      # (N, 24)
        x22b = x22[b * N:(b + 1) * N, :]
        # PAM residual (*gamma already in v), *X22, BN_spatial + mish (dropout = id)
        y2 = _mish((out + x22b) * x22b * ssp + shsp)
        rows.append(jnp.sum(y2, axis=0, keepdims=True) * (1.0 / N))     # global avg pool
    o_ref[...] = jnp.concatenate(rows, axis=0)                          # (B, 24)


def position_model_forward(x, P):
    B, H, W, D = x.shape
    x2 = x.reshape(B * H * W, D)
    kernel = functools.partial(_fused_kernel, B=B, H=H, W=W)
    vmem = pl.BlockSpec(memory_space=pltpu.MemorySpace.VMEM)
    return pl.pallas_call(
        kernel,
        out_shape=jax.ShapeDtypeStruct((B, 24), jnp.float32),
        in_specs=[vmem] * 10,
        out_specs=vmem,
    )(x2, P["masks"], P["w21"], P["w222"], P["w223"], P["w224"],
      P["wqkv"], P["vec24"], P["vec6"], P["bqkv"])


# ---------------------------------------------------------------------------
# Deterministic parameter init (shapes per the PyTorch __init__; eval-mode BN
# running stats folded with the module's eps=1e-3) + host-side packing/folding.
# ---------------------------------------------------------------------------
def init_raw_params(key):
    keys = iter(jax.random.split(key, 64))

    def nrm(shape, s=0.1):
        return jax.random.normal(next(keys), shape, jnp.float32) * s

    def bn(c, eps=1e-3):
        w = 1.0 + nrm((c,), 0.1)
        b = nrm((c,), 0.1)
        m = nrm((c,), 0.1)
        v = 1.0 + jnp.abs(nrm((c,), 0.2))
        s = w / jnp.sqrt(v + eps)
        return s, b - m * s

    R = {}
    R["w21"] = nrm((24, 2))                  # Conv3d(1,24,(1,1,2)) weight[:,0,0,0,:]
    R["b21"] = nrm((24,))
    R["s21"], R["sh21"] = bn(24)
    R["w222"] = nrm((6, 6, 3, 3));  R["b222"] = nrm((6,))
    R["s222"], R["sh222"] = bn(6)
    R["w223"] = nrm((6, 12, 3, 3)); R["b223"] = nrm((6,))
    R["s223"], R["sh223"] = bn(6)
    R["w224"] = nrm((6, 12, 3, 3)); R["b224"] = nrm((6,))
    R["s22"], R["sh22"] = bn(24)
    R["wq"] = nrm((3, 24)); R["bq"] = nrm((3,))
    R["wk"] = nrm((3, 24)); R["bk"] = nrm((3,))
    R["wv"] = nrm((24, 24)); R["bv"] = nrm((24,))
    # PyTorch inits PAM gamma = zeros(1); nonzero here so the attention path is
    # exercised numerically (set 0.0 to match a fresh torch model exactly).
    R["gamma"] = jnp.float32(0.5)
    R["ssp"], R["shsp"] = bn(24)
    return R


def pack_params(R, B, H, W):
    N = H * W

    def pack_conv(w, b, s=None, sh=None):
        # (O, I, 3, 3) -> (I, 9*O), column = tap*O + o ; fold BN scale/shift.
        O, I = w.shape[0], w.shape[1]
        wp = jnp.transpose(w, (1, 2, 3, 0)).reshape(I, 9 * O)
        if s is not None:
            wp = wp * jnp.tile(s, 9)[None, :]
            b = b * s + sh
        return wp, b

    P = {}
    P["w21"] = R["w21"].T * R["s21"][None, :]                       # (2, 24), BN21 folded
    b21 = R["b21"] * R["s21"] + R["sh21"]
    P["w222"], b222 = pack_conv(R["w222"], R["b222"], R["s222"], R["sh222"])
    P["w223"], b223 = pack_conv(R["w223"], R["b223"], R["s223"], R["sh223"])
    P["w224"], b224 = pack_conv(R["w224"], R["b224"])
    # fused QKV; PAM gamma folded into the V projection
    P["wqkv"] = jnp.concatenate(
        [R["wq"].T, R["wk"].T, R["wv"].T * R["gamma"]], axis=1)     # (24, 30)
    P["bqkv"] = jnp.concatenate(
        [R["bq"], R["bk"], R["bv"] * R["gamma"]])[None, :]          # (1, 30)
    P["vec24"] = jnp.stack([b21, R["s22"], R["sh22"], R["ssp"], R["shsp"]])  # (5, 24)
    P["vec6"] = jnp.stack([b222, b223, b224])                       # (3, 6)
    # per-tap 'same'-padding border masks on the flattened image, tiled over batch
    yy, xx = jnp.meshgrid(jnp.arange(H), jnp.arange(W), indexing="ij")
    blocks = []
    for t in range(9):
        dy, dx = t // 3 - 1, t % 3 - 1
        m = ((yy + dy >= 0) & (yy + dy < H) &
             (xx + dx >= 0) & (xx + dx < W)).astype(jnp.float32).reshape(N)
        blocks.append(jnp.tile(m, B))
    P["masks"] = jnp.concatenate(blocks).reshape(9 * B * N, 1)      # (9*B*N, 1)
    return P


# ---------------------------------------------------------------------------
# Pure-JAX reference (numerical sanity check of the fused Pallas kernel).
# ---------------------------------------------------------------------------
def reference_forward(x, R):
    B, H, W, D = x.shape

    def mish_ref(z):
        return z * jnp.tanh(jnp.logaddexp(z, 0.0))

    def conv3(z, w, b):
        wr = jnp.transpose(w, (2, 3, 1, 0))                          # HWIO
        return lax.conv_general_dilated(
            z, wr, (1, 1), ((1, 1), (1, 1)),
            dimension_numbers=("NHWC", "HWIO", "NHWC")) + b

    x21 = mish_ref((jnp.einsum("bhwd,od->bhwo", x, R["w21"]) + R["b21"])
                   * R["s21"] + R["sh21"])
    xs = [x21[..., 6 * i:6 * (i + 1)] for i in range(4)]
    x222 = mish_ref(conv3(xs[1], R["w222"], R["b222"]) * R["s222"] + R["sh222"])
    x223 = mish_ref(conv3(jnp.concatenate([x222, xs[2]], -1), R["w223"], R["b223"])
                    * R["s223"] + R["sh223"])
    x224 = conv3(jnp.concatenate([x223, xs[3]], -1), R["w224"], R["b224"])
    x22 = mish_ref(jnp.concatenate([xs[0], x222, x223, x224], -1)
                   * R["s22"] + R["sh22"])
    f = x22.reshape(B, H * W, 24)
    q = f @ R["wq"].T + R["bq"]
    k = f @ R["wk"].T + R["bk"]
    v = f @ R["wv"].T + R["bv"]
    attn = jax.nn.softmax(jnp.einsum("bnc,bmc->bnm", q, k), axis=-1)
    out = jnp.einsum("bnm,bmc->bnc", attn, v)
    y2 = mish_ref((R["gamma"] * out + f) * f * R["ssp"] + R["shsp"])
    return jnp.mean(y2, axis=1)


if __name__ == "__main__":
    key = jax.random.PRNGKey(0)
    k_x, k_p = jax.random.split(key)
    B, H, W, D = 2, 8, 8, 2
    x = jax.random.normal(k_x, (B, H, W, D), jnp.float32)
    R = init_raw_params(k_p)
    P = pack_params(R, B, H, W)

    feat = jax.jit(position_model_forward)(x, P)
    feat = jax.block_until_ready(feat)
    assert feat.shape == (B, 24)

    ref = jax.block_until_ready(reference_forward(x, R))
    np.testing.assert_allclose(np.asarray(feat), np.asarray(ref),
                               rtol=5e-2, atol=1e-2)
    print("KERNEL_OK")
</pallas_src>

<mosaic_0001>
module attributes {stable_mosaic.version = 11 : i64} {
  func.func @_fused_kernel(%arg0: memref<128x2xf32, #tpu.memory_space<vmem>>, %arg1: memref<1152x1xf32, #tpu.memory_space<vmem>>, %arg2: memref<2x24xf32, #tpu.memory_space<vmem>>, %arg3: memref<6x54xf32, #tpu.memory_space<vmem>>, %arg4: memref<12x54xf32, #tpu.memory_space<vmem>>, %arg5: memref<12x54xf32, #tpu.memory_space<vmem>>, %arg6: memref<24x30xf32, #tpu.memory_space<vmem>>, %arg7: memref<5x24xf32, #tpu.memory_space<vmem>>, %arg8: memref<3x6xf32, #tpu.memory_space<vmem>>, %arg9: memref<1x30xf32, #tpu.memory_space<vmem>>, %arg10: memref<2x24xf32, #tpu.memory_space<vmem>>) attributes {dimension_semantics = [], scalar_prefetch = 0 : i64, scratch_operands = 0 : i64, tpu.core_type = #tpu.core_type<tc>} {
    %c0 = arith.constant 0 : index
    %c0_0 = arith.constant 0 : index
    %0 = vector.load %arg0[%c0, %c0_0] : memref<128x2xf32, #tpu.memory_space<vmem>>, vector<128x2xf32>
    %c0_1 = arith.constant 0 : index
    %c0_2 = arith.constant 0 : index
    %1 = vector.load %arg2[%c0_1, %c0_2] : memref<2x24xf32, #tpu.memory_space<vmem>>, vector<2x24xf32>
    %2 = vector.extract_strided_slice %0 {offsets = [0, 0], sizes = [128, 1], strides = [1, 1]} : vector<128x2xf32> to vector<128x1xf32>
    %3 = vector.extract_strided_slice %1 {offsets = [0, 0], sizes = [1, 24], strides = [1, 1]} : vector<2x24xf32> to vector<1x24xf32>
    %4 = vector.broadcast %2 : vector<128x1xf32> to vector<128x24xf32>
    %5 = vector.broadcast %3 : vector<1x24xf32> to vector<128x24xf32>
    %6 = arith.mulf %4, %5 : vector<128x24xf32>
    %7 = vector.extract_strided_slice %0 {offsets = [0, 1], sizes = [128, 1], strides = [1, 1]} : vector<128x2xf32> to vector<128x1xf32>
    %8 = vector.extract_strided_slice %1 {offsets = [1, 0], sizes = [1, 24], strides = [1, 1]} : vector<2x24xf32> to vector<1x24xf32>
    %9 = vector.broadcast %7 : vector<128x1xf32> to vector<128x24xf32>
    %10 = vector.broadcast %8 : vector<1x24xf32> to vector<128x24xf32>
    %11 = arith.mulf %9, %10 : vector<128x24xf32>
    %12 = arith.addf %6, %11 : vector<128x24xf32>
    %c0_3 = arith.constant 0 : index
    %c0_4 = arith.constant 0 : index
    %13 = vector.load %arg7[%c0_3, %c0_4] : memref<5x24xf32, #tpu.memory_space<vmem>>, vector<1x24xf32>
    %14 = vector.broadcast %13 : vector<1x24xf32> to vector<128x24xf32>
    %15 = arith.addf %12, %14 : vector<128x24xf32>
    %cst = arith.constant 2.000000e+01 : f32
    %16 = vector.broadcast %cst : f32 to vector<128x24xf32>
    %17 = arith.minimumf %15, %16 : vector<128x24xf32>
    %18 = math.exp %17 : vector<128x24xf32>
    %cst_5 = arith.constant 2.000000e+00 : f32
    %19 = vector.broadcast %cst_5 : f32 to vector<128x24xf32>
    %20 = arith.addf %18, %19 : vector<128x24xf32>
    %21 = arith.mulf %18, %20 : vector<128x24xf32>
    %22 = arith.mulf %15, %21 : vector<128x24xf32>
    %cst_6 = arith.constant 2.000000e+00 : f32
    %23 = vector.broadcast %cst_6 : f32 to vector<128x24xf32>
    %24 = arith.addf %21, %23 : vector<128x24xf32>
    %25 = tpu.reciprocal %24 {approx = true} : vector<128x24xf32> -> vector<128x24xf32>
    %26 = arith.mulf %22, %25 : vector<128x24xf32>
    %cst_7 = arith.constant 2.000000e+01 : f32
    %27 = vector.broadcast %cst_7 : f32 to vector<128x24xf32>
    %28 = arith.cmpf ogt, %15, %27 : vector<128x24xf32>
    %29 = arith.select %28, %15, %26 : vector<128x24xi1>, vector<128x24xf32>
    %30 = vector.extract_strided_slice %29 {offsets = [0, 0], sizes = [128, 6], strides = [1, 1]} : vector<128x24xf32> to vector<128x6xf32>
    %31 = vector.extract_strided_slice %29 {offsets = [0, 6], sizes = [128, 6], strides = [1, 1]} : vector<128x24xf32> to vector<128x6xf32>
    %32 = vector.extract_strided_slice %29 {offsets = [0, 12], sizes = [128, 6], strides = [1, 1]} : vector<128x24xf32> to vector<128x6xf32>
    %33 = vector.extract_strided_slice %29 {offsets = [0, 18], sizes = [128, 6], strides = [1, 1]} : vector<128x24xf32> to vector<128x6xf32>
    %c0_8 = arith.constant 0 : index
    %c0_9 = arith.constant 0 : index
    %34 = vector.load %arg8[%c0_8, %c0_9] : memref<3x6xf32, #tpu.memory_space<vmem>>, vector<1x6xf32>
    %c0_10 = arith.constant 0 : index
    %c0_11 = arith.constant 0 : index
    %35 = vector.load %arg3[%c0_10, %c0_11] : memref<6x54xf32, #tpu.memory_space<vmem>>, vector<6x54xf32>
    %cst_12 = arith.constant dense<0.000000e+00> : vector<128x54xf32>
    %36 = tpu.matmul %31, %35, %cst_12 {dimension_numbers = #tpu.dot_dimension_numbers<[1], [0], [0], [1], [0, 0, 1, 1], [], []>} : vector<128x6xf32>, vector<6x54xf32>, vector<128x54xf32> -> vector<128x54xf32>
    %cst_13 = arith.constant 0.000000e+00 : f32
    %37 = vector.broadcast %cst_13 : f32 to vector<9x54xf32>
    %38 = tpu.concatenate %37, %36, %37 in 0 : vector<9x54xf32>, vector<128x54xf32>, vector<9x54xf32> -> vector<146x54xf32>
    %39 = vector.extract_strided_slice %36 {offsets = [0, 24], sizes = [128, 6], strides = [1, 1]} : vector<128x54xf32> to vector<128x6xf32>
    %40 = vector.broadcast %34 : vector<1x6xf32> to vector<128x6xf32>
    %41 = arith.addf %39, %40 : vector<128x6xf32>
    %42 = vector.extract_strided_slice %38 {offsets = [0, 0], sizes = [128, 6], strides = [1, 1]} : vector<146x54xf32> to vector<128x6xf32>
    %c0_14 = arith.constant 0 : index
    %c0_15 = arith.constant 0 : index
    %43 = vector.load %arg1[%c0_14, %c0_15] : memref<1152x1xf32, #tpu.memory_space<vmem>>, vector<128x1xf32>
    %44 = vector.broadcast %43 : vector<128x1xf32> to vector<128x6xf32>
    %45 = arith.mulf %42, %44 : vector<128x6xf32>
    %46 = arith.addf %41, %45 : vector<128x6xf32>
    %47 = vector.extract_strided_slice %38 {offsets = [1, 6], sizes = [128, 6], strides = [1, 1]} : vector<146x54xf32> to vector<128x6xf32>
    %c128 = arith.constant 128 : index
    %c0_16 = arith.constant 0 : index
    %48 = vector.load %arg1[%c128, %c0_16] : memref<1152x1xf32, #tpu.memory_space<vmem>>, vector<128x1xf32>
    %49 = vector.broadcast %48 : vector<128x1xf32> to vector<128x6xf32>
    %50 = arith.mulf %47, %49 : vector<128x6xf32>
    %51 = arith.addf %46, %50 : vector<128x6xf32>
    %52 = vector.extract_strided_slice %38 {offsets = [2, 12], sizes = [128, 6], strides = [1, 1]} : vector<146x54xf32> to vector<128x6xf32>
    %c256 = arith.constant 256 : index
    %c0_17 = arith.constant 0 : index
    %53 = vector.load %arg1[%c256, %c0_17] : memref<1152x1xf32, #tpu.memory_space<vmem>>, vector<128x1xf32>
    %54 = vector.broadcast %53 : vector<128x1xf32> to vector<128x6xf32>
    %55 = arith.mulf %52, %54 : vector<128x6xf32>
    %56 = arith.addf %51, %55 : vector<128x6xf32>
    %57 = vector.extract_strided_slice %38 {offsets = [8, 18], sizes = [128, 6], strides = [1, 1]} : vector<146x54xf32> to vector<128x6xf32>
    %c384 = arith.constant 384 : index
    %c0_18 = arith.constant 0 : index
    %58 = vector.load %arg1[%c384, %c0_18] : memref<1152x1xf32, #tpu.memory_space<vmem>>, vector<128x1xf32>
    %59 = vector.broadcast %58 : vector<128x1xf32> to vector<128x6xf32>
    %60 = arith.mulf %57, %59 : vector<128x6xf32>
    %61 = arith.addf %56, %60 : vector<128x6xf32>
    %62 = vector.extract_strided_slice %38 {offsets = [10, 30], sizes = [128, 6], strides = [1, 1]} : vector<146x54xf32> to vector<128x6xf32>
    %c640 = arith.constant 640 : index
    %c0_19 = arith.constant 0 : index
    %63 = vector.load %arg1[%c640, %c0_19] : memref<1152x1xf32, #tpu.memory_space<vmem>>, vector<128x1xf32>
    %64 = vector.broadcast %63 : vector<128x1xf32> to vector<128x6xf32>
    %65 = arith.mulf %62, %64 : vector<128x6xf32>
    %66 = arith.addf %61, %65 : vector<128x6xf32>
    %67 = vector.extract_strided_slice %38 {offsets = [16, 36], sizes = [128, 6], strides = [1, 1]} : vector<146x54xf32> to vector<128x6xf32>
    %c768 = arith.constant 768 : index
    %c0_20 = arith.constant 0 : index
    %68 = vector.load %arg1[%c768, %c0_20] : memref<1152x1xf32, #tpu.memory_space<vmem>>, vector<128x1xf32>
    %69 = vector.broadcast %68 : vector<128x1xf32> to vector<128x6xf32>
    %70 = arith.mulf %67, %69 : vector<128x6xf32>
    %71 = arith.addf %66, %70 : vector<128x6xf32>
    %72 = vector.extract_strided_slice %38 {offsets = [17, 42], sizes = [128, 6], strides = [1, 1]} : vector<146x54xf32> to vector<128x6xf32>
    %c896 = arith.constant 896 : index
    %c0_21 = arith.constant 0 : index
    %73 = vector.load %arg1[%c896, %c0_21] : memref<1152x1xf32, #tpu.memory_space<vmem>>, vector<128x1xf32>
    %74 = vector.broadcast %73 : vector<128x1xf32> to vector<128x6xf32>
    %75 = arith.mulf %72, %74 : vector<128x6xf32>
    %76 = arith.addf %71, %75 : vector<128x6xf32>
    %77 = vector.extract_strided_slice %38 {offsets = [18, 48], sizes = [128, 6], strides = [1, 1]} : vector<146x54xf32> to vector<128x6xf32>
    %c1024 = arith.constant 1024 : index
    %c0_22 = arith.constant 0 : index
    %78 = vector.load %arg1[%c1024, %c0_22] : memref<1152x1xf32, #tpu.memory_space<vmem>>, vector<128x1xf32>
    %79 = vector.broadcast %78 : vector<128x1xf32> to vector<128x6xf32>
    %80 = arith.mulf %77, %79 : vector<128x6xf32>
    %81 = arith.addf %76, %80 : vector<128x6xf32>
    %cst_23 = arith.constant 2.000000e+01 : f32
    %82 = vector.broadcast %cst_23 : f32 to vector<128x6xf32>
    %83 = arith.minimumf %81, %82 : vector<128x6xf32>
    %84 = math.exp %83 : vector<128x6xf32>
    %cst_24 = arith.constant 2.000000e+00 : f32
    %85 = vector.broadcast %cst_24 : f32 to vector<128x6xf32>
    %86 = arith.addf %84, %85 : vector<128x6xf32>
    %87 = arith.mulf %84, %86 : vector<128x6xf32>
    %88 = arith.mulf %81, %87 : vector<128x6xf32>
    %cst_25 = arith.constant 2.000000e+00 : f32
    %89 = vector.broadcast %cst_25 : f32 to vector<128x6xf32>
    %90 = arith.addf %87, %89 : vector<128x6xf32>
    %91 = tpu.reciprocal %90 {approx = true} : vector<128x6xf32> -> vector<128x6xf32>
    %92 = arith.mulf %88, %91 : vector<128x6xf32>
    %cst_26 = arith.constant 2.000000e+01 : f32
    %93 = vector.broadcast %cst_26 : f32 to vector<128x6xf32>
    %94 = arith.cmpf ogt, %81, %93 : vector<128x6xf32>
    %95 = arith.select %94, %81, %92 : vector<128x6xi1>, vector<128x6xf32>
    %96 = tpu.concatenate %95, %32 in 1 : vector<128x6xf32>, vector<128x6xf32> -> vector<128x12xf32>
    %c1 = arith.constant 1 : index
    %c0_27 = arith.constant 0 : index
    %97 = vector.load %arg8[%c1, %c0_27] : memref<3x6xf32, #tpu.memory_space<vmem>>, vector<1x6xf32>
    %c0_28 = arith.constant 0 : index
    %c0_29 = arith.constant 0 : index
    %98 = vector.load %arg4[%c0_28, %c0_29] : memref<12x54xf32, #tpu.memory_space<vmem>>, vector<12x54xf32>
    %cst_30 = arith.constant dense<0.000000e+00> : vector<128x54xf32>
    %99 = tpu.matmul %96, %98, %cst_30 {dimension_numbers = #tpu.dot_dimension_numbers<[1], [0], [0], [1], [0, 0, 1, 1], [], []>} : vector<128x12xf32>, vector<12x54xf32>, vector<128x54xf32> -> vector<128x54xf32>
    %cst_31 = arith.constant 0.000000e+00 : f32
    %100 = vector.broadcast %cst_31 : f32 to vector<9x54xf32>
    %101 = tpu.concatenate %100, %99, %100 in 0 : vector<9x54xf32>, vector<128x54xf32>, vector<9x54xf32> -> vector<146x54xf32>
    %102 = vector.extract_strided_slice %99 {offsets = [0, 24], sizes = [128, 6], strides = [1, 1]} : vector<128x54xf32> to vector<128x6xf32>
    %103 = vector.broadcast %97 : vector<1x6xf32> to vector<128x6xf32>
    %104 = arith.addf %102, %103 : vector<128x6xf32>
    %105 = vector.extract_strided_slice %101 {offsets = [0, 0], sizes = [128, 6], strides = [1, 1]} : vector<146x54xf32> to vector<128x6xf32>
    %c0_32 = arith.constant 0 : index
    %c0_33 = arith.constant 0 : index
    %106 = vector.load %arg1[%c0_32, %c0_33] : memref<1152x1xf32, #tpu.memory_space<vmem>>, vector<128x1xf32>
    %107 = vector.broadcast %106 : vector<128x1xf32> to vector<128x6xf32>
    %108 = arith.mulf %105, %107 : vector<128x6xf32>
    %109 = arith.addf %104, %108 : vector<128x6xf32>
    %110 = vector.extract_strided_slice %101 {offsets = [1, 6], sizes = [128, 6], strides = [1, 1]} : vector<146x54xf32> to vector<128x6xf32>
    %c128_34 = arith.constant 128 : index
    %c0_35 = arith.constant 0 : index
    %111 = vector.load %arg1[%c128_34, %c0_35] : memref<1152x1xf32, #tpu.memory_space<vmem>>, vector<128x1xf32>
    %112 = vector.broadcast %111 : vector<128x1xf32> to vector<128x6xf32>
    %113 = arith.mulf %110, %112 : vector<128x6xf32>
    %114 = arith.addf %109, %113 : vector<128x6xf32>
    %115 = vector.extract_strided_slice %101 {offsets = [2, 12], sizes = [128, 6], strides = [1, 1]} : vector<146x54xf32> to vector<128x6xf32>
    %c256_36 = arith.constant 256 : index
    %c0_37 = arith.constant 0 : index
    %116 = vector.load %arg1[%c256_36, %c0_37] : memref<1152x1xf32, #tpu.memory_space<vmem>>, vector<128x1xf32>
    %117 = vector.broadcast %116 : vector<128x1xf32> to vector<128x6xf32>
    %118 = arith.mulf %115, %117 : vector<128x6xf32>
    %119 = arith.addf %114, %118 : vector<128x6xf32>
    %120 = vector.extract_strided_slice %101 {offsets = [8, 18], sizes = [128, 6], strides = [1, 1]} : vector<146x54xf32> to vector<128x6xf32>
    %c384_38 = arith.constant 384 : index
    %c0_39 = arith.constant 0 : index
    %121 = vector.load %arg1[%c384_38, %c0_39] : memref<1152x1xf32, #tpu.memory_space<vmem>>, vector<128x1xf32>
    %122 = vector.broadcast %121 : vector<128x1xf32> to vector<128x6xf32>
    %123 = arith.mulf %120, %122 : vector<128x6xf32>
    %124 = arith.addf %119, %123 : vector<128x6xf32>
    %125 = vector.extract_strided_slice %101 {offsets = [10, 30], sizes = [128, 6], strides = [1, 1]} : vector<146x54xf32> to vector<128x6xf32>
    %c640_40 = arith.constant 640 : index
    %c0_41 = arith.constant 0 : index
    %126 = vector.load %arg1[%c640_40, %c0_41] : memref<1152x1xf32, #tpu.memory_space<vmem>>, vector<128x1xf32>
    %127 = vector.broadcast %126 : vector<128x1xf32> to vector<128x6xf32>
    %128 = arith.mulf %125, %127 : vector<128x6xf32>
    %129 = arith.addf %124, %128 : vector<128x6xf32>
    %130 = vector.extract_strided_slice %101 {offsets = [16, 36], sizes = [128, 6], strides = [1, 1]} : vector<146x54xf32> to vector<128x6xf32>
    %c768_42 = arith.constant 768 : index
    %c0_43 = arith.constant 0 : index
    %131 = vector.load %arg1[%c768_42, %c0_43] : memref<1152x1xf32, #tpu.memory_space<vmem>>, vector<128x1xf32>
    %132 = vector.broadcast %131 : vector<128x1xf32> to vector<128x6xf32>
    %133 = arith.mulf %130, %132 : vector<128x6xf32>
    %134 = arith.addf %129, %133 : vector<128x6xf32>
    %135 = vector.extract_strided_slice %101 {offsets = [17, 42], sizes = [128, 6], strides = [1, 1]} : vector<146x54xf32> to vector<128x6xf32>
    %c896_44 = arith.constant 896 : index
    %c0_45 = arith.constant 0 : index
    %136 = vector.load %arg1[%c896_44, %c0_45] : memref<1152x1xf32, #tpu.memory_space<vmem>>, vector<128x1xf32>
    %137 = vector.broadcast %136 : vector<128x1xf32> to vector<128x6xf32>
    %138 = arith.mulf %135, %137 : vector<128x6xf32>
    %139 = arith.addf %134, %138 : vector<128x6xf32>
    %140 = vector.extract_strided_slice %101 {offsets = [18, 48], sizes = [128, 6], strides = [1, 1]} : vector<146x54xf32> to vector<128x6xf32>
    %c1024_46 = arith.constant 1024 : index
    %c0_47 = arith.constant 0 : index
    %141 = vector.load %arg1[%c1024_46, %c0_47] : memref<1152x1xf32, #tpu.memory_space<vmem>>, vector<128x1xf32>
    %142 = vector.broadcast %141 : vector<128x1xf32> to vector<128x6xf32>
    %143 = arith.mulf %140, %142 : vector<128x6xf32>
    %144 = arith.addf %139, %143 : vector<128x6xf32>
    %cst_48 = arith.constant 2.000000e+01 : f32
    %145 = vector.broadcast %cst_48 : f32 to vector<128x6xf32>
    %146 = arith.minimumf %144, %145 : vector<128x6xf32>
    %147 = math.exp %146 : vector<128x6xf32>
    %cst_49 = arith.constant 2.000000e+00 : f32
    %148 = vector.broadcast %cst_49 : f32 to vector<128x6xf32>
    %149 = arith.addf %147, %148 : vector<128x6xf32>
    %150 = arith.mulf %147, %149 : vector<128x6xf32>
    %151 = arith.mulf %144, %150 : vector<128x6xf32>
    %cst_50 = arith.constant 2.000000e+00 : f32
    %152 = vector.broadcast %cst_50 : f32 to vector<128x6xf32>
    %153 = arith.addf %150, %152 : vector<128x6xf32>
    %154 = tpu.reciprocal %153 {approx = true} : vector<128x6xf32> -> vector<128x6xf32>
    %155 = arith.mulf %151, %154 : vector<128x6xf32>
    %cst_51 = arith.constant 2.000000e+01 : f32
    %156 = vector.broadcast %cst_51 : f32 to vector<128x6xf32>
    %157 = arith.cmpf ogt, %144, %156 : vector<128x6xf32>
    %158 = arith.select %157, %144, %155 : vector<128x6xi1>, vector<128x6xf32>
    %159 = tpu.concatenate %158, %33 in 1 : vector<128x6xf32>, vector<128x6xf32> -> vector<128x12xf32>
    %c2 = arith.constant 2 : index
    %c0_52 = arith.constant 0 : index
    %160 = vector.load %arg8[%c2, %c0_52] : memref<3x6xf32, #tpu.memory_space<vmem>>, vector<1x6xf32>
    %c0_53 = arith.constant 0 : index
    %c0_54 = arith.constant 0 : index
    %161 = vector.load %arg5[%c0_53, %c0_54] : memref<12x54xf32, #tpu.memory_space<vmem>>, vector<12x54xf32>
    %cst_55 = arith.constant dense<0.000000e+00> : vector<128x54xf32>
    %162 = tpu.matmul %159, %161, %cst_55 {dimension_numbers = #tpu.dot_dimension_numbers<[1], [0], [0], [1], [0, 0, 1, 1], [], []>} : vector<128x12xf32>, vector<12x54xf32>, vector<128x54xf32> -> vector<128x54xf32>
    %cst_56 = arith.constant 0.000000e+00 : f32
    %163 = vector.broadcast %cst_56 : f32 to vector<9x54xf32>
    %164 = tpu.concatenate %163, %162, %163 in 0 : vector<9x54xf32>, vector<128x54xf32>, vector<9x54xf32> -> vector<146x54xf32>
    %165 = vector.extract_strided_slice %162 {offsets = [0, 24], sizes = [128, 6], strides = [1, 1]} : vector<128x54xf32> to vector<128x6xf32>
    %166 = vector.broadcast %160 : vector<1x6xf32> to vector<128x6xf32>
    %167 = arith.addf %165, %166 : vector<128x6xf32>
    %168 = vector.extract_strided_slice %164 {offsets = [0, 0], sizes = [128, 6], strides = [1, 1]} : vector<146x54xf32> to vector<128x6xf32>
    %c0_57 = arith.constant 0 : index
    %c0_58 = arith.constant 0 : index
    %169 = vector.load %arg1[%c0_57, %c0_58] : memref<1152x1xf32, #tpu.memory_space<vmem>>, vector<128x1xf32>
    %170 = vector.broadcast %169 : vector<128x1xf32> to vector<128x6xf32>
    %171 = arith.mulf %168, %170 : vector<128x6xf32>
    %172 = arith.addf %167, %171 : vector<128x6xf32>
    %173 = vector.extract_strided_slice %164 {offsets = [1, 6], sizes = [128, 6], strides = [1, 1]} : vector<146x54xf32> to vector<128x6xf32>
    %c128_59 = arith.constant 128 : index
    %c0_60 = arith.constant 0 : index
    %174 = vector.load %arg1[%c128_59, %c0_60] : memref<1152x1xf32, #tpu.memory_space<vmem>>, vector<128x1xf32>
    %175 = vector.broadcast %174 : vector<128x1xf32> to vector<128x6xf32>
    %176 = arith.mulf %173, %175 : vector<128x6xf32>
    %177 = arith.addf %172, %176 : vector<128x6xf32>
    %178 = vector.extract_strided_slice %164 {offsets = [2, 12], sizes = [128, 6], strides = [1, 1]} : vector<146x54xf32> to vector<128x6xf32>
    %c256_61 = arith.constant 256 : index
    %c0_62 = arith.constant 0 : index
    %179 = vector.load %arg1[%c256_61, %c0_62] : memref<1152x1xf32, #tpu.memory_space<vmem>>, vector<128x1xf32>
    %180 = vector.broadcast %179 : vector<128x1xf32> to vector<128x6xf32>
    %181 = arith.mulf %178, %180 : vector<128x6xf32>
    %182 = arith.addf %177, %181 : vector<128x6xf32>
    %183 = vector.extract_strided_slice %164 {offsets = [8, 18], sizes = [128, 6], strides = [1, 1]} : vector<146x54xf32> to vector<128x6xf32>
    %c384_63 = arith.constant 384 : index
    %c0_64 = arith.constant 0 : index
    %184 = vector.load %arg1[%c384_63, %c0_64] : memref<1152x1xf32, #tpu.memory_space<vmem>>, vector<128x1xf32>
    %185 = vector.broadcast %184 : vector<128x1xf32> to vector<128x6xf32>
    %186 = arith.mulf %183, %185 : vector<128x6xf32>
    %187 = arith.addf %182, %186 : vector<128x6xf32>
    %188 = vector.extract_strided_slice %164 {offsets = [10, 30], sizes = [128, 6], strides = [1, 1]} : vector<146x54xf32> to vector<128x6xf32>
    %c640_65 = arith.constant 640 : index
    %c0_66 = arith.constant 0 : index
    %189 = vector.load %arg1[%c640_65, %c0_66] : memref<1152x1xf32, #tpu.memory_space<vmem>>, vector<128x1xf32>
    %190 = vector.broadcast %189 : vector<128x1xf32> to vector<128x6xf32>
    %191 = arith.mulf %188, %190 : vector<128x6xf32>
    %192 = arith.addf %187, %191 : vector<128x6xf32>
    %193 = vector.extract_strided_slice %164 {offsets = [16, 36], sizes = [128, 6], strides = [1, 1]} : vector<146x54xf32> to vector<128x6xf32>
    %c768_67 = arith.constant 768 : index
    %c0_68 = arith.constant 0 : index
    %194 = vector.load %arg1[%c768_67, %c0_68] : memref<1152x1xf32, #tpu.memory_space<vmem>>, vector<128x1xf32>
    %195 = vector.broadcast %194 : vector<128x1xf32> to vector<128x6xf32>
    %196 = arith.mulf %193, %195 : vector<128x6xf32>
    %197 = arith.addf %192, %196 : vector<128x6xf32>
    %198 = vector.extract_strided_slice %164 {offsets = [17, 42], sizes = [128, 6], strides = [1, 1]} : vector<146x54xf32> to vector<128x6xf32>
    %c896_69 = arith.constant 896 : index
    %c0_70 = arith.constant 0 : index
    %199 = vector.load %arg1[%c896_69, %c0_70] : memref<1152x1xf32, #tpu.memory_space<vmem>>, vector<128x1xf32>
    %200 = vector.broadcast %199 : vector<128x1xf32> to vector<128x6xf32>
    %201 = arith.mulf %198, %200 : vector<128x6xf32>
    %202 = arith.addf %197, %201 : vector<128x6xf32>
    %203 = vector.extract_strided_slice %164 {offsets = [18, 48], sizes = [128, 6], strides = [1, 1]} : vector<146x54xf32> to vector<128x6xf32>
    %c1024_71 = arith.constant 1024 : index
    %c0_72 = arith.constant 0 : index
    %204 = vector.load %arg1[%c1024_71, %c0_72] : memref<1152x1xf32, #tpu.memory_space<vmem>>, vector<128x1xf32>
    %205 = vector.broadcast %204 : vector<128x1xf32> to vector<128x6xf32>
    %206 = arith.mulf %203, %205 : vector<128x6xf32>
    %207 = arith.addf %202, %206 : vector<128x6xf32>
    %208 = tpu.concatenate %30, %95, %158, %207 in 1 : vector<128x6xf32>, vector<128x6xf32>, vector<128x6xf32>, vector<128x6xf32> -> vector<128x24xf32>
    %c1_73 = arith.constant 1 : index
    %c0_74 = arith.constant 0 : index
    %209 = vector.load %arg7[%c1_73, %c0_74] : memref<5x24xf32, #tpu.memory_space<vmem>>, vector<1x24xf32>
    %210 = vector.broadcast %209 : vector<1x24xf32> to vector<128x24xf32>
    %211 = arith.mulf %208, %210 : vector<128x24xf32>
    %c2_75 = arith.constant 2 : index
    %c0_76 = arith.constant 0 : index
    %212 = vector.load %arg7[%c2_75, %c0_76] : memref<5x24xf32, #tpu.memory_space<vmem>>, vector<1x24xf32>
    %213 = vector.broadcast %212 : vector<1x24xf32> to vector<128x24xf32>
    %214 = arith.addf %211, %213 : vector<128x24xf32>
    %cst_77 = arith.constant 2.000000e+01 : f32
    %215 = vector.broadcast %cst_77 : f32 to vector<128x24xf32>
    %216 = arith.minimumf %214, %215 : vector<128x24xf32>
    %217 = math.exp %216 : vector<128x24xf32>
    %cst_78 = arith.constant 2.000000e+00 : f32
    %218 = vector.broadcast %cst_78 : f32 to vector<128x24xf32>
    %219 = arith.addf %217, %218 : vector<128x24xf32>
    %220 = arith.mulf %217, %219 : vector<128x24xf32>
    %221 = arith.mulf %214, %220 : vector<128x24xf32>
    %cst_79 = arith.constant 2.000000e+00 : f32
    %222 = vector.broadcast %cst_79 : f32 to vector<128x24xf32>
    %223 = arith.addf %220, %222 : vector<128x24xf32>
    %224 = tpu.reciprocal %223 {approx = true} : vector<128x24xf32> -> vector<128x24xf32>
    %225 = arith.mulf %221, %224 : vector<128x24xf32>
    %cst_80 = arith.constant 2.000000e+01 : f32
    %226 = vector.broadcast %cst_80 : f32 to vector<128x24xf32>
    %227 = arith.cmpf ogt, %214, %226 : vector<128x24xf32>
    %228 = arith.select %227, %214, %225 : vector<128x24xi1>, vector<128x24xf32>
    %c0_81 = arith.constant 0 : index
    %c0_82 = arith.constant 0 : index
    %229 = vector.load %arg6[%c0_81, %c0_82] : memref<24x30xf32, #tpu.memory_space<vmem>>, vector<24x30xf32>
    %cst_83 = arith.constant dense<0.000000e+00> : vector<128x30xf32>
    %230 = tpu.matmul %228, %229, %cst_83 {dimension_numbers = #tpu.dot_dimension_numbers<[1], [0], [0], [1], [0, 0, 1, 1], [], []>} : vector<128x24xf32>, vector<24x30xf32>, vector<128x30xf32> -> vector<128x30xf32>
    %c0_84 = arith.constant 0 : index
    %c0_85 = arith.constant 0 : index
    %231 = vector.load %arg9[%c0_84, %c0_85] : memref<1x30xf32, #tpu.memory_space<vmem>>, vector<1x30xf32>
    %232 = vector.broadcast %231 : vector<1x30xf32> to vector<128x30xf32>
    %233 = arith.addf %230, %232 : vector<128x30xf32>
    %c3 = arith.constant 3 : index
    %c0_86 = arith.constant 0 : index
    %234 = vector.load %arg7[%c3, %c0_86] : memref<5x24xf32, #tpu.memory_space<vmem>>, vector<1x24xf32>
    %c4 = arith.constant 4 : index
    %c0_87 = arith.constant 0 : index
    %235 = vector.load %arg7[%c4, %c0_87] : memref<5x24xf32, #tpu.memory_space<vmem>>, vector<1x24xf32>
    %236 = vector.extract_strided_slice %233 {offsets = [0, 0], sizes = [64, 3], strides = [1, 1]} : vector<128x30xf32> to vector<64x3xf32>
    %237 = vector.extract_strided_slice %233 {offsets = [0, 3], sizes = [64, 3], strides = [1, 1]} : vector<128x30xf32> to vector<64x3xf32>
    %238 = vector.extract_strided_slice %233 {offsets = [0, 6], sizes = [64, 24], strides = [1, 1]} : vector<128x30xf32> to vector<64x24xf32>
    %cst_88 = arith.constant dense<0.000000e+00> : vector<64x64xf32>
    %239 = tpu.matmul %236, %237, %cst_88 {dimension_numbers = #tpu.dot_dimension_numbers<[1], [1], [0], [0], [0, 0, 1, 0], [], []>} : vector<64x3xf32>, vector<64x3xf32>, vector<64x64xf32> -> vector<64x64xf32>
    %cst_89 = arith.constant dense<0xFF800000> : vector<64xf32>
    %240 = vector.multi_reduction <maximumf>, %239, %cst_89 [1] : vector<64x64xf32> to vector<64xf32>
    %241 = vector.shape_cast %240 : vector<64xf32> to vector<64x1xf32>
    %242 = vector.broadcast %241 : vector<64x1xf32> to vector<64x64xf32>
    %243 = arith.subf %239, %242 : vector<64x64xf32>
    %244 = math.exp %243 : vector<64x64xf32>
    %cst_90 = arith.constant dense<0.000000e+00> : vector<64xf32>
    %245 = vector.multi_reduction <add>, %244, %cst_90 [1] : vector<64x64xf32> to vector<64xf32>
    %246 = vector.shape_cast %245 : vector<64xf32> to vector<64x1xf32>
    %247 = tpu.reciprocal %246 {approx = true} : vector<64x1xf32> -> vector<64x1xf32>
    %248 = vector.broadcast %247 : vector<64x1xf32> to vector<64x64xf32>
    %249 = arith.mulf %244, %248 : vector<64x64xf32>
    %cst_91 = arith.constant dense<0.000000e+00> : vector<64x24xf32>
    %250 = tpu.matmul %249, %238, %cst_91 {dimension_numbers = #tpu.dot_dimension_numbers<[1], [0], [0], [1], [0, 0, 1, 1], [], []>} : vector<64x64xf32>, vector<64x24xf32>, vector<64x24xf32> -> vector<64x24xf32>
    %251 = vector.extract_strided_slice %228 {offsets = [0, 0], sizes = [64, 24], strides = [1, 1]} : vector<128x24xf32> to vector<64x24xf32>
    %252 = arith.addf %250, %251 : vector<64x24xf32>
    %253 = arith.mulf %252, %251 : vector<64x24xf32>
    %254 = vector.broadcast %234 : vector<1x24xf32> to vector<64x24xf32>
    %255 = arith.mulf %253, %254 : vector<64x24xf32>
    %256 = vector.broadcast %235 : vector<1x24xf32> to vector<64x24xf32>
    %257 = arith.addf %255, %256 : vector<64x24xf32>
    %cst_92 = arith.constant 2.000000e+01 : f32
    %258 = vector.broadcast %cst_92 : f32 to vector<64x24xf32>
    %259 = arith.minimumf %257, %258 : vector<64x24xf32>
    %260 = math.exp %259 : vector<64x24xf32>
    %cst_93 = arith.constant 2.000000e+00 : f32
    %261 = vector.broadcast %cst_93 : f32 to vector<64x24xf32>
    %262 = arith.addf %260, %261 : vector<64x24xf32>
    %263 = arith.mulf %260, %262 : vector<64x24xf32>
    %264 = arith.mulf %257, %263 : vector<64x24xf32>
    %cst_94 = arith.constant 2.000000e+00 : f32
    %265 = vector.broadcast %cst_94 : f32 to vector<64x24xf32>
    %266 = arith.addf %263, %265 : vector<64x24xf32>
    %267 = tpu.reciprocal %266 {approx = true} : vector<64x24xf32> -> vector<64x24xf32>
    %268 = arith.mulf %264, %267 : vector<64x24xf32>
    %cst_95 = arith.constant 2.000000e+01 : f32
    %269 = vector.broadcast %cst_95 : f32 to vector<64x24xf32>
    %270 = arith.cmpf ogt, %257, %269 : vector<64x24xf32>
    %271 = arith.select %270, %257, %268 : vector<64x24xi1>, vector<64x24xf32>
    %cst_96 = arith.constant dense<0.000000e+00> : vector<24xf32>
    %272 = vector.multi_reduction <add>, %271, %cst_96 [0] : vector<64x24xf32> to vector<24xf32>
    %273 = vector.shape_cast %272 : vector<24xf32> to vector<1x24xf32>
    %cst_97 = arith.constant 1.562500e-02 : f32
    %274 = vector.broadcast %cst_97 : f32 to vector<1x24xf32>
    %275 = arith.mulf %273, %274 : vector<1x24xf32>
    %276 = vector.extract_strided_slice %233 {offsets = [64, 0], sizes = [64, 3], strides = [1, 1]} : vector<128x30xf32> to vector<64x3xf32>
    %277 = vector.extract_strided_slice %233 {offsets = [64, 3], sizes = [64, 3], strides = [1, 1]} : vector<128x30xf32> to vector<64x3xf32>
    %278 = vector.extract_strided_slice %233 {offsets = [64, 6], sizes = [64, 24], strides = [1, 1]} : vector<128x30xf32> to vector<64x24xf32>
    %cst_98 = arith.constant dense<0.000000e+00> : vector<64x64xf32>
    %279 = tpu.matmul %276, %277, %cst_98 {dimension_numbers = #tpu.dot_dimension_numbers<[1], [1], [0], [0], [0, 0, 1, 0], [], []>} : vector<64x3xf32>, vector<64x3xf32>, vector<64x64xf32> -> vector<64x64xf32>
    %cst_99 = arith.constant dense<0xFF800000> : vector<64xf32>
    %280 = vector.multi_reduction <maximumf>, %279, %cst_99 [1] : vector<64x64xf32> to vector<64xf32>
    %281 = vector.shape_cast %280 : vector<64xf32> to vector<64x1xf32>
    %282 = vector.broadcast %281 : vector<64x1xf32> to vector<64x64xf32>
    %283 = arith.subf %279, %282 : vector<64x64xf32>
    %284 = math.exp %283 : vector<64x64xf32>
    %cst_100 = arith.constant dense<0.000000e+00> : vector<64xf32>
    %285 = vector.multi_reduction <add>, %284, %cst_100 [1] : vector<64x64xf32> to vector<64xf32>
    %286 = vector.shape_cast %285 : vector<64xf32> to vector<64x1xf32>
    %287 = tpu.reciprocal %286 {approx = true} : vector<64x1xf32> -> vector<64x1xf32>
    %288 = vector.broadcast %287 : vector<64x1xf32> to vector<64x64xf32>
    %289 = arith.mulf %284, %288 : vector<64x64xf32>
    %cst_101 = arith.constant dense<0.000000e+00> : vector<64x24xf32>
    %290 = tpu.matmul %289, %278, %cst_101 {dimension_numbers = #tpu.dot_dimension_numbers<[1], [0], [0], [1], [0, 0, 1, 1], [], []>} : vector<64x64xf32>, vector<64x24xf32>, vector<64x24xf32> -> vector<64x24xf32>
    %291 = vector.extract_strided_slice %228 {offsets = [64, 0], sizes = [64, 24], strides = [1, 1]} : vector<128x24xf32> to vector<64x24xf32>
    %292 = arith.addf %290, %291 : vector<64x24xf32>
    %293 = arith.mulf %292, %291 : vector<64x24xf32>
    %294 = vector.broadcast %234 : vector<1x24xf32> to vector<64x24xf32>
    %295 = arith.mulf %293, %294 : vector<64x24xf32>
    %296 = vector.broadcast %235 : vector<1x24xf32> to vector<64x24xf32>
    %297 = arith.addf %295, %296 : vector<64x24xf32>
    %cst_102 = arith.constant 2.000000e+01 : f32
    %298 = vector.broadcast %cst_102 : f32 to vector<64x24xf32>
    %299 = arith.minimumf %297, %298 : vector<64x24xf32>
    %300 = math.exp %299 : vector<64x24xf32>
    %cst_103 = arith.constant 2.000000e+00 : f32
    %301 = vector.broadcast %cst_103 : f32 to vector<64x24xf32>
    %302 = arith.addf %300, %301 : vector<64x24xf32>
    %303 = arith.mulf %300, %302 : vector<64x24xf32>
    %304 = arith.mulf %297, %303 : vector<64x24xf32>
    %cst_104 = arith.constant 2.000000e+00 : f32
    %305 = vector.broadcast %cst_104 : f32 to vector<64x24xf32>
    %306 = arith.addf %303, %305 : vector<64x24xf32>
    %307 = tpu.reciprocal %306 {approx = true} : vector<64x24xf32> -> vector<64x24xf32>
    %308 = arith.mulf %304, %307 : vector<64x24xf32>
    %cst_105 = arith.constant 2.000000e+01 : f32
    %309 = vector.broadcast %cst_105 : f32 to vector<64x24xf32>
    %310 = arith.cmpf ogt, %297, %309 : vector<64x24xf32>
    %311 = arith.select %310, %297, %308 : vector<64x24xi1>, vector<64x24xf32>
    %cst_106 = arith.constant dense<0.000000e+00> : vector<24xf32>
    %312 = vector.multi_reduction <add>, %311, %cst_106 [0] : vector<64x24xf32> to vector<24xf32>
    %313 = vector.shape_cast %312 : vector<24xf32> to vector<1x24xf32>
    %cst_107 = arith.constant 1.562500e-02 : f32
    %314 = vector.broadcast %cst_107 : f32 to vector<1x24xf32>
    %315 = arith.mulf %313, %314 : vector<1x24xf32>
    %316 = tpu.concatenate %275, %315 in 0 : vector<1x24xf32>, vector<1x24xf32> -> vector<2x24xf32>
    %c0_108 = arith.constant 0 : index
    %c0_109 = arith.constant 0 : index
    %317 = vector.load %arg10[%c0_108, %c0_109] : memref<2x24xf32, #tpu.memory_space<vmem>>, vector<2x24xf32>
    tpu.vector_store %arg10[%c0_108, %c0_109], %316 {strides = array<i32>} : memref<2x24xf32, #tpu.memory_space<vmem>>, vector<2x24xf32>,
    return
  }
}

</mosaic_0001>

<bundles_post_ra>
// kernel: position_model_forward.1
= control target key start
LH: loop header
LB: loop body
LE: loop exit
PB: predicated region body
PF: predicated region fallthrough
CT: control target
= control target key end

     0   :  { %v8474_v2 = vmov 1   ;;  %v8475_v3 = vmov 0   ;;  %s14710_s0 = inlined_call_operand.vmem [shape: f32[128,2], index: 0, kind: input, shape index: {}]   ;;  %s14711_s1 = inlined_call_operand.vmem [shape: f32[1152,1], index: 1, kind: input, shape index: {}]   ;;  %s14712_s2 = inlined_call_operand.vmem [shape: f32[2,24], index: 2, kind: input, shape index: {}]   ;;  %s14713_s3 = inlined_call_operand.vmem [shape: f32[6,54], index: 3, kind: input, shape index: {}]   ;;  %s14714_s4 = inlined_call_operand.vmem [shape: f32[12,54], index: 4, kind: input, shape index: {}]   ;;  %s14715_s5 = inlined_call_operand.vmem [shape: f32[12,54], index: 5, kind: input, shape index: {}]   ;;  %s14716_s6 = inlined_call_operand.vmem [shape: f32[24,30], index: 6, kind: input, shape index: {}]   ;;  %s14717_s7 = inlined_call_operand.vmem [shape: f32[5,24], index: 7, kind: input, shape index: {}]   ;;  %s14718_s8 = inlined_call_operand.vmem [shape: f32[3,6], index: 8, kind: input, shape index: {}]   ;;  %s14719_s9 = inlined_call_operand.vmem [shape: f32[1,30], index: 9, kind: input, shape index: {}]   ;;  %s14720_s10 = inlined_call_operand.hbm [shape: f32[2,24], index: 10, kind: output, shape index: {}]  }
   0x1   :  { %v37_v0 = vld [vmem:[%s14710_s0 + $0x8] sm:$0xff]  ;;  %v36_v1 = vld [vmem:[%s14710_s0] sm:$0xff]  ;;  %7981 = vset.pattern.permute.xlu0 %v8474_v2  ;;  %7982 = vset.pattern.permute.xlu1 %v8475_v3  ;;  %v38_v4 = vld [vmem:[%s14710_s0 + $0x10] sm:$0xff] }
   0x2   :  { %60 = vperm.xlu1 %7982, %v37_v0   ;;  %154 = vperm.xlu0 %7981, %v36_v1   ;;  %v39_v5 = vld [vmem:[%s14710_s0 + $0x18] sm:$0xff]  ;;  %v40_v6 = vld [vmem:[%s14710_s0 + $0x20] sm:$0xff]  ;;  %v41_v7 = vld [vmem:[%s14710_s0 + $0x28] sm:$0xff] }
   0x6   :  { %7983 = vset.pattern.permute.xlu1 %v8474_v2  ;;  %162 = vperm.xlu0 %7981, %v38_v4  }
   0x7   :  { %158 = vperm.xlu1 %7983, %v37_v0  }
   0xa   :  { %166 = vperm.xlu0 %7981, %v39_v5  }
   0xb   :  { %7984 = vset.pattern.permute.xlu1 %v8475_v3 }
   0xc   :  { %65 = vperm.xlu1 %7984, %v38_v4  }
   0xe   :  { %170 = vperm.xlu0 %7981, %v40_v6  }
  0x10   :  { %70 = vperm.xlu1 %7984, %v39_v5  }
  0x12   :  { %174 = vperm.xlu0 %7981, %v41_v7  }
  0x13   :  { %15 = vsyncpa [#allocation3], 0  ;;  %v42_v8 = vld [vmem:[%s14710_s0 + $0x30] sm:$0xff]  ;;  %v43_v9 = vld [vmem:[%s14710_s0 + $0x38] sm:$0xff]  ;;  %v133_v46 = vlaneseq  ;;  %s8476_s16 = smov 122   ;;  %vm533_vm6 = vcmask 1045504  }
  0x14   :  { %75 = vperm.xlu1 %7984, %v40_v6   ;;  %v44_v10 = vld [vmem:[%s14710_s0 + $0x40] sm:$0xff]  ;;  %v45_v11 = vld [vmem:[%s14710_s0 + $0x48] sm:$0xff]  ;;  %v46_v12 = vld [vmem:[%s14710_s0 + $0x50] sm:$0xff]  ;;  %s8477_s28 = smov 24   ;;  %s8479_s29 = smov 116  }
  0x15   :  { %v47_v13 = vld [vmem:[%s14710_s0 + $0x58] sm:$0xff]  ;;  %v48_v14 = vld [vmem:[%s14710_s0 + $0x60] sm:$0xff]  ;;  %v49_v15 = vld [vmem:[%s14710_s0 + $0x68] sm:$0xff]  ;;  %v134_v49 = vshrl.u32 %v133_v46, 7  ;;  %s8480_s30 = smov 18   ;;  %s8483_s11 = smov 104  }
  0x16   :  { %178 = vperm.xlu0 %7981, %v42_v8   ;;  %v50_v16 = vld [vmem:[%s14710_s0 + $0x70] sm:$0xff]  ;;  %v51_v17 = vld [vmem:[%s14710_s0 + $0x78] sm:$0xff]  ;;  %v966_v18 = vld [vmem:[%s14711_s1 + $0x88] sm:$0xff]  ;;  %s8481_s0 = smov 12  }
  0x17   :  { %v965_v19 = vld [vmem:[%s14711_s1 + $0x80] sm:$0xff]  ;;  %v1226_v20 = vld [vmem:[%s14711_s1 + $0x108] sm:$0xff]  ;;  %v967_v21 = vld [vmem:[%s14711_s1 + $0x90] sm:$0xff]  ;;  %v135_v52 = vsub.s32 0, %v134_v49  ;;  %v219_v55 = vsub.s32 1, %v134_v49 }
  0x18   :  { %80 = vperm.xlu1 %7984, %v41_v7   ;;  %v773_v22 = vld [vmem:[%s14711_s1] sm:$0xff]  ;;  %v1227_v25 = vld [vmem:[%s14711_s1 + $0x110] sm:$0xff]  ;;  %v968_v26 = vld [vmem:[%s14711_s1 + $0x98] sm:$0xff] }
  0x19   :  { %v1225_v23 = vld [vmem:[%s14711_s1 + $0x100] sm:$0xff]  ;;  %v774_v27 = vld [vmem:[%s14711_s1 + $0x8] sm:$0xff]  ;;  %v1679_v31 = vld [vmem:[%s14711_s1 + $0x290] sm:$0xff] }
  0x1a   :  { %182 = vperm.xlu0 %7981, %v43_v9   ;;  %v1677_v24 = vld [vmem:[%s14711_s1 + $0x280] sm:$0xff]  ;;  %v1678_v29 = vld [vmem:[%s14711_s1 + $0x288] sm:$0xff]  ;;  %v1228_v33 = vld [vmem:[%s14711_s1 + $0x118] sm:$0xff] }
  0x1b   :  { %v969_v28 = vld [vmem:[%s14711_s1 + $0xa0] sm:$0xff]  ;;  %v775_v34 = vld [vmem:[%s14711_s1 + $0x10] sm:$0xff]  ;;  %v2129_v37 = vld [vmem:[%s14711_s1 + $0x388] sm:$0xff] }
  0x1c   :  { %85 = vperm.xlu1 %7984, %v42_v8   ;;  %v1229_v30 = vld [vmem:[%s14711_s1 + $0x120] sm:$0xff]  ;;  %v2130_v36 = vld [vmem:[%s14711_s1 + $0x390] sm:$0xff]  ;;  %v1486_v39 = vld [vmem:[%s14711_s1 + $0x188] sm:$0xff] }
  0x1d   :  { %v2128_v32 = vld [vmem:[%s14711_s1 + $0x380] sm:$0xff]  ;;  %v1680_v40 = vld [vmem:[%s14711_s1 + $0x298] sm:$0xff]  ;;  %v970_v42 = vld [vmem:[%s14711_s1 + $0xa8] sm:$0xff] }
  0x1e   :  { %186 = vperm.xlu0 %7981, %v44_v10   ;;  %v1485_v35 = vld [vmem:[%s14711_s1 + $0x180] sm:$0xff]  ;;  %v776_v41 = vld [vmem:[%s14711_s1 + $0x18] sm:$0xff]  ;;  %v2388_v43 = vld [vmem:[%s14711_s1 + $0x408] sm:$0xff] }
  0x1f   :  { %v2387_v38 = vld [vmem:[%s14711_s1 + $0x400] sm:$0xff]  ;;  %v2389_v45 = vld [vmem:[%s14711_s1 + $0x410] sm:$0xff]  ;;  %v1937_v47 = vld [vmem:[%s14711_s1 + $0x308] sm:$0xff] }
  0x20   :  { %90 = vperm.xlu1 %7984, %v43_v9   ;;  %v1936_v44 = vld [vmem:[%s14711_s1 + $0x300] sm:$0xff]  ;;  %v1231_v50 = vld [vmem:[%s14711_s1 + $0x130] sm:$0xff]  ;;  %v2131_v54 = vld [vmem:[%s14711_s1 + $0x398] sm:$0xff] }
  0x21   :  { %v1681_v48 = vld [vmem:[%s14711_s1 + $0x2a0] sm:$0xff]  ;;  %v971_v51 = vld [vmem:[%s14711_s1 + $0xb0] sm:$0xff]  ;;  %v1230_v59 = vld [vmem:[%s14711_s1 + $0x128] sm:$0xff] }
  0x22   :  { %190 = vperm.xlu0 %7981, %v45_v11   ;;  %v52_v53 = vld [vmem:[%s14712_s2] sm:$0x3]  ;;  %v1487_v63 = vld [vmem:[%s14711_s1 + $0x190] sm:$0xff]  ;;  %s8482_s2 = smov 110  }
  0x23   :  { %v8694_v57 = vrot.slane %v52_v53, %v135_v52  ;;  %v8699_v60 = vrot.slane %v52_v53, %v219_v55  ;;  %v8711_v2 = vld [vmem:[%s14717_s7] ss:$0 sm:$0xff] }
  0x24   :  { %95 = vperm.xlu1 %7984, %v44_v10   ;;  %v777_v5 = vld [vmem:[%s14711_s1 + $0x20] sm:$0xff] }
  0x26   :  { %194 = vperm.xlu0 %7981, %v46_v12  }
  0x28   :  { %100 = vperm.xlu1 %7984, %v45_v11  }
  0x2a   :  { %198 = vperm.xlu0 %7981, %v47_v13  }
  0x2c   :  { %105 = vperm.xlu1 %7984, %v46_v12  }
  0x2e   :  { %202 = vperm.xlu0 %7981, %v48_v14  }
  0x30   :  { %110 = vperm.xlu1 %7984, %v47_v13  }
  0x32   :  { %206 = vperm.xlu0 %7981, %v49_v15  }
  0x34   :  { %115 = vperm.xlu1 %7984, %v48_v14  }
  0x36   :  { %210 = vperm.xlu0 %7981, %v50_v16  }
  0x38   :  { %120 = vperm.xlu1 %7984, %v49_v15  }
  0x3a   :  { %214 = vperm.xlu0 %7981, %v51_v17  }
  0x3c   :  { %125 = vperm.xlu1 %7984, %v50_v16  }
  0x3e   :  { %7985 = vset.pattern.permute.xlu0 %v8475_v3 }
  0x3f   :  { %55 = vperm.xlu0 %7985, %v36_v1  }
  0x40   :  { %130 = vperm.xlu1 %7984, %v51_v17  }
  0x43   :  { %987 = vperm.xlu0 %7985, %v966_v18  }
  0x44   :  { %983 = vperm.xlu1 %7984, %v965_v19  }
  0x47   :  { %1247 = vperm.xlu0 %7985, %v1226_v20  }
  0x48   :  { %991 = vperm.xlu1 %7984, %v967_v21  }
  0x4b   :  { %791 = vperm.xlu0 %7985, %v773_v22  }
  0x4c   :  { %1243 = vperm.xlu1 %7984, %v1225_v23  }
  0x4f   :  { %1695 = vperm.xlu0 %7985, %v1677_v24  }
  0x50   :  { %1251 = vperm.xlu1 %7984, %v1227_v25  }
  0x53   :  { %995 = vperm.xlu0 %7985, %v968_v26  }
  0x54   :  { %796 = vperm.xlu1 %7984, %v774_v27  }
  0x57   :  { %999 = vperm.xlu0 %7985, %v969_v28  }
  0x58   :  { %1699 = vperm.xlu1 %7984, %v1678_v29  }
  0x5b   :  { %1259 = vperm.xlu0 %7985, %v1229_v30  }
  0x5c   :  { %1703 = vperm.xlu1 %7984, %v1679_v31  }
  0x5f   :  { %2146 = vperm.xlu0 %7985, %v2128_v32  }
  0x60   :  { %1255 = vperm.xlu1 %7984, %v1228_v33  }
  0x63   :  { %801 = vperm.xlu0 %7985, %v775_v34  }
  0x64   :  { %1503 = vperm.xlu1 %7984, %v1485_v35  }
  0x67   :  { %2154 = vperm.xlu0 %7985, %v2130_v36  }
  0x68   :  { %2150 = vperm.xlu1 %7984, %v2129_v37  }
  0x6b   :  { %2405 = vperm.xlu0 %7985, %v2387_v38  }
  0x6c   :  { %1508 = vperm.xlu1 %7984, %v1486_v39  }
  0x6f   :  { %1707 = vperm.xlu0 %7985, %v1680_v40  }
  0x70   :  { %806 = vperm.xlu1 %7984, %v776_v41  }
  0x73   :  { %1003 = vperm.xlu0 %7985, %v970_v42  }
  0x74   :  { %2409 = vperm.xlu1 %7984, %v2388_v43  }
  0x77   :  { %1954 = vperm.xlu0 %7985, %v1936_v44  }
  0x78   :  { %2413 = vperm.xlu1 %7984, %v2389_v45  }
  0x7b   :  { %1959 = vperm.xlu0 %7985, %v1937_v47  }
  0x7c   :  { %1711 = vperm.xlu1 %7984, %v1681_v48  }
  0x7f   :  { %1267 = vperm.xlu0 %7985, %v1231_v50  }
  0x80   :  { %1007 = vperm.xlu1 %7984, %v971_v51  }
  0x81   :  { %v8692_v56 = vpop.permute.xlu0 %154  ;;  %v61_v58 = vpop.permute.xlu1 %60 }
  0x82   :  { %v138_v61 = vmul.f32 %v8694_v57, %v61_v58 }
  0x83   :  { %2158 = vperm.xlu0 %7985, %v2131_v54  }
  0x84   :  { %1263 = vperm.xlu1 %7984, %v1230_v59  }
  0x85   :  { %v8702_v62 = vpop.permute.xlu0 %162 }
  0x86   :  { %v159_v0 = vpop.permute.xlu1 %158 }
  0x87   :  { %v222_v1 = vmul.f32 %v8699_v60, %v159_v0 }
  0x88   :  { %1513 = vperm.xlu1 %7984, %v1487_v63  }
  0x89   :  { %v238_v3 = vadd.f32 %v222_v1, %v138_v61  ;;  %v167_v4 = vpop.permute.xlu0 %166 }
  0x8a   :  { %v224_v12 = vmul.f32 %v8699_v60, %v167_v4  ;;  %v223_v4 = vmul.f32 %v8699_v60, %v8702_v62 }
  0x8b   :  { %v8717_v6 = vadd.f32 %v8711_v2, %v238_v3  ;;  %v66_v7 = vpop.permute.xlu1 %65 }
  0x8c   :  { %811 = vperm.xlu1 %7984, %v777_v5   ;;  %v139_v63 = vmul.f32 %v8694_v57, %v66_v7 }
  0x8d   :  { %v275_v8 = vmin.f32 %v8717_v6, 20.0  ;;  %v8720_v9 = vpop.permute.xlu0 %170  ;;  %vm419_vm0 = vcmp.gt.f32.partialorder %v8717_v6, 20.0 }
  0x8f   :  { %v292_v10 = vmul.f32 1.442695, %v275_v8  ;;  %v71_v11 = vpop.permute.xlu1 %70 }
  0x90   :  { %v140_v13 = vmul.f32 %v8694_v57, %v71_v11 }
  0x91   :  { %8066 = vpow2.f32 %v292_v10  ;;  %v175_v14 = vpop.permute.xlu0 %174 }
  0x92   :  { %v240_v15 = vadd.f32 %v224_v12, %v140_v13  ;;  %v226_v22 = vmul.f32 %v8699_v60, %v175_v14  ;;  %v239_v14 = vadd.f32 %v223_v4, %v139_v63 }
  0x93   :  { %v8724_v16 = vpop.permute.xlu1 %75 }
  0x94   :  { %v8727_v17 = vadd.f32 %v8711_v2, %v240_v15 }
  0x95   :  { %v179_v18 = vpop.permute.xlu0 %178 }
  0x96   :  { %v277_v19 = vmin.f32 %v8727_v17, 20.0  ;;  %v227_v28 = vmul.f32 %v8699_v60, %v179_v18  ;;  %vm421_vm1 = vcmp.gt.f32.partialorder %v8727_v17, 20.0 }
  0x97   :  { %v81_v20 = vpop.permute.xlu1 %80 }
  0x98   :  { %v296_v21 = vmul.f32 1.442695, %v277_v19  ;;  %v142_v23 = vmul.f32 %v8694_v57, %v81_v20 }
  0x99   :  { %v183_v24 = vpop.permute.xlu0 %182 }
  0x9a   :  { %8068 = vpow2.f32 %v296_v21  ;;  %v242_v25 = vadd.f32 %v226_v22, %v142_v23  ;;  %v228_v38 = vmul.f32 %v8699_v60, %v183_v24 }
  0x9b   :  { %v8067_v26 = vpop.eup %8066  ;;  %v86_v27 = vpop.permute.xlu1 %85 }
  0x9c   :  { %v8734_v29 = vadd.f32 %v8711_v2, %v242_v25  ;;  %v143_v30 = vmul.f32 %v8694_v57, %v86_v27  ;;  %v323_v31 = vadd.f32 2.0, %v8067_v26  ;;  %v8771_v27 = vadd.f32 %v8711_v2, %v239_v14 }
  0x9d   :  { %v187_v32 = vpop.permute.xlu0 %186 }
  0x9e   :  { %v279_v33 = vmin.f32 %v8734_v29, 20.0  ;;  %v243_v34 = vadd.f32 %v227_v28, %v143_v30  ;;  %v339_v36 = vmul.f32 %v8067_v26, %v323_v31  ;;  %v229_v46 = vmul.f32 %v8699_v60, %v187_v32 }
  0x9f   :  { %v91_v35 = vpop.permute.xlu1 %90  ;;  %v141_v28 = vmul.f32 %v8694_v57, %v8724_v16  ;;  %vm423_vm2 = vcmp.gt.f32.partialorder %v8734_v29, 20.0  ;;  %vm420_vm10 = vcmp.gt.f32.partialorder %v8771_v27, 20.0 }
  0xa0   :  { %v300_v37 = vmul.f32 1.442695, %v279_v33  ;;  %v8740_v39 = vadd.f32 %v8711_v2, %v243_v34  ;;  %v144_v40 = vmul.f32 %v8694_v57, %v91_v35  ;;  %v371_v42 = vadd.f32 2.0, %v339_v36 }
  0xa1   :  { %v191_v41 = vpop.permute.xlu0 %190  ;;  %v355_v8 = vmul.f32 %v339_v36, %v8717_v6  ;;  %v225_v34 = vmul.f32 %v8699_v60, %v8720_v9 }
  0xa2   :  { %8070 = vpow2.f32 %v300_v37  ;;  %v244_v43 = vadd.f32 %v228_v38, %v144_v40  ;;  %v230_v58 = vmul.f32 %v8699_v60, %v191_v41  ;;  %v276_v40 = vmin.f32 %v8771_v27, 20.0 }
  0xa3   :  { %v96_v44 = vpop.permute.xlu1 %95  ;;  %8072 = vrcp.f32 %v371_v42  ;;  %v241_v41 = vadd.f32 %v225_v34, %v141_v28  ;;  %vm424_vm12 = vcmp.gt.f32.partialorder %v8740_v39, 20.0 }
  0xa4   :  { %v8069_v45 = vpop.eup %8068  ;;  %v8745_v47 = vadd.f32 %v8711_v2, %v244_v43  ;;  %v145_v48 = vmul.f32 %v8694_v57, %v96_v44 }
  0xa5   :  { %v195_v49 = vpop.permute.xlu0 %194  ;;  %v325_v50 = vadd.f32 2.0, %v8069_v45 }
  0xa6   :  { %v281_v51 = vmin.f32 %v8745_v47, 20.0  ;;  %v245_v52 = vadd.f32 %v229_v46, %v145_v48  ;;  %v231_v11 = vmul.f32 %v8699_v60, %v195_v49  ;;  %vm425_vm3 = vcmp.gt.f32.partialorder %v8745_v47, 20.0 }
  0xa7   :  { %v101_v53 = vpop.permute.xlu1 %100  ;;  %v341_v54 = vmul.f32 %v8069_v45, %v325_v50 }
  0xa8   :  { %v304_v55 = vmul.f32 1.442695, %v281_v51  ;;  %v8751_v59 = vadd.f32 %v8711_v2, %v245_v52  ;;  %v146_v61 = vmul.f32 %v8694_v57, %v101_v53 }
  0xa9   :  { %v199_v0 = vpop.permute.xlu0 %198  ;;  %v373_v1 = vadd.f32 2.0, %v341_v54  ;;  %v357_v43 = vmul.f32 %v341_v54, %v8727_v17  ;;  %v8797_v54 = vadd.f32 %v8711_v2, %v241_v41 }
  0xaa   :  { %8074 = vpow2.f32 %v304_v55  ;;  %v246_v3 = vadd.f32 %v230_v58, %v146_v61  ;;  %v232_v24 = vmul.f32 %v8699_v60, %v199_v0  ;;  %v294_v55 = vmul.f32 1.442695, %v276_v40 }
  0xab   :  { %v106_v5 = vpop.permute.xlu1 %105  ;;  %8076 = vrcp.f32 %v373_v1  ;;  %vm422_vm11 = vcmp.gt.f32.partialorder %v8797_v54, 20.0  ;;  %vm426_vm13 = vcmp.gt.f32.partialorder %v8751_v59, 20.0 }
  0xac   :  { %v8071_v10 = vpop.eup %8070  ;;  %v8760_v12 = vadd.f32 %v8711_v2, %v246_v3  ;;  %v147_v13 = vmul.f32 %v8694_v57, %v106_v5 }
  0xad   :  { %v8073_v7 = vpop.eup %8072  ;;  %v203_v15 = vpop.permute.xlu0 %202  ;;  %v327_v18 = vadd.f32 2.0, %v8071_v10 }
  0xae   :  { %v283_v19 = vmin.f32 %v8760_v12, 20.0  ;;  %v247_v20 = vadd.f32 %v231_v11, %v147_v13  ;;  %v403_v21 = vmul.f32 %v8073_v7, %v355_v8  ;;  %v233_v37 = vmul.f32 %v8699_v60, %v203_v15 }
  0xaf   :  { %v111_v62 = vpop.permute.xlu1 %110  ;;  %v343_v22 = vmul.f32 %v8071_v10, %v327_v18  ;;  %v221_v11 = vmul.f32 %v8699_v60, %v8692_v56  ;;  %v278_v13 = vmin.f32 %v8797_v54, 20.0  ;;  %vm427_vm4 = vcmp.gt.f32.partialorder %v8760_v12, 20.0 }
  0xb0   :  { %v308_v23 = vmul.f32 1.442695, %v283_v19  ;;  %v8767_v25 = vadd.f32 %v8711_v2, %v247_v20  ;;  %v148_v26 = vmul.f32 %v8694_v57, %v111_v62  ;;  %v8776_v31 = vsel %vm419_vm0, %v8717_v6, %v403_v21 }
  0xb1   :  { %v207_v30 = vpop.permute.xlu0 %206  ;;  %15085 = vst [vmem:[#allocation5_spill] sm:$0xff] %v8776_v31  ;;  %v375_v32 = vadd.f32 2.0, %v343_v22  ;;  %470 = vrot.lane.b32.xlu0 %v8776_v31, %s8476_s16  ;;  %v280_v20 = vmin.f32 %v8740_v39, 20.0  ;;  %v1496_v31 = vld [vmem:[%s14711_s1 + $0x1d8] sm:$0xff] }
  0xb2   :  { %8078 = vpow2.f32 %v308_v23  ;;  %v248_v33 = vadd.f32 %v232_v24, %v148_v26  ;;  %v234_v51 = vmul.f32 %v8699_v60, %v207_v30  ;;  %v298_v30 = vmul.f32 1.442695, %v278_v13 }
  0xb3   :  { %v116_v35 = vpop.permute.xlu1 %115  ;;  %8080 = vrcp.f32 %v375_v32  ;;  %vm428_vm14 = vcmp.gt.f32.partialorder %v8767_v25, 20.0 }
  0xb4   :  { %v8075_v36 = vpop.eup %8074  ;;  %v8784_v16 = vadd.f32 %v8711_v2, %v248_v33  ;;  %v149_v6 = vmul.f32 %v8694_v57, %v116_v35 }
  0xb5   :  { %v8077_v38 = vpop.eup %8076  ;;  %v211_v42 = vpop.permute.xlu0 %210  ;;  %v329_v44 = vadd.f32 2.0, %v8075_v36 }
  0xb6   :  { %v285_v9 = vmin.f32 %v8784_v16, 20.0  ;;  %v249_v45 = vadd.f32 %v233_v37, %v149_v6  ;;  %v405_v48 = vmul.f32 %v8077_v38, %v357_v43  ;;  %v235_v4 = vmul.f32 %v8699_v60, %v211_v42 }
  0xb7   :  { %v121_v46 = vpop.permute.xlu1 %120  ;;  %v345_v49 = vmul.f32 %v8075_v36, %v329_v44  ;;  %v302_v36 = vmul.f32 1.442695, %v280_v20  ;;  %v282_v37 = vmin.f32 %v8751_v59, 20.0  ;;  %vm429_vm5 = vcmp.gt.f32.partialorder %v8784_v16, 20.0 }
  0xb8   :  { %v312_v50 = vmul.f32 1.442695, %v285_v9  ;;  %v8793_v52 = vadd.f32 %v8711_v2, %v249_v45  ;;  %v150_v53 = vmul.f32 %v8694_v57, %v121_v46  ;;  %v8800_v58 = vsel %vm421_vm1, %v8727_v17, %v405_v48 }
  0xb9   :  { %15086 = vst [vmem:[#allocation6_spill] sm:$0xff] %v8800_v58  ;;  %v215_v61 = vpop.permute.xlu0 %214  ;;  %v377_v63 = vadd.f32 2.0, %v345_v49  ;;  %474 = vrot.lane.b32.xlu0 %v8800_v58, %s8476_s16  ;;  %v359_v17 = vmul.f32 %v343_v22, %v8734_v29  ;;  %v361_v38 = vmul.f32 %v345_v49, %v8745_v47  ;;  %v306_v45 = vmul.f32 1.442695, %v282_v37  ;;  %v451_v37 = vld [vmem:[%s14713_s3] sm:$0x3f] }
  0xba   :  { %8082 = vpow2.f32 %v312_v50  ;;  %v250_v0 = vadd.f32 %v234_v51, %v150_v53  ;;  %v236_v62 = vmul.f32 %v8699_v60, %v215_v61  ;;  %7646 = vmatprep.subr.msk.mxu0 %vm533_vm6, %v451_v37  ;;  %7966 = vmatprep.subr.msk.mxu1 %vm533_vm6, %v451_v37  ;;  %vm430_vm15 = vcmp.gt.f32.partialorder %v8793_v52, 20.0 }
  0xbb   :  { %v126_v1 = vpop.permute.xlu1 %125  ;;  %8084 = vrcp.f32 %v377_v63  ;;  %v286_v63 = vmin.f32 %v8793_v52, 20.0  ;;  %7647 = vmatpush3.msk.msra.mxu0 %vm533_vm6, %v451_v37  ;;  %7967 = vmatpush3.msk.msra.mxu1 %vm533_vm6, %v451_v37  ;;  %vm500_vm1 = vcmask 48128  }
  0xbc   :  { %v8079_v3 = vpop.eup %8078  ;;  %v8806_v5 = vadd.f32 %v8711_v2, %v250_v0  ;;  %v151_v8 = vmul.f32 %v8694_v57, %v126_v1  ;;  %8086 = vpow2.f32 %v294_v55 }
  0xbd   :  { %v8081_v10 = vpop.eup %8080  ;;  %v331_v7 = vadd.f32 2.0, %v8079_v3 }
  0xbe   :  { %v287_v14 = vmin.f32 %v8806_v5, 20.0  ;;  %v251_v15 = vadd.f32 %v235_v4, %v151_v8  ;;  %v56_v18 = vpop.permute.xlu0 %55  ;;  %v407_v19 = vmul.f32 %v8081_v10, %v359_v17  ;;  %v314_v17 = vmul.f32 1.442695, %v286_v63 }
  0xbf   :  { %v137_v21 = vmul.f32 %v8694_v57, %v56_v18  ;;  %v131_v22 = vpop.permute.xlu1 %130  ;;  %v347_v23 = vmul.f32 %v8079_v3, %v331_v7  ;;  %vm431_vm7 = vcmp.gt.f32.partialorder %v8806_v5, 20.0 }
  0xc0   :  { %v316_v56 = vmul.f32 1.442695, %v287_v14  ;;  %v8819_v24 = vadd.f32 %v8711_v2, %v251_v15  ;;  %v152_v26 = vmul.f32 %v8694_v57, %v131_v22  ;;  %v8823_v28 = vsel %vm423_vm2, %v8734_v29, %v407_v19 }
  0xc1   :  { %15087 = vst [vmem:[#allocation7_spill] sm:$0xff] %v8823_v28  ;;  %v237_v32 = vadd.f32 %v221_v11, %v137_v21  ;;  %478 = vrot.lane.b32.xlu0 %v8823_v28, %s8476_s16  ;;  %v379_v33 = vadd.f32 2.0, %v347_v23  ;;  %v363_v51 = vmul.f32 %v347_v23, %v8760_v12  ;;  %v1946_v28 = vld [vmem:[%s14711_s1 + $0x350] sm:$0xff]  ;;  %vm698_vm2 = vcmask 1040384  }
  0xc2   :  { %8088 = vpow2.f32 %v316_v56  ;;  %v252_v60 = vadd.f32 %v236_v62, %v152_v26  ;;  %v288_v10 = vmin.f32 %v8819_v24, 20.0  ;;  %vm432_vm0 = vcmp.gt.f32.partialorder %v8819_v24, 20.0 }
  0xc3   :  { %v8828_v34 = vadd.f32 %v8711_v2, %v237_v32  ;;  %8090 = vrcp.f32 %v379_v33 }
  0xc4   :  { %v8083_v35 = vpop.eup %8082  ;;  %v8832_v57 = vadd.f32 %v8711_v2, %v252_v60  ;;  %8092 = vpow2.f32 %v298_v30  ;;  %v284_v2 = vmin.f32 %v8767_v25, 20.0  ;;  %v318_v62 = vmul.f32 1.442695, %v288_v10 }
  0xc5   :  { %v8085_v29 = vpop.eup %8084  ;;  %v274_v6 = vmin.f32 %v8828_v34, 20.0  ;;  %v333_v40 = vadd.f32 2.0, %v8083_v35  ;;  %8094 = vpow2.f32 %v302_v36  ;;  %vm418_vm8 = vcmp.gt.f32.partialorder %v8828_v34, 20.0 }
  0xc6   :  { %v289_v41 = vmin.f32 %v8832_v57, 20.0  ;;  %v8087_v42 = vpop.eup %8086  ;;  %v409_v44 = vmul.f32 %v8085_v29, %v361_v38  ;;  %v310_v61 = vmul.f32 1.442695, %v284_v2  ;;  %vm433_vm9 = vcmp.gt.f32.partialorder %v8832_v57, 20.0 }
  0xc7   :  { %v290_v43 = vmul.f32 1.442695, %v274_v6  ;;  %v349_v9 = vmul.f32 %v8083_v35, %v333_v40  ;;  %v324_v53 = vadd.f32 2.0, %v8087_v42 }
  0xc8   :  { %v320_v46 = vmul.f32 1.442695, %v289_v41  ;;  %v8840_v48 = vsel %vm425_vm3, %v8745_v47, %v409_v44  ;;  %vm1305_vm3 = vcmask 1041408  }
  0xc9   :  { %8096 = vpow2.f32 %v290_v43  ;;  %15088 = vst [vmem:[#allocation8_spill] sm:$0xff] %v8840_v48  ;;  %v381_v50 = vadd.f32 2.0, %v349_v9  ;;  %482 = vrot.lane.b32.xlu0 %v8840_v48, %s8476_s16  ;;  %v8850_v8 = vmul.f32 %v8087_v42, %v324_v53  ;;  %v365_v18 = vmul.f32 %v349_v9, %v8784_v16  ;;  %v2399_v48 = vld [vmem:[%s14711_s1 + $0x460] sm:$0xff] }
  0xca   :  { %8098 = vpow2.f32 %v320_v46 }
  0xcb   :  { %8100 = vrcp.f32 %v381_v50 }
  0xcc   :  { %v8089_v49 = vpop.eup %8088  ;;  %8102 = vpow2.f32 %v306_v45 }
  0xcd   :  { %v8091_v55 = vpop.eup %8090  ;;  %v335_v0 = vadd.f32 2.0, %v8089_v49  ;;  %8104 = vpow2.f32 %v310_v61 }
  0xce   :  { %v411_v1 = vmul.f32 %v8091_v55, %v363_v51  ;;  %v8093_v3 = vpop.eup %8092 }
  0xcf   :  { %v351_v47 = vmul.f32 %v8089_v49, %v335_v0  ;;  %v8095_v13 = vpop.eup %8094  ;;  %v326_v7 = vadd.f32 2.0, %v8093_v3 }
  0xd0   :  { %v8848_v4 = vsel %vm427_vm4, %v8760_v12, %v411_v1  ;;  %v372_v12 = vadd.f32 2.0, %v8850_v8  ;;  %v328_v30 = vadd.f32 2.0, %v8095_v13  ;;  %v8882_v1 = vpop.permute.xlu0 %987  ;;  %vm1127_vm4 = vcmask 1046528  }
  0xd1   :  { %15089 = vst [vmem:[#allocation9_spill] sm:$0xff] %v8848_v4  ;;  %486 = vrot.lane.b32.xlu0 %v8848_v4, %s8476_s16  ;;  %v383_v11 = vadd.f32 2.0, %v351_v47  ;;  %v342_v26 = vmul.f32 %v8093_v3, %v326_v7  ;;  %v2398_v4 = vld [vmem:[%s14711_s1 + $0x458] sm:$0xff] }
  0xd2   :  { %v344_v6 = vmul.f32 %v8095_v13, %v328_v30 }
  0xd3   :  { %v8097_v14 = vpop.eup %8096  ;;  %8106 = vrcp.f32 %v383_v11  ;;  %v374_v29 = vadd.f32 2.0, %v342_v26 }
  0xd4   :  { %v8099_v15 = vpop.eup %8098  ;;  %v322_v19 = vadd.f32 2.0, %v8097_v14  ;;  %8108 = vpow2.f32 %v314_v17  ;;  %v376_v43 = vadd.f32 2.0, %v344_v6 }
  0xd5   :  { %v8101_v20 = vpop.eup %8100  ;;  %v337_v21 = vadd.f32 2.0, %v8099_v15  ;;  %8110 = vrcp.f32 %v372_v12 }
  0xd6   :  { %v8103_v22 = vpop.eup %8102  ;;  %v413_v23 = vmul.f32 %v8101_v20, %v365_v18  ;;  %v338_v56 = vmul.f32 %v8097_v14, %v322_v19  ;;  %8112 = vpow2.f32 %v318_v62  ;;  %v8905_v62 = vpop.permute.xlu0 %1247 }
  0xd7   :  { %v353_v32 = vmul.f32 %v8099_v15, %v337_v21  ;;  %v330_v36 = vadd.f32 2.0, %v8103_v22  ;;  %v8105_v38 = vpop.eup %8104  ;;  %v8896_v15 = vpop.permute.xlu1 %983  ;;  %v360_v21 = vmul.f32 %v344_v6, %v8740_v39 }
  0xd8   :  { %v8859_v33 = vsel %vm429_vm5, %v8784_v16, %v413_v23  ;;  %v370_v60 = vadd.f32 2.0, %v338_v56  ;;  %v367_v16 = vmul.f32 %v351_v47, %v8806_v5  ;;  %v332_v44 = vadd.f32 2.0, %v8105_v38 }
  0xd9   :  { %15090 = vst [vmem:[#allocation10_spill] sm:$0xff] %v8859_v33  ;;  %490 = vrot.lane.b32.xlu0 %v8859_v33, %s8476_s16  ;;  %v385_v35 = vadd.f32 2.0, %v353_v32  ;;  %v346_v41 = vmul.f32 %v8103_v22, %v330_v36  ;;  %v354_v53 = vmul.f32 %v338_v56, %v8828_v34  ;;  %v369_v61 = vmul.f32 %v353_v32, %v8832_v57  ;;  %v778_v22 = vld [vmem:[%s14711_s1 + $0x28] sm:$0xff]  ;;  %v2140_v33 = vld [vmem:[%s14711_s1 + $0x3e0] sm:$0xff] }
  0xda   :  { %8114 = vrcp.f32 %v370_v60  ;;  %v348_v50 = vmul.f32 %v8105_v38, %v332_v44  ;;  %v8922_v60 = vpop.permute.xlu0 %791  ;;  %v1683_v38 = vld [vmem:[%s14711_s1 + $0x2b0] sm:$0xff] }
  0xdb   :  { %8116 = vrcp.f32 %v385_v35  ;;  %v378_v46 = vadd.f32 2.0, %v346_v41  ;;  %v8917_v30 = vpop.permute.xlu1 %991  ;;  %v362_v32 = vmul.f32 %v346_v41, %v8751_v59  ;;  %v1682_v35 = vld [vmem:[%s14711_s1 + $0x2a8] sm:$0xff] }
  0xdc   :  { %8118 = vrcp.f32 %v374_v29  ;;  %v380_v47 = vadd.f32 2.0, %v348_v50  ;;  %v364_v29 = vmul.f32 %v348_v50, %v8767_v25 }
  0xdd   :  { %v8107_v40 = vpop.eup %8106  ;;  %8120 = vrcp.f32 %v376_v43  ;;  %v972_v43 = vld [vmem:[%s14711_s1 + $0xb8] sm:$0xff] }
  0xde   :  { %v415_v42 = vmul.f32 %v8107_v40, %v367_v16  ;;  %v8109_v9 = vpop.eup %8108  ;;  %8122 = vrcp.f32 %v378_v46  ;;  %v8943_v41 = vpop.permute.xlu0 %1695 }
  0xdf   :  { %v8111_v2 = vpop.eup %8110  ;;  %v334_v49 = vadd.f32 2.0, %v8109_v9  ;;  %8124 = vrcp.f32 %v380_v47  ;;  %v8934_v6 = vpop.permute.xlu1 %1243  ;;  %v2134_v47 = vld [vmem:[%s14711_s1 + $0x3b0] sm:$0xff] }
  0xe0   :  { %v8873_v45 = vsel %vm431_vm7, %v8806_v5, %v415_v42  ;;  %v8113_v51 = vpop.eup %8112  ;;  %v356_v5 = vmul.f32 %v8850_v8, %v8771_v27  ;;  %v358_v8 = vmul.f32 %v342_v26, %v8797_v54 }
  0xe1   :  { %15091 = vst [vmem:[#allocation11_spill] sm:$0xff] %v8873_v45  ;;  %494 = vrot.lane.b32.xlu0 %v8873_v45, %s8476_s16  ;;  %v350_v17 = vmul.f32 %v8109_v9, %v334_v49  ;;  %v336_v10 = vadd.f32 2.0, %v8113_v51  ;;  %v973_v49 = vld [vmem:[%s14711_s1 + $0xc0] sm:$0xff]  ;;  %v1239_v45 = vld [vmem:[%s14711_s1 + $0x170] sm:$0xff] }
  0xe2   :  { %v404_v13 = vmul.f32 %v8111_v2, %v356_v5  ;;  %v8960_v50 = vpop.permute.xlu0 %995 }
  0xe3   :  { %v382_v18 = vadd.f32 2.0, %v350_v17  ;;  %v352_v19 = vmul.f32 %v8113_v51, %v336_v10  ;;  %v366_v42 = vmul.f32 %v350_v17, %v8793_v52  ;;  %v8955_v46 = vpop.permute.xlu1 %1251  ;;  %v2391_v17 = vld [vmem:[%s14711_s1 + $0x420] sm:$0xff] }
  0xe4   :  { %v8115_v55 = vpop.eup %8114  ;;  %v8903_v12 = vsel %vm420_vm10, %v8771_v27, %v404_v13  ;;  %v2392_v13 = vld [vmem:[%s14711_s1 + $0x428] sm:$0xff] }
  0xe5   :  { %v8117_v63 = vpop.eup %8116  ;;  %v402_v0 = vmul.f32 %v8115_v55, %v354_v53  ;;  %15094 = vst [vmem:[#allocation14_spill] sm:$0xff] %v8903_v12  ;;  %8126 = vrcp.f32 %v382_v18  ;;  %v384_v23 = vadd.f32 2.0, %v352_v19  ;;  %v368_v2 = vmul.f32 %v352_v19, %v8819_v24  ;;  %v1489_v55 = vld [vmem:[%s14711_s1 + $0x1a0] sm:$0xff]  ;;  %v1939_v19 = vld [vmem:[%s14711_s1 + $0x318] sm:$0xff] }
  0xe6   :  { %v417_v3 = vmul.f32 %v8117_v63, %v369_v61  ;;  %v8119_v7 = vpop.eup %8118  ;;  %v8980_v63 = vpop.permute.xlu0 %999 }
  0xe7   :  { %v8885_v11 = vsel %vm418_vm8, %v8828_v34, %v402_v0  ;;  %v1488_v34 = vld [vmem:[%s14711_s1 + $0x198] sm:$0xff]  ;;  %v8121_v20 = vpop.eup %8120  ;;  %8128 = vrcp.f32 %v384_v23  ;;  %v8971_v53 = vpop.permute.xlu1 %796  ;;  %v1233_v0 = vld [vmem:[%s14711_s1 + $0x140] sm:$0xff]  ;;  %v1941_v23 = vld [vmem:[%s14711_s1 + $0x328] sm:$0xff] }
  0xe8   :  { %15092 = vst [vmem:[#allocation12_spill] sm:$0xff] %v8885_v11  ;;  %468 = vrot.lane.b32.xlu1 %v8885_v11, %s8476_s16  ;;  %v8891_v14 = vsel %vm433_vm9, %v8832_v57, %v417_v3  ;;  %v406_v57 = vmul.f32 %v8119_v7, %v358_v8  ;;  %v8123_v27 = vpop.eup %8122  ;;  %v408_v26 = vmul.f32 %v8121_v20, %v360_v21  ;;  %15100 = vst [vmem:[#allocation20_spill] sm:$0xff] %v8971_v53  ;;  %v1938_v8 = vld [vmem:[%s14711_s1 + $0x310] sm:$0xff]  ;;  %v1940_v20 = vld [vmem:[%s14711_s1 + $0x320] sm:$0xff] }
  0xe9   :  { %15093 = vst [vmem:[#allocation13_spill] sm:$0xff] %v8891_v14  ;;  %498 = vrot.lane.b32.xlu0 %v8891_v14, %s8476_s16  ;;  %v410_v36 = vmul.f32 %v8123_v27, %v362_v32  ;;  %v8125_v37 = vpop.eup %8124  ;;  %v1232_v21 = vld [vmem:[%s14711_s1 + $0x138] sm:$0xff]  ;;  %v975_v32 = vld [vmem:[%s14711_s1 + $0xd0] sm:$0xff]  ;;  %v785_v11 = vld [vmem:[%s14711_s1 + $0x60] sm:$0xff] }
  0xea   :  { %v8915_v56 = vsel %vm422_vm11, %v8797_v54, %v406_v57  ;;  %v8929_v54 = vsel %vm424_vm12, %v8740_v39, %v408_v26  ;;  %v412_v39 = vmul.f32 %v8125_v37, %v364_v29  ;;  %v8995_v3 = vpop.permute.xlu0 %1259  ;;  %v2133_v26 = vld [vmem:[%s14711_s1 + $0x3a8] sm:$0xff]  ;;  %v1491_v29 = vld [vmem:[%s14711_s1 + $0x1b0] sm:$0xff]  ;;  %vm2970_vm11 = vcmask 1043456  }
  0xeb   :  { %15095 = vst [vmem:[#allocation15_spill] sm:$0xff] %v8915_v56  ;;  %15096 = vst [vmem:[#allocation16_spill] sm:$0xff] %v8929_v54  ;;  %v8941_v16 = vsel %vm426_vm13, %v8751_v59, %v410_v36  ;;  %v8990_v5 = vpop.permute.xlu1 %1699  ;;  %v1490_v36 = vld [vmem:[%s14711_s1 + $0x1a8] sm:$0xff]  ;;  %v1495_v14 = vld [vmem:[%s14711_s1 + $0x1d0] sm:$0xff]  ;;  %vm8484_vm12 = vmmov 1  }
  0xec   :  { %472 = vrot.lane.b32.xlu1 %v8903_v12, %s8476_s16  ;;  %15097 = vst [vmem:[#allocation17_spill] sm:$0xff] %v8941_v16  ;;  %v8953_v44 = vsel %vm428_vm14, %v8767_v25, %v412_v39  ;;  %vm11038_vm13 = vmpackc.low %vm2970_vm11, %vm8484_vm12 }
  0xed   :  { %1518 = vperm.xlu0 %7985, %v1488_v34   ;;  %15098 = vst [vmem:[#allocation18_spill] sm:$0xff] %v8953_v44  ;;  %v2393_v34 = vld [vmem:[%s14711_s1 + $0x430] sm:$0xff] }
  0xee   :  { %v9008_v7 = vpop.permute.xlu0 %2146 }
  0xef   :  { %v8127_v40 = vpop.eup %8126  ;;  %v9003_v10 = vpop.permute.xlu1 %1703 }
  0xf0   :  { %476 = vrot.lane.b32.xlu1 %v8915_v56, %s8476_s16  ;;  %v414_v59 = vmul.f32 %v8127_v40, %v366_v42  ;;  %v1235_v40 = vld [vmem:[%s14711_s1 + $0x150] sm:$0xff]  ;;  %v1947_v56 = vld [vmem:[%s14711_s1 + $0x358] sm:$0xff] }
  0xf1   :  { %816 = vperm.xlu0 %7985, %v778_v22   ;;  %v8129_v9 = vpop.eup %8128 }
  0xf2   :  { %v8967_v25 = vsel %vm430_vm15, %v8793_v52, %v414_v59  ;;  %v416_v51 = vmul.f32 %v8129_v9, %v368_v2  ;;  %v2132_v52 = vld [vmem:[%s14711_s1 + $0x3a0] sm:$0xff]  ;;  %v9021_v57 = vpop.permute.xlu0 %801  ;;  %v1684_v2 = vld [vmem:[%s14711_s1 + $0x2b8] sm:$0xff] }
  0xf3   :  { %15099 = vst [vmem:[#allocation19_spill] sm:$0xff] %v8967_v25  ;;  %v9016_v18 = vpop.permute.xlu1 %1255  ;;  %15102 = vst [vmem:[#allocation22_spill] sm:$0xff] %v9021_v57  ;;  %v2136_v59 = vld [vmem:[%s14711_s1 + $0x3c0] sm:$0xff] }
  0xf4   :  { %480 = vrot.lane.b32.xlu1 %v8929_v54, %s8476_s16  ;;  %v8978_v61 = vsel %vm432_vm0, %v8819_v24, %v416_v51  ;;  %v2390_v24 = vld [vmem:[%s14711_s1 + $0x418] sm:$0xff] }
  0xf5   :  { %1715 = vperm.xlu0 %7985, %v1682_v35   ;;  %15101 = vst [vmem:[#allocation21_spill] sm:$0xff] %v8978_v61  ;;  %v2394_v51 = vld [vmem:[%s14711_s1 + $0x438] sm:$0xff] }
  0xf6   :  { %v9034_v27 = vpop.permute.xlu0 %2154 }
  0xf7   :  { %v9029_v22 = vpop.permute.xlu1 %1503 }
  0xf8   :  { %484 = vrot.lane.b32.xlu1 %v8941_v16, %s8476_s16  ;;  %15103 = vst [vmem:[#allocation23_spill] sm:$0xff] %v9029_v22 }
  0xf9   :  { %1719 = vperm.xlu0 %7985, %v1683_v38   ;;  %v779_v38 = vld [vmem:[%s14711_s1 + $0x30] sm:$0xff] }
  0xfa   :  { %v9047_v37 = vpop.permute.xlu0 %2405 }
  0xfb   :  { %v9042_v35 = vpop.permute.xlu1 %2150 }
  0xfc   :  { %488 = vrot.lane.b32.xlu1 %v8953_v44, %s8476_s16 }
  0xfd   :  { %1011 = vperm.xlu0 %7985, %v972_v43   ;;  %v780_v43 = vld [vmem:[%s14711_s1 + $0x38] sm:$0xff] }
  0xfe   :  { %v9060_v42 = vpop.permute.xlu0 %1707 }
  0xff   :  { %v9055_v39 = vpop.permute.xlu1 %1508 }
 0x100   :  { %492 = vrot.lane.b32.xlu1 %v8967_v25, %s8476_s16  ;;  %15104 = vst [vmem:[#allocation24_spill] sm:$0xff] %v9055_v39 }
 0x101   :  { %1015 = vperm.xlu0 %7985, %v973_v49  }
 0x102   :  { %v9073_v49 = vpop.permute.xlu0 %1003 }
 0x103   :  { %v9068_v9 = vpop.permute.xlu1 %806 }
 0x104   :  { %496 = vrot.lane.b32.xlu1 %v8978_v61, %s8476_s16  ;;  %15105 = vst [vmem:[#allocation25_spill] sm:$0xff] %v9068_v9 }
 0x105   :  { %1523 = vperm.xlu0 %7985, %v1489_v55   ;;  %v1685_v55 = vld [vmem:[%s14711_s1 + $0x2c0] sm:$0xff] }
 0x108   :  { %2162 = vperm.xlu1 %7984, %v2132_v52   ;;  %v9081_v52 = vpop.permute.xlu1 %2409 }
 0x109   :  { %1275 = vperm.xlu0 %7985, %v1233_v0   ;;  %v2395_v0 = vld [vmem:[%s14711_s1 + $0x440] sm:$0xff] }
 0x10c   :  { %2417 = vperm.xlu1 %7984, %v2390_v24   ;;  %v9086_v24 = vpop.permute.xlu0 %1954 }
 0x10d   :  { %2170 = vperm.xlu0 %7985, %v2134_v47   ;;  %15106 = vst [vmem:[#allocation26_spill] sm:$0xff] %v9086_v24  ;;  %v974_v47 = vld [vmem:[%s14711_s1 + $0xc8] sm:$0xff] }
 0x110   :  { %2421 = vperm.xlu1 %7984, %v2391_v17   ;;  %v1942_v17 = vld [vmem:[%s14711_s1 + $0x330] sm:$0xff] }
 0x111   :  { %2425 = vperm.xlu0 %7985, %v2392_v13   ;;  %v9094_v13 = vpop.permute.xlu1 %2413 }
 0x114   :  { %1964 = vperm.xlu1 %7984, %v1938_v8   ;;  %v1234_v8 = vld [vmem:[%s14711_s1 + $0x148] sm:$0xff] }
 0x115   :  { %2429 = vperm.xlu0 %7985, %v2393_v34   ;;  %v9099_v34 = vpop.permute.xlu0 %1959 }
 0x116   :  { %15107 = vst [vmem:[#allocation27_spill] sm:$0xff] %v9099_v34 }
 0x118   :  { %1969 = vperm.xlu1 %7984, %v1939_v19   ;;  %v1943_v19 = vld [vmem:[%s14711_s1 + $0x338] sm:$0xff] }
 0x119   :  { %1974 = vperm.xlu0 %7985, %v1940_v20   ;;  %v2135_v20 = vld [vmem:[%s14711_s1 + $0x3b8] sm:$0xff] }
 0x11c   :  { %1271 = vperm.xlu1 %7984, %v1232_v21   ;;  %v9107_v21 = vpop.permute.xlu1 %1711 }
 0x11d   :  { %1979 = vperm.xlu0 %7985, %v1941_v23   ;;  %v977_v23 = vld [vmem:[%s14711_s1 + $0xe0] sm:$0xff] }
 0x120   :  { %2166 = vperm.xlu1 %7984, %v2133_v26   ;;  %v9112_v26 = vpop.permute.xlu0 %1267 }
 0x121   :  { %1023 = vperm.xlu0 %7985, %v975_v32   ;;  %v1492_v32 = vld [vmem:[%s14711_s1 + $0x1b8] sm:$0xff] }
 0x124   :  { %1528 = vperm.xlu1 %7984, %v1490_v36   ;;  %v1493_v36 = vld [vmem:[%s14711_s1 + $0x1c0] sm:$0xff] }
 0x125   :  { %1533 = vperm.xlu0 %7985, %v1491_v29   ;;  %v9120_v29 = vpop.permute.xlu1 %1007 }
 0x128   :  { %821 = vperm.xlu1 %7984, %v779_v38   ;;  %v781_v38 = vld [vmem:[%s14711_s1 + $0x40] sm:$0xff] }
 0x129   :  { %1283 = vperm.xlu0 %7985, %v1235_v40   ;;  %v9125_v40 = vpop.permute.xlu0 %2158 }
 0x12c   :  { %826 = vperm.xlu1 %7984, %v780_v43   ;;  %v1237_v43 = vld [vmem:[%s14711_s1 + $0x160] sm:$0xff] }
 0x12d   :  { %2178 = vperm.xlu0 %7985, %v2136_v59   ;;  %v782_v59 = vld [vmem:[%s14711_s1 + $0x48] sm:$0xff] }
 0x130   :  { %1723 = vperm.xlu1 %7984, %v1684_v2   ;;  %v9133_v2 = vpop.permute.xlu1 %1263 }
 0x131   :  { %2433 = vperm.xlu0 %7985, %v2394_v51   ;;  %v9135_v51 = vpop.permute.xlu0 %470 }
 0x132   :  { %15108 = vst [vmem:[#allocation28_spill] sm:$0xff] %v9135_v51 }
 0x134   :  { %1727 = vperm.xlu1 %7984, %v1685_v55   ;;  %v2138_v55 = vld [vmem:[%s14711_s1 + $0x3d0] sm:$0xff] }
 0x135   :  { %2437 = vperm.xlu0 %7985, %v2395_v0   ;;  %v1686_v0 = vld [vmem:[%s14711_s1 + $0x2c8] sm:$0xff] }
 0x138   :  { %1019 = vperm.xlu1 %7984, %v974_v47   ;;  %v2396_v47 = vld [vmem:[%s14711_s1 + $0x448] sm:$0xff] }
 0x139   :  { %1984 = vperm.xlu0 %7985, %v1942_v17   ;;  %v9146_v17 = vpop.permute.xlu1 %1513 }
 0x13a   :  { %15109 = vst [vmem:[#allocation29_spill] sm:$0xff] %v9146_v17 }
 0x13c   :  { %1279 = vperm.xlu1 %7984, %v1234_v8   ;;  %v9148_v8 = vpop.permute.xlu0 %474 }
 0x13d   :  { %1989 = vperm.xlu0 %7985, %v1943_v19   ;;  %15110 = vst [vmem:[#allocation30_spill] sm:$0xff] %v9148_v8  ;;  %v1687_v19 = vld [vmem:[%s14711_s1 + $0x2d0] sm:$0xff] }
 0x140   :  { %2174 = vperm.xlu1 %7984, %v2135_v20   ;;  %v2397_v20 = vld [vmem:[%s14711_s1 + $0x450] sm:$0xff] }
 0x141   :  { %1031 = vperm.xlu0 %7985, %v977_v23   ;;  %v9156_v23 = vpop.permute.xlu0 %478 }
 0x142   :  { %15111 = vst [vmem:[#allocation31_spill] sm:$0xff] %v9156_v23 }
 0x144   :  { %1538 = vperm.xlu1 %7984, %v1492_v32   ;;  %v976_v32 = vld [vmem:[%s14711_s1 + $0xd8] sm:$0xff] }
 0x145   :  { %1543 = vperm.xlu0 %7985, %v1493_v36   ;;  %v9161_v36 = vpop.permute.xlu1 %811 }
 0x146   :  { %15112 = vst [vmem:[#allocation32_spill] sm:$0xff] %v9161_v36 }
 0x148   :  { %831 = vperm.xlu1 %7984, %v781_v38   ;;  %v1944_v38 = vld [vmem:[%s14711_s1 + $0x340] sm:$0xff] }
 0x149   :  { %1291 = vperm.xlu0 %7985, %v1237_v43   ;;  %v9166_v43 = vpop.permute.xlu0 %482 }
 0x14a   :  { %15113 = vst [vmem:[#allocation33_spill] sm:$0xff] %v9166_v43 }
 0x14c   :  { %836 = vperm.xlu1 %7984, %v782_v59   ;;  %v1236_v59 = vld [vmem:[%s14711_s1 + $0x158] sm:$0xff] }
 0x14d   :  { %2186 = vperm.xlu0 %7985, %v2138_v55  }
 0x150   :  { %1731 = vperm.xlu1 %7984, %v1686_v0   ;;  %v1945_v0 = vld [vmem:[%s14711_s1 + $0x348] sm:$0xff] }
 0x151   :  { %2441 = vperm.xlu0 %7985, %v2396_v47   ;;  %v9178_v47 = vpop.permute.xlu0 %486 }
 0x152   :  { %15115 = vst [vmem:[#allocation35_spill] sm:$0xff] %v9178_v47 }
 0x154   :  { %1735 = vperm.xlu1 %7984, %v1687_v19   ;;  %v2137_v19 = vld [vmem:[%s14711_s1 + $0x3c8] sm:$0xff] }
 0x155   :  { %2445 = vperm.xlu0 %7985, %v2397_v20  }
 0x158   :  { %1027 = vperm.xlu1 %7984, %v976_v32   ;;  %v979_v32 = vld [vmem:[%s14711_s1 + $0xf0] sm:$0xff] }
 0x159   :  { %1994 = vperm.xlu0 %7985, %v1944_v38   ;;  %v9192_v38 = vpop.permute.xlu0 %490 }
 0x15a   :  { %v9171_v55 = vpop.permute.xlu1 %468  ;;  %15117 = vst [vmem:[#allocation37_spill] sm:$0xff] %v9192_v38 }
 0x15b   :  { %15114 = vst [vmem:[#allocation34_spill] sm:$0xff] %v9171_v55  ;;  %7648 = vmatprep.mubr.msk.f32.mxu0 %vm500_vm1, %v9171_v55 }
 0x15c   :  { %1287 = vperm.xlu1 %7984, %v1236_v59   ;;  %7649 = vmatmul.mubr.msk.f32.vlgmr.msra.gmra.mrb[0].mxu0 %vm500_vm1, %v9135_v51  ;;  %v1494_v59 = vld [vmem:[%s14711_s1 + $0x1c8] sm:$0xff]  ;;  %v1692_v51 = vld [vmem:[%s14711_s1 + $0x2f8] sm:$0xff] }
 0x15d   :  { %1999 = vperm.xlu0 %7985, %v1945_v0   ;;  %v9206_v61 = vpop.permute.xlu0 %494 }
 0x15e   :  { %v9185_v20 = vpop.permute.xlu1 %472  ;;  %15119 = vst [vmem:[#allocation39_spill] sm:$0xff] %v9206_v61 }
 0x15f   :  { %15116 = vst [vmem:[#allocation36_spill] sm:$0xff] %v9185_v20  ;;  %7651 = vmatprep.mubr.msk.f32.mxu0 %vm500_vm1, %v9185_v20 }
 0x160   :  { %2182 = vperm.xlu1 %7984, %v2137_v19   ;;  %7652 = vmatmul.mubr.msk.f32.gmra.mrb[2].mxu0 %vm500_vm1, %v9148_v8  ;;  %v783_v19 = vld [vmem:[%s14711_s1 + $0x50] sm:$0xff] }
 0x161   :  { %1039 = vperm.xlu0 %7985, %v979_v32   ;;  %v9220_v25 = vpop.permute.xlu0 %498 }
 0x162   :  { %v9199_v0 = vpop.permute.xlu1 %476  ;;  %15121 = vst [vmem:[#allocation41_spill] sm:$0xff] %v9220_v25 }
 0x163   :  { %15118 = vst [vmem:[#allocation38_spill] sm:$0xff] %v9199_v0  ;;  %7654 = vmatprep.mubr.msk.f32.mxu0 %vm500_vm1, %v9199_v0  ;;  %v788_v0 = vld [vmem:[%s14711_s1 + $0x78] sm:$0xff] }
 0x164   :  { %1548 = vperm.xlu1 %7984, %v1494_v59   ;;  %7655 = vmatmul.mubr.msk.f32.gmra.mrb[4].mxu0 %vm500_vm1, %v9156_v23  ;;  %v787_v23 = vld [vmem:[%s14711_s1 + $0x70] sm:$0xff] }
 0x165   :  { %1553 = vperm.xlu0 %7985, %v1495_v14   ;;  %v784_v14 = vld [vmem:[%s14711_s1 + $0x58] sm:$0xff] }
 0x166   :  { %v9213_v32 = vpop.permute.xlu1 %480 }
 0x167   :  { %15120 = vst [vmem:[#allocation40_spill] sm:$0xff] %v9213_v32  ;;  %7657 = vmatprep.mubr.msk.f32.mxu0 %vm500_vm1, %v9213_v32  ;;  %v1498_v32 = vld [vmem:[%s14711_s1 + $0x1e8] sm:$0xff] }
 0x168   :  { %841 = vperm.xlu1 %7984, %v783_v19   ;;  %7658 = vmatmul.mubr.msk.f32.gmra.mrb[6].mxu0 %vm500_vm1, %v9166_v43 }
 0x169   :  { %1299 = vperm.xlu0 %7985, %v1239_v45   ;;  %v1688_v45 = vld [vmem:[%s14711_s1 + $0x2d8] sm:$0xff] }
 0x16a   :  { %v9227_v59 = vpop.permute.xlu1 %484 }
 0x16b   :  { %15122 = vst [vmem:[#allocation42_spill] sm:$0xff] %v9227_v59  ;;  %7660 = vmatprep.mubr.msk.f32.mxu0 %vm500_vm1, %v9227_v59  ;;  %v1497_v59 = vld [vmem:[%s14711_s1 + $0x1e0] sm:$0xff] }
 0x16c   :  { %846 = vperm.xlu1 %7984, %v784_v14   ;;  %7661 = vmatmul.mubr.msk.f32.gmra.mrb[8].mxu0 %vm500_vm1, %v9178_v47  ;;  %v9236_v19 = vpop.permute.xlu0 %1518 }
 0x16d   :  { %15123 = vst [vmem:[#allocation43_spill] sm:$0xff] %v9236_v19  ;;  %2194 = vperm.xlu0 %7985, %v2140_v33   ;;  %v1689_v33 = vld [vmem:[%s14711_s1 + $0x2e0] sm:$0xff] }
 0x16e   :  { %v9241_v44 = vpop.permute.xlu1 %488 }
 0x16f   :  { %15124 = vst [vmem:[#allocation44_spill] sm:$0xff] %v9241_v44  ;;  %7663 = vmatprep.mubr.msk.f32.mxu0 %vm500_vm1, %v9241_v44  ;;  %v980_v44 = vld [vmem:[%s14711_s1 + $0xf8] sm:$0xff] }
 0x170   :  { %1739 = vperm.xlu1 %7984, %v1688_v45   ;;  %7664 = vmatmul.mubr.msk.f32.gmra.mrb[10].mxu0 %vm500_vm1, %v9192_v38  ;;  %v9250_v14 = vpop.permute.xlu0 %816  ;;  %v1691_v38 = vld [vmem:[%s14711_s1 + $0x2f0] sm:$0xff] }
 0x171   :  { %15125 = vst [vmem:[#allocation45_spill] sm:$0xff] %v9250_v14  ;;  %2449 = vperm.xlu0 %7985, %v2398_v4   ;;  %v978_v4 = vld [vmem:[%s14711_s1 + $0xe8] sm:$0xff] }
 0x172   :  { %v9255_v16 = vpop.permute.xlu1 %492 }
 0x173   :  { %15126 = vst [vmem:[#allocation46_spill] sm:$0xff] %v9255_v16  ;;  %7666 = vmatprep.mubr.msk.f32.mxu1 %vm500_vm1, %v9255_v16 }
 0x174   :  { %1743 = vperm.xlu1 %7984, %v1689_v33   ;;  %7667 = vmatmul.mubr.msk.f32.vlgmr.msra.gmra.mrb[0].mxu1 %vm500_vm1, %v9206_v61  ;;  %v9264_v45 = vpop.permute.xlu0 %1715  ;;  %v1690_v61 = vld [vmem:[%s14711_s1 + $0x2e8] sm:$0xff] }
 0x175   :  { %2453 = vperm.xlu0 %7985, %v2399_v48   ;;  %v1238_v48 = vld [vmem:[%s14711_s1 + $0x168] sm:$0xff] }
 0x176   :  { %v9269_v54 = vpop.permute.xlu1 %496 }
 0x177   :  { %15127 = vst [vmem:[#allocation47_spill] sm:$0xff] %v9269_v54  ;;  %7669 = vmatprep.mubr.msk.f32.mxu1 %vm500_vm1, %v9269_v54 }
 0x178   :  { %1035 = vperm.xlu1 %7984, %v978_v4   ;;  %7670 = vmatmul.mubr.msk.f32.gmra.mrb[2].mxu1 %vm500_vm1, %v9220_v25  ;;  %v9278_v33 = vpop.permute.xlu0 %1719  ;;  %v2139_v4 = vld [vmem:[%s14711_s1 + $0x3d8] sm:$0xff]  ;;  %v786_v25 = vld [vmem:[%s14711_s1 + $0x68] sm:$0xff] }
 0x179   :  { %2004 = vperm.xlu0 %7985, %v1946_v28   ;;  %v1240_v28 = vld [vmem:[%s14711_s1 + $0x178] sm:$0xff] }
 0x17c   :  { %1295 = vperm.xlu1 %7984, %v1238_v48   ;;  %v9286_v58 = vpop.permute.xlu0 %1011 }
 0x17d   :  { %2009 = vperm.xlu0 %7985, %v1947_v56   ;;  %v2141_v56 = vld [vmem:[%s14711_s1 + $0x3e8] sm:$0xff] }
 0x180   :  { %2190 = vperm.xlu1 %7984, %v2139_v4   ;;  %v9294_v12 = vpop.permute.xlu0 %1015  ;;  %v2142_v4 = vld [vmem:[%s14711_s1 + $0x3f0] sm:$0xff] }
 0x181   :  { %1303 = vperm.xlu0 %7985, %v1240_v28  }
 0x184   :  { %1558 = vperm.xlu1 %7984, %v1496_v31   ;;  %v9302_v48 = vpop.permute.xlu0 %1523  ;;  %v2400_v31 = vld [vmem:[%s14711_s1 + $0x468] sm:$0xff] }
 0x185   :  { %15128 = vst [vmem:[#allocation48_spill] sm:$0xff] %v9302_v48  ;;  %2198 = vperm.xlu0 %7985, %v2141_v56  }
 0x187   :  { %v9310_v28 = vpop.permute.xlu1 %2162 }
 0x188   :  { %851 = vperm.xlu1 %7984, %v785_v11   ;;  %v9318_v56 = vpop.permute.xlu0 %1275  ;;  %v2401_v11 = vld [vmem:[%s14711_s1 + $0x470] sm:$0xff] }
 0x189   :  { %2202 = vperm.xlu0 %7985, %v2142_v4  }
 0x18b   :  { %v9320_v54 = vpop.permute.xlu1 %2417 }
 0x18c   :  { %856 = vperm.xlu1 %7984, %v786_v25   ;;  %v9330_v16 = vpop.permute.xlu0 %2170  ;;  %v1948_v25 = vld [vmem:[%s14711_s1 + $0x360] sm:$0xff] }
 0x18d   :  { %2457 = vperm.xlu0 %7985, %v2400_v31  }
 0x18f   :  { %v9328_v4 = vpop.permute.xlu1 %2421 }
 0x190   :  { %1747 = vperm.xlu1 %7984, %v1690_v61   ;;  %v1499_v61 = vld [vmem:[%s14711_s1 + $0x1f0] sm:$0xff] }
 0x191   :  { %2461 = vperm.xlu0 %7985, %v2401_v11   ;;  %v9346_v11 = vpop.permute.xlu0 %2425 }
 0x193   :  { %v9338_v31 = vpop.permute.xlu1 %1964 }
 0x194   :  { %15129 = vst [vmem:[#allocation49_spill] sm:$0xff] %v9338_v31  ;;  %1751 = vperm.xlu1 %7984, %v1691_v38   ;;  %v1500_v38 = vld [vmem:[%s14711_s1 + $0x1f8] sm:$0xff] }
 0x195   :  { %2014 = vperm.xlu0 %7985, %v1948_v25   ;;  %v9358_v43 = vpop.permute.xlu0 %2429 }
 0x197   :  { %v9348_v47 = vpop.permute.xlu1 %1969 }
 0x198   :  { %15130 = vst [vmem:[#allocation50_spill] sm:$0xff] %v9348_v47  ;;  %1043 = vperm.xlu1 %7984, %v980_v44   ;;  %v1950_v44 = vld [vmem:[%s14711_s1 + $0x370] sm:$0xff] }
 0x199   :  { %1573 = vperm.xlu0 %7985, %v1499_v61  }
 0x19b   :  { %v9356_v25 = vpop.permute.xlu1 %1271 }
 0x19c   :  { %1563 = vperm.xlu1 %7984, %v1497_v59   ;;  %v1951_v59 = vld [vmem:[%s14711_s1 + $0x378] sm:$0xff] }
 0x19d   :  { %1578 = vperm.xlu0 %7985, %v1500_v38   ;;  %v9374_v38 = vpop.permute.xlu0 %1974 }
 0x19e   :  { %15131 = vst [vmem:[#allocation51_spill] sm:$0xff] %v9374_v38 }
 0x19f   :  { %v9366_v61 = vpop.permute.xlu1 %2166 }
 0x1a0   :  { %1568 = vperm.xlu1 %7984, %v1498_v32  }
 0x1a1   :  { %2024 = vperm.xlu0 %7985, %v1950_v44   ;;  %v9383_v44 = vpop.permute.xlu0 %1979 }
 0x1a2   :  { %15134 = vst [vmem:[#allocation54_spill] sm:$0xff] %v9383_v44 }
 0x1a3   :  { %v9376_v8 = vpop.permute.xlu1 %1528 }
 0x1a4   :  { %15132 = vst [vmem:[#allocation52_spill] sm:$0xff] %v9376_v8  ;;  %861 = vperm.xlu1 %7984, %v787_v23   ;;  %v1949_v23 = vld [vmem:[%s14711_s1 + $0x368] sm:$0xff] }
 0x1a5   :  { %2029 = vperm.xlu0 %7985, %v1951_v59   ;;  %v9393_v59 = vpop.permute.xlu0 %1023 }
 0x1a7   :  { %v9381_v32 = vpop.permute.xlu1 %821 }
 0x1a8   :  { %15133 = vst [vmem:[#allocation53_spill] sm:$0xff] %v9381_v32  ;;  %866 = vperm.xlu1 %7984, %v788_v0   ;;  %v2143_v0 = vld [vmem:[%s14711_s1 + $0x3f8] sm:$0xff] }
 0x1a9   :  { %v9402_v38 = vpop.permute.xlu0 %1533 }
 0x1aa   :  { %15136 = vst [vmem:[#allocation56_spill] sm:$0xff] %v9402_v38 }
 0x1ab   :  { %v9388_v20 = vpop.permute.xlu1 %826 }
 0x1ac   :  { %15135 = vst [vmem:[#allocation55_spill] sm:$0xff] %v9388_v20  ;;  %1755 = vperm.xlu1 %7984, %v1692_v51   ;;  %v2402_v51 = vld [vmem:[%s14711_s1 + $0x478] sm:$0xff]  ;;  %s8478_s1 = smov 6  }
 0x1ad   :  { %v9412_v32 = vpop.permute.xlu0 %1283 }
 0x1af   :  { %v9395_v55 = vpop.permute.xlu1 %1723 }
 0x1b0   :  { %2019 = vperm.xlu1 %7984, %v1949_v23   ;;  %v7404_v23 = vld [vmem:[%s14718_s8] ss:$0 sm:$0xff] }
 0x1b1   :  { %v9421_v47 = vpop.permute.xlu0 %2178 }
 0x1b3   :  { %v9400_v44 = vpop.permute.xlu1 %1727 }
 0x1b4   :  { %2206 = vperm.xlu1 %7984, %v2143_v0   ;;  %v869_v0 = vmul.f32 0.0, %v8922_v60 }
 0x1b5   :  { %v9425_v48 = vpop.permute.xlu0 %2433 }
 0x1b7   :  { %v9407_v20 = vpop.permute.xlu1 %1019 }
 0x1b8   :  { %2465 = vperm.xlu1 %7984, %v2402_v51  }
 0x1b9   :  { %v9429_v31 = vpop.permute.xlu0 %2437 }
 0x1bb   :  { %v9414_v8 = vpop.permute.xlu1 %1279 }
 0x1bc   :  { %754 = vrot.lane.b32.xlu1 %v7404_v23, %s8477_s28 }
 0x1bd   :  { %v9433_v36 = vpop.permute.xlu0 %1984 }
 0x1be   :  { %15140 = vst [vmem:[#allocation60_spill] sm:$0xff] %v9433_v36 }
 0x1bf   :  { %v9418_v38 = vpop.permute.xlu1 %2174 }
 0x1c0   :  { %901 = vrot.lane.b32.xlu1 %v869_v0, %s8477_s28 }
 0x1c1   :  { %v9437_v60 = vpop.permute.xlu0 %1989 }
 0x1c2   :  { %15141 = vst [vmem:[#allocation61_spill] sm:$0xff] %v9437_v60 }
 0x1c3   :  { %v9423_v51 = vpop.permute.xlu1 %1538 }
 0x1c4   :  { %15137 = vst [vmem:[#allocation57_spill] sm:$0xff] %v9423_v51 }
 0x1c5   :  { %v9441_v0 = vpop.permute.xlu0 %1031 }
 0x1c6   :  { %15142 = vst [vmem:[#allocation62_spill] sm:$0xff] %v9441_v0 }
 0x1c7   :  { %v9427_v14 = vpop.permute.xlu1 %831 }
 0x1c8   :  { %15138 = vst [vmem:[#allocation58_spill] sm:$0xff] %v9427_v14 }
 0x1c9   :  { %v9445_v51 = vpop.permute.xlu0 %1543 }
 0x1ca   :  { %15144 = vst [vmem:[#allocation64_spill] sm:$0xff] %v9445_v51 }
 0x1cb   :  { %v9431_v19 = vpop.permute.xlu1 %836 }
 0x1cc   :  { %15139 = vst [vmem:[#allocation59_spill] sm:$0xff] %v9431_v19 }
 0x1cd   :  { %v9449_v14 = vpop.permute.xlu0 %1291 }
 0x1ce   :  { %15146 = vst [vmem:[#allocation66_spill] sm:$0xff] %v9449_v14 }
 0x1cf   :  { %v9435_v23 = vpop.permute.xlu1 %1731 }
 0x1d1   :  { %v9453_v19 = vpop.permute.xlu0 %2186 }
 0x1d2   :  { %15148 = vst [vmem:[#allocation68_spill] sm:$0xff] %v9453_v19 }
 0x1d3   :  { %v9439_v34 = vpop.permute.xlu1 %1735 }
 0x1d5   :  { %v9457_v57 = vpop.permute.xlu0 %2441 }
 0x1d7   :  { %v9443_v17 = vpop.permute.xlu1 %1027 }
 0x1d8   :  { %15143 = vst [vmem:[#allocation63_spill] sm:$0xff] %v9443_v17 }
 0x1d9   :  { %v9461_v39 = vpop.permute.xlu0 %2445 }
 0x1da   :  { %15151 = vst [vmem:[#allocation71_spill] sm:$0xff] %v9461_v39 }
 0x1db   :  { %v9447_v9 = vpop.permute.xlu1 %1287 }
 0x1dc   :  { %15145 = vst [vmem:[#allocation65_spill] sm:$0xff] %v9447_v9 }
 0x1dd   :  { %v9465_v17 = vpop.permute.xlu0 %1994 }
 0x1de   :  { %15153 = vst [vmem:[#allocation73_spill] sm:$0xff] %v9465_v17  ;;  %v1048_v17 = vrot.slane %v8917_v30, 7 }
 0x1df   :  { %v9451_v24 = vpop.permute.xlu1 %2182 }
 0x1e0   :  { %15147 = vst [vmem:[#allocation67_spill] sm:$0xff] %v9451_v24 }
 0x1e1   :  { %v9469_v9 = vpop.permute.xlu0 %1999 }
 0x1e2   :  { %15155 = vst [vmem:[#allocation75_spill] sm:$0xff] %v9469_v9 }
 0x1e3   :  { %v9455_v36 = vpop.permute.xlu1 %1548 }
 0x1e4   :  { %15149 = vst [vmem:[#allocation69_spill] sm:$0xff] %v9455_v36  ;;  %v1045_v36 = vrot.slane %v8896_v15, 7  ;;  %v1052_v15 = vrot.slane %v8980_v63, 7  ;;  %v1311_v63 = vrot.slane %v9016_v18, 6 }
 0x1e5   :  { %v9473_v24 = vpop.permute.xlu0 %1039 }
 0x1e6   :  { %15157 = vst [vmem:[#allocation77_spill] sm:$0xff] %v9473_v24  ;;  %v1093_v0 = vmul.f32 0.0, %v1045_v36  ;;  %v1050_v24 = vrot.slane %v8960_v50, 7  ;;  %v1760_v50 = vrot.slane %v9003_v10, 6  ;;  %v1762_v10 = vrot.slane %v9060_v42, 6 }
 0x1e7   :  { %v9459_v60 = vpop.permute.xlu1 %841  ;;  %v2470_v42 = vrot.slane %v9094_v13, 6 }
 0x1e8   :  { %15150 = vst [vmem:[#allocation70_spill] sm:$0xff] %v9459_v60  ;;  %v1306_v60 = vrot.slane %v8934_v6, 6  ;;  %v9559_v13 = vsel %vm1305_vm3, %v1760_v50, %v1762_v10 }
 0x1e9   :  { %v9479_v14 = vpop.permute.xlu0 %1553  ;;  %15180 = vst [vmem:[#allocation100_spill] sm:$0xff] %v9559_v13 }
 0x1ea   :  { %15159 = vst [vmem:[#allocation79_spill] sm:$0xff] %v9479_v14  ;;  %v1354_v9 = vmul.f32 0.0, %v1306_v60  ;;  %v1758_v14 = vrot.slane %v8990_v5, 6  ;;  %v2209_v5 = vrot.slane %v9042_v35, 7  ;;  %v2468_v35 = vrot.slane %v9081_v52, 6 }
 0x1eb   :  { %v9463_v53 = vpop.permute.xlu1 %846  ;;  %v1764_v52 = vrot.slane %v9107_v21, 6  ;;  %v1766_v21 = vrot.slane %v9264_v45, 6  ;;  %v2472_v45 = vrot.slane %v9320_v54, 6  ;;  %v2476_v54 = vrot.slane %v9346_v11, 6 }
 0x1ec   :  { %15152 = vst [vmem:[#allocation72_spill] sm:$0xff] %v9463_v53  ;;  %v1046_v53 = vrot.slane %v8882_v1, 7  ;;  %v9492_v1 = vrot.slane %v1093_v0, 1  ;;  %v2217_v11 = vrot.slane %v9366_v61, 7 }
 0x1ed   :  { %v9498_v39 = vpop.permute.xlu0 %1299 }
 0x1ee   :  { %v9490_v6 = vsel %vm698_vm2, %v1045_v36, %v1046_v53  ;;  %15162 = vst [vmem:[#allocation82_spill] sm:$0xff] %v9492_v1  ;;  %v9495_v30 = vsel %vm698_vm2, %v1046_v53, %v1048_v17  ;;  %v9508_v36 = vrot.slane %v1354_v9, 2  ;;  %v9514_v53 = vsel %vm698_vm2, %v1048_v17, %v1050_v24 }
 0x1ef   :  { %v9467_v51 = vpop.permute.xlu1 %1739  ;;  %15161 = vst [vmem:[#allocation81_spill] sm:$0xff] %v9490_v6  ;;  %15163 = vst [vmem:[#allocation83_spill] sm:$0xff] %v9495_v30  ;;  %v9528_v9 = vrot.slane %v9008_v7, 7  ;;  %v1054_v17 = vrot.slane %v9073_v49, 7  ;;  %v9549_v49 = vrot.slane %v9047_v37, 6 }
 0x1f0   :  { %15154 = vst [vmem:[#allocation74_spill] sm:$0xff] %v9467_v51  ;;  %15166 = vst [vmem:[#allocation86_spill] sm:$0xff] %v9508_v36 }
 0x1f1   :  { %15168 = vst [vmem:[#allocation88_spill] sm:$0xff] %v9514_v53  ;;  %15171 = vst [vmem:[#allocation91_spill] sm:$0xff] %v9528_v9  ;;  %v9546_v7 = vsel %vm698_vm2, %v9528_v9, %v2209_v5  ;;  %v9564_v36 = vsel %vm698_vm2, %v1052_v15, %v1054_v17  ;;  %v9568_v37 = vsel %vm1305_vm3, %v9549_v49, %v2468_v35 }
 0x1f2   :  { %15176 = vst [vmem:[#allocation96_spill] sm:$0xff] %v9546_v7  ;;  %15177 = vst [vmem:[#allocation97_spill] sm:$0xff] %v9549_v49 }
 0x1f3   :  { %v9471_v22 = vpop.permute.xlu1 %1743  ;;  %15181 = vst [vmem:[#allocation101_spill] sm:$0xff] %v9564_v36  ;;  %15182 = vst [vmem:[#allocation102_spill] sm:$0xff] %v9568_v37 }
 0x1f4   :  { %15156 = vst [vmem:[#allocation76_spill] sm:$0xff] %v9471_v22  ;;  %v1309_v22 = vrot.slane %v8955_v46, 6 }
 0x1f7   :  { %v9475_v19 = vpop.permute.xlu1 %1035 }
 0x1f8   :  { %15158 = vst [vmem:[#allocation78_spill] sm:$0xff] %v9475_v19  ;;  %v1307_v19 = vrot.slane %v8905_v62, 6  ;;  %v9504_v62 = vrot.slane %v8943_v41, 6  ;;  %v1313_v41 = vrot.slane %v8995_v3, 6  ;;  %v9536_v3 = vsel %vm1305_vm3, %v1309_v22, %v1311_v63 }
 0x1f9   :  { %15173 = vst [vmem:[#allocation93_spill] sm:$0xff] %v9536_v3 }
 0x1fa   :  { %v9501_v46 = vsel %vm1305_vm3, %v1306_v60, %v1307_v19  ;;  %15165 = vst [vmem:[#allocation85_spill] sm:$0xff] %v9504_v62  ;;  %v9511_v0 = vsel %vm1305_vm3, %v1307_v19, %v1309_v22  ;;  %v9518_v60 = vsel %vm698_vm2, %v1050_v24, %v1052_v15  ;;  %v9525_v18 = vsel %vm1305_vm3, %v9504_v62, %v1758_v14  ;;  %v9553_v22 = vpop.permute.xlu0 %2194 }
 0x1fb   :  { %v9487_v51 = vpop.permute.xlu1 %1295  ;;  %15164 = vst [vmem:[#allocation84_spill] sm:$0xff] %v9501_v46  ;;  %15167 = vst [vmem:[#allocation87_spill] sm:$0xff] %v9511_v0  ;;  %v9533_v24 = vsel %vm1305_vm3, %v1758_v14, %v1760_v50  ;;  %v1056_v14 = vrot.slane %v9120_v29, 7  ;;  %v1768_v29 = vrot.slane %v9278_v33, 6  ;;  %v1317_v50 = vrot.slane %v9112_v26, 6 }
 0x1fc   :  { %15160 = vst [vmem:[#allocation80_spill] sm:$0xff] %v9487_v51  ;;  %15169 = vst [vmem:[#allocation89_spill] sm:$0xff] %v9518_v60  ;;  %v2211_v51 = vrot.slane %v9034_v27, 7  ;;  %v9539_v27 = vsel %vm1305_vm3, %v1311_v63, %v1313_v41  ;;  %v9579_v15 = vsel %vm1305_vm3, %v1762_v10, %v1764_v52  ;;  %v9599_v10 = vsel %vm1305_vm3, %v1764_v52, %v1766_v21 }
 0x1fd   :  { %15170 = vst [vmem:[#allocation90_spill] sm:$0xff] %v9525_v18  ;;  %15172 = vst [vmem:[#allocation92_spill] sm:$0xff] %v9533_v24  ;;  %v9582_v36 = vsel %vm698_vm2, %v1054_v17, %v1056_v14  ;;  %v1319_v52 = vrot.slane %v9356_v25, 6 }
 0x1fe   :  { %15174 = vst [vmem:[#allocation94_spill] sm:$0xff] %v9539_v27  ;;  %15178 = vst [vmem:[#allocation98_spill] sm:$0xff] %v9553_v22  ;;  %v9556_v63 = vsel %vm698_vm2, %v2209_v5, %v2211_v51  ;;  %v1315_v27 = vrot.slane %v9133_v2, 6  ;;  %v9573_v5 = vsel %vm1305_vm3, %v2468_v35, %v2470_v42  ;;  %v1060_v2 = vrot.slane %v9294_v12, 7  ;;  %v9606_v17 = vpop.permute.xlu0 %2449 }
 0x1ff   :  { %v9542_v19 = vpop.permute.xlu1 %2190  ;;  %15179 = vst [vmem:[#allocation99_spill] sm:$0xff] %v9556_v63  ;;  %15183 = vst [vmem:[#allocation103_spill] sm:$0xff] %v9573_v5  ;;  %v2215_v22 = vrot.slane %v9310_v28, 7  ;;  %v2474_v12 = vrot.slane %v9328_v4, 6  ;;  %v9602_v28 = vsel %vm1305_vm3, %v1766_v21, %v1768_v29  ;;  %v1321_v4 = vrot.slane %v9318_v56, 6 }
 0x200   :  { %15175 = vst [vmem:[#allocation95_spill] sm:$0xff] %v9542_v19  ;;  %v2213_v19 = vrot.slane %v9125_v40, 7  ;;  %v1058_v40 = vrot.slane %v9286_v58, 7  ;;  %15184 = vst [vmem:[#allocation104_spill] sm:$0xff] %v9579_v15  ;;  %v9590_v35 = vsel %vm1305_vm3, %v1313_v41, %v1315_v27  ;;  %v9593_v58 = vsel %vm1305_vm3, %v1315_v27, %v1317_v50 }
 0x201   :  { %15185 = vst [vmem:[#allocation105_spill] sm:$0xff] %v9582_v36  ;;  %15187 = vst [vmem:[#allocation107_spill] sm:$0xff] %v9590_v35  ;;  %v9620_v21 = vsel %vm1305_vm3, %v2470_v42, %v2472_v45  ;;  %v1772_v56 = vrot.slane %v9400_v44, 6  ;;  %v9631_v25 = vsel %vm1305_vm3, %v2474_v12, %v2476_v54  ;;  %v2482_v42 = vrot.slane %v9429_v31, 6 }
 0x202   :  { %v9587_v33 = vsel %vm698_vm2, %v2211_v51, %v2213_v19  ;;  %15188 = vst [vmem:[#allocation108_spill] sm:$0xff] %v9593_v58  ;;  %15190 = vst [vmem:[#allocation110_spill] sm:$0xff] %v9599_v10  ;;  %v2478_v51 = vrot.slane %v9358_v43, 6  ;;  %v9609_v41 = vsel %vm698_vm2, %v1056_v14, %v1058_v40  ;;  %v9612_v27 = vsel %vm698_vm2, %v1058_v40, %v1060_v2 }
 0x203   :  { %15186 = vst [vmem:[#allocation106_spill] sm:$0xff] %v9587_v33  ;;  %v9596_v26 = vpop.permute.xlu1 %1558  ;;  %15191 = vst [vmem:[#allocation111_spill] sm:$0xff] %v9602_v28  ;;  %v2219_v43 = vrot.slane %v9330_v16, 7  ;;  %v9625_v14 = vsel %vm1305_vm3, %v2472_v45, %v2474_v12  ;;  %v1770_v40 = vrot.slane %v9395_v55, 6  ;;  %v1062_v16 = vrot.slane %v9407_v20, 7 }
 0x204   :  { %15189 = vst [vmem:[#allocation109_spill] sm:$0xff] %v9596_v26  ;;  %15192 = vst [vmem:[#allocation112_spill] sm:$0xff] %v9609_v41  ;;  %v9617_v26 = vsel %vm698_vm2, %v2213_v19, %v2215_v22  ;;  %v9634_v19 = vsel %vm1305_vm3, %v2476_v54, %v2478_v51  ;;  %v9639_v61 = vsel %vm1305_vm3, %v1317_v50, %v1319_v52  ;;  %v9656_v50 = vpop.permute.xlu0 %2453  ;;  %v15209_v31 = vrot.slane %v9393_v59, 7 }
 0x205   :  { %15193 = vst [vmem:[#allocation113_spill] sm:$0xff] %v9612_v27  ;;  %15194 = vst [vmem:[#allocation114_spill] sm:$0xff] %v9617_v26  ;;  %v2480_v27 = vrot.slane %v9425_v48, 6  ;;  %v9642_v45 = vsel %vm1305_vm3, %v1319_v52, %v1321_v4  ;;  %v1323_v48 = vrot.slane %v9414_v8, 6  ;;  %v9649_v12 = vsel %vm698_vm2, %v2215_v22, %v2217_v11 }
 0x206   :  { %15195 = vst [vmem:[#allocation115_spill] sm:$0xff] %v9620_v21  ;;  %15196 = vst [vmem:[#allocation116_spill] sm:$0xff] %v9625_v14  ;;  %v9652_v54 = vsel %vm698_vm2, %v2217_v11, %v2219_v43  ;;  %v9659_v52 = vsel %vm1305_vm3, %v1768_v29, %v1770_v40  ;;  %v9665_v8 = vsel %vm1305_vm3, %v1770_v40, %v1772_v56  ;;  %v2221_v22 = vrot.slane %v9418_v38, 7 }
 0x207   :  { %15197 = vst [vmem:[#allocation117_spill] sm:$0xff] %v9631_v25  ;;  %15198 = vst [vmem:[#allocation118_spill] sm:$0xff] %v9634_v19  ;;  %v9646_v44 = vpop.permute.xlu1 %851  ;;  %v9662_v55 = vsel %vm1305_vm3, %v2478_v51, %v2480_v27  ;;  %v9669_v11 = vsel %vm1305_vm3, %v2480_v27, %v2482_v42  ;;  %v9672_v20 = vsel %vm698_vm2, %v1060_v2, %v1062_v16  ;;  %v1774_v29 = vrot.slane %v9435_v23, 6  ;;  %v15236_v19 = vld [vmem:[#allocation65_spill] sm:$0xff] }
 0x208   :  { %15199 = vst [vmem:[#allocation119_spill] sm:$0xff] %v9639_v61  ;;  %15200 = vst [vmem:[#allocation120_spill] sm:$0xff] %v9642_v45  ;;  %v9683_v40 = vsel %vm1305_vm3, %v1321_v4, %v1323_v48  ;;  %v15213_v38 = vrot.slane %v9412_v32, 6  ;;  %v2484_v2 = vrot.slane %v9457_v57, 6  ;;  %v9698_v4 = vsel %vm698_vm2, %v2219_v43, %v2221_v22  ;;  %v15220_v57 = vld [vmem:[#allocation62_spill] sm:$0xff]  ;;  %v15237_v45 = vld [vmem:[#allocation67_spill] sm:$0xff] }
 0x209   :  { %15201 = vst [vmem:[#allocation121_spill] sm:$0xff] %v9646_v44  ;;  %15202 = vst [vmem:[#allocation122_spill] sm:$0xff] %v9649_v12  ;;  %v9677_v44 = vsel %vm698_vm2, %v1062_v16, %v15209_v31  ;;  %v15216_v31 = vld [vmem:[#allocation71_spill] sm:$0xff]  ;;  %v15223_v16 = vld [vmem:[#allocation68_spill] sm:$0xff]  ;;  %v9711_v23 = vsel %vm1305_vm3, %v1772_v56, %v1774_v29  ;;  %v1327_v25 = vrot.slane %v15236_v19, 6 }
 0x20a   :  { %15203 = vst [vmem:[#allocation123_spill] sm:$0xff] %v9652_v54  ;;  %15204 = vst [vmem:[#allocation124_spill] sm:$0xff] %v9659_v52  ;;  %v9688_v27 = vsel %vm1305_vm3, %v1323_v48, %v15213_v38  ;;  %v15230_v56 = vld [vmem:[#allocation20_spill] sm:$0xff] }
 0x20b   :  { %15205 = vst [vmem:[#allocation125_spill] sm:$0xff] %v9662_v55  ;;  %15206 = vst [vmem:[#allocation126_spill] sm:$0xff] %v9665_v8  ;;  %v9707_v8 = vpop.permute.xlu1 %856 }
 0x20c   :  { %15207 = vst [vmem:[#allocation127_spill] sm:$0xff] %v9669_v11  ;;  %15208 = vst [vmem:[#allocation128_spill] sm:$0xff] %v9672_v20  ;;  %v15229_v20 = vld [vmem:[#allocation23_spill] sm:$0xff] }
 0x20d   :  { %15210 = vst [vmem:[#allocation129_spill] sm:$0xff] %v9677_v44  ;;  %15212 = vst [vmem:[#allocation131_spill] sm:$0xff] %v9683_v40  ;;  %v15218_v40 = vrot.slane %v9421_v47, 7 }
 0x20e   :  { %15214 = vst [vmem:[#allocation132_spill] sm:$0xff] %v9688_v27  ;;  %15217 = vst [vmem:[#allocation71_spill] sm:$0xff] %v9698_v4 }
 0x20f   :  { %v9703_v48 = vsel %vm698_vm2, %v2221_v22, %v15218_v40  ;;  %15222 = vst [vmem:[#allocation62_spill] sm:$0xff] %v9707_v8  ;;  %v9722_v40 = vsel %vm1305_vm3, %v2482_v42, %v2484_v2  ;;  %v15235_v42 = vld [vmem:[#allocation63_spill] sm:$0xff] }
 0x210   :  { %15219 = vst [vmem:[#allocation134_spill] sm:$0xff] %v9703_v48  ;;  %15227 = vst [vmem:[#allocation136_spill] sm:$0xff] %v9722_v40  ;;  %v1066_v40 = vrot.slane %v15235_v42, 7 }
 0x22f   :  { %v9680_v51 = vpop.f32.mrb[0].mxu0 }
 0x230   :  { %15211 = vst [vmem:[#allocation130_spill] sm:$0xff] %v9680_v51  ;;  %v700_v11 = vrot.slane %v9680_v51, 7  ;;  %v9692_v55 = vpop.f32.mrb[1].mxu0  ;;  %v15221_v51 = vld [vmem:[#allocation66_spill] sm:$0xff] }
 0x231   :  { %15215 = vst [vmem:[#allocation133_spill] sm:$0xff] %v9692_v55  ;;  %v699_v44 = vrot.slane %v9692_v55, 7  ;;  %15224 = vst [vmem:[#allocation66_spill] sm:$0xff] %v9711_v23  ;;  %v9713_v55 = vpop.permute.xlu0 %2004 }
 0x232   :  { %15225 = vst [vmem:[#allocation68_spill] sm:$0xff] %v9713_v55  ;;  %v15231_v55 = vrot.slane %v9439_v34, 6 }
 0x233   :  { %v9716_v43 = vsel %vm698_vm2, %v699_v44, %v700_v11  ;;  %v747_v4 = vsel %vm698_vm2, 0.0, %v699_v44  ;;  %v9719_v22 = vpop.f32.mrb[2].mxu0  ;;  %v15233_v44 = vrot.slane %v15216_v31, 6 }
 0x234   :  { %15226 = vst [vmem:[#allocation135_spill] sm:$0xff] %v9719_v22  ;;  %v704_v27 = vrot.slane %v9719_v22, 7  ;;  %v9725_v38 = vpop.f32.mrb[3].mxu0  ;;  %v1581_v8 = vmul.f32 %v15229_v20, %v747_v4  ;;  %v870_v23 = vmul.f32 %v15230_v56, %v747_v4  ;;  %v9732_v48 = vsel %vm1305_vm3, %v1774_v29, %v15231_v55 }
 0x235   :  { %15228 = vst [vmem:[#allocation137_spill] sm:$0xff] %v9725_v38  ;;  %15232 = vst [vmem:[#allocation138_spill] sm:$0xff] %v9732_v48  ;;  %v9737_v52 = vsel %vm1305_vm3, %v2484_v2, %v15233_v44  ;;  %v702_v22 = vrot.slane %v9725_v38, 7  ;;  %v2225_v20 = vrot.slane %v15237_v45, 7  ;;  %v1094_v55 = vmul.f32 %v9490_v6, %v747_v4 }
 0x236   :  { %15234 = vst [vmem:[#allocation139_spill] sm:$0xff] %v9737_v52  ;;  %1613 = vrot.lane.b32.xlu1 %v1581_v8, %s8478_s1  ;;  %903 = vrot.lane.b32.xlu0 %v870_v23, %s8477_s28  ;;  %v9748_v29 = vmul.f32 %v9495_v30, %v9716_v43  ;;  %v9759_v45 = vmul.f32 %v9501_v46, %v747_v4  ;;  %v9765_v23 = vpop.permute.xlu1 %1747  ;;  %v9774_v52 = vpop.permute.xlu0 %2009 }
 0x237   :  { %v9751_v2 = vsel %vm698_vm2, %v700_v11, %v702_v22  ;;  %v9754_v44 = vsel %vm698_vm2, %v702_v22, %v704_v27  ;;  %v9756_v19 = vpop.f32.mrb[4].mxu0  ;;  %v9763_v8 = vmul.f32 %v9511_v0, %v9716_v43  ;;  %v15240_v11 = vld [vmem:[#allocation24_spill] sm:$0xff]  ;;  %v15241_v22 = vld [vmem:[#allocation22_spill] sm:$0xff]  ;;  %v1129_v38 = vrot.slane %v1094_v55, 1  ;;  %15242 = vst [vmem:[#allocation67_spill] sm:$0xff] %v9774_v52 }
 0x238   :  { %15238 = vst [vmem:[#allocation63_spill] sm:$0xff] %v9756_v19  ;;  %v708_v42 = vrot.slane %v9756_v19, 7  ;;  %v9768_v30 = vpop.f32.mrb[5].mxu0  ;;  %v1582_v6 = vmul.f32 %v15240_v11, %v9716_v43  ;;  %v871_v56 = vmul.f32 %v15241_v22, %v9716_v43  ;;  %v15243_v19 = vrot.slane %v9393_v59, 7  ;;  %v15249_v0 = vld [vmem:[#allocation74_spill] sm:$0xff] }
 0x239   :  { %15239 = vst [vmem:[#allocation65_spill] sm:$0xff] %v9768_v30  ;;  %v706_v46 = vrot.slane %v9768_v30, 7  ;;  %v14856_v54 = vrot.slane %v9763_v8, 2  ;;  %v15245_v11 = vrot.slane %v15220_v57, 7  ;;  %v15247_v55 = vrot.slane %v9412_v32, 6 }
 0x23a   :  { %v9783_v61 = vsel %vm698_vm2, %v15243_v19, %v1066_v40  ;;  %1615 = vrot.lane.b32.xlu1 %v1582_v6, %s8478_s1  ;;  %905 = vrot.lane.b32.xlu0 %v871_v56, %s8477_s28  ;;  %v15253_v56 = vrot.slane %v15221_v51, 6 }
 0x23b   :  { %15244 = vst [vmem:[#allocation140_spill] sm:$0xff] %v9783_v61  ;;  %v9788_v22 = vsel %vm698_vm2, %v1066_v40, %v15245_v11  ;;  %v9793_v30 = vsel %vm1305_vm3, %v15247_v55, %v1327_v25  ;;  %v9799_v59 = vsel %vm698_vm2, %v704_v27, %v706_v46  ;;  %v9802_v19 = vsel %vm698_vm2, %v706_v46, %v708_v42  ;;  %v9804_v48 = vpop.f32.mrb[6].mxu0  ;;  %v15255_v55 = vld [vmem:[#allocation77_spill] sm:$0xff] }
 0x23c   :  { %15246 = vst [vmem:[#allocation141_spill] sm:$0xff] %v9788_v22  ;;  %15248 = vst [vmem:[#allocation142_spill] sm:$0xff] %v9793_v30  ;;  %v15251_v40 = vrot.slane %v9748_v29, 1  ;;  %v15252_v11 = vrot.slane %v9759_v45, 2  ;;  %v9817_v27 = vsel %vm1305_vm3, %v1327_v25, %v15253_v56  ;;  %v712_v52 = vrot.slane %v9804_v48, 7  ;;  %v9821_v30 = vpop.f32.mrb[7].mxu0 }
 0x23d   :  { %15250 = vst [vmem:[#allocation74_spill] sm:$0xff] %v9804_v48  ;;  %15254 = vst [vmem:[#allocation143_spill] sm:$0xff] %v9817_v27  ;;  %v15257_v22 = vld [vmem:[#allocation26_spill] sm:$0xff]  ;;  %v15258_v61 = vrot.slane %v9421_v47, 7  ;;  %v1806_v25 = vmul.f32 %v9525_v18, %v9716_v43  ;;  %v15260_v56 = vrot.slane %v15223_v16, 7  ;;  %v15263_v47 = vrot.slane %v9439_v34, 6 }
 0x23e   :  { %v1132_v32 = vsel %vm1127_vm4, %v1129_v38, %v15251_v40  ;;  %v1392_v6 = vsel %vm533_vm6, %v15252_v11, %v14856_v54  ;;  %15256 = vst [vmem:[#allocation77_spill] sm:$0xff] %v9821_v30  ;;  %v2032_v40 = vmul.f32 %v15257_v22, %v9716_v43  ;;  %v710_v11 = vrot.slane %v9821_v30, 7  ;;  %v15267_v30 = vld [vmem:[#allocation76_spill] sm:$0xff] }
 0x23f   :  { %v9828_v12 = vsel %vm698_vm2, %v15258_v61, %v2225_v20  ;;  %v1805_v54 = vmul.f32 %v9504_v62, %v747_v4  ;;  %v9837_v46 = vsel %vm698_vm2, %v2225_v20, %v15260_v56  ;;  %v15262_v22 = vrot.slane %v15249_v0, 6  ;;  %v9848_v4 = vpop.permute.xlu1 %1751  ;;  %1163 = vrot.lane.b32.xlu0 %v1132_v32, %s8480_s30  ;;  %v9852_v20 = vpop.permute.xlu0 %1303 }
 0x240   :  { %15259 = vst [vmem:[#allocation144_spill] sm:$0xff] %v9828_v12  ;;  %15261 = vst [vmem:[#allocation145_spill] sm:$0xff] %v9837_v46  ;;  %2064 = vrot.lane.b32.xlu1 %v2032_v40, %s8479_s29  ;;  %v9855_v56 = vsel %vm698_vm2, %v708_v42, %v710_v11  ;;  %v9858_v34 = vsel %vm698_vm2, %v710_v11, %v712_v52  ;;  %v1840_v48 = vrot.slane %v1806_v25, 2  ;;  %v15269_v42 = vld [vmem:[#allocation78_spill] sm:$0xff] }
 0x241   :  { %v9845_v61 = vsel %vm1305_vm3, %v15263_v47, %v15262_v22  ;;  %15265 = vst [vmem:[#allocation147_spill] sm:$0xff] %v9858_v34  ;;  %v9860_v22 = vpop.f32.mrb[8].mxu0  ;;  %v1839_v47 = vrot.slane %v1805_v54, 2  ;;  %v1096_v32 = vmul.f32 %v9514_v53, %v9751_v2  ;;  %v1130_v46 = vsel %vm1127_vm4, %v9492_v1, %v1129_v38  ;;  %v15278_v12 = vld [vmem:[#allocation86_spill] sm:$0xff] }
 0x242   :  { %15264 = vst [vmem:[#allocation146_spill] sm:$0xff] %v9845_v61  ;;  %15266 = vst [vmem:[#allocation148_spill] sm:$0xff] %v9860_v22  ;;  %v716_v40 = vrot.slane %v9860_v22, 7  ;;  %v9865_v61 = vpop.f32.mrb[9].mxu0  ;;  %v9878_v62 = vmul.f32 %v9518_v60, %v9754_v44  ;;  %v9882_v27 = vmul.f32 %v9533_v24, %v9751_v2  ;;  %v1357_v18 = vmul.f32 %v9536_v3, %v9751_v2 }
 0x243   :  { %15268 = vst [vmem:[#allocation76_spill] sm:$0xff] %v9865_v61  ;;  %v714_v11 = vrot.slane %v9865_v61, 7  ;;  %v1841_v54 = vsel %vm533_vm6, %v1839_v47, %v1840_v48  ;;  %1423 = vrot.lane.b32.xlu0 %v1392_v6, %s8481_s0  ;;  %v1133_v25 = vrot.slane %v1096_v32, 1  ;;  %v9892_v47 = vpop.f32.mrb[10].mxu0  ;;  %v2256_v6 = vmul.f32 %v9528_v9, %v9716_v43  ;;  %v9898_v60 = vpop.permute.xlu1 %1043 }
 0x244   :  { %1161 = vrot.lane.b32.xlu1 %v1130_v46, %s8480_s30  ;;  %15272 = vst [vmem:[#allocation150_spill] sm:$0xff] %v9892_v47  ;;  %v2257_v32 = vmul.f32 %v9546_v7, %v9751_v2  ;;  %15273 = vst [vmem:[#allocation151_spill] sm:$0xff] %v9898_v60  ;;  %v720_v53 = vrot.slane %v9892_v47, 7  ;;  %v9901_v1 = vpop.f32.mrb[11].mxu0  ;;  %v14887_v22 = vrot.slane %v9878_v62, 1  ;;  %v9911_v9 = vpop.permute.xlu0 %2198  ;;  %v15277_v61 = vrot.slane %v9759_v45, 2 }
 0x245   :  { %v9887_v38 = vsel %vm698_vm2, %v712_v52, %v714_v11  ;;  %v9890_v46 = vsel %vm698_vm2, %v714_v11, %v716_v40  ;;  %15274 = vst [vmem:[#allocation152_spill] sm:$0xff] %v9901_v1  ;;  %v15275_v52 = vld [vmem:[#allocation25_spill] sm:$0xff]  ;;  %v15276_v11 = vrot.slane %v9748_v29, 1  ;;  %v718_v7 = vrot.slane %v9901_v1, 7  ;;  %v15279_v1 = vld [vmem:[#allocation94_spill] sm:$0xff] }
 0x246   :  { %15270 = vst [vmem:[#allocation78_spill] sm:$0xff] %v9887_v38  ;;  %15271 = vst [vmem:[#allocation149_spill] sm:$0xff] %v9890_v46  ;;  %v872_v3 = vmul.f32 %v15275_v52, %v9751_v2  ;;  %v1390_v47 = vsel %vm533_vm6, %v15278_v12, %v15277_v61  ;;  %v14888_v46 = vrot.slane %v9882_v27, 2  ;;  %v1393_v38 = vrot.slane %v1357_v18, 2 }
 0x247   :  { %v9908_v24 = vsel %vm1127_vm4, %v15276_v11, %v1133_v25  ;;  %v9924_v29 = vsel %vm1127_vm4, %v1133_v25, %v14887_v22  ;;  %v2290_v11 = vrot.slane %v2256_v6, 1  ;;  %v2291_v52 = vrot.slane %v2257_v32, 1  ;;  %v9965_v60 = vpop.permute.xlu1 %1563 }
 0x248   :  { %1421 = vrot.lane.b32.xlu1 %v1390_v47, %s8481_s0  ;;  %907 = vrot.lane.b32.xlu0 %v872_v3, %s8477_s28  ;;  %v9928_v45 = vmul.f32 %v15279_v1, %v9754_v44  ;;  %v9931_v61 = vsel %vm698_vm2, %v716_v40, %v718_v7  ;;  %v9934_v18 = vsel %vm698_vm2, %v718_v7, %v720_v53  ;;  %v9936_v47 = vpop.f32.mrb[0].mxu1  ;;  %v15283_v25 = vrot.slane %v9763_v8, 2  ;;  %v15285_v40 = vld [vmem:[#allocation29_spill] sm:$0xff] }
 0x249   :  { %15280 = vst [vmem:[#allocation153_spill] sm:$0xff] %v9931_v61  ;;  %15281 = vst [vmem:[#allocation154_spill] sm:$0xff] %v9934_v18  ;;  %v9941_v3 = vsel %vm533_vm6, %v1840_v48, %v14888_v46  ;;  %v724_v32 = vrot.slane %v9936_v47, 7  ;;  %v9949_v22 = vpop.f32.mrb[1].mxu1  ;;  %v1583_v7 = vmul.f32 %v15285_v40, %v9751_v2  ;;  %v9954_v12 = vsel %vm1127_vm4, %v2290_v11, %v2291_v52  ;;  %v15286_v46 = vld [vmem:[#allocation27_spill] sm:$0xff]  ;;  %v15287_v18 = vld [vmem:[#allocation80_spill] sm:$0xff] }
 0x24a   :  { %15282 = vst [vmem:[#allocation155_spill] sm:$0xff] %v9936_v47  ;;  %v9946_v6 = vsel %vm533_vm6, %v15283_v25, %v1393_v38  ;;  %15284 = vst [vmem:[#allocation156_spill] sm:$0xff] %v9949_v22  ;;  %v14892_v1 = vrot.slane %v9928_v45, 2  ;;  %v722_v48 = vrot.slane %v9949_v22, 7  ;;  %v2033_v8 = vmul.f32 %v15286_v46, %v9751_v2 }
 0x24b   :  { %v2258_v25 = vmul.f32 %v9556_v63, %v9754_v44  ;;  %v2515_v47 = vmul.f32 %v9549_v49, %v9716_v43  ;;  %v1331_v61 = vrot.slane %v15287_v18, 6  ;;  %15288 = vst [vmem:[#allocation80_spill] sm:$0xff] %v9965_v60  ;;  %v2516_v46 = vmul.f32 %v9568_v37, %v9751_v2  ;;  %v9980_v43 = vpop.permute.xlu0 %2202  ;;  %v15297_v2 = vld [vmem:[#allocation98_spill] sm:$0xff] }
 0x24c   :  { %1872 = vrot.lane.b32.xlu1 %v1841_v54, %s8476_s16  ;;  %1617 = vrot.lane.b32.xlu0 %v1583_v7, %s8478_s1  ;;  %v9972_v11 = vsel %vm533_vm6, %v1393_v38, %v14892_v1  ;;  %v9978_v40 = vmul.f32 %v9573_v5, %v9754_v44  ;;  %v9983_v18 = vsel %vm698_vm2, %v720_v53, %v722_v48  ;;  %v9988_v7 = vpop.f32.mrb[2].mxu1  ;;  %v15292_v38 = vld [vmem:[#allocation32_spill] sm:$0xff]  ;;  %v15294_v53 = vrot.slane %v9606_v17, 6 }
 0x24d   :  { %15289 = vst [vmem:[#allocation157_spill] sm:$0xff] %v9983_v18  ;;  %v9986_v54 = vsel %vm698_vm2, %v722_v48, %v724_v32  ;;  %15291 = vst [vmem:[#allocation159_spill] sm:$0xff] %v9988_v7  ;;  %v873_v1 = vmul.f32 %v15292_v38, %v9754_v44  ;;  %v2293_v49 = vrot.slane %v2258_v25, 1  ;;  %v9993_v37 = vpop.f32.mrb[3].mxu1  ;;  %v2549_v5 = vrot.slane %v2515_v47, 2 }
 0x24e   :  { %15290 = vst [vmem:[#allocation158_spill] sm:$0xff] %v9986_v54  ;;  %15293 = vst [vmem:[#allocation160_spill] sm:$0xff] %v9993_v37  ;;  %v2550_v63 = vrot.slane %v2516_v46, 2  ;;  %v2552_v22 = vrot.slane %v9978_v40, 2  ;;  %v15295_v60 = vrot.slane %v15216_v31, 6  ;;  %v726_v54 = vrot.slane %v9993_v37, 7 }
 0x24f   :  { %v10005_v38 = vsel %vm1127_vm4, %v2291_v52, %v2293_v49  ;;  %v1808_v25 = vmul.f32 %v9559_v13, %v9754_v44  ;;  %v15298_v46 = vrot.slane %v15267_v30, 6  ;;  %v15299_v40 = vrot.slane %v15249_v0, 6 }
 0x250   :  { %v10001_v48 = vsel %vm1305_vm3, %v15295_v60, %v15294_v53  ;;  %2066 = vrot.lane.b32.xlu1 %v2033_v8, %s8479_s29  ;;  %909 = vrot.lane.b32.xlu0 %v873_v1, %s8477_s28  ;;  %v10020_v60 = vsel %vm533_vm6, %v2549_v5, %v2550_v63  ;;  %v10023_v31 = vsel %vm533_vm6, %v2550_v63, %v2552_v22  ;;  %v15301_v52 = vrot.slane %v9656_v50, 6 }
 0x251   :  { %15296 = vst [vmem:[#allocation161_spill] sm:$0xff] %v10001_v48  ;;  %v10015_v18 = vsel %vm1305_vm3, %v15299_v40, %v15298_v46  ;;  %v15303_v0 = vrot.slane %v15269_v42, 7  ;;  %v15304_v46 = vrot.slane %v15220_v57, 7  ;;  %v15306_v1 = vrot.slane %v15255_v55, 7  ;;  %v15314_v42 = vld [vmem:[#allocation43_spill] sm:$0xff] }
 0x252   :  { %15300 = vst [vmem:[#allocation98_spill] sm:$0xff] %v10015_v18  ;;  %v10030_v47 = vsel %vm1305_vm3, %v15294_v53, %v15301_v52  ;;  %v10047_v40 = vsel %vm698_vm2, %v724_v32, %v726_v54  ;;  %v15309_v17 = vrot.slane %v15221_v51, 6  ;;  %v10054_v53 = vpop.permute.xlu1 %1568  ;;  %v15312_v57 = vrot.slane %v9988_v7, 7  ;;  %v15317_v51 = vld [vmem:[#allocation95_spill] sm:$0xff] }
 0x253   :  { %15302 = vst [vmem:[#allocation162_spill] sm:$0xff] %v10030_v47  ;;  %v10037_v8 = vsel %vm698_vm2, %v15304_v46, %v15303_v0  ;;  %v15307_v5 = vmov %v15303_v0  ;;  %15311 = vst [vmem:[#allocation166_spill] sm:$0xff] %v10054_v53  ;;  %v1584_v46 = vmul.f32 %v15314_v42, %v9754_v44  ;;  %v2229_v13 = vrot.slane %v15317_v51, 7  ;;  %v15321_v42 = vld [vmem:[#allocation101_spill] sm:$0xff] }
 0x254   :  { %15305 = vst [vmem:[#allocation163_spill] sm:$0xff] %v10037_v8  ;;  %v10044_v63 = vsel %vm698_vm2, %v15307_v5, %v15306_v1  ;;  %v10052_v52 = vsel %vm1305_vm3, %v15309_v17, %v1331_v61  ;;  %v10059_v0 = vsel %vm698_vm2, %v726_v54, %v15312_v57  ;;  %v1844_v1 = vrot.slane %v1808_v25, 2  ;;  %v10069_v17 = vpop.permute.xlu0 %2457  ;;  %1165 = vrot.lane.b32.xlu0 %v9908_v24, %s8480_s30 }
 0x255   :  { %15308 = vst [vmem:[#allocation164_spill] sm:$0xff] %v10044_v63  ;;  %15310 = vst [vmem:[#allocation165_spill] sm:$0xff] %v10052_v52  ;;  %v15315_v5 = vrot.slane %v9498_v39, 6  ;;  %v1809_v37 = vmul.f32 %v9579_v15, %v9799_v59  ;;  %v2259_v54 = vmul.f32 %v9587_v33, %v9799_v59  ;;  %v10076_v57 = vrot.slane %v9852_v20, 6  ;;  %1619 = vrot.lane.b32.xlu1 %v1584_v46, %s8478_s1 }
 0x256   :  { %15313 = vst [vmem:[#allocation167_spill] sm:$0xff] %v10059_v0  ;;  %v10090_v15 = vmul.f32 %v9617_v26, %v9802_v19  ;;  %v1098_v46 = vmul.f32 %v15321_v42, %v9799_v59  ;;  %v2518_v24 = vmul.f32 %v9620_v21, %v9799_v59  ;;  %v10109_v21 = vpop.permute.xlu1 %861 }
 0x257   :  { %v10066_v32 = vsel %vm1305_vm3, %v1331_v61, %v15315_v5  ;;  %15318 = vst [vmem:[#allocation95_spill] sm:$0xff] %v10076_v57  ;;  %v15319_v61 = vld [vmem:[#allocation49_spill] sm:$0xff]  ;;  %v15320_v5 = vrot.slane %v9882_v27, 2  ;;  %v1846_v33 = vrot.slane %v1809_v37, 2  ;;  %v2295_v20 = vrot.slane %v2259_v54, 1  ;;  %15322 = vst [vmem:[#allocation169_spill] sm:$0xff] %v10109_v21 }
 0x258   :  { %15316 = vst [vmem:[#allocation168_spill] sm:$0xff] %v10066_v32  ;;  %v2034_v25 = vmul.f32 %v15319_v61, %v9754_v44  ;;  %v2297_v53 = vrot.slane %v10090_v15, 1  ;;  %v1099_v44 = vmul.f32 %v9582_v36, %v9802_v19  ;;  %v1810_v27 = vmul.f32 %v9599_v10, %v9802_v19  ;;  %1167 = vrot.lane.b32.xlu0 %v9924_v29, %s8480_s30  ;;  %v15334_v21 = vld [vmem:[#allocation120_spill] sm:$0xff] }
 0x259   :  { %v10086_v51 = vsel %vm533_vm6, %v15320_v5, %v1844_v1  ;;  %v1359_v5 = vmul.f32 %v9590_v35, %v9799_v59  ;;  %v10104_v37 = vsel %vm533_vm6, %v1844_v1, %v1846_v33  ;;  %v10107_v54 = vsel %vm1127_vm4, %v2293_v49, %v2295_v20 }
 0x25a   :  { %v1137_v61 = vrot.slane %v1098_v46, 1  ;;  %v2554_v26 = vrot.slane %v2518_v24, 2  ;;  %2068 = vrot.lane.b32.xlu1 %v2034_v25, %s8479_s29  ;;  %v10115_v15 = vsel %vm1127_vm4, %v2295_v20, %v2297_v53  ;;  %v1139_v10 = vrot.slane %v1099_v44, 1  ;;  %v10122_v46 = vpop.permute.xlu0 %2461 }
 0x25b   :  { %v1848_v35 = vrot.slane %v1810_v27, 2  ;;  %v1397_v36 = vrot.slane %v1359_v5, 2  ;;  %v15323_v1 = vrot.slane %v15223_v16, 7  ;;  %v15325_v24 = vrot.slane %v9878_v62, 1 }
 0x25c   :  { %v10130_v29 = vsel %vm533_vm6, %v2552_v22, %v2554_v26  ;;  %v1360_v20 = vmul.f32 %v9593_v58, %v9802_v19  ;;  %v15326_v44 = vrot.slane %v15297_v2, 7  ;;  %v10140_v27 = vsel %vm1127_vm4, %v1137_v61, %v1139_v10  ;;  %1425 = vrot.lane.b32.xlu0 %v9946_v6, %s8481_s0 }
 0x25d   :  { %v10120_v49 = vsel %vm698_vm2, %v15323_v1, %v2229_v13  ;;  %v10127_v25 = vsel %vm1127_vm4, %v15325_v24, %v1137_v61  ;;  %v10143_v5 = vsel %vm533_vm6, %v1846_v33, %v1848_v35  ;;  %v15328_v62 = vrot.slane %v9928_v45, 2  ;;  %v10172_v33 = vpop.permute.xlu1 %866  ;;  %v15331_v24 = vld [vmem:[#allocation122_spill] sm:$0xff] }
 0x25e   :  { %15324 = vst [vmem:[#allocation170_spill] sm:$0xff] %v10120_v49  ;;  %v10137_v16 = vsel %vm698_vm2, %v2229_v13, %v15326_v44  ;;  %v2233_v22 = vrot.slane %v9911_v9, 7  ;;  %v1399_v58 = vrot.slane %v1360_v20, 2  ;;  %v2519_v13 = vmul.f32 %v9625_v14, %v9802_v19  ;;  %1874 = vrot.lane.b32.xlu1 %v9941_v3, %s8476_s16  ;;  %15330 = vst [vmem:[#allocation172_spill] sm:$0xff] %v10172_v33  ;;  %v15332_v14 = vld [vmem:[#allocation119_spill] sm:$0xff] }
 0x25f   :  { %15327 = vst [vmem:[#allocation171_spill] sm:$0xff] %v10137_v16  ;;  %v10148_v1 = vsel %vm533_vm6, %v15328_v62, %v1397_v36  ;;  %v2492_v44 = vrot.slane %v10069_v17, 6  ;;  %v1782_v61 = vrot.slane %v9765_v23, 6  ;;  %v1100_v9 = vmul.f32 %v9609_v41, %v9855_v56  ;;  %v15329_v23 = vld [vmem:[#allocation113_spill] sm:$0xff] }
 0x260   :  { %v10164_v45 = vsel %vm533_vm6, %v1397_v36, %v1399_v58  ;;  %v2556_v20 = vrot.slane %v2519_v13, 2  ;;  %v1811_v17 = vmul.f32 %v9602_v28, %v9855_v56  ;;  %v10170_v62 = vmul.f32 %v15329_v23, %v9858_v34  ;;  %v15333_v36 = vld [vmem:[#allocation123_spill] sm:$0xff]  ;;  %1427 = vrot.lane.b32.xlu0 %v9972_v11, %s8481_s0 }
 0x261   :  { %v1141_v3 = vrot.slane %v1100_v9, 1  ;;  %v2261_v6 = vmul.f32 %v15331_v24, %v9855_v56  ;;  %v1361_v41 = vmul.f32 %v15332_v14, %v9855_v56  ;;  %v10180_v42 = vmul.f32 %v15333_v36, %v9858_v34 }
 0x262   :  { %v10183_v13 = vsel %vm533_vm6, %v2554_v26, %v2556_v20  ;;  %v1850_v28 = vrot.slane %v1811_v17, 2  ;;  %v1143_v23 = vrot.slane %v10170_v62, 1  ;;  %v10188_v33 = vmul.f32 %v15334_v21, %v9858_v34  ;;  %2323 = vrot.lane.b32.xlu1 %v9954_v12, %s8482_s2  ;;  %v15338_v12 = vld [vmem:[#allocation117_spill] sm:$0xff] }
 0x263   :  { %v10195_v9 = vsel %vm1127_vm4, %v1139_v10, %v1141_v3  ;;  %v2299_v14 = vrot.slane %v2261_v6, 1  ;;  %v1401_v26 = vrot.slane %v1361_v41, 2  ;;  %v2301_v17 = vrot.slane %v10180_v42, 1 }
 0x264   :  { %15335 = vst [vmem:[#allocation173_spill] sm:$0xff] %v10195_v9  ;;  %v10199_v62 = vsel %vm533_vm6, %v1848_v35, %v1850_v28  ;;  %v10202_v21 = vsel %vm1127_vm4, %v1141_v3, %v1143_v23  ;;  %v1403_v36 = vrot.slane %v10188_v33, 2  ;;  %v2520_v24 = vmul.f32 %v15338_v12, %v9855_v56  ;;  %v15342_v35 = vld [vmem:[#allocation151_spill] sm:$0xff]  ;;  %v15345_v12 = vld [vmem:[#allocation118_spill] sm:$0xff]  ;;  %2582 = vrot.lane.b32.xlu0 %v10020_v60, %s8483_s11 }
 0x265   :  { %15336 = vst [vmem:[#allocation174_spill] sm:$0xff] %v10199_v62  ;;  %15337 = vst [vmem:[#allocation175_spill] sm:$0xff] %v10202_v21  ;;  %v1784_v11 = vrot.slane %v9848_v4, 6  ;;  %v10209_v10 = vsel %vm1127_vm4, %v2297_v53, %v2299_v14  ;;  %v10212_v41 = vsel %vm533_vm6, %v1399_v58, %v1401_v26  ;;  %v10215_v42 = vsel %vm1127_vm4, %v2299_v14, %v2301_v17 }
 0x266   :  { %15339 = vst [vmem:[#allocation176_spill] sm:$0xff] %v10209_v10  ;;  %15340 = vst [vmem:[#allocation177_spill] sm:$0xff] %v10212_v41  ;;  %v10218_v6 = vrot.slane %v15342_v35, 7  ;;  %v10221_v3 = vsel %vm533_vm6, %v1401_v26, %v1403_v36  ;;  %v2558_v33 = vrot.slane %v2520_v24, 2  ;;  %v2521_v21 = vmul.f32 %v15345_v12, %v9858_v34  ;;  %v1756_v35 = vpop.permute.xlu1 %1755  ;;  %2325 = vrot.lane.b32.xlu1 %v10005_v38, %s8482_s2  ;;  %v15350_v24 = vld [vmem:[#allocation124_spill] sm:$0xff]  ;;  %v15373_v10 = vld [vmem:[#allocation131_spill] sm:$0xff] }
 0x267   :  { %15341 = vst [vmem:[#allocation178_spill] sm:$0xff] %v10215_v42  ;;  %15344 = vst [vmem:[#allocation179_spill] sm:$0xff] %v10221_v3  ;;  %v15346_v4 = vrot.slane %v9498_v39, 6  ;;  %v15348_v58 = vrot.slane %v15297_v2, 7  ;;  %v1812_v26 = vmul.f32 %v15350_v24, %v9858_v34  ;;  %v15351_v39 = vrot.slane %v9980_v43, 7  ;;  %v15377_v34 = vld [vmem:[#allocation132_spill] sm:$0xff] }
 0x268   :  { %15343 = vst [vmem:[#allocation151_spill] sm:$0xff] %v10218_v6  ;;  %v15353_v2 = vrot.slane %v9656_v50, 6  ;;  %v10253_v12 = vsel %vm533_vm6, %v2556_v20, %v2558_v33  ;;  %v2560_v38 = vrot.slane %v2521_v21, 2  ;;  %v15356_v3 = vrot.slane %v15267_v30, 6  ;;  %v15364_v21 = vld [vmem:[#allocation78_spill] sm:$0xff]  ;;  %1876 = vrot.lane.b32.xlu0 %v10086_v51, %s8476_s16  ;;  %v15375_v51 = vld [vmem:[#allocation48_spill] sm:$0xff] }
 0x269   :  { %v10229_v53 = vsel %vm1305_vm3, %v15346_v4, %v10076_v57  ;;  %v10234_v14 = vsel %vm698_vm2, %v15348_v58, %v2233_v22  ;;  %v10245_v4 = vsel %vm698_vm2, %v2233_v22, %v15351_v39  ;;  %15355 = vst [vmem:[#allocation184_spill] sm:$0xff] %v10253_v12  ;;  %v15358_v24 = vrot.slane %v10122_v46, 6  ;;  %v15366_v12 = vld [vmem:[#allocation126_spill] sm:$0xff] }
 0x26a   :  { %15347 = vst [vmem:[#allocation180_spill] sm:$0xff] %v10229_v53  ;;  %15349 = vst [vmem:[#allocation181_spill] sm:$0xff] %v10234_v14  ;;  %v10250_v58 = vsel %vm1305_vm3, %v15353_v2, %v2492_v44  ;;  %v10258_v60 = vsel %vm1305_vm3, %v15356_v3, %v1782_v61  ;;  %v10266_v22 = vsel %vm1305_vm3, %v1782_v61, %v1784_v11  ;;  %v1852_v50 = vrot.slane %v1812_v26, 2  ;;  %v15365_v3 = vld [vmem:[#allocation128_spill] sm:$0xff]  ;;  %v15370_v26 = vld [vmem:[#allocation149_spill] sm:$0xff]  ;;  %v10298_v62 = vpop.permute.xlu1 %2019 }
 0x26b   :  { %15352 = vst [vmem:[#allocation182_spill] sm:$0xff] %v10245_v4  ;;  %15354 = vst [vmem:[#allocation183_spill] sm:$0xff] %v10250_v58  ;;  %v10263_v42 = vsel %vm1305_vm3, %v2492_v44, %v15358_v24  ;;  %v15361_v39 = vrot.slane %v15255_v55, 7  ;;  %v10275_v30 = vsel %vm533_vm6, %v2558_v33, %v2560_v38  ;;  %v1102_v2 = vmul.f32 %v15365_v3, %v15364_v21  ;;  %v15368_v55 = vld [vmem:[#allocation45_spill] sm:$0xff] }
 0x26c   :  { %15357 = vst [vmem:[#allocation185_spill] sm:$0xff] %v10258_v60  ;;  %15359 = vst [vmem:[#allocation186_spill] sm:$0xff] %v10263_v42  ;;  %v1813_v44 = vmul.f32 %v15366_v12, %v15364_v21  ;;  %v10281_v24 = vrot.slane %v1756_v35, 6  ;;  %2584 = vrot.lane.b32.xlu1 %v10023_v31, %s8483_s11  ;;  %v874_v61 = vmul.f32 %v15368_v55, %v9799_v59  ;;  %v15372_v35 = vld [vmem:[#allocation71_spill] sm:$0xff] }
 0x26d   :  { %15360 = vst [vmem:[#allocation187_spill] sm:$0xff] %v10266_v22  ;;  %v10272_v20 = vsel %vm698_vm2, %v15361_v39, %v10218_v6  ;;  %15363 = vst [vmem:[#allocation189_spill] sm:$0xff] %v10275_v30  ;;  %v10290_v33 = vsel %vm533_vm6, %v1850_v28, %v1852_v50  ;;  %v15371_v39 = vld [vmem:[#allocation129_spill] sm:$0xff]  ;;  %v1145_v30 = vrot.slane %v1102_v2, 1  ;;  %v2263_v12 = vmul.f32 %v15372_v35, %v15364_v21  ;;  %v15376_v28 = vld [vmem:[#allocation134_spill] sm:$0xff] }
 0x26e   :  { %15362 = vst [vmem:[#allocation188_spill] sm:$0xff] %v10272_v20  ;;  %15367 = vst [vmem:[#allocation190_spill] sm:$0xff] %v10281_v24  ;;  %v1103_v3 = vmul.f32 %v15371_v39, %v15370_v26  ;;  %v1854_v41 = vrot.slane %v1813_v44, 2  ;;  %v1363_v31 = vmul.f32 %v15373_v10, %v15364_v21  ;;  %v1585_v9 = vmul.f32 %v15375_v51, %v9799_v59 }
 0x26f   :  { %15369 = vst [vmem:[#allocation191_spill] sm:$0xff] %v10290_v33  ;;  %15374 = vst [vmem:[#allocation192_spill] sm:$0xff] %v10298_v62  ;;  %v2264_v33 = vmul.f32 %v15376_v28, %v15370_v26  ;;  %v1364_v39 = vmul.f32 %v15377_v34, %v15370_v26  ;;  %v10307_v2 = vsel %vm1127_vm4, %v1143_v23, %v1145_v30  ;;  %v2303_v35 = vrot.slane %v2263_v12, 1  ;;  %v15381_v62 = vld [vmem:[#allocation125_spill] sm:$0xff]  ;;  %v15382_v23 = vld [vmem:[#allocation50_spill] sm:$0xff] }
 0x270   :  { %v1147_v55 = vrot.slane %v1103_v3, 1  ;;  %15378 = vst [vmem:[#allocation193_spill] sm:$0xff] %v10307_v2  ;;  %v10310_v44 = vsel %vm533_vm6, %v1852_v50, %v1854_v41  ;;  %v1405_v10 = vrot.slane %v1363_v31, 2  ;;  %911 = vrot.lane.b32.xlu1 %v874_v61, %s8477_s28  ;;  %1621 = vrot.lane.b32.xlu0 %v1585_v9, %s8478_s1  ;;  %v2522_v34 = vmul.f32 %v15381_v62, %v15364_v21  ;;  %v15385_v61 = vld [vmem:[#allocation127_spill] sm:$0xff] }
 0x271   :  { %15379 = vst [vmem:[#allocation194_spill] sm:$0xff] %v10310_v44  ;;  %v2305_v51 = vrot.slane %v2264_v33, 1  ;;  %v1407_v28 = vrot.slane %v1364_v39, 2  ;;  %v2035_v2 = vmul.f32 %v15382_v23, %v9799_v59  ;;  %v10322_v50 = vsel %vm1127_vm4, %v2301_v17, %v2303_v35 }
 0x272   :  { %v10315_v3 = vsel %vm1127_vm4, %v1145_v30, %v1147_v55  ;;  %15383 = vst [vmem:[#allocation196_spill] sm:$0xff] %v10322_v50  ;;  %v10325_v12 = vsel %vm533_vm6, %v1403_v36, %v1405_v10  ;;  %v2523_v9 = vmul.f32 %v15385_v61, %v15370_v26  ;;  %v15386_v30 = vld [vmem:[#allocation52_spill] sm:$0xff]  ;;  %v2562_v62 = vrot.slane %v2522_v34, 2  ;;  %v15390_v36 = vld [vmem:[#allocation53_spill] sm:$0xff]  ;;  %v15391_v61 = vld [vmem:[#allocation66_spill] sm:$0xff]  ;;  %v10345_v50 = vpop.permute.xlu1 %2206 }
 0x273   :  { %15380 = vst [vmem:[#allocation195_spill] sm:$0xff] %v10315_v3  ;;  %15384 = vst [vmem:[#allocation197_spill] sm:$0xff] %v10325_v12  ;;  %v1586_v31 = vmul.f32 %v15386_v30, %v9802_v19  ;;  %v10332_v33 = vsel %vm1127_vm4, %v2303_v35, %v2305_v51  ;;  %v10335_v39 = vsel %vm533_vm6, %v1405_v10, %v1407_v28  ;;  %v15394_v34 = vld [vmem:[#allocation153_spill] sm:$0xff]  ;;  %v15395_v35 = vld [vmem:[#allocation140_spill] sm:$0xff] }
 0x274   :  { %15387 = vst [vmem:[#allocation198_spill] sm:$0xff] %v10332_v33  ;;  %15388 = vst [vmem:[#allocation199_spill] sm:$0xff] %v10335_v39  ;;  %v10339_v59 = vsel %vm1305_vm3, %v1784_v11, %v10281_v24  ;;  %v875_v17 = vmul.f32 %v15390_v36, %v9802_v19  ;;  %v2564_v23 = vrot.slane %v2523_v9, 2  ;;  %v1814_v12 = vmul.f32 %v15391_v61, %v15370_v26  ;;  %v15396_v30 = vld [vmem:[#allocation138_spill] sm:$0xff]  ;;  %v15399_v33 = vld [vmem:[#allocation141_spill] sm:$0xff] }
 0x275   :  { %15389 = vst [vmem:[#allocation200_spill] sm:$0xff] %v10339_v59  ;;  %15392 = vst [vmem:[#allocation201_spill] sm:$0xff] %v10345_v50  ;;  %2070 = vrot.lane.b32.xlu1 %v2035_v2, %s8479_s29  ;;  %1623 = vrot.lane.b32.xlu0 %v1586_v31, %s8478_s1  ;;  %v10350_v10 = vsel %vm533_vm6, %v2560_v38, %v2562_v62  ;;  %v1104_v11 = vmul.f32 %v15395_v35, %v15394_v34  ;;  %v15398_v61 = vld [vmem:[#allocation154_spill] sm:$0xff]  ;;  %v15400_v2 = vld [vmem:[#allocation144_spill] sm:$0xff] }
 0x276   :  { %15393 = vst [vmem:[#allocation202_spill] sm:$0xff] %v10350_v10  ;;  %v1815_v39 = vmul.f32 %v15396_v30, %v15394_v34  ;;  %v10357_v9 = vsel %vm533_vm6, %v2562_v62, %v2564_v23  ;;  %v1856_v36 = vrot.slane %v1814_v12, 2  ;;  %v1105_v3 = vmul.f32 %v15399_v33, %v15398_v61  ;;  %v15401_v38 = vld [vmem:[#allocation142_spill] sm:$0xff]  ;;  %v15402_v35 = vld [vmem:[#allocation145_spill] sm:$0xff] }
 0x277   :  { %15397 = vst [vmem:[#allocation153_spill] sm:$0xff] %v10357_v9  ;;  %v2265_v44 = vmul.f32 %v15400_v2, %v15394_v34  ;;  %v1149_v31 = vrot.slane %v1104_v11, 1  ;;  %v1365_v10 = vmul.f32 %v15401_v38, %v15394_v34  ;;  %v10367_v21 = vmul.f32 %v15402_v35, %v15398_v61 }
 0x278   :  { %v1858_v26 = vrot.slane %v1815_v39, 2  ;;  %v10371_v62 = vsel %vm533_vm6, %v1854_v41, %v1856_v36  ;;  %v1151_v12 = vrot.slane %v1105_v3, 1  ;;  %v15406_v3 = vld [vmem:[#allocation136_spill] sm:$0xff]  ;;  %v15411_v2 = vrot.slane %v10345_v50, 7  ;;  %v15416_v50 = vld [vmem:[#allocation158_spill] sm:$0xff] }
 0x279   :  { %v2307_v9 = vrot.slane %v2265_v44, 1  ;;  %1878 = vrot.lane.b32.xlu1 %v10104_v37, %s8476_s16  ;;  %913 = vrot.lane.b32.xlu0 %v875_v17, %s8477_s28  ;;  %v10377_v39 = vsel %vm1127_vm4, %v1147_v55, %v1149_v31  ;;  %v1409_v38 = vrot.slane %v1365_v10, 2  ;;  %v2309_v35 = vrot.slane %v10367_v21, 1  ;;  %v15405_v44 = vld [vmem:[#allocation143_spill] sm:$0xff]  ;;  %v10393_v55 = vpop.permute.xlu1 %2465 }
 0x27a   :  { %v10380_v11 = vsel %vm533_vm6, %v1856_v36, %v1858_v26  ;;  %v10384_v30 = vsel %vm1127_vm4, %v1149_v31, %v1151_v12  ;;  %v1366_v37 = vmul.f32 %v15405_v44, %v15398_v61  ;;  %v2524_v17 = vmul.f32 %v15406_v3, %v15394_v34  ;;  %15407 = vst [vmem:[#allocation204_spill] sm:$0xff] %v10393_v55  ;;  %v15408_v36 = vld [vmem:[#allocation51_spill] sm:$0xff] }
 0x27b   :  { %15403 = vst [vmem:[#allocation154_spill] sm:$0xff] %v10384_v30  ;;  %v10387_v41 = vsel %vm1127_vm4, %v2305_v51, %v2307_v9  ;;  %v2036_v33 = vmul.f32 %v15408_v36, %v9802_v19  ;;  %v10398_v10 = vsel %vm533_vm6, %v1407_v28, %v1409_v38  ;;  %v10401_v21 = vsel %vm1127_vm4, %v2307_v9, %v2309_v35  ;;  %v15410_v51 = vld [vmem:[#allocation139_spill] sm:$0xff]  ;;  %v15414_v19 = vld [vmem:[#allocation146_spill] sm:$0xff]  ;;  %v15415_v9 = vld [vmem:[#allocation157_spill] sm:$0xff] }
 0x27c   :  { %15404 = vst [vmem:[#allocation203_spill] sm:$0xff] %v10387_v41  ;;  %15409 = vst [vmem:[#allocation205_spill] sm:$0xff] %v10401_v21  ;;  %v2525_v31 = vmul.f32 %v15410_v51, %v15398_v61  ;;  %v15412_v44 = vrot.slane %v9980_v43, 7  ;;  %v1411_v41 = vrot.slane %v1366_v37, 2  ;;  %v2566_v30 = vrot.slane %v2524_v17, 2 }
 0x27d   :  { %v1816_v36 = vmul.f32 %v15414_v19, %v15398_v61  ;;  %2327 = vrot.lane.b32.xlu1 %v10107_v54, %s8482_s2  ;;  %2072 = vrot.lane.b32.xlu0 %v2036_v33, %s8479_s29  ;;  %v1106_v51 = vmul.f32 %v10037_v8, %v15415_v9  ;;  %v1817_v43 = vmul.f32 %v10015_v18, %v15415_v9  ;;  %v15417_v18 = vrot.slane %v9988_v7, 7 }
 0x27e   :  { %v10410_v3 = vsel %vm698_vm2, %v15412_v44, %v15411_v2  ;;  %v2568_v28 = vrot.slane %v2525_v31, 2  ;;  %v1107_v2 = vmul.f32 %v10044_v63, %v15416_v50  ;;  %v10425_v37 = vsel %vm533_vm6, %v1409_v38, %v1411_v41 }
 0x27f   :  { %15413 = vst [vmem:[#allocation206_spill] sm:$0xff] %v10410_v3  ;;  %v10428_v17 = vsel %vm533_vm6, %v2564_v23, %v2566_v30  ;;  %v1860_v54 = vrot.slane %v1816_v36, 2  ;;  %v1153_v31 = vrot.slane %v1106_v51, 1  ;;  %v1862_v8 = vrot.slane %v1817_v43, 2 }
 0x280   :  { %v10431_v33 = vsel %vm533_vm6, %v2566_v30, %v2568_v28  ;;  %v1155_v19 = vrot.slane %v1107_v2, 1  ;;  %v10436_v21 = vsel %vm698_vm2, %v15417_v18, 0.0  ;;  %v1367_v38 = vmul.f32 %v10052_v52, %v15415_v9 }
 0x281   :  { %15418 = vst [vmem:[#allocation157_spill] sm:$0xff] %v10436_v21  ;;  %v10439_v44 = vsel %vm533_vm6, %v1858_v26, %v1860_v54  ;;  %v1368_v23 = vmul.f32 %v10066_v32, %v15416_v50  ;;  %2329 = vrot.lane.b32.xlu1 %v10115_v15, %s8482_s2  ;;  %1169 = vrot.lane.b32.xlu0 %v10127_v25, %s8480_s30  ;;  %v15419_v36 = vrot.slane %v10393_v55, 6  ;;  %v15420_v51 = vrot.slane %v10122_v46, 6  ;;  %v15473_v55 = vld [vmem:[#allocation72_spill] sm:$0xff] }
 0x282   :  { %v10450_v30 = vsel %vm1127_vm4, %v1151_v12, %v1153_v31  ;;  %v10453_v18 = vsel %vm533_vm6, %v1860_v54, %v1862_v8  ;;  %v10456_v26 = vsel %vm1127_vm4, %v1153_v31, %v1155_v19  ;;  %v1413_v15 = vrot.slane %v1367_v38, 2 }
 0x283   :  { %v10463_v43 = vsel %vm1305_vm3, %v15420_v51, %v15419_v36  ;;  %v1415_v2 = vrot.slane %v1368_v23, 2  ;;  %v2267_v25 = vmul.f32 %v10120_v49, %v15415_v9  ;;  %v10469_v12 = vmul.f32 %v10281_v24, %v10436_v21 }
 0x284   :  { %15421 = vst [vmem:[#allocation158_spill] sm:$0xff] %v10463_v43  ;;  %v10473_v54 = vmul.f32 %v10410_v3, %v10436_v21  ;;  %v2268_v31 = vmul.f32 %v10137_v16, %v15416_v50  ;;  %v2526_v46 = vmul.f32 %v10001_v48, %v15415_v9  ;;  %v10480_v38 = vsel %vm533_vm6, %v1411_v41, %v1413_v15  ;;  %v15456_v16 = vld [vmem:[#allocation59_spill] sm:$0xff] }
 0x285   :  { %v10483_v23 = vsel %vm533_vm6, %v1413_v15, %v1415_v2  ;;  %v2311_v36 = vrot.slane %v2267_v25, 1  ;;  %v2527_v51 = vmul.f32 %v10030_v47, %v15416_v50  ;;  %v10489_v24 = vmul.f32 %v10463_v43, %v10436_v21  ;;  %2586 = vrot.lane.b32.xlu1 %v10130_v29, %s8483_s11  ;;  %1171 = vrot.lane.b32.xlu0 %v10140_v27, %s8480_s30 }
 0x286   :  { %15422 = vst [vmem:[#allocation207_spill] sm:$0xff] %v10473_v54  ;;  %v2313_v3 = vrot.slane %v2268_v31, 1  ;;  %v2570_v41 = vrot.slane %v2526_v46, 2  ;;  %v1818_v15 = vmul.f32 %v10258_v60, %v15416_v50  ;;  %v1108_v47 = vmul.f32 %v10272_v20, %v10047_v40 }
 0x287   :  { %15423 = vst [vmem:[#allocation208_spill] sm:$0xff] %v10489_v24  ;;  %v10498_v25 = vsel %vm1127_vm4, %v2309_v35, %v2311_v36  ;;  %v2572_v48 = vrot.slane %v2527_v51, 2  ;;  %v1819_v43 = vmul.f32 %v10266_v22, %v10047_v40  ;;  %v1109_v46 = vmul.f32 %v10218_v6, %v10059_v0 }
 0x288   :  { %v10505_v29 = vsel %vm1127_vm4, %v2311_v36, %v2313_v3  ;;  %v10508_v27 = vsel %vm533_vm6, %v2568_v28, %v2570_v41  ;;  %v1864_v31 = vrot.slane %v1818_v15, 2  ;;  %v1157_v51 = vrot.slane %v1108_v47, 1  ;;  %v15424_v28 = vld [vmem:[#allocation55_spill] sm:$0xff] }
 0x289   :  { %v10513_v35 = vsel %vm533_vm6, %v2570_v41, %v2572_v48  ;;  %v1866_v60 = vrot.slane %v1819_v43, 2  ;;  %v1870_v20 = vrot.slane %v10469_v12, 2  ;;  %1880 = vrot.lane.b32.xlu1 %v10143_v5, %s8476_s16  ;;  %1429 = vrot.lane.b32.xlu0 %v10148_v1, %s8481_s0  ;;  %v876_v36 = vmul.f32 %v15424_v28, %v9855_v56  ;;  %v15464_v28 = vld [vmem:[#allocation73_spill] sm:$0xff] }
 0x28a   :  { %v10523_v15 = vsel %vm533_vm6, %v1862_v8, %v1864_v31  ;;  %v1159_v6 = vrot.slane %v1109_v46, 1  ;;  %v1369_v41 = vmul.f32 %v10229_v53, %v10047_v40  ;;  %v10528_v47 = vsel %vm1127_vm4, %v1155_v19, %v1157_v51  ;;  %v15425_v19 = vld [vmem:[#allocation56_spill] sm:$0xff] }
 0x28b   :  { %v10531_v43 = vsel %vm533_vm6, %v1864_v31, %v1866_v60  ;;  %v1370_v5 = vmul.f32 %v10076_v57, %v10059_v0  ;;  %v2269_v1 = vmul.f32 %v10234_v14, %v10047_v40  ;;  %v2270_v46 = vmul.f32 %v10245_v4, %v10059_v0 }
 0x28c   :  { %v10538_v12 = vsel %vm1127_vm4, %v1157_v51, %v1159_v6  ;;  %v1417_v8 = vrot.slane %v1369_v41, 2  ;;  %v1587_v22 = vmul.f32 %v15425_v19, %v9855_v56  ;;  %v2528_v57 = vmul.f32 %v10250_v58, %v10047_v40 }
 0x28d   :  { %v1419_v31 = vrot.slane %v1370_v5, 2  ;;  %v2315_v32 = vrot.slane %v2269_v1, 1  ;;  %915 = vrot.lane.b32.xlu1 %v876_v36, %s8477_s28  ;;  %1431 = vrot.lane.b32.xlu0 %v10164_v45, %s8481_s0  ;;  %v2317_v51 = vrot.slane %v2270_v46, 1  ;;  %v1820_v41 = vmul.f32 %v10339_v59, %v10059_v0 }
 0x28e   :  { %v10551_v6 = vsel %vm533_vm6, %v1415_v2, %v1417_v8  ;;  %v2529_v53 = vmul.f32 %v10263_v42, %v10059_v0  ;;  %v2574_v36 = vrot.slane %v2528_v57, 2  ;;  %v14975_v58 = vrot.slane %v10489_v24, 2 }
 0x28f   :  { %15426 = vst [vmem:[#allocation209_spill] sm:$0xff] %v10551_v6  ;;  %v10558_v5 = vsel %vm533_vm6, %v1417_v8, %v1419_v31  ;;  %v10561_v1 = vsel %vm1127_vm4, %v2313_v3, %v2315_v32  ;;  %v10565_v45 = vsel %vm1127_vm4, %v2315_v32, %v2317_v51  ;;  %v1868_v2 = vrot.slane %v1820_v41, 2  ;;  %v15438_v3 = vld [vmem:[#allocation57_spill] sm:$0xff] }
 0x290   :  { %15427 = vst [vmem:[#allocation210_spill] sm:$0xff] %v10558_v5  ;;  %15428 = vst [vmem:[#allocation211_spill] sm:$0xff] %v10561_v1  ;;  %v2576_v46 = vrot.slane %v2529_v53, 2  ;;  %v15430_v4 = vrot.slane %v10473_v54, 1  ;;  %v10573_v42 = vsel %vm533_vm6, %v2572_v48, %v2574_v36  ;;  %v10592_v48 = vpop.permute.xlu0 %2014  ;;  %v15471_v54 = vld [vmem:[#allocation199_spill] sm:$0xff]  ;;  %v15485_v1 = vld [vmem:[#allocation130_spill] sm:$0xff] }
 0x291   :  { %15429 = vst [vmem:[#allocation212_spill] sm:$0xff] %v10565_v45  ;;  %15432 = vst [vmem:[#allocation214_spill] sm:$0xff] %v10573_v42  ;;  %1625 = vrot.lane.b32.xlu1 %v1587_v22, %s8478_s1  ;;  %2588 = vrot.lane.b32.xlu0 %v10183_v13, %s8483_s11  ;;  %v10579_v57 = vsel %vm533_vm6, %v1866_v60, %v1868_v2  ;;  %v10585_v53 = vsel %vm533_vm6, %v1868_v2, %v1870_v20  ;;  %v15437_v22 = vld [vmem:[#allocation147_spill] sm:$0xff]  ;;  %v15439_v13 = vld [vmem:[#allocation54_spill] sm:$0xff] }
 0x292   :  { %v10570_v59 = vsel %vm1127_vm4, %v2317_v51, %v15430_v4  ;;  %15433 = vst [vmem:[#allocation215_spill] sm:$0xff] %v10579_v57  ;;  %v10582_v32 = vsel %vm533_vm6, %v2574_v36, %v2576_v46  ;;  %15435 = vst [vmem:[#allocation217_spill] sm:$0xff] %v10585_v53  ;;  %v10590_v4 = vsel %vm533_vm6, %v2576_v46, %v14975_v58  ;;  %v15440_v20 = vld [vmem:[#allocation58_spill] sm:$0xff]  ;;  %v15441_v51 = vld [vmem:[#allocation60_spill] sm:$0xff]  ;;  %v10620_v58 = vpop.permute.xlu1 %754 }
 0x293   :  { %15431 = vst [vmem:[#allocation213_spill] sm:$0xff] %v10570_v59  ;;  %15434 = vst [vmem:[#allocation216_spill] sm:$0xff] %v10582_v32  ;;  %v1588_v8 = vmul.f32 %v15438_v3, %v15437_v22  ;;  %v2037_v60 = vmul.f32 %v15439_v13, %v9855_v56  ;;  %v877_v31 = vmul.f32 %v15440_v20, %v15437_v22  ;;  %v15443_v2 = vld [vmem:[#allocation173_spill] sm:$0xff]  ;;  %v15444_v56 = vld [vmem:[#allocation174_spill] sm:$0xff] }
 0x294   :  { %15436 = vst [vmem:[#allocation218_spill] sm:$0xff] %v10590_v4  ;;  %v2038_v41 = vmul.f32 %v15441_v51, %v15437_v22  ;;  %v10604_v36 = vpop.permute.xlu0 %1573  ;;  %v15461_v51 = vld [vmem:[#allocation69_spill] sm:$0xff] }
 0x295   :  { %1627 = vrot.lane.b32.xlu1 %v1588_v8, %s8478_s1  ;;  %2074 = vrot.lane.b32.xlu0 %v2037_v60, %s8479_s29  ;;  %15442 = vst [vmem:[#allocation147_spill] sm:$0xff] %v10604_v36  ;;  %v15446_v8 = vld [vmem:[#allocation175_spill] sm:$0xff]  ;;  %v15447_v60 = vld [vmem:[#allocation176_spill] sm:$0xff]  ;;  %v15481_v42 = vld [vmem:[#allocation121_spill] sm:$0xff] }
 0x296   :  { %v10632_v14 = vpop.permute.xlu1 %901  ;;  %v15484_v45 = vld [vmem:[#allocation133_spill] sm:$0xff] }
 0x297   :  { %15454 = vst [vmem:[#allocation176_spill] sm:$0xff] %v10632_v14 }
 0x298   :  { %v10612_v46 = vpop.permute.xlu0 %1578 }
 0x299   :  { %917 = vrot.lane.b32.xlu1 %v877_v31, %s8477_s28  ;;  %2076 = vrot.lane.b32.xlu0 %v2038_v41, %s8479_s29  ;;  %15445 = vst [vmem:[#allocation173_spill] sm:$0xff] %v10612_v46  ;;  %v15449_v31 = vld [vmem:[#allocation177_spill] sm:$0xff]  ;;  %v15450_v41 = vld [vmem:[#allocation178_spill] sm:$0xff] }
 0x29c   :  { %v10618_v22 = vpop.permute.xlu0 %2024 }
 0x29d   :  { %1173 = vrot.lane.b32.xlu1 %v15443_v2, %s8480_s30  ;;  %1882 = vrot.lane.b32.xlu0 %v15444_v56, %s8476_s16  ;;  %15448 = vst [vmem:[#allocation174_spill] sm:$0xff] %v10618_v22  ;;  %v15451_v2 = vld [vmem:[#allocation179_spill] sm:$0xff]  ;;  %v15452_v56 = vld [vmem:[#allocation184_spill] sm:$0xff] }
 0x2a1   :  { %1175 = vrot.lane.b32.xlu1 %v15446_v8, %s8480_s30  ;;  %2331 = vrot.lane.b32.xlu0 %v15447_v60, %s8482_s2  ;;  %v10630_v8 = vpop.permute.xlu0 %2029  ;;  %v15455_v60 = vld [vmem:[#allocation78_spill] sm:$0xff] }
 0x2a2   :  { %15453 = vst [vmem:[#allocation175_spill] sm:$0xff] %v10630_v8  ;;  %v878_v52 = vmul.f32 %v15456_v16, %v15455_v60  ;;  %v880_v8 = vmul.f32 %v15473_v55, %v15394_v34 }
 0x2a5   :  { %1433 = vrot.lane.b32.xlu1 %v15449_v31, %s8481_s0  ;;  %2333 = vrot.lane.b32.xlu0 %v15450_v41, %s8482_s2  ;;  %v15457_v31 = vld [vmem:[#allocation189_spill] sm:$0xff] }
 0x2a8   :  { %v10639_v49 = vpop.permute.xlu1 %1613  ;;  %v10641_v41 = vpop.permute.xlu0 %903 }
 0x2a9   :  { %1435 = vrot.lane.b32.xlu1 %v15451_v2, %s8481_s0  ;;  %2590 = vrot.lane.b32.xlu0 %v15452_v56, %s8483_s11  ;;  %v15458_v2 = vld [vmem:[#allocation64_spill] sm:$0xff]  ;;  %v15459_v56 = vld [vmem:[#allocation191_spill] sm:$0xff] }
 0x2aa   :  { %v1589_v63 = vmul.f32 %v15458_v2, %v15455_v60 }
 0x2ac   :  { %v10648_v20 = vpop.permute.xlu1 %1615  ;;  %v10650_v16 = vpop.permute.xlu0 %905 }
 0x2ad   :  { %919 = vrot.lane.b32.xlu1 %v878_v52, %s8477_s28  ;;  %2592 = vrot.lane.b32.xlu0 %v15457_v31, %s8483_s11  ;;  %v15460_v52 = vld [vmem:[#allocation149_spill] sm:$0xff] }
 0x2ae   :  { %v1590_v3 = vmul.f32 %v15461_v51, %v15460_v52  ;;  %v15462_v31 = vld [vmem:[#allocation61_spill] sm:$0xff]  ;;  %v2040_v7 = vmul.f32 %v15464_v28, %v15460_v52 }
 0x2af   :  { %v2039_v13 = vmul.f32 %v15462_v31, %v15455_v60  ;;  %v15469_v28 = vld [vmem:[#allocation197_spill] sm:$0xff] }
 0x2b1   :  { %1629 = vrot.lane.b32.xlu1 %v1589_v63, %s8478_s1  ;;  %1884 = vrot.lane.b32.xlu0 %v15459_v56, %s8476_s16  ;;  %v10660_v63 = vpop.permute.xlu0 %1163  ;;  %v15463_v56 = vld [vmem:[#allocation70_spill] sm:$0xff] }
 0x2b2   :  { %v10658_v2 = vpop.permute.xlu1 %2064  ;;  %v879_v19 = vmul.f32 %v15463_v56, %v15460_v52  ;;  %v15467_v56 = vld [vmem:[#allocation195_spill] sm:$0xff] }
 0x2b5   :  { %1631 = vrot.lane.b32.xlu1 %v1590_v3, %s8478_s1  ;;  %2078 = vrot.lane.b32.xlu0 %v2039_v13, %s8479_s29  ;;  %v10668_v60 = vpop.permute.xlu0 %1423  ;;  %v15465_v3 = vld [vmem:[#allocation193_spill] sm:$0xff]  ;;  %v15466_v13 = vld [vmem:[#allocation194_spill] sm:$0xff] }
 0x2b6   :  { %v1162_v51 = vpop.permute.xlu1 %1161 }
 0x2b9   :  { %921 = vrot.lane.b32.xlu1 %v879_v19, %s8477_s28  ;;  %2080 = vrot.lane.b32.xlu0 %v2040_v7, %s8479_s29  ;;  %v15468_v19 = vld [vmem:[#allocation196_spill] sm:$0xff] }
 0x2ba   :  { %v10674_v31 = vpop.permute.xlu1 %1421  ;;  %v10676_v24 = vpop.permute.xlu0 %907 }
 0x2bd   :  { %1177 = vrot.lane.b32.xlu1 %v15465_v3, %s8480_s30  ;;  %1886 = vrot.lane.b32.xlu0 %v15466_v13, %s8476_s16  ;;  %v15470_v3 = vld [vmem:[#allocation198_spill] sm:$0xff] }
 0x2be   :  { %v10682_v7 = vpop.permute.xlu1 %1872  ;;  %v10684_v52 = vpop.permute.xlu0 %1617 }
 0x2c1   :  { %1179 = vrot.lane.b32.xlu1 %v15467_v56, %s8480_s30  ;;  %2335 = vrot.lane.b32.xlu0 %v15468_v19, %s8482_s2  ;;  %v15472_v56 = vld [vmem:[#allocation202_spill] sm:$0xff] }
 0x2c2   :  { %v10690_v13 = vpop.permute.xlu1 %2066  ;;  %v10692_v4 = vpop.permute.xlu0 %909 }
 0x2c5   :  { %1437 = vrot.lane.b32.xlu1 %v15469_v28, %s8481_s0  ;;  %2337 = vrot.lane.b32.xlu0 %v15470_v3, %s8482_s2  ;;  %v15474_v28 = vld [vmem:[#allocation153_spill] sm:$0xff] }
 0x2c6   :  { %v1166_v59 = vpop.permute.xlu0 %1165 }
 0x2c7   :  { %v10698_v19 = vpop.permute.xlu1 %1619 }
 0x2c9   :  { %1439 = vrot.lane.b32.xlu1 %v15471_v54, %s8481_s0  ;;  %2594 = vrot.lane.b32.xlu0 %v15472_v56, %s8483_s11  ;;  %v15475_v54 = vld [vmem:[#allocation79_spill] sm:$0xff] }
 0x2ca   :  { %v10707_v21 = vpop.permute.xlu0 %1167  ;;  %v1591_v53 = vmul.f32 %v15475_v54, %v15394_v34 }
 0x2cc   :  { %v10705_v3 = vpop.permute.xlu1 %2068 }
 0x2cd   :  { %923 = vrot.lane.b32.xlu1 %v880_v8, %s8477_s28  ;;  %2596 = vrot.lane.b32.xlu0 %v15474_v28, %s8483_s11  ;;  %v15476_v8 = vld [vmem:[#allocation109_spill] sm:$0xff]  ;;  %v15477_v28 = vld [vmem:[#allocation75_spill] sm:$0xff] }
 0x2ce   :  { %v1426_v55 = vpop.permute.xlu0 %1425  ;;  %v1592_v22 = vmul.f32 %v15476_v8, %v15398_v61  ;;  %v2041_v32 = vmul.f32 %v15477_v28, %v15394_v34  ;;  %v15478_v8 = vld [vmem:[#allocation154_spill] sm:$0xff]  ;;  %v15479_v34 = vld [vmem:[#allocation203_spill] sm:$0xff] }
 0x2d0   :  { %v10714_v56 = vpop.permute.xlu1 %1874 }
 0x2d1   :  { %1633 = vrot.lane.b32.xlu1 %v1591_v53, %s8478_s1  ;;  %1888 = vrot.lane.b32.xlu0 %v10371_v62, %s8476_s16 }
 0x2d2   :  { %v1428_v54 = vpop.permute.xlu0 %1427 }
 0x2d4   :  { %v10722_v57 = vpop.permute.xlu1 %2323 }
 0x2d5   :  { %1635 = vrot.lane.b32.xlu1 %v1592_v22, %s8478_s1  ;;  %2082 = vrot.lane.b32.xlu0 %v2041_v32, %s8479_s29 }
 0x2d6   :  { %v10730_v53 = vpop.permute.xlu0 %2582 }
 0x2d8   :  { %v10728_v62 = vpop.permute.xlu1 %2325 }
 0x2d9   :  { %1181 = vrot.lane.b32.xlu1 %v10377_v39, %s8480_s30  ;;  %1890 = vrot.lane.b32.xlu0 %v10380_v11, %s8476_s16  ;;  %v15480_v39 = vld [vmem:[#allocation205_spill] sm:$0xff] }
 0x2da   :  { %v1877_v22 = vpop.permute.xlu0 %1876 }
 0x2dd   :  { %1183 = vrot.lane.b32.xlu1 %v15478_v8, %s8480_s30  ;;  %2339 = vrot.lane.b32.xlu0 %v15479_v34, %s8482_s2 }
 0x2de   :  { %v10736_v32 = vpop.permute.xlu1 %2584 }
 0x2e1   :  { %1441 = vrot.lane.b32.xlu1 %v10398_v10, %s8481_s0  ;;  %2341 = vrot.lane.b32.xlu0 %v15480_v39, %s8482_s2  ;;  %v881_v10 = vmul.f32 %v15481_v42, %v15398_v61 }
 0x2e2   :  { %v10742_v11 = vpop.permute.xlu1 %911  ;;  %v10744_v28 = vpop.permute.xlu0 %1621 }
 0x2e5   :  { %1443 = vrot.lane.b32.xlu1 %v10425_v37, %s8481_s0  ;;  %2598 = vrot.lane.b32.xlu0 %v10428_v17, %s8483_s11  ;;  %v15483_v37 = vld [vmem:[#allocation62_spill] sm:$0xff]  ;;  %v757_v17 = vadd.f32 %v10620_v58, %v15484_v45  ;;  %v15486_v45 = vld [vmem:[#allocation137_spill] sm:$0xff] }
 0x2e6   :  { %v882_v0 = vmul.f32 %v15483_v37, %v15415_v9 }
 0x2e7   :  { %v10750_v8 = vpop.permute.xlu1 %2070  ;;  %v10752_v34 = vpop.permute.xlu0 %1623  ;;  %v949_v42 = vadd.f32 %v10632_v14, %v757_v17 }
 0x2e9   :  { %925 = vrot.lane.b32.xlu1 %v881_v10, %s8477_s28  ;;  %2600 = vrot.lane.b32.xlu0 %v10431_v33, %s8483_s11  ;;  %v1209_v33 = vadd.f32 %v1162_v51, %v949_v42  ;;  %v15487_v42 = vld [vmem:[#allocation68_spill] sm:$0xff] }
 0x2ea   :  { %v2042_v51 = vmul.f32 %v15487_v42, %v15398_v61 }
 0x2eb   :  { %v1879_v39 = vpop.permute.xlu1 %1878  ;;  %v10759_v46 = vpop.permute.xlu0 %913 }
 0x2ec   :  { %15482 = vst [vmem:[#allocation177_spill] sm:$0xff] %v10759_v46  ;;  %v758_v46 = vadd.f32 %v15485_v1, %v10620_v58 }
 0x2ed   :  { %927 = vrot.lane.b32.xlu1 %v882_v0, %s8477_s28  ;;  %1892 = vrot.lane.b32.xlu0 %v10439_v44, %s8476_s16  ;;  %v759_v0 = vadd.f32 %v10620_v58, %v15486_v45  ;;  %v1469_v44 = vadd.f32 %v10674_v31, %v1209_v33 }
 0x2ee   :  { %v950_v17 = vadd.f32 %v10641_v41, %v758_v46 }
 0x2ef   :  { %v2328_v10 = vpop.permute.xlu1 %2327  ;;  %v10769_v36 = vpop.permute.xlu0 %2072  ;;  %v951_v1 = vadd.f32 %v10650_v16, %v759_v0  ;;  %v15489_v16 = vld [vmem:[#allocation67_spill] sm:$0xff] }
 0x2f0   :  { %v1210_v5 = vadd.f32 %v10660_v63, %v950_v17  ;;  %v2043_v63 = vmul.f32 %v15489_v16, %v15415_v9 }
 0x2f1   :  { %1185 = vrot.lane.b32.xlu1 %v10450_v30, %s8480_s30  ;;  %1894 = vrot.lane.b32.xlu0 %v10453_v18, %s8476_s16  ;;  %v15488_v30 = vld [vmem:[#allocation135_spill] sm:$0xff]  ;;  %v1661_v18 = vadd.f32 %v10639_v49, %v1469_v44  ;;  %v1211_v46 = vadd.f32 %v1166_v59, %v951_v1 }
 0x2f2   :  { %v760_v6 = vadd.f32 %v15488_v30, %v10620_v58  ;;  %v1470_v41 = vadd.f32 %v10668_v60, %v1210_v5 }
 0x2f3   :  { %v2330_v14 = vpop.permute.xlu1 %2329  ;;  %v1170_v37 = vpop.permute.xlu0 %1169  ;;  %v1471_v45 = vadd.f32 %v1426_v55, %v1211_v46  ;;  %v1920_v49 = vadd.f32 %v10682_v7, %v1661_v18 }
 0x2f4   :  { %v952_v31 = vadd.f32 %v10676_v24, %v760_v6  ;;  %v1662_v59 = vadd.f32 %v10648_v20, %v1470_v41 }
 0x2f5   :  { %1187 = vrot.lane.b32.xlu1 %v10456_v26, %s8480_s30  ;;  %2084 = vrot.lane.b32.xlu0 %v2042_v51, %s8479_s29  ;;  %v1663_v5 = vadd.f32 %v10684_v52, %v1471_v45  ;;  %v2112_v55 = vadd.f32 %v10658_v2, %v1920_v49  ;;  %v15494_v45 = vld [vmem:[#allocation172_spill] sm:$0xff] }
 0x2f6   :  { %v1212_v0 = vadd.f32 %v10707_v21, %v952_v31  ;;  %v1921_v60 = vadd.f32 %v10714_v56, %v1662_v59 }
 0x2f7   :  { %v2587_v61 = vpop.permute.xlu1 %2586  ;;  %v10793_v33 = vpop.permute.xlu0 %1171  ;;  %v1922_v21 = vadd.f32 %v1877_v22, %v1663_v5  ;;  %v2371_v52 = vadd.f32 %v10722_v57, %v2112_v55  ;;  %v15491_v57 = vld [vmem:[#allocation166_spill] sm:$0xff] }
 0x2f8   :  { %v1472_v26 = vadd.f32 %v1428_v54, %v1212_v0  ;;  %v15490_v54 = vld [vmem:[#allocation80_spill] sm:$0xff]  ;;  %v2113_v56 = vadd.f32 %v10690_v13, %v1921_v60  ;;  %v1594_v22 = vmul.f32 %v15491_v57, %v15416_v50  ;;  %v15495_v0 = vld [vmem:[#allocation63_spill] sm:$0xff] }
 0x2f9   :  { %1445 = vrot.lane.b32.xlu1 %v10480_v38, %s8481_s0  ;;  %2086 = vrot.lane.b32.xlu0 %v2043_v63, %s8479_s29  ;;  %v1593_v44 = vmul.f32 %v15490_v54, %v15415_v9  ;;  %v762_v49 = vadd.f32 %v15495_v0, %v10620_v58 }
 0x2fa   :  { %v1664_v38 = vadd.f32 %v10698_v19, %v1472_v26  ;;  %v2372_v2 = vadd.f32 %v10728_v62, %v2113_v56 }
 0x2fb   :  { %v10803_v24 = vpop.permute.xlu1 %1880  ;;  %v1430_v6 = vpop.permute.xlu0 %1429 }
 0x2fc   :  { %v1923_v17 = vadd.f32 %v1879_v39, %v1664_v38  ;;  %v10832_v39 = vadd.f32 %v10736_v32, %v2372_v2  ;;  %v15493_v32 = vld [vmem:[#allocation169_spill] sm:$0xff] }
 0x2fd   :  { %1447 = vrot.lane.b32.xlu1 %v10483_v23, %s8481_s0  ;;  %2343 = vrot.lane.b32.xlu0 %v10498_v25, %s8482_s2  ;;  %v10823_v23 = vadd.f32 %v10730_v53, %v2371_v52  ;;  %v2114_v25 = vadd.f32 %v10705_v3, %v1922_v21  ;;  %v883_v18 = vmul.f32 %v15493_v32, %v15416_v50 }
 0x2fe   :  { %v2115_v51 = vadd.f32 %v10750_v8, %v1923_v17  ;;  %v2647_v46 = vmin.f32 %v10832_v39, 20.0  ;;  %v2044_v52 = vmul.f32 %v10592_v48, %v15416_v50  ;;  %vm2791_vm7 = vcmp.gt.f32.partialorder %v10832_v39, 20.0 }
 0x2ff   :  { %v10813_v20 = vpop.permute.xlu1 %915  ;;  %v1432_v7 = vpop.permute.xlu0 %1431  ;;  %v2373_v13 = vadd.f32 %v2328_v10, %v2114_v25  ;;  %v2646_v62 = vmin.f32 %v10823_v23, 20.0  ;;  %vm2790_vm5 = vcmp.gt.f32.partialorder %v10823_v23, 20.0 }
 0x300   :  { %v2374_v1 = vadd.f32 %v2330_v14, %v2115_v51  ;;  %v2664_v26 = vmul.f32 1.442695, %v2647_v46 }
 0x301   :  { %1637 = vrot.lane.b32.xlu1 %v1593_v44, %s8478_s1  ;;  %2345 = vrot.lane.b32.xlu0 %v10505_v29, %s8482_s2  ;;  %v15492_v29 = vld [vmem:[#allocation65_spill] sm:$0xff]  ;;  %v10841_v53 = vadd.f32 %v2587_v61, %v2373_v13 }
 0x302   :  { %v761_v3 = vadd.f32 %v10620_v58, %v15492_v29 }
 0x303   :  { %v10827_v19 = vpop.permute.xlu1 %1625  ;;  %v2589_v9 = vpop.permute.xlu0 %2588  ;;  %v2648_v14 = vmin.f32 %v10841_v53, 20.0  ;;  %vm2792_vm8 = vcmp.gt.f32.partialorder %v10841_v53, 20.0 }
 0x304   :  { %v953_v8 = vadd.f32 %v10692_v4, %v761_v3  ;;  %v10849_v41 = vadd.f32 %v2589_v9, %v2374_v1  ;;  %v884_v4 = vmul.f32 %v15494_v45, %v10047_v40  ;;  %v15498_v3 = vld [vmem:[#allocation210_spill] sm:$0xff] }
 0x305   :  { %1639 = vrot.lane.b32.xlu1 %v1594_v22, %s8478_s1  ;;  %2602 = vrot.lane.b32.xlu0 %v10508_v27, %s8483_s11  ;;  %v2662_v27 = vmul.f32 1.442695, %v2646_v62 }
 0x306   :  { %v1213_v31 = vadd.f32 %v1170_v37, %v953_v8  ;;  %v2649_v5 = vmin.f32 %v10849_v41, 20.0  ;;  %v2666_v37 = vmul.f32 1.442695, %v2648_v14  ;;  %vm2793_vm9 = vcmp.gt.f32.partialorder %v10849_v41, 20.0 }
 0x307   :  { %v10843_v30 = vpop.permute.xlu1 %1627  ;;  %v2075_v10 = vpop.permute.xlu0 %2074  ;;  %8130 = vpow2.f32 %v2662_v27 }
 0x308   :  { %v1473_v59 = vadd.f32 %v1430_v6, %v1213_v31  ;;  %8132 = vpow2.f32 %v2664_v26  ;;  %v2668_v6 = vmul.f32 1.442695, %v2649_v5 }
 0x309   :  { %929 = vrot.lane.b32.xlu1 %v883_v18, %s8477_s28  ;;  %2604 = vrot.lane.b32.xlu0 %v10513_v35, %s8483_s11  ;;  %v954_v35 = vadd.f32 %v10742_v11, %v762_v49  ;;  %8134 = vpow2.f32 %v2666_v37 }
 0x30a   :  { %v1665_v38 = vadd.f32 %v10744_v28, %v1473_v59  ;;  %8136 = vpow2.f32 %v2668_v6  ;;  %v15501_v59 = vld [vmem:[#allocation212_spill] sm:$0xff]  ;;  %v15503_v6 = vld [vmem:[#allocation173_spill] sm:$0xff] }
 0x30b   :  { %v10855_v61 = vpop.permute.xlu1 %917  ;;  %v10857_v63 = vpop.permute.xlu0 %2076  ;;  %v1214_v21 = vadd.f32 %v10793_v33, %v954_v35 }
 0x30c   :  { %v1924_v33 = vadd.f32 %v10803_v24, %v1665_v38  ;;  %v15497_v24 = vld [vmem:[#allocation209_spill] sm:$0xff]  ;;  %v15502_v38 = vld [vmem:[#allocation167_spill] sm:$0xff] }
 0x30d   :  { %931 = vrot.lane.b32.xlu1 %v884_v4, %s8477_s28  ;;  %1896 = vrot.lane.b32.xlu0 %v10523_v15, %s8476_s16  ;;  %v1474_v15 = vadd.f32 %v1432_v7, %v1214_v21  ;;  %v15496_v7 = vld [vmem:[#allocation192_spill] sm:$0xff] }
 0x30e   :  { %v2045_v56 = vmul.f32 %v15496_v7, %v10047_v40  ;;  %v2116_v50 = vadd.f32 %v10769_v36, %v1924_v33  ;;  %v15499_v36 = vld [vmem:[#allocation211_spill] sm:$0xff] }
 0x30f   :  { %v10868_v60 = vpop.permute.xlu1 %1173  ;;  %v1883_v55 = vpop.permute.xlu0 %1882 }
 0x311   :  { %1189 = vrot.lane.b32.xlu1 %v10528_v47, %s8480_s30  ;;  %1898 = vrot.lane.b32.xlu0 %v10531_v43, %s8476_s16  ;;  %v1666_v47 = vadd.f32 %v10752_v34, %v1474_v15  ;;  %v8131_v17 = vpop.eup %8130  ;;  %v1596_v15 = vmul.f32 %v15503_v6, %v15502_v38 }
 0x312   :  { %v8133_v2 = vpop.eup %8132  ;;  %v2694_v9 = vadd.f32 2.0, %v8131_v17 }
 0x313   :  { %v10876_v44 = vpop.permute.xlu1 %1175  ;;  %v2332_v11 = vpop.permute.xlu0 %2331  ;;  %v1925_v25 = vadd.f32 %v1883_v55, %v1666_v47  ;;  %v2695_v62 = vadd.f32 2.0, %v8133_v2 }
 0x314   :  { %v8135_v13 = vpop.eup %8134  ;;  %v2710_v46 = vmul.f32 %v8131_v17, %v2694_v9 }
 0x315   :  { %1191 = vrot.lane.b32.xlu1 %v10538_v12, %s8480_s30  ;;  %2088 = vrot.lane.b32.xlu0 %v2044_v52, %s8479_s29  ;;  %v2375_v12 = vadd.f32 %v2332_v11, %v2116_v50  ;;  %v2117_v51 = vadd.f32 %v2075_v10, %v1925_v25  ;;  %v8137_v8 = vpop.eup %8136  ;;  %v2696_v27 = vadd.f32 2.0, %v8135_v13  ;;  %v15500_v10 = vld [vmem:[#allocation147_spill] sm:$0xff]  ;;  %v10911_v26 = vmul.f32 %v8133_v2, %v2695_v62  ;;  %v15504_v52 = vld [vmem:[#allocation214_spill] sm:$0xff]  ;;  %v15505_v25 = vld [vmem:[#allocation77_spill] sm:$0xff] }
 0x316   :  { %v1595_v4 = vmul.f32 %v15500_v10, %v10047_v40  ;;  %v2697_v5 = vadd.f32 2.0, %v8137_v8  ;;  %v2742_v37 = vadd.f32 2.0, %v2710_v46  ;;  %v763_v50 = vadd.f32 %v10620_v58, %v15505_v25  ;;  %v15508_v2 = vld [vmem:[#allocation177_spill] sm:$0xff]  ;;  %v15684_v10 = vld [vmem:[#allocation171_spill] sm:$0xff] }
 0x317   :  { %v10885_v28 = vpop.permute.xlu1 %1433  ;;  %v2334_v43 = vpop.permute.xlu0 %2333  ;;  %v10914_v55 = vmul.f32 %v8135_v13, %v2696_v27  ;;  %v2743_v33 = vadd.f32 2.0, %v10911_v26 }
 0x318   :  { %v2376_v1 = vadd.f32 %v2334_v43, %v2117_v51  ;;  %v10924_v47 = vmul.f32 %v8137_v8, %v2697_v5  ;;  %v955_v9 = vadd.f32 %v15508_v2, %v763_v50  ;;  %v15516_v50 = vld [vmem:[#allocation204_spill] sm:$0xff] }
 0x319   :  { %1449 = vrot.lane.b32.xlu1 %v15497_v24, %s8481_s0  ;;  %2090 = vrot.lane.b32.xlu0 %v2045_v56, %s8479_s29  ;;  %v2744_v43 = vadd.f32 2.0, %v10914_v55  ;;  %v15506_v24 = vld [vmem:[#allocation215_spill] sm:$0xff] }
 0x31a   :  { %v1215_v8 = vadd.f32 %v10868_v60, %v955_v9  ;;  %v15515_v60 = vld [vmem:[#allocation175_spill] sm:$0xff] }
 0x31b   :  { %v10893_v22 = vpop.permute.xlu1 %1435  ;;  %v2591_v34 = vpop.permute.xlu0 %2590 }
 0x31c   :  { %v10895_v29 = vadd.f32 %v2591_v34, %v2375_v12  ;;  %v15507_v12 = vld [vmem:[#allocation216_spill] sm:$0xff]  ;;  %v2745_v34 = vadd.f32 2.0, %v10924_v47 }
 0x31d   :  { %1451 = vrot.lane.b32.xlu1 %v15498_v3, %s8481_s0  ;;  %2347 = vrot.lane.b32.xlu0 %v15499_v36, %s8482_s2  ;;  %v15509_v3 = vld [vmem:[#allocation174_spill] sm:$0xff] }
 0x31e   :  { %v2650_v18 = vmin.f32 %v10895_v29, 20.0  ;;  %v2046_v36 = vmul.f32 %v15509_v3, %v15502_v38  ;;  %vm2794_vm10 = vcmp.gt.f32.partialorder %v10895_v29, 20.0  ;;  %v15683_v3 = vld [vmem:[#allocation165_spill] sm:$0xff] }
 0x31f   :  { %v10902_v31 = vpop.permute.xlu1 %919  ;;  %v2593_v14 = vpop.permute.xlu0 %2592 }
 0x320   :  { %v2670_v0 = vmul.f32 1.442695, %v2650_v18  ;;  %v10906_v49 = vadd.f32 %v2593_v14, %v2376_v1  ;;  %v15510_v1 = vld [vmem:[#allocation74_spill] sm:$0xff]  ;;  %v15511_v14 = vld [vmem:[#allocation217_spill] sm:$0xff] }
 0x321   :  { %1641 = vrot.lane.b32.xlu1 %v1595_v4, %s8478_s1  ;;  %2349 = vrot.lane.b32.xlu0 %v15501_v59, %s8482_s2  ;;  %v764_v18 = vadd.f32 %v15510_v1, %v10620_v58  ;;  %v15512_v4 = vld [vmem:[#allocation201_spill] sm:$0xff] }
 0x322   :  { %8138 = vpow2.f32 %v2670_v0  ;;  %v2651_v35 = vmin.f32 %v10906_v49, 20.0  ;;  %v15513_v0 = vrot.slane %v15512_v4, 7  ;;  %vm2795_vm14 = vcmp.gt.f32.partialorder %v10906_v49, 20.0 }
 0x323   :  { %v10916_v21 = vpop.permute.xlu1 %1629  ;;  %v1885_v40 = vpop.permute.xlu0 %1884  ;;  %v956_v5 = vadd.f32 %v10813_v20, %v764_v18  ;;  %v15518_v20 = vld [vmem:[#allocation213_spill] sm:$0xff] }
 0x324   :  { %v2672_v11 = vmul.f32 1.442695, %v2651_v35  ;;  %v2272_v59 = vmul.f32 0.0, %v15513_v0  ;;  %v1475_v35 = vadd.f32 %v10885_v28, %v1215_v8 }
 0x325   :  { %1643 = vrot.lane.b32.xlu1 %v1596_v15, %s8478_s1  ;;  %2606 = vrot.lane.b32.xlu0 %v15504_v52, %s8483_s11 }
 0x326   :  { %8140 = vpow2.f32 %v2672_v11  ;;  %v15514_v11 = vld [vmem:[#allocation157_spill] sm:$0xff]  ;;  %v10965_v28 = vrot.slane %v2272_v59, 1 }
 0x327   :  { %8142 = vrcp.f32 %v2742_v37  ;;  %v10927_v56 = vpop.permute.xlu1 %1631  ;;  %v10929_v17 = vpop.permute.xlu0 %2078  ;;  %v2047_v52 = vmul.f32 %v15515_v60, %v15514_v11 }
 0x328   :  { %8144 = vrcp.f32 %v2743_v33  ;;  %15519 = vst [vmem:[#allocation178_spill] sm:$0xff] %v10965_v28 }
 0x329   :  { %1900 = vrot.lane.b32.xlu1 %v15506_v24, %s8476_s16  ;;  %2608 = vrot.lane.b32.xlu0 %v15507_v12, %s8483_s11  ;;  %8146 = vrcp.f32 %v2744_v43  ;;  %v1216_v43 = vadd.f32 %v10876_v44, %v956_v5  ;;  %v15517_v24 = vrot.slane %v15516_v50, 6 }
 0x32a   :  { %8148 = vrcp.f32 %v2745_v34  ;;  %v2726_v34 = vmul.f32 %v2710_v46, %v10823_v23  ;;  %v15523_v46 = vld [vmem:[#allocation218_spill] sm:$0xff] }
 0x32b   :  { %v10939_v13 = vpop.permute.xlu1 %921  ;;  %v10941_v51 = vpop.permute.xlu0 %2080  ;;  %v2531_v12 = vmul.f32 0.0, %v15517_v24 }
 0x32c   :  { %v8139_v62 = vpop.eup %8138 }
 0x32d   :  { %v2698_v27 = vadd.f32 2.0, %v8139_v62  ;;  %2092 = vrot.lane.b32.xlu1 %v2046_v36, %s8479_s29  ;;  %1902 = vrot.lane.b32.xlu0 %v15511_v14, %s8476_s16  ;;  %v1476_v36 = vadd.f32 %v10893_v22, %v1216_v43  ;;  %v15520_v14 = vld [vmem:[#allocation207_spill] sm:$0xff]  ;;  %v10976_v11 = vrot.slane %v2531_v12, 2  ;;  %v2727_v22 = vmul.f32 %v10911_v26, %v10832_v39  ;;  %v15524_v43 = vld [vmem:[#allocation208_spill] sm:$0xff] }
 0x32e   :  { %v15521_v4 = vrot.slane %v15520_v14, 1  ;;  %v15525_v26 = vrot.slane %v15524_v43, 2  ;;  %v15534_v43 = vld [vmem:[#allocation76_spill] sm:$0xff] }
 0x32f   :  { %v2714_v37 = vmul.f32 %v8139_v62, %v2698_v27  ;;  %v10955_v38 = vpop.permute.xlu1 %1177  ;;  %v1887_v15 = vpop.permute.xlu0 %1886  ;;  %v1667_v62 = vadd.f32 %v10827_v19, %v1475_v35  ;;  %15522 = vst [vmem:[#allocation179_spill] sm:$0xff] %v10976_v11  ;;  %v1668_v35 = vadd.f32 %v10843_v30, %v1476_v36 }
 0x330   :  { %v8141_v33 = vpop.eup %8140  ;;  %v2322_v0 = vsel %vm1127_vm4, %v15521_v4, %v10965_v28 }
 0x331   :  { %v8143_v25 = vpop.eup %8142  ;;  %v2746_v2 = vadd.f32 2.0, %v2714_v37  ;;  %v2699_v9 = vadd.f32 2.0, %v8141_v33  ;;  %2351 = vrot.lane.b32.xlu1 %v15518_v20, %s8482_s2  ;;  %2094 = vrot.lane.b32.xlu0 %v2047_v52, %s8479_s29  ;;  %v1926_v27 = vadd.f32 %v1885_v40, %v1667_v62  ;;  %v2728_v40 = vmul.f32 %v10914_v55, %v10841_v53 }
 0x332   :  { %v8145_v8 = vpop.eup %8144  ;;  %v2774_v59 = vmul.f32 %v8143_v25, %v2726_v34  ;;  %v2581_v25 = vsel %vm533_vm6, %v15525_v26, %v10976_v11  ;;  %v1927_v12 = vadd.f32 %v1887_v15, %v1668_v35  ;;  %v2730_v15 = vmul.f32 %v2714_v37, %v10895_v29 }
 0x333   :  { %8150 = vrcp.f32 %v2746_v2  ;;  %v2715_v44 = vmul.f32 %v8141_v33, %v2699_v9  ;;  %v10970_v1 = vpop.permute.xlu1 %1179  ;;  %v2336_v18 = vpop.permute.xlu0 %2335  ;;  %v2775_v50 = vmul.f32 %v8145_v8, %v2727_v22  ;;  %v2118_v2 = vadd.f32 %v10857_v63, %v1926_v27 }
 0x334   :  { %v8147_v5 = vpop.eup %8146  ;;  %v10995_v55 = vsel %vm2790_vm5, %v10823_v23, %v2774_v59  ;;  %v2729_v9 = vmul.f32 %v10924_v47, %v10849_v41  ;;  %v2119_v47 = vadd.f32 %v10929_v17, %v1927_v12  ;;  %v765_v26 = vadd.f32 %v10620_v58, %v15534_v43 }
 0x335   :  { %v2747_v19 = vadd.f32 2.0, %v2715_v44  ;;  %2610 = vrot.lane.b32.xlu1 %v15523_v46, %s8483_s11  ;;  %2353 = vrot.lane.b32.xlu0 %v2322_v0, %s8482_s2  ;;  %v8149_v24 = vpop.eup %8148  ;;  %15526 = vst [vmem:[#allocation184_spill] sm:$0xff] %v10995_v55  ;;  %v2776_v30 = vmul.f32 %v8147_v5, %v2728_v40  ;;  %v2377_v20 = vadd.f32 %v2336_v18, %v2118_v2  ;;  %v2920_v0 = vld [vmem:[%s14714_s4 + $0x8] sm:$0xf] }
 0x336   :  { %v11005_v63 = vsel %vm2791_vm7, %v10832_v39, %v2775_v50  ;;  %v2777_v23 = vmul.f32 %v8149_v24, %v2729_v9  ;;  %v2731_v59 = vmul.f32 %v2715_v44, %v10906_v49  ;;  %v957_v24 = vadd.f32 %v10855_v61, %v765_v26 }
 0x337   :  { %8152 = vrcp.f32 %v2747_v19  ;;  %v10986_v52 = vpop.permute.xlu1 %1437  ;;  %v2338_v33 = vpop.permute.xlu0 %2337  ;;  %15527 = vst [vmem:[#allocation78_spill] sm:$0xff] %v11005_v63  ;;  %v11012_v8 = vsel %vm2792_vm8, %v10841_v53, %v2776_v30  ;;  %v2919_v53 = vld [vmem:[%s14714_s4] sm:$0xff] }
 0x338   :  { %15528 = vst [vmem:[#allocation189_spill] sm:$0xff] %v11012_v8  ;;  %v2378_v27 = vadd.f32 %v2338_v33, %v2119_v47  ;;  %v11023_v4 = vsel %vm2793_vm9, %v10849_v41, %v2777_v23  ;;  %v15531_v41 = vmov 0  ;;  %v7870_v40 = vpack.c.bf16 %v2920_v0, %v2919_v53  ;;  %v15536_v30 = vld [vmem:[#allocation148_spill] sm:$0xff] }
 0x339   :  { %2838 = vrot.lane.b32.xlu1 %v10995_v55, %s8483_s11  ;;  %2612 = vrot.lane.b32.xlu0 %v2581_v25, %s8483_s11  ;;  %15529 = vst [vmem:[#allocation191_spill] sm:$0xff] %v11023_v4  ;;  %v15532_v41 = vsel %vm11038_vm13, 4294967295, %v15531_v41  ;;  %v766_v9 = vadd.f32 %v15536_v30, %v10620_v58  ;;  %vm2921_vm9 = vcmask 97280  }
 0x33a   :  { %15533 = vst [vmem:[#allocation193_spill] sm:$0xff] %v15532_v41  ;;  %7872 = vmatprep.subr.msk.bf16.mxu1 %vm11038_vm13, %v7870_v40  ;;  %v15640_v41 = vld [vmem:[#allocation132_spill] sm:$0xff] }
 0x33b   :  { %v1440_v34 = vpop.permute.xlu1 %1439  ;;  %v2595_v36 = vpop.permute.xlu0 %2594  ;;  %7875 = vmatpush3.bf16.msk.msra.mxu1 %vm11038_vm13, %v7870_v40 }
 0x33c   :  { %v11009_v62 = vadd.f32 %v2595_v36, %v2377_v20  ;;  %v1217_v20 = vadd.f32 %v10955_v38, %v957_v24 }
 0x33d   :  { %v8151_v18 = vpop.eup %8150  ;;  %2842 = vrot.lane.b32.xlu1 %v11012_v8, %s8483_s11  ;;  %2840 = vrot.lane.b32.xlu0 %v11005_v63, %s8483_s11  ;;  %v15622_v63 = vld [vmem:[#allocation120_spill] sm:$0xff] }
 0x33e   :  { %v2652_v39 = vmin.f32 %v11009_v62, 20.0  ;;  %v2778_v37 = vmul.f32 %v8151_v18, %v2730_v15  ;;  %v1477_v36 = vadd.f32 %v10986_v52, %v1217_v20  ;;  %vm2796_vm15 = vcmp.gt.f32.partialorder %v11009_v62, 20.0 }
 0x33f   :  { %v11020_v14 = vpop.permute.xlu1 %923  ;;  %v2597_v17 = vpop.permute.xlu0 %2596 }
 0x340   :  { %v2674_v5 = vmul.f32 1.442695, %v2652_v39  ;;  %v11033_v22 = vadd.f32 %v2597_v17, %v2378_v27  ;;  %v11036_v19 = vsel %vm2794_vm10, %v10895_v29, %v2778_v37  ;;  %v1669_v39 = vadd.f32 %v10916_v21, %v1477_v36 }
 0x341   :  { %15530 = vst [vmem:[#allocation149_spill] sm:$0xff] %v11036_v19  ;;  %v8153_v46 = vpop.eup %8152  ;;  %2844 = vrot.lane.b32.xlu0 %v11023_v4, %s8483_s11  ;;  %2846 = vrot.lane.b32.xlu1 %v11036_v19, %s8483_s11 }
 0x342   :  { %8154 = vpow2.f32 %v2674_v5  ;;  %v2653_v44 = vmin.f32 %v11033_v22, 20.0  ;;  %v2779_v35 = vmul.f32 %v8153_v46, %v2731_v59  ;;  %vm2797_vm0 = vcmp.gt.f32.partialorder %v11033_v22, 20.0 }
 0x343   :  { %v11047_v33 = vpop.permute.xlu1 %1633  ;;  %v1889_v29 = vpop.permute.xlu0 %1888 }
 0x344   :  { %v2676_v25 = vmul.f32 1.442695, %v2653_v44  ;;  %v11055_v50 = vsel %vm2795_vm14, %v10906_v49, %v2779_v35  ;;  %v958_v49 = vadd.f32 %v10902_v31, %v766_v9  ;;  %v1928_v59 = vadd.f32 %v1889_v29, %v1669_v39 }
 0x345   :  { %15535 = vst [vmem:[#allocation194_spill] sm:$0xff] %v11055_v50  ;;  %2848 = vrot.lane.b32.xlu0 %v11055_v50, %s8483_s11 }
 0x346   :  { %8156 = vpow2.f32 %v2676_v25  ;;  %v1218_v18 = vadd.f32 %v10970_v1, %v958_v49  ;;  %v2120_v1 = vadd.f32 %v10941_v51, %v1928_v59 }
 0x347   :  { %v11062_v12 = vpop.permute.xlu1 %1635  ;;  %v2083_v2 = vpop.permute.xlu0 %2082 }
 0x348   :  { %v1478_v61 = vadd.f32 %v1440_v34, %v1218_v18 }
 0x34a   :  { %v1670_v31 = vadd.f32 %v10927_v56, %v1478_v61 }
 0x34b   :  { %v1182_v23 = vpop.permute.xlu1 %1181  ;;  %v1891_v15 = vpop.permute.xlu0 %1890 }
 0x34c   :  { %v8155_v47 = vpop.eup %8154  ;;  %v1929_v44 = vadd.f32 %v1891_v15, %v1670_v31 }
 0x34d   :  { %v2700_v27 = vadd.f32 2.0, %v8155_v47 }
 0x34e   :  { %v2121_v26 = vadd.f32 %v2083_v2, %v1929_v44 }
 0x34f   :  { %v2716_v37 = vmul.f32 %v8155_v47, %v2700_v27  ;;  %v1184_v17 = vpop.permute.xlu1 %1183  ;;  %v2340_v53 = vpop.permute.xlu0 %2339 }
 0x350   :  { %v8157_v0 = vpop.eup %8156  ;;  %v2379_v34 = vadd.f32 %v2340_v53, %v2120_v1  ;;  %v15540_v1 = vld [vmem:[#allocation150_spill] sm:$0xff] }
 0x351   :  { %v2748_v5 = vadd.f32 2.0, %v2716_v37  ;;  %v2701_v38 = vadd.f32 2.0, %v8157_v0  ;;  %v2732_v9 = vmul.f32 %v2716_v37, %v11009_v62 }
 0x353   :  { %8158 = vrcp.f32 %v2748_v5  ;;  %v2717_v52 = vmul.f32 %v8157_v0, %v2701_v38  ;;  %v1442_v46 = vpop.permute.xlu1 %1441  ;;  %v2342_v40 = vpop.permute.xlu0 %2341  ;;  %v15539_v5 = vld [vmem:[#allocation152_spill] sm:$0xff] }
 0x354   :  { %v2380_v29 = vadd.f32 %v2342_v40, %v2121_v26 }
 0x355   :  { %v2749_v35 = vadd.f32 2.0, %v2717_v52  ;;  %v2733_v18 = vmul.f32 %v2717_v52, %v11033_v22 }
 0x357   :  { %8160 = vrcp.f32 %v2749_v35  ;;  %v1444_v21 = vpop.permute.xlu1 %1443  ;;  %v2599_v43 = vpop.permute.xlu0 %2598  ;;  %v768_v35 = vadd.f32 %v15540_v1, %v10620_v58 }
 0x358   :  { %v11073_v25 = vadd.f32 %v2599_v43, %v2379_v34 }
 0x35a   :  { %v2654_v24 = vmin.f32 %v11073_v25, 20.0  ;;  %vm2798_vm3 = vcmp.gt.f32.partialorder %v11073_v25, 20.0 }
 0x35b   :  { %v11076_v30 = vpop.permute.xlu1 %925  ;;  %v2601_v56 = vpop.permute.xlu0 %2600 }
 0x35c   :  { %v2678_v20 = vmul.f32 1.442695, %v2654_v24  ;;  %v11079_v49 = vadd.f32 %v2601_v56, %v2380_v29  ;;  %v960_v24 = vadd.f32 %v11020_v14, %v768_v35 }
 0x35d   :  { %v8159_v51 = vpop.eup %8158 }
 0x35e   :  { %8162 = vpow2.f32 %v2678_v20  ;;  %v2655_v36 = vmin.f32 %v11079_v49, 20.0  ;;  %v2780_v15 = vmul.f32 %v8159_v51, %v2732_v9  ;;  %v1220_v51 = vadd.f32 %v1184_v17, %v960_v24 }
 0x35f   :  { %v11082_v47 = vpop.permute.xlu1 %927  ;;  %v1893_v2 = vpop.permute.xlu0 %1892  ;;  %vm2799_vm5 = vcmp.gt.f32.partialorder %v11079_v49, 20.0 }
 0x360   :  { %v2680_v27 = vmul.f32 1.442695, %v2655_v36  ;;  %v11087_v61 = vsel %vm2796_vm15, %v11009_v62, %v2780_v15  ;;  %v767_v62 = vadd.f32 %v10620_v58, %v15539_v5 }
 0x361   :  { %15537 = vst [vmem:[#allocation195_spill] sm:$0xff] %v11087_v61  ;;  %v8161_v39 = vpop.eup %8160  ;;  %2850 = vrot.lane.b32.xlu1 %v11087_v61, %s8483_s11 }
 0x362   :  { %8164 = vpow2.f32 %v2680_v27  ;;  %v2781_v37 = vmul.f32 %v8161_v39, %v2733_v18  ;;  %v959_v40 = vadd.f32 %v10939_v13, %v767_v62  ;;  %v1480_v18 = vadd.f32 %v1444_v21, %v1220_v51 }
 0x363   :  { %v11091_v53 = vpop.permute.xlu1 %1185  ;;  %v1895_v0 = vpop.permute.xlu0 %1894 }
 0x364   :  { %v11095_v59 = vsel %vm2797_vm0, %v11033_v22, %v2781_v37  ;;  %v1219_v34 = vadd.f32 %v1182_v23, %v959_v40  ;;  %v1672_v62 = vadd.f32 %v11062_v12, %v1480_v18 }
 0x365   :  { %15538 = vst [vmem:[#allocation196_spill] sm:$0xff] %v11095_v59  ;;  %2852 = vrot.lane.b32.xlu0 %v11095_v59, %s8483_s11 }
 0x366   :  { %v1479_v56 = vadd.f32 %v1442_v46, %v1219_v34  ;;  %v1931_v46 = vadd.f32 %v1895_v0, %v1672_v62 }
 0x367   :  { %v11101_v38 = vpop.permute.xlu1 %1187  ;;  %v2085_v31 = vpop.permute.xlu0 %2084 }
 0x368   :  { %v8163_v52 = vpop.eup %8162  ;;  %v1671_v27 = vadd.f32 %v11047_v33, %v1479_v56 }
 0x369   :  { %v2702_v44 = vadd.f32 2.0, %v8163_v52 }
 0x36a   :  { %v1930_v39 = vadd.f32 %v1893_v2, %v1671_v27 }
 0x36b   :  { %v2718_v43 = vmul.f32 %v8163_v52, %v2702_v44  ;;  %v11106_v22 = vpop.permute.xlu1 %1445  ;;  %v2087_v26 = vpop.permute.xlu0 %2086 }
 0x36c   :  { %v8165_v29 = vpop.eup %8164  ;;  %v2122_v14 = vadd.f32 %v2085_v31, %v1930_v39  ;;  %v2123_v1 = vadd.f32 %v2087_v26, %v1931_v46 }
 0x36d   :  { %v2750_v9 = vadd.f32 2.0, %v2718_v43  ;;  %v2703_v20 = vadd.f32 2.0, %v8165_v29  ;;  %v2734_v44 = vmul.f32 %v2718_v43, %v11073_v25 }
 0x36f   :  { %8166 = vrcp.f32 %v2750_v9  ;;  %v2719_v36 = vmul.f32 %v8165_v29, %v2703_v20  ;;  %v11109_v15 = vpop.permute.xlu1 %1447  ;;  %v2344_v13 = vpop.permute.xlu0 %2343 }
 0x370   :  { %v2381_v52 = vadd.f32 %v2344_v13, %v2122_v14 }
 0x371   :  { %v2751_v23 = vadd.f32 2.0, %v2719_v36  ;;  %v2735_v12 = vmul.f32 %v2719_v36, %v11079_v49 }
 0x373   :  { %8168 = vrcp.f32 %v2751_v23  ;;  %v1638_v37 = vpop.permute.xlu1 %1637  ;;  %v2346_v5 = vpop.permute.xlu0 %2345 }
 0x374   :  { %v2382_v34 = vadd.f32 %v2346_v5, %v2123_v1  ;;  %v15543_v5 = vld [vmem:[#allocation156_spill] sm:$0xff]  ;;  %v15544_v1 = vld [vmem:[#allocation155_spill] sm:$0xff] }
 0x375   :  { %v769_v62 = vadd.f32 %v10620_v58, %v15543_v5 }
 0x377   :  { %v1640_v40 = vpop.permute.xlu1 %1639  ;;  %v2603_v17 = vpop.permute.xlu0 %2602  ;;  %v961_v46 = vadd.f32 %v11076_v30, %v769_v62 }
 0x378   :  { %v11114_v35 = vadd.f32 %v2603_v17, %v2381_v52 }
 0x379   :  { %v8167_v21 = vpop.eup %8166 }
 0x37a   :  { %v2656_v33 = vmin.f32 %v11114_v35, 20.0  ;;  %v2782_v2 = vmul.f32 %v8167_v21, %v2734_v44  ;;  %v770_v21 = vadd.f32 %v15544_v1, %v10620_v58  ;;  %vm2800_vm7 = vcmp.gt.f32.partialorder %v11114_v35, 20.0 }
 0x37b   :  { %v930_v29 = vpop.permute.xlu1 %929  ;;  %v2605_v24 = vpop.permute.xlu0 %2604 }
 0x37c   :  { %v2682_v0 = vmul.f32 1.442695, %v2656_v33  ;;  %v11119_v31 = vadd.f32 %v2605_v24, %v2382_v34  ;;  %v11122_v56 = vsel %vm2798_vm3, %v11073_v25, %v2782_v2  ;;  %v1221_v34 = vadd.f32 %v11091_v53, %v961_v46 }
 0x37d   :  { %15541 = vst [vmem:[#allocation197_spill] sm:$0xff] %v11122_v56  ;;  %v8169_v43 = vpop.eup %8168  ;;  %2854 = vrot.lane.b32.xlu1 %v11122_v56, %s8483_s11  ;;  %v962_v24 = vadd.f32 %v11082_v47, %v770_v21  ;;  %v15545_v21 = vld [vmem:[#allocation160_spill] sm:$0xff] }
 0x37e   :  { %8170 = vpow2.f32 %v2682_v0  ;;  %v2657_v26 = vmin.f32 %v11119_v31, 20.0  ;;  %v2783_v9 = vmul.f32 %v8169_v43, %v2735_v12  ;;  %v1481_v12 = vadd.f32 %v11106_v22, %v1221_v34  ;;  %v15585_v56 = vld [vmem:[#allocation96_spill] sm:$0xff] }
 0x37f   :  { %v932_v20 = vpop.permute.xlu1 %931  ;;  %v1897_v51 = vpop.permute.xlu0 %1896  ;;  %v1222_v30 = vadd.f32 %v11101_v38, %v962_v24  ;;  %v771_v22 = vadd.f32 %v10620_v58, %v15545_v21  ;;  %vm2801_vm8 = vcmp.gt.f32.partialorder %v11119_v31, 20.0 }
 0x380   :  { %v2684_v13 = vmul.f32 1.442695, %v2657_v26  ;;  %v11129_v36 = vsel %vm2799_vm5, %v11079_v49, %v2783_v9  ;;  %v1673_v9 = vadd.f32 %v1638_v37, %v1481_v12 }
 0x381   :  { %15542 = vst [vmem:[#allocation198_spill] sm:$0xff] %v11129_v36  ;;  %2856 = vrot.lane.b32.xlu0 %v11129_v36, %s8483_s11 }
 0x382   :  { %8172 = vpow2.f32 %v2684_v13  ;;  %v1932_v5 = vadd.f32 %v1897_v51, %v1673_v9 }
 0x383   :  { %v1190_v25 = vpop.permute.xlu1 %1189  ;;  %v1899_v18 = vpop.permute.xlu0 %1898 }
 0x387   :  { %v1192_v27 = vpop.permute.xlu1 %1191  ;;  %v2089_v23 = vpop.permute.xlu0 %2088 }
 0x388   :  { %v8171_v39 = vpop.eup %8170  ;;  %v2124_v46 = vadd.f32 %v2089_v23, %v1932_v5 }
 0x389   :  { %v2704_v14 = vadd.f32 2.0, %v8171_v39 }
 0x38b   :  { %v2720_v52 = vmul.f32 %v8171_v39, %v2704_v14  ;;  %v1450_v17 = vpop.permute.xlu1 %1449  ;;  %v2091_v44 = vpop.permute.xlu0 %2090  ;;  %v1482_v39 = vadd.f32 %v11109_v15, %v1222_v30  ;;  %v963_v15 = vadd.f32 %v930_v29, %v771_v22 }
 0x38c   :  { %v8173_v49 = vpop.eup %8172 }
 0x38d   :  { %v2752_v33 = vadd.f32 2.0, %v2720_v52  ;;  %v2705_v2 = vadd.f32 2.0, %v8173_v49  ;;  %v1674_v14 = vadd.f32 %v1640_v40, %v1482_v39  ;;  %v15546_v40 = vld [vmem:[#allocation159_spill] sm:$0xff]  ;;  %v1223_v23 = vadd.f32 %v1190_v25, %v963_v15 }
 0x38f   :  { %8174 = vrcp.f32 %v2752_v33  ;;  %v2721_v0 = vmul.f32 %v8173_v49, %v2705_v2  ;;  %v1452_v43 = vpop.permute.xlu1 %1451  ;;  %v2348_v26 = vpop.permute.xlu0 %2347  ;;  %v1933_v1 = vadd.f32 %v1899_v18, %v1674_v14  ;;  %v2736_v33 = vmul.f32 %v2720_v52, %v11114_v35 }
 0x390   :  { %v2383_v47 = vadd.f32 %v2348_v26, %v2124_v46  ;;  %v772_v18 = vadd.f32 %v15546_v40, %v10620_v58  ;;  %v1483_v5 = vadd.f32 %v1450_v17, %v1223_v23 }
 0x391   :  { %v2753_v13 = vadd.f32 2.0, %v2721_v0  ;;  %v2125_v38 = vadd.f32 %v2091_v44, %v1933_v1  ;;  %v2737_v9 = vmul.f32 %v2721_v0, %v11119_v31 }
 0x392   :  { %v964_v39 = vadd.f32 %v932_v20, %v772_v18 }
 0x393   :  { %8176 = vrcp.f32 %v2753_v13  ;;  %v1642_v62 = vpop.permute.xlu1 %1641  ;;  %v2350_v53 = vpop.permute.xlu0 %2349 }
 0x394   :  { %v2384_v51 = vadd.f32 %v2350_v53, %v2125_v38  ;;  %v1224_v0 = vadd.f32 %v1192_v27, %v964_v39  ;;  %v1675_v46 = vadd.f32 %v1642_v62, %v1483_v5 }
 0x396   :  { %v1484_v20 = vadd.f32 %v1452_v43, %v1224_v0 }
 0x397   :  { %v1644_v49 = vpop.permute.xlu1 %1643  ;;  %v2607_v34 = vpop.permute.xlu0 %2606 }
 0x398   :  { %v11146_v37 = vadd.f32 %v2607_v34, %v2383_v47  ;;  %v1676_v22 = vadd.f32 %v1644_v49, %v1484_v20  ;;  %v15549_v49 = vld [vmem:[#allocation34_spill] sm:$0xff] }
 0x399   :  { %v8175_v2 = vpop.eup %8174 }
 0x39a   :  { %v2658_v24 = vmin.f32 %v11146_v37, 20.0  ;;  %v2784_v12 = vmul.f32 %v8175_v2, %v2736_v33  ;;  %vm2802_vm10 = vcmp.gt.f32.partialorder %v11146_v37, 20.0 }
 0x39b   :  { %v1901_v26 = vpop.permute.xlu1 %1900  ;;  %v2609_v30 = vpop.permute.xlu0 %2608 }
 0x39c   :  { %v2686_v52 = vmul.f32 1.442695, %v2658_v24  ;;  %v11153_v44 = vadd.f32 %v2609_v30, %v2384_v51  ;;  %v11156_v13 = vsel %vm2800_vm7, %v11114_v35, %v2784_v12  ;;  %v1934_v47 = vadd.f32 %v1901_v26, %v1675_v46  ;;  %v15551_v46 = vld [vmem:[#allocation28_spill] sm:$0xff] }
 0x39d   :  { %15547 = vst [vmem:[#allocation199_spill] sm:$0xff] %v11156_v13  ;;  %v8177_v29 = vpop.eup %8176  ;;  %2858 = vrot.lane.b32.xlu1 %v11156_v13, %s8483_s11 }
 0x39e   :  { %8178 = vpow2.f32 %v2686_v52  ;;  %v2659_v58 = vmin.f32 %v11153_v44, 20.0  ;;  %v2785_v25 = vmul.f32 %v8177_v29, %v2737_v9  ;;  %vm2803_vm11 = vcmp.gt.f32.partialorder %v11153_v44, 20.0 }
 0x39f   :  { %v2093_v53 = vpop.permute.xlu1 %2092  ;;  %v1903_v14 = vpop.permute.xlu0 %1902 }
 0x3a0   :  { %v2688_v1 = vmul.f32 1.442695, %v2659_v58  ;;  %v11163_v35 = vsel %vm2801_vm8, %v11119_v31, %v2785_v25  ;;  %v2126_v34 = vadd.f32 %v2093_v53, %v1934_v47  ;;  %v1935_v33 = vadd.f32 %v1903_v14, %v1676_v22  ;;  %v15550_v14 = vld [vmem:[#allocation36_spill] sm:$0xff] }
 0x3a1   :  { %15548 = vst [vmem:[#allocation202_spill] sm:$0xff] %v11163_v35  ;;  %2860 = vrot.lane.b32.xlu0 %v11163_v35, %s8483_s11  ;;  %v15583_v35 = vld [vmem:[#allocation91_spill] sm:$0xff] }
 0x3a2   :  { %8180 = vpow2.f32 %v2688_v1 }
 0x3a3   :  { %v2352_v17 = vpop.permute.xlu1 %2351  ;;  %v2095_v21 = vpop.permute.xlu0 %2094 }
 0x3a4   :  { %v2385_v38 = vadd.f32 %v2352_v17, %v2126_v34  ;;  %v2127_v62 = vadd.f32 %v2095_v21, %v1935_v33  ;;  %v15552_v21 = vld [vmem:[#allocation38_spill] sm:$0xff] }
 0x3a5   :  { %v15553_v34 = vld [vmem:[#allocation30_spill] sm:$0xff] }
 0x3a7   :  { %v2611_v2 = vpop.permute.xlu1 %2610  ;;  %v2354_v15 = vpop.permute.xlu0 %2353 }
 0x3a8   :  { %v8179_v27 = vpop.eup %8178  ;;  %v11167_v51 = vadd.f32 %v2611_v2, %v2385_v38  ;;  %v2386_v12 = vadd.f32 %v2354_v15, %v2127_v62 }
 0x3a9   :  { %v2706_v31 = vadd.f32 2.0, %v8179_v27 }
 0x3aa   :  { %v2660_v24 = vmin.f32 %v11167_v51, 20.0  ;;  %vm2804_vm12 = vcmp.gt.f32.partialorder %v11167_v51, 20.0 }
 0x3ab   :  { %v2722_v43 = vmul.f32 %v8179_v27, %v2706_v31  ;;  %v2839_v40 = vpop.permute.xlu1 %2838  ;;  %v2613_v18 = vpop.permute.xlu0 %2612  ;;  %v15554_v27 = vld [vmem:[#allocation31_spill] sm:$0xff] }
 0x3ac   :  { %v8181_v23 = vpop.eup %8180  ;;  %v2690_v26 = vmul.f32 1.442695, %v2660_v24  ;;  %v2902_v30 = vsel %vm500_vm1, %v2839_v40, %v15549_v49  ;;  %v2645_v9 = vadd.f32 %v2613_v18, %v2386_v12 }
 0x3ad   :  { %v2754_v52 = vadd.f32 2.0, %v2722_v43  ;;  %v2707_v29 = vadd.f32 2.0, %v8181_v23  ;;  %7676 = vmatprep.mubr.msk.f32.mxu1 %vm2921_vm9, %v2902_v30  ;;  %v2738_v15 = vmul.f32 %v2722_v43, %v11146_v37 }
 0x3ae   :  { %8182 = vpow2.f32 %v2690_v26  ;;  %v2661_v39 = vmin.f32 %v2645_v9, 20.0  ;;  %vm2805_vm14 = vcmp.gt.f32.partialorder %v2645_v9, 20.0 }
 0x3af   :  { %8184 = vrcp.f32 %v2754_v52  ;;  %v2723_v5 = vmul.f32 %v8181_v23, %v2707_v29  ;;  %v2843_v58 = vpop.permute.xlu1 %2842  ;;  %v2841_v25 = vpop.permute.xlu0 %2840 }
 0x3b0   :  { %v2692_v53 = vmul.f32 1.442695, %v2661_v39  ;;  %v2904_v0 = vsel %vm500_vm1, %v2843_v58, %v15550_v14  ;;  %v2903_v1 = vsel %vm500_vm1, %v2841_v25, %v15551_v46  ;;  %v7422_v46 = vld [vmem:[%s14718_s8 + $0x1] ss:$0 sm:$0xff] }
 0x3b1   :  { %v2755_v20 = vadd.f32 2.0, %v2723_v5  ;;  %7677 = vmatmul.mubr.msk.f32.vlgmr.msra.gmra.mrb[4].mxu1 %vm2921_vm9, %v2903_v1  ;;  %v2739_v23 = vmul.f32 %v2723_v5, %v11153_v44 }
 0x3b2   :  { %8186 = vpow2.f32 %v2692_v53  ;;  %7679 = vmatprep.mubr.msk.f32.mxu1 %vm2921_vm9, %v2904_v0 }
 0x3b3   :  { %8188 = vrcp.f32 %v2755_v20  ;;  %v2847_v47 = vpop.permute.xlu1 %2846  ;;  %v2845_v17 = vpop.permute.xlu0 %2844 }
 0x3b4   :  { %v2906_v22 = vsel %vm500_vm1, %v2847_v47, %v15552_v21  ;;  %v2905_v33 = vsel %vm500_vm1, %v2845_v17, %v15553_v34  ;;  %v15560_v21 = vld [vmem:[#allocation33_spill] sm:$0xff] }
 0x3b5   :  { %7680 = vmatmul.mubr.msk.f32.gmra.mrb[6].mxu1 %vm2921_vm9, %v2905_v33 }
 0x3b6   :  { %7682 = vmatprep.mubr.msk.f32.mxu1 %vm2921_vm9, %v2906_v22 }
 0x3b7   :  { %v2849_v38 = vpop.permute.xlu0 %2848 }
 0x3b8   :  { %v8183_v2 = vpop.eup %8182  ;;  %v2907_v62 = vsel %vm500_vm1, %v2849_v38, %v15554_v27 }
 0x3b9   :  { %v8185_v31 = vpop.eup %8184  ;;  %v2708_v24 = vadd.f32 2.0, %v8183_v2  ;;  %7683 = vmatmul.mubr.msk.f32.gmra.mrb[8].mxu1 %vm2921_vm9, %v2907_v62  ;;  %v15563_v62 = vld [vmem:[#allocation44_spill] sm:$0xff] }
 0x3ba   :  { %v2786_v12 = vmul.f32 %v8185_v31, %v2738_v15 }
 0x3bb   :  { %v2724_v40 = vmul.f32 %v8183_v2, %v2708_v24  ;;  %v15562_v2 = vld [vmem:[#allocation35_spill] sm:$0xff] }
 0x3bc   :  { %v8187_v18 = vpop.eup %8186  ;;  %v11192_v26 = vsel %vm2802_vm10, %v11146_v37, %v2786_v12  ;;  %v15564_v12 = vld [vmem:[#allocation37_spill] sm:$0xff] }
 0x3bd   :  { %15555 = vst [vmem:[#allocation153_spill] sm:$0xff] %v11192_v26  ;;  %v8189_v49 = vpop.eup %8188  ;;  %v2756_v30 = vadd.f32 2.0, %v2724_v40  ;;  %v2709_v43 = vadd.f32 2.0, %v8187_v18  ;;  %2862 = vrot.lane.b32.xlu1 %v11192_v26, %s8483_s11  ;;  %v2740_v37 = vmul.f32 %v2724_v40, %v11167_v51  ;;  %v15582_v26 = vld [vmem:[#allocation92_spill] sm:$0xff] }
 0x3be   :  { %v2787_v52 = vmul.f32 %v8189_v49, %v2739_v23  ;;  %v15565_v23 = vld [vmem:[#allocation46_spill] sm:$0xff] }
 0x3bf   :  { %8190 = vrcp.f32 %v2756_v30  ;;  %v2725_v29 = vmul.f32 %v8187_v18, %v2709_v43  ;;  %v15566_v43 = vld [vmem:[#allocation39_spill] sm:$0xff] }
 0x3c0   :  { %v11198_v39 = vsel %vm2803_vm11, %v11153_v44, %v2787_v52 }
 0x3c1   :  { %15556 = vst [vmem:[#allocation154_spill] sm:$0xff] %v11198_v39  ;;  %v2757_v58 = vadd.f32 2.0, %v2725_v29  ;;  %2864 = vrot.lane.b32.xlu0 %v11198_v39, %s8483_s11  ;;  %v2741_v53 = vmul.f32 %v2725_v29, %v2645_v9  ;;  %v15581_v39 = vld [vmem:[#allocation90_spill] sm:$0xff] }
 0x3c3   :  { %8192 = vrcp.f32 %v2757_v58  ;;  %v15567_v58 = vld [vmem:[#allocation47_spill] sm:$0xff] }
 0x3c9   :  { %v8191_v5 = vpop.eup %8190 }
 0x3ca   :  { %v2788_v25 = vmul.f32 %v8191_v5, %v2740_v37 }
 0x3cc   :  { %v11205_v14 = vsel %vm2804_vm12, %v11167_v51, %v2788_v25  ;;  %v15559_v51 = vld [vmem:[#allocation40_spill] sm:$0xff]  ;;  %v15568_v25 = vld [vmem:[#allocation41_spill] sm:$0xff] }
 0x3cd   :  { %15557 = vst [vmem:[#allocation203_spill] sm:$0xff] %v11205_v14  ;;  %v8193_v0 = vpop.eup %8192  ;;  %2866 = vrot.lane.b32.xlu1 %v11205_v14, %s8483_s11  ;;  %v15580_v14 = vld [vmem:[#allocation85_spill] sm:$0xff] }
 0x3ce   :  { %v2789_v44 = vmul.f32 %v8193_v0, %v2741_v53 }
 0x3d0   :  { %v11212_v1 = vsel %vm2805_vm14, %v2645_v9, %v2789_v44  ;;  %v15561_v9 = vld [vmem:[#allocation42_spill] sm:$0xff] }
 0x3d1   :  { %15558 = vst [vmem:[#allocation205_spill] sm:$0xff] %v11212_v1  ;;  %2868 = vrot.lane.b32.xlu0 %v11212_v1, %s8483_s11  ;;  %3190 = vrot.lane.b32.xlu1 %v7422_v46, %s8477_s28 }
 0x3d3   :  { %v2851_v20 = vpop.permute.xlu1 %2850 }
 0x3d4   :  { %v2908_v47 = vsel %vm500_vm1, %v2851_v20, %v15559_v51 }
 0x3d5   :  { %7685 = vmatprep.mubr.msk.f32.mxu1 %vm2921_vm9, %v2908_v47 }
 0x3d7   :  { %v2853_v17 = vpop.permute.xlu0 %2852 }
 0x3d8   :  { %v2909_v22 = vsel %vm500_vm1, %v2853_v17, %v15560_v21 }
 0x3d9   :  { %7686 = vmatmul.mubr.msk.f32.gmra.mrb[10].mxu1 %vm2921_vm9, %v2909_v22 }
 0x3ef   :  { %v2855_v34 = vpop.permute.xlu1 %2854 }
 0x3f0   :  { %v2910_v33 = vsel %vm500_vm1, %v2855_v34, %v15561_v9  ;;  %v15569_v34 = vld [vmem:[#allocation23_spill] sm:$0xff] }
 0x3f1   :  { %7688 = vmatprep.mubr.msk.f32.mxu1 %vm2921_vm9, %v2910_v33  ;;  %v15570_v33 = vld [vmem:[#allocation20_spill] sm:$0xff] }
 0x3f3   :  { %v2857_v38 = vpop.permute.xlu0 %2856 }
 0x3f4   :  { %v2911_v15 = vsel %vm500_vm1, %v2857_v38, %v15562_v2 }
 0x3f5   :  { %7689 = vmatmul.mubr.msk.f32.gmra.mrb[12].mxu1 %vm2921_vm9, %v2911_v15  ;;  %v15571_v15 = vld [vmem:[#allocation24_spill] sm:$0xff] }
 0x40f   :  { %v2859_v27 = vpop.permute.xlu1 %2858 }
 0x410   :  { %v2912_v31 = vsel %vm500_vm1, %v2859_v27, %v15563_v62  ;;  %v15572_v62 = vld [vmem:[#allocation81_spill] sm:$0xff] }
 0x411   :  { %7691 = vmatprep.mubr.msk.f32.mxu1 %vm2921_vm9, %v2912_v31 }
 0x413   :  { %v2861_v24 = vpop.permute.xlu0 %2860 }
 0x414   :  { %v2913_v40 = vsel %vm500_vm1, %v2861_v24, %v15564_v12  ;;  %v15573_v24 = vld [vmem:[#allocation83_spill] sm:$0xff] }
 0x415   :  { %7692 = vmatmul.mubr.msk.f32.gmra.mrb[14].mxu1 %vm2921_vm9, %v2913_v40 }
 0x42f   :  { %v2863_v18 = vpop.permute.xlu1 %2862 }
 0x430   :  { %v2914_v49 = vsel %vm500_vm1, %v2863_v18, %v15565_v23 }
 0x431   :  { %7694 = vmatprep.mubr.msk.f32.mxu1 %vm2921_vm9, %v2914_v49  ;;  %v15575_v49 = vld [vmem:[#allocation84_spill] sm:$0xff] }
 0x433   :  { %v2865_v30 = vpop.permute.xlu0 %2864 }
 0x434   :  { %v2915_v52 = vsel %vm500_vm1, %v2865_v30, %v15566_v43  ;;  %v15576_v43 = vld [vmem:[#allocation87_spill] sm:$0xff] }
 0x435   :  { %7695 = vmatmul.mubr.msk.f32.gmra.mrb[16].mxu1 %vm2921_vm9, %v2915_v52 }
 0x43f   :  { %v2867_v29 = vpop.permute.xlu1 %2866 }
 0x440   :  { %v2916_v37 = vsel %vm500_vm1, %v2867_v29, %v15567_v58 }
 0x441   :  { %7697 = vmatprep.mubr.msk.f32.mxu1 %vm2921_vm9, %v2916_v37  ;;  %v15578_v37 = vld [vmem:[#allocation22_spill] sm:$0xff] }
 0x443   :  { %v2869_v5 = vpop.permute.xlu0 %2868 }
 0x444   :  { %v2917_v53 = vsel %vm500_vm1, %v2869_v5, %v15568_v25 }
 0x445   :  { %7698 = vmatmul.mubr.msk.f32.gmra.mrb[18].mxu1 %vm2921_vm9, %v2917_v53 }
 0x484   :  { %v11247_v0 = vpop.f32.mrb[4].mxu1 }
 0x485   :  { %v3136_v44 = vrot.slane %v11247_v0, 7  ;;  %v11250_v46 = vpop.f32.mrb[5].mxu1 }
 0x486   :  { %v3135_v20 = vrot.slane %v11250_v46, 7 }
 0x488   :  { %v3137_v51 = vsel %vm698_vm2, %v3135_v20, %v3136_v44  ;;  %v3183_v47 = vsel %vm698_vm2, 0.0, %v3135_v20  ;;  %v11255_v17 = vpop.f32.mrb[6].mxu1 }
 0x489   :  { %v3140_v21 = vrot.slane %v11255_v17, 7  ;;  %v11258_v22 = vpop.f32.mrb[7].mxu1  ;;  %v3556_v9 = vmul.f32 %v3183_v47, %v15569_v34  ;;  %v3209_v38 = vmul.f32 %v3183_v47, %v15570_v33  ;;  %v3557_v27 = vmul.f32 %v3137_v51, %v15571_v15  ;;  %v15586_v15 = vld [vmem:[#allocation99_spill] sm:$0xff] }
 0x48a   :  { %v3138_v2 = vrot.slane %v11258_v22, 7  ;;  %v3300_v31 = vmul.f32 %v3183_v47, %v15572_v62  ;;  %v3301_v12 = vmul.f32 %v3137_v51, %v15573_v24  ;;  %v3428_v30 = vmul.f32 %v3183_v47, %v15575_v49  ;;  %v15589_v49 = vld [vmem:[#allocation102_spill] sm:$0xff]  ;;  %v15598_v24 = vld [vmem:[#allocation27_spill] sm:$0xff]  ;;  %v15601_v62 = vld [vmem:[#allocation101_spill] sm:$0xff] }
 0x48b   :  { %3588 = vrot.lane.b32.xlu1 %v3556_v9, %s8478_s1  ;;  %3239 = vrot.lane.b32.xlu0 %v3209_v38, %s8477_s28  ;;  %v11278_v52 = vmul.f32 %v3137_v51, %v15576_v43  ;;  %v3210_v5 = vmul.f32 %v3137_v51, %v15578_v37  ;;  %v3879_v13 = vmul.f32 %v3137_v51, %v15583_v35 }
 0x48c   :  { %v11269_v40 = vsel %vm698_vm2, %v3136_v44, %v3138_v2  ;;  %v11272_v18 = vsel %vm698_vm2, %v3138_v2, %v3140_v21  ;;  %v11274_v23 = vpop.f32.mrb[8].mxu1  ;;  %v3332_v25 = vrot.slane %v3300_v31, 1  ;;  %v3334_v53 = vrot.slane %v3301_v12, 1  ;;  %v15579_v12 = vld [vmem:[#allocation26_spill] sm:$0xff] }
 0x48d   :  { %15574 = vst [vmem:[#allocation133_spill] sm:$0xff] %v11274_v23  ;;  %v15005_v29 = vrot.slane %v11274_v23, 7  ;;  %v11281_v58 = vpop.f32.mrb[9].mxu1  ;;  %v3460_v20 = vrot.slane %v3428_v30, 2  ;;  %v3462_v9 = vrot.slane %v11278_v52, 2  ;;  %v3783_v30 = vmul.f32 %v3137_v51, %v15579_v12 }
 0x48e   :  { %15577 = vst [vmem:[#allocation130_spill] sm:$0xff] %v11281_v58  ;;  %v3142_v44 = vrot.slane %v11281_v58, 7  ;;  %v3335_v38 = vsel %vm1127_vm4, %v3332_v25, %v3334_v53  ;;  %v3652_v52 = vmul.f32 %v3183_v47, %v15580_v14  ;;  %v3880_v12 = vmul.f32 %v11269_v40, %v15585_v56 }
 0x48f   :  { %3590 = vrot.lane.b32.xlu1 %v3557_v27, %s8478_s1  ;;  %3241 = vrot.lane.b32.xlu0 %v3210_v5, %s8477_s28  ;;  %v3463_v31 = vsel %vm533_vm6, %v3460_v20, %v3462_v9  ;;  %v3653_v27 = vmul.f32 %v3137_v51, %v15581_v39  ;;  %v3654_v5 = vmul.f32 %v11269_v40, %v15582_v26  ;;  %v3911_v37 = vrot.slane %v3879_v13, 1  ;;  %v15587_v26 = vld [vmem:[#allocation88_spill] sm:$0xff]  ;;  %v15590_v13 = vld [vmem:[#allocation89_spill] sm:$0xff] }
 0x490   :  { %v11290_v2 = vsel %vm698_vm2, %v3140_v21, %v3142_v44  ;;  %v11295_v1 = vsel %vm698_vm2, %v3142_v44, %v15005_v29  ;;  %v15584_v21 = vld [vmem:[#allocation82_spill] sm:$0xff]  ;;  %v3686_v29 = vrot.slane %v3652_v52, 2  ;;  %v3881_v39 = vmul.f32 %v11272_v18, %v15586_v15  ;;  %v15591_v15 = vld [vmem:[#allocation100_spill] sm:$0xff] }
 0x491   :  { %v3333_v44 = vsel %vm1127_vm4, %v15584_v21, %v3332_v25  ;;  %v3687_v36 = vrot.slane %v3653_v27, 2  ;;  %v3689_v47 = vrot.slane %v3654_v5, 2  ;;  %v3302_v35 = vmul.f32 %v11269_v40, %v15587_v26  ;;  %v15593_v26 = vld [vmem:[#allocation25_spill] sm:$0xff]  ;;  %v15596_v21 = vld [vmem:[#allocation103_spill] sm:$0xff] }
 0x492   :  { %v3912_v14 = vrot.slane %v3880_v12, 1  ;;  %v4008_v25 = vmul.f32 %v11269_v40, %v15589_v49  ;;  %v3914_v27 = vrot.slane %v3881_v39, 1  ;;  %v3303_v56 = vmul.f32 %v11272_v18, %v15590_v13  ;;  %v15592_v13 = vld [vmem:[#allocation93_spill] sm:$0xff] }
 0x493   :  { %3815 = vrot.lane.b32.xlu1 %v3783_v30, %s8479_s29  ;;  %3366 = vrot.lane.b32.xlu0 %v3335_v38, %s8480_s30  ;;  %v3688_v30 = vsel %vm533_vm6, %v3686_v29, %v3687_v36  ;;  %v15588_v38 = vld [vmem:[#allocation97_spill] sm:$0xff]  ;;  %v11319_v52 = vsel %vm533_vm6, %v3687_v36, %v3689_v47  ;;  %v3336_v5 = vrot.slane %v3302_v35, 1  ;;  %v3655_v49 = vmul.f32 %v11272_v18, %v15591_v15 }
 0x494   :  { %v4007_v43 = vmul.f32 %v3137_v51, %v15588_v38  ;;  %v11326_v29 = vsel %vm1127_vm4, %v3911_v37, %v3912_v14  ;;  %v4040_v51 = vrot.slane %v4008_v25, 2  ;;  %v11331_v36 = vsel %vm1127_vm4, %v3912_v14, %v3914_v27  ;;  %v15594_v25 = vld [vmem:[#allocation94_spill] sm:$0xff] }
 0x495   :  { %v11334_v35 = vsel %vm1127_vm4, %v3334_v53, %v3336_v5  ;;  %v3338_v39 = vrot.slane %v3303_v56, 1  ;;  %v3431_v15 = vmul.f32 %v11272_v18, %v15594_v25  ;;  %v15595_v38 = vld [vmem:[#allocation86_spill] sm:$0xff] }
 0x496   :  { %v4039_v12 = vrot.slane %v4007_v43, 2  ;;  %v3691_v43 = vrot.slane %v3655_v49, 2  ;;  %v3461_v14 = vsel %vm533_vm6, %v15595_v38, %v3460_v20  ;;  %v3784_v20 = vmul.f32 %v11269_v40, %v15598_v24  ;;  %v15605_v24 = vld [vmem:[#allocation107_spill] sm:$0xff] }
 0x497   :  { %3364 = vrot.lane.b32.xlu1 %v3333_v44, %s8480_s30  ;;  %3494 = vrot.lane.b32.xlu0 %v3463_v31, %s8481_s0  ;;  %v3430_v44 = vmul.f32 %v11269_v40, %v15592_v13  ;;  %v3211_v31 = vmul.f32 %v11269_v40, %v15593_v26  ;;  %v11348_v53 = vsel %vm1127_vm4, %v3336_v5, %v3338_v39  ;;  %v3466_v25 = vrot.slane %v3431_v15, 2  ;;  %v15599_v5 = vld [vmem:[#allocation43_spill] sm:$0xff]  ;;  %v15602_v15 = vld [vmem:[#allocation106_spill] sm:$0xff] }
 0x498   :  { %v11341_v37 = vsel %vm533_vm6, %v4039_v12, %v4040_v51  ;;  %v4009_v13 = vmul.f32 %v11272_v18, %v15596_v21  ;;  %v15597_v12 = vld [vmem:[#allocation29_spill] sm:$0xff]  ;;  %v11357_v26 = vsel %vm533_vm6, %v3689_v47, %v3691_v43  ;;  %v3304_v47 = vmul.f32 %v11290_v2, %v15601_v62 }
 0x499   :  { %v3464_v56 = vrot.slane %v3430_v44, 2  ;;  %v3558_v49 = vmul.f32 %v11269_v40, %v15597_v12  ;;  %v3559_v44 = vmul.f32 %v11272_v18, %v15599_v5  ;;  %v3882_v33 = vmul.f32 %v11290_v2, %v15602_v15  ;;  %v15603_v5 = vld [vmem:[#allocation105_spill] sm:$0xff] }
 0x49a   :  { %v4042_v21 = vrot.slane %v4009_v13, 2  ;;  %v15604_v13 = vld [vmem:[#allocation114_spill] sm:$0xff]  ;;  %v3340_v15 = vrot.slane %v3304_v47, 1 }
 0x49b   :  { %3492 = vrot.lane.b32.xlu1 %v3461_v14, %s8481_s0  ;;  %3243 = vrot.lane.b32.xlu0 %v3211_v31, %s8477_s28  ;;  %v11364_v38 = vsel %vm533_vm6, %v3462_v9, %v3464_v56  ;;  %v11367_v14 = vsel %vm533_vm6, %v3464_v56, %v3466_v25  ;;  %v15600_v31 = vld [vmem:[#allocation104_spill] sm:$0xff]  ;;  %v11380_v9 = vmul.f32 %v11295_v1, %v15603_v5  ;;  %v3916_v34 = vrot.slane %v3882_v33, 1 }
 0x49c   :  { %v3656_v12 = vmul.f32 %v11290_v2, %v15600_v31  ;;  %v11376_v40 = vsel %vm533_vm6, %v4040_v51, %v4042_v21  ;;  %v11384_v56 = vmul.f32 %v11295_v1, %v15604_v13  ;;  %v3432_v31 = vmul.f32 %v11290_v2, %v15605_v24  ;;  %v15606_v51 = vld [vmem:[#allocation115_spill] sm:$0xff]  ;;  %v15607_v13 = vld [vmem:[#allocation108_spill] sm:$0xff] }
 0x49d   :  { %v4010_v61 = vmul.f32 %v11290_v2, %v15606_v51  ;;  %v3342_v5 = vrot.slane %v11380_v9, 1  ;;  %v3433_v55 = vmul.f32 %v11295_v1, %v15607_v13 }
 0x49e   :  { %v3693_v62 = vrot.slane %v3656_v12, 2  ;;  %v3918_v19 = vrot.slane %v11384_v56, 1  ;;  %v3468_v8 = vrot.slane %v3432_v31, 2  ;;  %v11403_v12 = vsel %vm1127_vm4, %v3914_v27, %v3916_v34  ;;  %v15608_v27 = vld [vmem:[#allocation116_spill] sm:$0xff] }
 0x49f   :  { %3719 = vrot.lane.b32.xlu1 %v3688_v30, %s8476_s16  ;;  %3592 = vrot.lane.b32.xlu0 %v3558_v49, %s8478_s1  ;;  %v11400_v30 = vsel %vm1127_vm4, %v3338_v39, %v3340_v15  ;;  %v4044_v33 = vrot.slane %v4010_v61, 2  ;;  %v11406_v49 = vsel %vm1127_vm4, %v3340_v15, %v3342_v5  ;;  %v3470_v9 = vrot.slane %v3433_v55, 2  ;;  %v15610_v56 = vld [vmem:[#allocation32_spill] sm:$0xff] }
 0x4a0   :  { %v11397_v24 = vsel %vm533_vm6, %v3691_v43, %v3693_v62  ;;  %v11409_v47 = vsel %vm1127_vm4, %v3916_v34, %v3918_v19  ;;  %v11412_v31 = vsel %vm533_vm6, %v3466_v25, %v3468_v8  ;;  %v4011_v61 = vmul.f32 %v11295_v1, %v15608_v27  ;;  %v15609_v43 = vld [vmem:[#allocation110_spill] sm:$0xff] }
 0x4a1   :  { %v11417_v39 = vsel %vm533_vm6, %v4042_v21, %v4044_v33  ;;  %v3657_v15 = vmul.f32 %v11295_v1, %v15609_v43  ;;  %v11424_v34 = vsel %vm533_vm6, %v3468_v8, %v3470_v9  ;;  %v3212_v25 = vmul.f32 %v11272_v18, %v15610_v56  ;;  %v15616_v56 = vld [vmem:[#allocation112_spill] sm:$0xff] }
 0x4a2   :  { %v4046_v55 = vrot.slane %v4011_v61, 2 }
 0x4a3   :  { %3817 = vrot.lane.b32.xlu1 %v3784_v20, %s8479_s29  ;;  %3594 = vrot.lane.b32.xlu0 %v3559_v44, %s8478_s1  ;;  %v3695_v13 = vrot.slane %v3657_v15, 2  ;;  %v15611_v44 = vld [vmem:[#allocation49_spill] sm:$0xff] }
 0x4a4   :  { %v11432_v21 = vsel %vm533_vm6, %v4044_v33, %v4046_v55  ;;  %v3785_v8 = vmul.f32 %v11272_v18, %v15611_v44 }
 0x4a5   :  { %v11435_v20 = vsel %vm533_vm6, %v3693_v62, %v3695_v13  ;;  %v15614_v62 = vrot.slane %v11274_v23, 7  ;;  %v15685_v23 = vld [vmem:[#allocation168_spill] sm:$0xff] }
 0x4a7   :  { %3721 = vrot.lane.b32.xlu1 %v11319_v52, %s8476_s16  ;;  %3245 = vrot.lane.b32.xlu0 %v3212_v25, %s8477_s28  ;;  %v15615_v25 = vld [vmem:[#allocation111_spill] sm:$0xff] }
 0x4ab   :  { %3943 = vrot.lane.b32.xlu1 %v11326_v29, %s8482_s2  ;;  %3819 = vrot.lane.b32.xlu0 %v3785_v8, %s8479_s29 }
 0x4ac   :  { %v11442_v61 = vpop.f32.mrb[10].mxu1 }
 0x4ad   :  { %15612 = vst [vmem:[#allocation137_spill] sm:$0xff] %v11442_v61  ;;  %v3148_v52 = vrot.slane %v11442_v61, 7  ;;  %v11445_v15 = vpop.f32.mrb[11].mxu1 }
 0x4ae   :  { %15613 = vst [vmem:[#allocation135_spill] sm:$0xff] %v11445_v15  ;;  %v3146_v33 = vrot.slane %v11445_v15, 7 }
 0x4af   :  { %3945 = vrot.lane.b32.xlu1 %v11331_v36, %s8482_s2  ;;  %3368 = vrot.lane.b32.xlu0 %v11334_v35, %s8480_s30  ;;  %v15617_v36 = vld [vmem:[#allocation122_spill] sm:$0xff] }
 0x4b0   :  { %v11455_v18 = vsel %vm698_vm2, %v15614_v62, %v3146_v33  ;;  %v11458_v29 = vsel %vm698_vm2, %v3146_v33, %v3148_v52  ;;  %v15618_v62 = vld [vmem:[#allocation113_spill] sm:$0xff]  ;;  %v15619_v33 = vld [vmem:[#allocation123_spill] sm:$0xff] }
 0x4b1   :  { %v3658_v8 = vmul.f32 %v11455_v18, %v15615_v25  ;;  %v3306_v44 = vmul.f32 %v11455_v18, %v15616_v56  ;;  %v3884_v35 = vmul.f32 %v11455_v18, %v15617_v36  ;;  %v11472_v43 = vmul.f32 %v11458_v29, %v15618_v62  ;;  %v15620_v56 = vld [vmem:[#allocation119_spill] sm:$0xff] }
 0x4b2   :  { %v11476_v27 = vmul.f32 %v11458_v29, %v15619_v33  ;;  %v3434_v59 = vmul.f32 %v11455_v18, %v15620_v56  ;;  %v11486_v62 = vmul.f32 %v11458_v29, %v15622_v63  ;;  %v15625_v63 = vld [vmem:[#allocation45_spill] sm:$0xff] }
 0x4b3   :  { %4071 = vrot.lane.b32.xlu1 %v11341_v37, %s8483_s11  ;;  %3370 = vrot.lane.b32.xlu0 %v11348_v53, %s8480_s30  ;;  %v3697_v25 = vrot.slane %v3658_v8, 2  ;;  %v3344_v51 = vrot.slane %v3306_v44, 1  ;;  %v15621_v37 = vld [vmem:[#allocation117_spill] sm:$0xff]  ;;  %v3920_v53 = vrot.slane %v3884_v35, 1  ;;  %v3346_v4 = vrot.slane %v11472_v43, 1 }
 0x4b4   :  { %v4012_v50 = vmul.f32 %v11455_v18, %v15621_v37  ;;  %v15016_v36 = vrot.slane %v11476_v27, 1  ;;  %v3472_v8 = vrot.slane %v3434_v59, 2  ;;  %v3474_v59 = vrot.slane %v11486_v62, 2 }
 0x4b5   :  { %v11489_v33 = vsel %vm533_vm6, %v3695_v13, %v3697_v25  ;;  %v11492_v44 = vsel %vm1127_vm4, %v3342_v5, %v3344_v51  ;;  %v11499_v43 = vsel %vm1127_vm4, %v3918_v19, %v3920_v53  ;;  %v11502_v35 = vsel %vm1127_vm4, %v3344_v51, %v3346_v4  ;;  %v15624_v5 = vld [vmem:[#allocation124_spill] sm:$0xff] }
 0x4b6   :  { %v4048_v56 = vrot.slane %v4012_v50, 2  ;;  %v11507_v13 = vsel %vm1127_vm4, %v3920_v53, %v15016_v36  ;;  %v11511_v50 = vsel %vm533_vm6, %v3470_v9, %v3472_v8  ;;  %v3659_v51 = vmul.f32 %v11458_v29, %v15624_v5  ;;  %v15626_v5 = vld [vmem:[#allocation48_spill] sm:$0xff] }
 0x4b7   :  { %3723 = vrot.lane.b32.xlu1 %v11357_v26, %s8476_s16  ;;  %3496 = vrot.lane.b32.xlu0 %v11364_v38, %s8481_s0  ;;  %v15623_v38 = vld [vmem:[#allocation118_spill] sm:$0xff]  ;;  %v3213_v37 = vmul.f32 %v11290_v2, %v15625_v63  ;;  %v11523_v53 = vsel %vm533_vm6, %v3472_v8, %v3474_v59 }
 0x4b8   :  { %v11514_v26 = vsel %vm533_vm6, %v4046_v55, %v4048_v56  ;;  %v4013_v19 = vmul.f32 %v11458_v29, %v15623_v38  ;;  %v3699_v62 = vrot.slane %v3659_v51, 2  ;;  %v3560_v38 = vmul.f32 %v11290_v2, %v15626_v5  ;;  %v15627_v8 = vld [vmem:[#allocation50_spill] sm:$0xff]  ;;  %v15630_v51 = vld [vmem:[#allocation53_spill] sm:$0xff] }
 0x4b9   :  { %v3214_v5 = vmul.f32 %v11295_v1, %v15630_v51  ;;  %v15634_v51 = vld [vmem:[#allocation128_spill] sm:$0xff] }
 0x4ba   :  { %v4050_v36 = vrot.slane %v4013_v19, 2  ;;  %v11532_v55 = vsel %vm533_vm6, %v3697_v25, %v3699_v62  ;;  %v3786_v19 = vmul.f32 %v11290_v2, %v15627_v8 }
 0x4bb   :  { %3498 = vrot.lane.b32.xlu0 %v11367_v14, %s8481_s0  ;;  %3247 = vrot.lane.b32.xlu1 %v3213_v37, %s8477_s28  ;;  %v15628_v14 = vld [vmem:[#allocation52_spill] sm:$0xff] }
 0x4bc   :  { %v11529_v9 = vsel %vm533_vm6, %v4048_v56, %v4050_v36  ;;  %v3561_v37 = vmul.f32 %v11295_v1, %v15628_v14  ;;  %v15629_v56 = vld [vmem:[#allocation51_spill] sm:$0xff] }
 0x4bd   :  { %v3787_v25 = vmul.f32 %v11295_v1, %v15629_v56 }
 0x4bf   :  { %4073 = vrot.lane.b32.xlu0 %v11376_v40, %s8483_s11  ;;  %3596 = vrot.lane.b32.xlu1 %v3560_v38, %s8478_s1 }
 0x4c3   :  { %3821 = vrot.lane.b32.xlu0 %v3786_v19, %s8479_s29  ;;  %3598 = vrot.lane.b32.xlu1 %v3561_v37, %s8478_s1  ;;  %v15633_v37 = vld [vmem:[#allocation126_spill] sm:$0xff] }
 0x4c7   :  { %3823 = vrot.lane.b32.xlu0 %v3787_v25, %s8479_s29  ;;  %3249 = vrot.lane.b32.xlu1 %v3214_v5, %s8477_s28 }
 0x4c8   :  { %v11551_v40 = vpop.f32.mrb[12].mxu1 }
 0x4c9   :  { %15631 = vst [vmem:[#allocation67_spill] sm:$0xff] %v11551_v40  ;;  %v15017_v2 = vrot.slane %v11551_v40, 7  ;;  %v11554_v38 = vpop.f32.mrb[13].mxu1 }
 0x4ca   :  { %15632 = vst [vmem:[#allocation80_spill] sm:$0xff] %v11554_v38  ;;  %v3150_v19 = vrot.slane %v11554_v38, 7 }
 0x4cb   :  { %3725 = vrot.lane.b32.xlu0 %v11397_v24, %s8476_s16  ;;  %3372 = vrot.lane.b32.xlu1 %v11400_v30, %s8480_s30  ;;  %v15635_v24 = vld [vmem:[#allocation71_spill] sm:$0xff] }
 0x4cc   :  { %v11562_v1 = vsel %vm698_vm2, %v3148_v52, %v3150_v19  ;;  %v11567_v5 = vsel %vm698_vm2, %v3150_v19, %v15017_v2  ;;  %v15636_v52 = vld [vmem:[#allocation129_spill] sm:$0xff]  ;;  %v15637_v19 = vld [vmem:[#allocation134_spill] sm:$0xff] }
 0x4cd   :  { %v3660_v25 = vmul.f32 %v11562_v1, %v15633_v37  ;;  %v3308_v56 = vmul.f32 %v11562_v1, %v15634_v51  ;;  %v3886_v30 = vmul.f32 %v11562_v1, %v15635_v24  ;;  %v11581_v14 = vmul.f32 %v11567_v5, %v15636_v52  ;;  %v15638_v51 = vld [vmem:[#allocation131_spill] sm:$0xff] }
 0x4ce   :  { %v11585_v2 = vmul.f32 %v11567_v5, %v15637_v19  ;;  %v3436_v63 = vmul.f32 %v11562_v1, %v15638_v51  ;;  %v11595_v52 = vmul.f32 %v11567_v5, %v15640_v41  ;;  %v15644_v41 = vld [vmem:[#allocation66_spill] sm:$0xff] }
 0x4cf   :  { %3947 = vrot.lane.b32.xlu0 %v11403_v12, %s8482_s2  ;;  %3374 = vrot.lane.b32.xlu1 %v11406_v49, %s8480_s30  ;;  %v3701_v37 = vrot.slane %v3660_v25, 2  ;;  %v3348_v8 = vrot.slane %v3308_v56, 1  ;;  %v15639_v12 = vld [vmem:[#allocation125_spill] sm:$0xff]  ;;  %v3924_v49 = vrot.slane %v3886_v30, 1  ;;  %v15023_v11 = vrot.slane %v11581_v14, 1 }
 0x4d0   :  { %v4014_v38 = vmul.f32 %v11562_v1, %v15639_v12  ;;  %v3476_v25 = vrot.slane %v3436_v63, 2  ;;  %v15641_v30 = vrot.slane %v11476_v27, 1  ;;  %v15643_v27 = vld [vmem:[#allocation127_spill] sm:$0xff] }
 0x4d1   :  { %v11598_v19 = vsel %vm533_vm6, %v3699_v62, %v3701_v37  ;;  %v11601_v56 = vsel %vm1127_vm4, %v3346_v4, %v3348_v8  ;;  %v11615_v62 = vsel %vm1127_vm4, %v3348_v8, %v15023_v11  ;;  %v15642_v4 = vrot.slane %v11585_v2, 1 }
 0x4d2   :  { %v4052_v51 = vrot.slane %v4014_v38, 2  ;;  %v11610_v24 = vsel %vm1127_vm4, %v15641_v30, %v3924_v49  ;;  %v11624_v38 = vsel %vm533_vm6, %v3474_v59, %v3476_v25  ;;  %v4015_v30 = vmul.f32 %v11567_v5, %v15643_v27 }
 0x4d3   :  { %3949 = vrot.lane.b32.xlu0 %v11409_v47, %s8482_s2  ;;  %3500 = vrot.lane.b32.xlu1 %v11412_v31, %s8481_s0  ;;  %v11620_v63 = vsel %vm1127_vm4, %v3924_v49, %v15642_v4  ;;  %v3478_v47 = vrot.slane %v11595_v52, 2  ;;  %v3661_v8 = vmul.f32 %v11567_v5, %v15644_v41  ;;  %v15645_v52 = vld [vmem:[#allocation55_spill] sm:$0xff] }
 0x4d4   :  { %v11627_v31 = vsel %vm533_vm6, %v4050_v36, %v4052_v51  ;;  %v4054_v12 = vrot.slane %v4015_v30, 2  ;;  %v3215_v4 = vmul.f32 %v11455_v18, %v15645_v52 }
 0x4d5   :  { %v11634_v11 = vsel %vm533_vm6, %v3476_v25, %v3478_v47  ;;  %v3703_v49 = vrot.slane %v3661_v8, 2  ;;  %v15646_v25 = vld [vmem:[#allocation56_spill] sm:$0xff] }
 0x4d6   :  { %v11641_v36 = vsel %vm533_vm6, %v4052_v51, %v4054_v12 }
 0x4d7   :  { %4075 = vrot.lane.b32.xlu0 %v11417_v39, %s8483_s11  ;;  %3502 = vrot.lane.b32.xlu1 %v11424_v34, %s8481_s0  ;;  %v11644_v59 = vsel %vm533_vm6, %v3701_v37, %v3703_v49  ;;  %v3562_v39 = vmul.f32 %v11455_v18, %v15646_v25  ;;  %v15647_v34 = vld [vmem:[#allocation54_spill] sm:$0xff]  ;;  %v15648_v37 = vld [vmem:[#allocation57_spill] sm:$0xff] }
 0x4d8   :  { %v3788_v51 = vmul.f32 %v11455_v18, %v15647_v34  ;;  %v3563_v30 = vmul.f32 %v11458_v29, %v15648_v37 }
 0x4db   :  { %4077 = vrot.lane.b32.xlu0 %v11432_v21, %s8483_s11  ;;  %3251 = vrot.lane.b32.xlu1 %v3215_v4, %s8477_s28  ;;  %v15649_v21 = vld [vmem:[#allocation60_spill] sm:$0xff]  ;;  %v15650_v4 = vld [vmem:[#allocation58_spill] sm:$0xff] }
 0x4dc   :  { %v3789_v8 = vmul.f32 %v11458_v29, %v15649_v21  ;;  %v3216_v25 = vmul.f32 %v11458_v29, %v15650_v4  ;;  %v15653_v29 = vrot.slane %v11551_v40, 7  ;;  %v15655_v21 = vld [vmem:[#allocation140_spill] sm:$0xff]  ;;  %v15661_v40 = vld [vmem:[#allocation143_spill] sm:$0xff] }
 0x4df   :  { %3727 = vrot.lane.b32.xlu0 %v11435_v20, %s8476_s16  ;;  %3600 = vrot.lane.b32.xlu1 %v3562_v39, %s8478_s1 }
 0x4e3   :  { %3825 = vrot.lane.b32.xlu0 %v3788_v51, %s8479_s29  ;;  %3602 = vrot.lane.b32.xlu1 %v3563_v30, %s8478_s1 }
 0x4e7   :  { %3827 = vrot.lane.b32.xlu0 %v3789_v8, %s8479_s29  ;;  %3253 = vrot.lane.b32.xlu1 %v3216_v25, %s8477_s28  ;;  %v15654_v8 = vld [vmem:[#allocation138_spill] sm:$0xff] }
 0x4e8   :  { %v11668_v20 = vpop.f32.mrb[14].mxu1 }
 0x4e9   :  { %15651 = vst [vmem:[#allocation166_spill] sm:$0xff] %v11668_v20  ;;  %v15024_v18 = vrot.slane %v11668_v20, 7  ;;  %v11671_v39 = vpop.f32.mrb[15].mxu1 }
 0x4ea   :  { %15652 = vst [vmem:[#allocation65_spill] sm:$0xff] %v11671_v39  ;;  %v3154_v51 = vrot.slane %v11671_v39, 7 }
 0x4eb   :  { %3729 = vrot.lane.b32.xlu0 %v11489_v33, %s8476_s16  ;;  %3376 = vrot.lane.b32.xlu1 %v11492_v44, %s8480_s30  ;;  %v15656_v33 = vld [vmem:[#allocation144_spill] sm:$0xff] }
 0x4ec   :  { %v11681_v30 = vsel %vm698_vm2, %v15653_v29, %v3154_v51  ;;  %v11686_v25 = vsel %vm698_vm2, %v3154_v51, %v15024_v18  ;;  %v15657_v29 = vld [vmem:[#allocation141_spill] sm:$0xff] }
 0x4ed   :  { %v3662_v4 = vmul.f32 %v11681_v30, %v15654_v8  ;;  %v3310_v37 = vmul.f32 %v11681_v30, %v15655_v21  ;;  %v3888_v44 = vmul.f32 %v11681_v30, %v15656_v33  ;;  %v11700_v34 = vmul.f32 %v11686_v25, %v15657_v29  ;;  %v15658_v51 = vld [vmem:[#allocation145_spill] sm:$0xff]  ;;  %v15659_v21 = vld [vmem:[#allocation142_spill] sm:$0xff] }
 0x4ee   :  { %v11704_v18 = vmul.f32 %v11686_v25, %v15658_v51  ;;  %v3438_v41 = vmul.f32 %v11681_v30, %v15659_v21  ;;  %v11714_v29 = vmul.f32 %v11686_v25, %v15661_v40  ;;  %v15674_v40 = vld [vmem:[#allocation70_spill] sm:$0xff] }
 0x4ef   :  { %3951 = vrot.lane.b32.xlu0 %v11499_v43, %s8482_s2  ;;  %3378 = vrot.lane.b32.xlu1 %v11502_v35, %s8480_s30  ;;  %v3705_v8 = vrot.slane %v3662_v4, 2  ;;  %v3352_v52 = vrot.slane %v3310_v37, 1  ;;  %v15660_v43 = vld [vmem:[#allocation136_spill] sm:$0xff]  ;;  %v3928_v35 = vrot.slane %v3888_v44, 1  ;;  %v15029_v39 = vrot.slane %v11700_v34, 1 }
 0x4f0   :  { %v4016_v27 = vmul.f32 %v11681_v30, %v15660_v43  ;;  %v15662_v37 = vrot.slane %v11581_v14, 1  ;;  %v3480_v21 = vrot.slane %v3438_v41, 2  ;;  %v15663_v44 = vrot.slane %v11585_v2, 1  ;;  %v15665_v2 = vld [vmem:[#allocation139_spill] sm:$0xff] }
 0x4f1   :  { %v11717_v51 = vsel %vm533_vm6, %v3703_v49, %v3705_v8  ;;  %v11736_v14 = vsel %vm1127_vm4, %v3352_v52, %v15029_v39  ;;  %v15664_v49 = vrot.slane %v11704_v18, 1  ;;  %v3218_v61 = vmul.f32 %v11567_v5, %v15674_v40 }
 0x4f2   :  { %v11722_v4 = vsel %vm1127_vm4, %v15662_v37, %v3352_v52  ;;  %v4056_v28 = vrot.slane %v4016_v27, 2  ;;  %v11731_v33 = vsel %vm1127_vm4, %v15663_v44, %v3928_v35  ;;  %v11745_v27 = vsel %vm533_vm6, %v3478_v47, %v3480_v21  ;;  %v15666_v44 = vld [vmem:[#allocation146_spill] sm:$0xff] }
 0x4f3   :  { %3953 = vrot.lane.b32.xlu0 %v11507_v13, %s8482_s2  ;;  %3504 = vrot.lane.b32.xlu1 %v11511_v50, %s8481_s0  ;;  %v11741_v41 = vsel %vm1127_vm4, %v3928_v35, %v15664_v49  ;;  %v15030_v13 = vrot.slane %v11714_v29, 2  ;;  %v11752_v37 = vmul.f32 %v11686_v25, %v15665_v2  ;;  %v3663_v52 = vmul.f32 %v11686_v25, %v15666_v44  ;;  %v11774_v44 = vpop.permute.xlu1 %3190 }
 0x4f4   :  { %v11748_v50 = vsel %vm533_vm6, %v4054_v12, %v4056_v28 }
 0x4f5   :  { %v11759_v35 = vsel %vm533_vm6, %v3480_v21, %v15030_v13  ;;  %v15031_v49 = vrot.slane %v11752_v37, 2  ;;  %v3707_v39 = vrot.slane %v3663_v52, 2  ;;  %v15667_v21 = vld [vmem:[#allocation59_spill] sm:$0xff]  ;;  %v15668_v52 = vld [vmem:[#allocation64_spill] sm:$0xff] }
 0x4f6   :  { %v3217_v13 = vmul.f32 %v11562_v1, %v15667_v21  ;;  %v15670_v21 = vld [vmem:[#allocation61_spill] sm:$0xff] }
 0x4f7   :  { %4079 = vrot.lane.b32.xlu0 %v11514_v26, %s8483_s11  ;;  %3506 = vrot.lane.b32.xlu1 %v11523_v53, %s8481_s0  ;;  %v11769_v12 = vsel %vm533_vm6, %v4056_v28, %v15031_v49  ;;  %v11772_v47 = vsel %vm533_vm6, %v3705_v8, %v3707_v39  ;;  %v3564_v28 = vmul.f32 %v11562_v1, %v15668_v52 }
 0x4fb   :  { %4081 = vrot.lane.b32.xlu0 %v11529_v9, %s8483_s11  ;;  %3255 = vrot.lane.b32.xlu1 %v3217_v13, %s8477_s28  ;;  %v3790_v9 = vmul.f32 %v11562_v1, %v15670_v21  ;;  %v15671_v13 = vld [vmem:[#allocation69_spill] sm:$0xff] }
 0x4fc   :  { %v3565_v2 = vmul.f32 %v11567_v5, %v15671_v13 }
 0x4fd   :  { %v11781_v26 = vpop.permute.xlu1 %3588  ;;  %v11783_v53 = vpop.permute.xlu0 %3239 }
 0x4ff   :  { %3731 = vrot.lane.b32.xlu0 %v11532_v55, %s8476_s16  ;;  %3604 = vrot.lane.b32.xlu1 %v3564_v28, %s8478_s1  ;;  %v15673_v55 = vld [vmem:[#allocation73_spill] sm:$0xff] }
 0x500   :  { %v3791_v28 = vmul.f32 %v11567_v5, %v15673_v55 }
 0x501   :  { %v11790_v8 = vpop.permute.xlu1 %3590  ;;  %v11792_v49 = vpop.permute.xlu0 %3241 }
 0x502   :  { %15669 = vst [vmem:[#allocation169_spill] sm:$0xff] %v11790_v8 }
 0x503   :  { %3829 = vrot.lane.b32.xlu0 %v3790_v9, %s8479_s29  ;;  %3606 = vrot.lane.b32.xlu1 %v3565_v2, %s8478_s1 }
 0x505   :  { %v11800_v52 = vpop.permute.xlu1 %3815  ;;  %v11802_v43 = vpop.permute.xlu0 %3366 }
 0x506   :  { %15672 = vst [vmem:[#allocation63_spill] sm:$0xff] %v11800_v52 }
 0x507   :  { %3831 = vrot.lane.b32.xlu0 %v3791_v28, %s8479_s29  ;;  %3257 = vrot.lane.b32.xlu1 %v3218_v61, %s8477_s28  ;;  %v15677_v61 = vrot.slane %v11668_v20, 7  ;;  %v15682_v20 = vld [vmem:[#allocation170_spill] sm:$0xff] }
 0x508   :  { %v11810_v1 = vpop.f32.mrb[16].mxu1 }
 0x509   :  { %15675 = vst [vmem:[#allocation209_spill] sm:$0xff] %v11810_v1  ;;  %v3160_v9 = vrot.slane %v11810_v1, 7  ;;  %v11813_v13 = vpop.permute.xlu1 %3364  ;;  %v11815_v2 = vpop.f32.mrb[17].mxu1  ;;  %v15680_v1 = vld [vmem:[#allocation98_spill] sm:$0xff] }
 0x50a   :  { %15676 = vst [vmem:[#allocation210_spill] sm:$0xff] %v11815_v2  ;;  %v3158_v21 = vrot.slane %v11815_v2, 7  ;;  %v11818_v15 = vpop.permute.xlu0 %3494  ;;  %v15681_v2 = vld [vmem:[#allocation164_spill] sm:$0xff] }
 0x50b   :  { %3733 = vrot.lane.b32.xlu0 %v11598_v19, %s8476_s16  ;;  %3380 = vrot.lane.b32.xlu1 %v11601_v56, %s8480_s30  ;;  %v15679_v19 = vld [vmem:[#allocation163_spill] sm:$0xff] }
 0x50c   :  { %v11827_v5 = vsel %vm698_vm2, %v15677_v61, %v3158_v21  ;;  %v11830_v28 = vsel %vm698_vm2, %v3158_v21, %v3160_v9 }
 0x50d   :  { %v11832_v40 = vpop.permute.xlu1 %3492  ;;  %v3312_v56 = vmul.f32 %v11827_v5, %v15679_v19  ;;  %v3664_v61 = vmul.f32 %v11827_v5, %v15680_v1  ;;  %v11846_v21 = vmul.f32 %v11830_v28, %v15681_v2  ;;  %v3890_v7 = vmul.f32 %v11827_v5, %v15682_v20 }
 0x50e   :  { %v11834_v55 = vpop.permute.xlu0 %3243  ;;  %v3440_v60 = vmul.f32 %v11827_v5, %v15683_v3  ;;  %v11856_v19 = vmul.f32 %v11830_v28, %v15684_v10  ;;  %v11860_v1 = vmul.f32 %v11830_v28, %v15685_v23  ;;  %v15701_v3 = vld [vmem:[#allocation162_spill] sm:$0xff] }
 0x50f   :  { %15678 = vst [vmem:[#allocation211_spill] sm:$0xff] %v11834_v55  ;;  %3955 = vrot.lane.b32.xlu0 %v11610_v24, %s8482_s2  ;;  %3382 = vrot.lane.b32.xlu1 %v11615_v62, %s8480_s30  ;;  %v3356_v6 = vrot.slane %v3312_v56, 1  ;;  %v3709_v62 = vrot.slane %v3664_v61, 2  ;;  %v3932_v20 = vrot.slane %v3890_v7, 1  ;;  %v15687_v56 = vrot.slane %v11700_v34, 1  ;;  %v15730_v55 = vld [vmem:[#allocation158_spill] sm:$0xff] }
 0x510   :  { %v3484_v58 = vrot.slane %v3440_v60, 2  ;;  %v15039_v10 = vrot.slane %v11856_v19, 1  ;;  %v15690_v7 = vrot.slane %v11846_v21, 1  ;;  %v15694_v34 = vrot.slane %v11714_v29, 2 }
 0x511   :  { %v11852_v24 = vpop.permute.xlu1 %3719  ;;  %v11872_v61 = vsel %vm1127_vm4, %v15687_v56, %v3356_v6  ;;  %v11875_v23 = vsel %vm533_vm6, %v3707_v39, %v3709_v62  ;;  %v11910_v29 = vmul.f32 %v11830_v28, %v15701_v3 }
 0x512   :  { %v11862_v2 = vpop.permute.xlu0 %3592  ;;  %15688 = vst [vmem:[#allocation167_spill] sm:$0xff] %v11872_v61  ;;  %15689 = vst [vmem:[#allocation214_spill] sm:$0xff] %v11875_v23  ;;  %v11882_v60 = vsel %vm1127_vm4, %v3356_v6, %v15690_v7  ;;  %v11892_v56 = vsel %vm533_vm6, %v15694_v34, %v3484_v58  ;;  %v11899_v45 = vsel %vm1127_vm4, %v3932_v20, %v15039_v10  ;;  %v15698_v6 = vrot.slane %v11860_v1, 2 }
 0x513   :  { %15686 = vst [vmem:[#allocation212_spill] sm:$0xff] %v11862_v2  ;;  %3957 = vrot.lane.b32.xlu0 %v11620_v63, %s8482_s2  ;;  %3508 = vrot.lane.b32.xlu1 %v11624_v38, %s8481_s0  ;;  %15691 = vst [vmem:[#allocation77_spill] sm:$0xff] %v11882_v60  ;;  %v15692_v63 = vrot.slane %v11704_v18, 1  ;;  %v15700_v18 = vld [vmem:[#allocation161_spill] sm:$0xff] }
 0x514   :  { %15695 = vst [vmem:[#allocation216_spill] sm:$0xff] %v11892_v56  ;;  %15697 = vst [vmem:[#allocation74_spill] sm:$0xff] %v11899_v45  ;;  %v11904_v7 = vsel %vm533_vm6, %v3484_v58, %v15698_v6  ;;  %v15703_v56 = vld [vmem:[#allocation185_spill] sm:$0xff]  ;;  %v15707_v45 = vld [vmem:[#allocation72_spill] sm:$0xff] }
 0x515   :  { %v11887_v38 = vsel %vm1127_vm4, %v15692_v63, %v3932_v20  ;;  %v11894_v39 = vpop.permute.xlu1 %3817  ;;  %15699 = vst [vmem:[#allocation217_spill] sm:$0xff] %v11904_v7  ;;  %v4018_v63 = vmul.f32 %v11827_v5, %v15700_v18  ;;  %v15041_v20 = vrot.slane %v11910_v29, 2  ;;  %v15725_v60 = vld [vmem:[#allocation181_spill] sm:$0xff] }
 0x516   :  { %15693 = vst [vmem:[#allocation215_spill] sm:$0xff] %v11887_v38  ;;  %15696 = vst [vmem:[#allocation177_spill] sm:$0xff] %v11894_v39  ;;  %v11912_v34 = vpop.permute.xlu0 %3594  ;;  %v3665_v39 = vmul.f32 %v11830_v28, %v15703_v56  ;;  %v3219_v56 = vmul.f32 %v11681_v30, %v15707_v45  ;;  %v15715_v45 = vld [vmem:[#allocation75_spill] sm:$0xff] }
 0x517   :  { %15702 = vst [vmem:[#allocation201_spill] sm:$0xff] %v11912_v34  ;;  %4083 = vrot.lane.b32.xlu0 %v11627_v31, %s8483_s11  ;;  %3510 = vrot.lane.b32.xlu1 %v11634_v11, %s8481_s0  ;;  %v4060_v58 = vrot.slane %v4018_v63, 2  ;;  %v15708_v31 = vrot.slane %v11752_v37, 2 }
 0x518   :  { %v11921_v6 = vpop.f32.mrb[18].mxu1  ;;  %v3711_v10 = vrot.slane %v3665_v39, 2 }
 0x519   :  { %15704 = vst [vmem:[#allocation157_spill] sm:$0xff] %v11921_v6  ;;  %v3164_v3 = vrot.slane %v11921_v6, 7  ;;  %v11924_v18 = vpop.permute.xlu1 %3721  ;;  %v11926_v7 = vpop.f32.mrb[19].mxu1  ;;  %v11933_v34 = vsel %vm533_vm6, %v15708_v31, %v4060_v58  ;;  %v11938_v11 = vsel %vm533_vm6, %v4060_v58, %v15041_v20  ;;  %v15714_v20 = vld [vmem:[#allocation79_spill] sm:$0xff] }
 0x51a   :  { %15705 = vst [vmem:[#allocation204_spill] sm:$0xff] %v11924_v18  ;;  %15706 = vst [vmem:[#allocation213_spill] sm:$0xff] %v11926_v7  ;;  %v3162_v39 = vrot.slane %v11926_v7, 7  ;;  %v11941_v63 = vpop.permute.xlu0 %3245  ;;  %v11944_v6 = vsel %vm533_vm6, %v3709_v62, %v3711_v10  ;;  %v3566_v62 = vmul.f32 %v11681_v30, %v15714_v20  ;;  %v3792_v7 = vmul.f32 %v11681_v30, %v15715_v45  ;;  %v15722_v30 = vld [vmem:[#allocation188_spill] sm:$0xff] }
 0x51b   :  { %15709 = vst [vmem:[#allocation207_spill] sm:$0xff] %v11933_v34  ;;  %15710 = vst [vmem:[#allocation218_spill] sm:$0xff] %v11938_v11  ;;  %v11947_v38 = vsel %vm698_vm2, %v3164_v3, 0.0  ;;  %4085 = vrot.lane.b32.xlu0 %v11641_v36, %s8483_s11  ;;  %3259 = vrot.lane.b32.xlu1 %v3219_v56, %s8477_s28  ;;  %v15719_v56 = vld [vmem:[#allocation109_spill] sm:$0xff]  ;;  %v15721_v34 = vld [vmem:[#allocation190_spill] sm:$0xff] }
 0x51c   :  { %15711 = vst [vmem:[#allocation208_spill] sm:$0xff] %v11941_v63  ;;  %15712 = vst [vmem:[#allocation76_spill] sm:$0xff] %v11944_v6  ;;  %v11953_v37 = vsel %vm698_vm2, %v3160_v9, %v3162_v39  ;;  %v11956_v58 = vsel %vm698_vm2, %v3162_v39, %v3164_v3  ;;  %v15716_v6 = vld [vmem:[#allocation206_spill] sm:$0xff]  ;;  %v3567_v9 = vmul.f32 %v11686_v25, %v15719_v56  ;;  %v15720_v39 = vld [vmem:[#allocation121_spill] sm:$0xff] }
 0x51d   :  { %v11958_v31 = vpop.permute.xlu1 %3943  ;;  %v11966_v11 = vmul.f32 %v11947_v38, %v15716_v6  ;;  %v3793_v3 = vmul.f32 %v11686_v25, %v15487_v42  ;;  %v3220_v63 = vmul.f32 %v11686_v25, %v15720_v39  ;;  %v3668_v20 = vmul.f32 %v11947_v38, %v15721_v34  ;;  %v15723_v6 = vld [vmem:[#allocation187_spill] sm:$0xff]  ;;  %v15726_v39 = vld [vmem:[#allocation180_spill] sm:$0xff] }
 0x51e   :  { %15713 = vst [vmem:[#allocation148_spill] sm:$0xff] %v11958_v31  ;;  %v11968_v36 = vpop.permute.xlu0 %3819  ;;  %v3314_v45 = vmul.f32 %v11953_v37, %v15722_v30  ;;  %v3666_v56 = vmul.f32 %v11953_v37, %v15723_v6  ;;  %v3892_v25 = vmul.f32 %v11953_v37, %v15725_v60  ;;  %v3442_v34 = vmul.f32 %v11953_v37, %v15726_v39  ;;  %v15727_v31 = vld [vmem:[#allocation182_spill] sm:$0xff]  ;;  %v15728_v30 = vld [vmem:[#allocation95_spill] sm:$0xff] }
 0x51f   :  { %15717 = vst [vmem:[#allocation152_spill] sm:$0xff] %v11966_v11  ;;  %15718 = vst [vmem:[#allocation150_spill] sm:$0xff] %v11968_v36  ;;  %3735 = vrot.lane.b32.xlu0 %v11644_v59, %s8476_s16  ;;  %3608 = vrot.lane.b32.xlu1 %v3566_v62, %s8478_s1  ;;  %v15724_v36 = vld [vmem:[#allocation151_spill] sm:$0xff]  ;;  %v3893_v59 = vmul.f32 %v11956_v58, %v15727_v31  ;;  %v3443_v23 = vmul.f32 %v11956_v58, %v15728_v30  ;;  %v3717_v30 = vrot.slane %v3668_v20, 2 }
 0x520   :  { %v3315_v42 = vmul.f32 %v11956_v58, %v15724_v36  ;;  %v3360_v62 = vrot.slane %v3314_v45, 1  ;;  %v3713_v18 = vrot.slane %v3666_v56, 2  ;;  %v15729_v6 = vld [vmem:[#allocation183_spill] sm:$0xff]  ;;  %v3936_v60 = vrot.slane %v3892_v25, 1 }
 0x521   :  { %v11993_v2 = vpop.permute.xlu1 %3945  ;;  %v4020_v61 = vmul.f32 %v11953_v37, %v15729_v6  ;;  %v3488_v8 = vrot.slane %v3442_v34, 2  ;;  %v12004_v31 = vmul.f32 %v11947_v38, %v15730_v55  ;;  %v15731_v45 = vrot.slane %v11846_v21, 1  ;;  %v15734_v55 = vld [vmem:[#allocation200_spill] sm:$0xff] }
 0x522   :  { %v11999_v36 = vpop.permute.xlu0 %3368  ;;  %v3362_v52 = vrot.slane %v3315_v42, 1  ;;  %v12014_v6 = vsel %vm533_vm6, %v3711_v10, %v3713_v18  ;;  %v3938_v42 = vrot.slane %v3893_v59, 1  ;;  %v15732_v25 = vrot.slane %v11856_v19, 1 }
 0x523   :  { %3833 = vrot.lane.b32.xlu0 %v3792_v7, %s8479_s29  ;;  %3610 = vrot.lane.b32.xlu1 %v3567_v9, %s8478_s1  ;;  %v12011_v56 = vsel %vm1127_vm4, %v15731_v45, %v3360_v62  ;;  %v15733_v7 = vrot.slane %v11860_v1, 2  ;;  %v3490_v21 = vrot.slane %v3443_v23, 2  ;;  %v4064_v59 = vrot.slane %v4020_v61, 2 }
 0x524   :  { %v12017_v34 = vsel %vm1127_vm4, %v3360_v62, %v3362_v52  ;;  %v12022_v39 = vsel %vm1127_vm4, %v15732_v25, %v3936_v60  ;;  %v12032_v10 = vsel %vm1127_vm4, %v3936_v60, %v3938_v42  ;;  %v3667_v52 = vmul.f32 %v11956_v58, %v15734_v55  ;;  %v15735_v62 = vld [vmem:[#allocation186_spill] sm:$0xff] }
 0x525   :  { %v12027_v9 = vsel %vm533_vm6, %v15733_v7, %v3488_v8  ;;  %v12029_v45 = vpop.permute.xlu1 %4071  ;;  %v4021_v19 = vmul.f32 %v11956_v58, %v15735_v62  ;;  %v12041_v1 = vsel %vm533_vm6, %v3488_v8, %v3490_v21  ;;  %v15736_v7 = vrot.slane %v11966_v11, 1 }
 0x526   :  { %v12038_v25 = vpop.permute.xlu0 %3370  ;;  %v15737_v61 = vrot.slane %v11910_v29, 2  ;;  %v3715_v62 = vrot.slane %v3667_v52, 2  ;;  %v15045_v8 = vrot.slane %v12004_v31, 2 }
 0x527   :  { %v12046_v23 = vsel %vm1127_vm4, %v3938_v42, %v15736_v7  ;;  %3835 = vrot.lane.b32.xlu0 %v3793_v3, %s8479_s29  ;;  %3261 = vrot.lane.b32.xlu1 %v3220_v63, %s8477_s28  ;;  %v4066_v55 = vrot.slane %v4021_v19, 2 }
 0x528   :  { %v12053_v60 = vsel %vm533_vm6, %v15737_v61, %v4064_v59  ;;  %v12059_v11 = vsel %vm533_vm6, %v3713_v18, %v3715_v62  ;;  %v12065_v3 = vsel %vm533_vm6, %v3715_v62, %v3717_v30 }
 0x529   :  { %v12056_v21 = vpop.permute.xlu1 %3723  ;;  %v12062_v20 = vsel %vm533_vm6, %v4064_v59, %v4066_v55  ;;  %v12070_v29 = vsel %vm533_vm6, %v4066_v55, %v15045_v8  ;;  %v15738_v55 = vld [vmem:[#allocation62_spill] sm:$0xff] }
 0x52a   :  { %v3497_v63 = vpop.permute.xlu0 %3496 }
 0x52b   :  { %3737 = vrot.lane.b32.xlu0 %v11717_v51, %s8476_s16  ;;  %3384 = vrot.lane.b32.xlu1 %v11722_v4, %s8480_s30 }
 0x52d   :  { %v12076_v18 = vpop.permute.xlu1 %3247 }
 0x52e   :  { %v3499_v42 = vpop.permute.xlu0 %3498 }
 0x52f   :  { %3959 = vrot.lane.b32.xlu0 %v11731_v33, %s8482_s2  ;;  %3386 = vrot.lane.b32.xlu1 %v11736_v14, %s8480_s30  ;;  %v3193_v33 = vadd.f32 %v11774_v44, %v11250_v46 }
 0x531   :  { %v12082_v30 = vpop.permute.xlu1 %3596 }
 0x532   :  { %v12084_v59 = vpop.permute.xlu0 %4073 }
 0x533   :  { %3961 = vrot.lane.b32.xlu0 %v11741_v41, %s8482_s2  ;;  %3512 = vrot.lane.b32.xlu1 %v11745_v27, %s8481_s0  ;;  %v3221_v41 = vmul.f32 %v11827_v5, %v15738_v55  ;;  %v15739_v27 = vld [vmem:[#allocation176_spill] sm:$0xff] }
 0x534   :  { %v3284_v62 = vadd.f32 %v3193_v33, %v15739_v27  ;;  %v3569_v33 = vmul.f32 %v11830_v28, %v15491_v57 }
 0x535   :  { %v12090_v51 = vpop.permute.xlu1 %3598 }
 0x536   :  { %v12092_v4 = vpop.permute.xlu0 %3821  ;;  %v3412_v46 = vadd.f32 %v11813_v13, %v3284_v62  ;;  %v3794_v13 = vmul.f32 %v11827_v5, %v15489_v16 }
 0x537   :  { %4087 = vrot.lane.b32.xlu0 %v11748_v50, %s8483_s11  ;;  %3514 = vrot.lane.b32.xlu1 %v11759_v35, %s8481_s0  ;;  %v3568_v35 = vmul.f32 %v11827_v5, %v15490_v54 }
 0x538   :  { %v3540_v7 = vadd.f32 %v11832_v40, %v3412_v46 }
 0x539   :  { %v12100_v14 = vpop.permute.xlu1 %3249 }
 0x53a   :  { %v12104_v52 = vpop.permute.xlu0 %3823 }
 0x53b   :  { %4089 = vrot.lane.b32.xlu0 %v11769_v12, %s8483_s11  ;;  %3263 = vrot.lane.b32.xlu1 %v3221_v41, %s8477_s28  ;;  %v3194_v12 = vadd.f32 %v11247_v0, %v11774_v44  ;;  %v3195_v41 = vadd.f32 %v11774_v44, %v11258_v22  ;;  %v3222_v22 = vmul.f32 %v11830_v28, %v15493_v32 }
 0x53d   :  { %v12111_v50 = vpop.permute.xlu1 %3372  ;;  %v3285_v40 = vadd.f32 %v11783_v53, %v3194_v12  ;;  %v3286_v0 = vadd.f32 %v11792_v49, %v3195_v41 }
 0x53e   :  { %v3726_v19 = vpop.permute.xlu0 %3725 }
 0x53f   :  { %3739 = vrot.lane.b32.xlu0 %v11772_v47, %s8476_s16  ;;  %3612 = vrot.lane.b32.xlu1 %v3568_v35, %s8478_s1  ;;  %v3636_v47 = vadd.f32 %v11781_v26, %v3540_v7  ;;  %v3413_v46 = vadd.f32 %v11802_v43, %v3285_v40  ;;  %v3795_v35 = vmul.f32 %v11830_v28, %v10592_v48  ;;  %v15741_v28 = vld [vmem:[#allocation169_spill] sm:$0xff] }
 0x540   :  { %v3414_v26 = vadd.f32 %v11999_v36, %v3286_v0  ;;  %v3196_v43 = vadd.f32 %v11255_v17, %v11774_v44  ;;  %v15743_v0 = vld [vmem:[#allocation167_spill] sm:$0xff] }
 0x541   :  { %v12121_v61 = vpop.permute.xlu1 %3374  ;;  %v3541_v53 = vadd.f32 %v11818_v15, %v3413_v46  ;;  %v3767_v12 = vadd.f32 %v11852_v24, %v3636_v47  ;;  %v15742_v46 = vld [vmem:[#allocation63_spill] sm:$0xff]  ;;  %v15744_v24 = vld [vmem:[#allocation214_spill] sm:$0xff]  ;;  %v15745_v47 = vld [vmem:[#allocation204_spill] sm:$0xff] }
 0x542   :  { %v3948_v62 = vpop.permute.xlu0 %3947  ;;  %v3542_v49 = vadd.f32 %v3497_v63, %v3414_v26  ;;  %v15746_v63 = vld [vmem:[#allocation212_spill] sm:$0xff] }
 0x543   :  { %3837 = vrot.lane.b32.xlu0 %v3794_v13, %s8479_s29  ;;  %3614 = vrot.lane.b32.xlu1 %v3569_v33, %s8478_s1  ;;  %v15740_v33 = vld [vmem:[#allocation211_spill] sm:$0xff]  ;;  %v3637_v40 = vadd.f32 %v15741_v28, %v3541_v53  ;;  %v3863_v36 = vadd.f32 %v15742_v46, %v3767_v12  ;;  %v15747_v26 = vld [vmem:[#allocation148_spill] sm:$0xff]  ;;  %v15748_v28 = vld [vmem:[#allocation77_spill] sm:$0xff] }
 0x544   :  { %v3287_v41 = vadd.f32 %v15740_v33, %v3196_v43  ;;  %v15749_v46 = vld [vmem:[#allocation215_spill] sm:$0xff] }
 0x545   :  { %v12135_v5 = vpop.permute.xlu1 %3500  ;;  %v3991_v8 = vadd.f32 %v15747_v26, %v3863_v36  ;;  %v15751_v36 = vld [vmem:[#allocation201_spill] sm:$0xff] }
 0x546   :  { %v3950_v7 = vpop.permute.xlu0 %3949  ;;  %v3415_v17 = vadd.f32 %v12038_v25, %v3287_v41 }
 0x547   :  { %3839 = vrot.lane.b32.xlu0 %v3795_v35, %s8479_s29  ;;  %3265 = vrot.lane.b32.xlu1 %v3222_v22, %s8477_s28  ;;  %v3768_v35 = vadd.f32 %v15745_v47, %v3637_v40  ;;  %v3638_v22 = vadd.f32 %v15746_v63, %v3542_v49  ;;  %v12164_v12 = vadd.f32 %v12029_v45, %v3991_v8  ;;  %v15750_v40 = vld [vmem:[#allocation177_spill] sm:$0xff]  ;;  %v15752_v8 = vld [vmem:[#allocation216_spill] sm:$0xff]  ;;  %v15753_v47 = vld [vmem:[#allocation74_spill] sm:$0xff] }
 0x548   :  { %v3543_v53 = vadd.f32 %v3499_v42, %v3415_v17 }
 0x549   :  { %v12148_v13 = vpop.permute.xlu1 %3502  ;;  %v3769_v25 = vadd.f32 %v12056_v21, %v3638_v22  ;;  %v4135_v45 = vmin.f32 %v12164_v12, 20.0  ;;  %v15754_v21 = vld [vmem:[#allocation150_spill] sm:$0xff]  ;;  %vm4279_vm15 = vcmp.gt.f32.partialorder %v12164_v12, 20.0 }
 0x54a   :  { %v4076_v15 = vpop.permute.xlu0 %4075  ;;  %v3639_v42 = vadd.f32 %v15751_v36, %v3543_v53  ;;  %v15755_v53 = vld [vmem:[#allocation130_spill] sm:$0xff] }
 0x54b   :  { %3388 = vrot.lane.b32.xlu1 %v15743_v0, %s8480_s30  ;;  %3741 = vrot.lane.b32.xlu0 %v15744_v24, %s8476_s16  ;;  %v3864_v0 = vadd.f32 %v15750_v40, %v3768_v35  ;;  %v3865_v63 = vadd.f32 %v15754_v21, %v3769_v25  ;;  %v15756_v40 = vld [vmem:[#allocation217_spill] sm:$0xff]  ;;  %v15758_v25 = vld [vmem:[#allocation208_spill] sm:$0xff] }
 0x54c   :  { %v3770_v35 = vadd.f32 %v3726_v19, %v3639_v42  ;;  %v15759_v42 = vld [vmem:[#allocation172_spill] sm:$0xff]  ;;  %v15760_v21 = vld [vmem:[#allocation133_spill] sm:$0xff] }
 0x54d   :  { %v12161_v43 = vpop.permute.xlu1 %3251  ;;  %v3992_v41 = vadd.f32 %v11993_v2, %v3864_v0  ;;  %v3993_v2 = vadd.f32 %v3948_v62, %v3865_v63  ;;  %v15757_v0 = vld [vmem:[#allocation207_spill] sm:$0xff]  ;;  %v3198_v63 = vadd.f32 %v15760_v21, %v11774_v44 }
 0x54e   :  { %v4078_v33 = vpop.permute.xlu0 %4077  ;;  %v3866_v19 = vadd.f32 %v12092_v4, %v3770_v35  ;;  %v15761_v4 = vld [vmem:[#allocation218_spill] sm:$0xff]  ;;  %v15765_v21 = vld [vmem:[#allocation175_spill] sm:$0xff] }
 0x54f   :  { %3390 = vrot.lane.b32.xlu1 %v15748_v28, %s8480_s30  ;;  %3963 = vrot.lane.b32.xlu0 %v15749_v46, %s8482_s2  ;;  %v12182_v17 = vadd.f32 %v12084_v59, %v3992_v41  ;;  %v3197_v28 = vadd.f32 %v11774_v44, %v15755_v53  ;;  %v4151_v46 = vmul.f32 1.442695, %v4135_v45  ;;  %v12195_v41 = vadd.f32 %v4076_v15, %v3993_v2 }
 0x550   :  { %v3994_v45 = vadd.f32 %v3950_v7, %v3866_v19  ;;  %v3289_v7 = vadd.f32 %v12076_v18, %v3198_v63 }
 0x551   :  { %v12172_v49 = vpop.permute.xlu1 %3600  ;;  %v4136_v59 = vmin.f32 %v12182_v17, 20.0  ;;  %v3288_v36 = vadd.f32 %v15758_v25, %v3197_v28  ;;  %8194 = vpow2.f32 %v4151_v46  ;;  %v4137_v35 = vmin.f32 %v12195_v41, 20.0 }
 0x552   :  { %v3728_v24 = vpop.permute.xlu0 %3727  ;;  %v12211_v2 = vadd.f32 %v4078_v33, %v3994_v45  ;;  %v3417_v19 = vadd.f32 %v12121_v61, %v3289_v7  ;;  %v3798_v61 = vmul.f32 %v11947_v38, %v15765_v21  ;;  %vm4280_vm0 = vcmp.gt.f32.partialorder %v12182_v17, 20.0 }
 0x553   :  { %3516 = vrot.lane.b32.xlu1 %v15752_v8, %s8481_s0  ;;  %3965 = vrot.lane.b32.xlu0 %v15753_v47, %s8482_s2  ;;  %v3223_v8 = vmul.f32 %v11953_v37, %v15759_v42  ;;  %v3416_v53 = vadd.f32 %v12111_v50, %v3288_v36  ;;  %v4153_v15 = vmul.f32 1.442695, %v4136_v59  ;;  %v15763_v59 = vld [vmem:[#allocation76_spill] sm:$0xff]  ;;  %v4155_v33 = vmul.f32 1.442695, %v4137_v35  ;;  %v15766_v35 = vld [vmem:[#allocation174_spill] sm:$0xff] }
 0x554   :  { %v4138_v25 = vmin.f32 %v12211_v2, 20.0  ;;  %v3545_v18 = vadd.f32 %v12148_v13, %v3417_v19  ;;  %v3797_v7 = vmul.f32 %v11956_v58, %v15766_v35  ;;  %vm4282_vm3 = vcmp.gt.f32.partialorder %v12211_v2, 20.0 }
 0x555   :  { %v12185_v22 = vpop.permute.xlu1 %3602  ;;  %v3544_v28 = vadd.f32 %v12135_v5, %v3416_v53  ;;  %8196 = vpow2.f32 %v4153_v15 }
 0x556   :  { %v3826_v26 = vpop.permute.xlu0 %3825  ;;  %8198 = vpow2.f32 %v4155_v33  ;;  %v3641_v13 = vadd.f32 %v12090_v51, %v3545_v18 }
 0x557   :  { %3518 = vrot.lane.b32.xlu1 %v15756_v40, %s8481_s0  ;;  %4091 = vrot.lane.b32.xlu0 %v15757_v0, %s8483_s11  ;;  %v15762_v0 = vld [vmem:[#allocation147_spill] sm:$0xff]  ;;  %v3640_v5 = vadd.f32 %v12082_v30, %v3544_v28  ;;  %v15767_v28 = vld [vmem:[#allocation192_spill] sm:$0xff] }
 0x558   :  { %v3570_v46 = vmul.f32 %v11953_v37, %v15762_v0 }
 0x559   :  { %v12198_v62 = vpop.permute.xlu1 %3253  ;;  %v3771_v53 = vadd.f32 %v3728_v24, %v3640_v5 }
 0x55a   :  { %v12202_v47 = vpop.permute.xlu0 %3827 }
 0x55b   :  { %3267 = vrot.lane.b32.xlu1 %v3223_v8, %s8477_s28  ;;  %4093 = vrot.lane.b32.xlu0 %v15761_v4, %s8483_s11  ;;  %v15764_v8 = vld [vmem:[#allocation173_spill] sm:$0xff]  ;;  %v4157_v4 = vmul.f32 1.442695, %v4138_v25  ;;  %v8195_v15 = vpop.eup %8194  ;;  %v3867_v24 = vadd.f32 %v12104_v52, %v3771_v53 }
 0x55c   :  { %v3571_v45 = vmul.f32 %v11956_v58, %v15764_v8 }
 0x55d   :  { %v12215_v40 = vpop.permute.xlu1 %3376  ;;  %8200 = vpow2.f32 %v4157_v4 }
 0x55e   :  { %v3730_v50 = vpop.permute.xlu0 %3729 }
 0x55f   :  { %3616 = vrot.lane.b32.xlu1 %v3570_v46, %s8478_s1  ;;  %3743 = vrot.lane.b32.xlu0 %v15763_v59, %s8476_s16  ;;  %v3796_v46 = vmul.f32 %v11953_v37, %v15767_v28  ;;  %v3772_v19 = vadd.f32 %v3730_v50, %v3641_v13  ;;  %v4183_v59 = vadd.f32 2.0, %v8195_v15  ;;  %v8197_v25 = vpop.eup %8196 }
 0x560   :  { %v4184_v52 = vadd.f32 2.0, %v8197_v25 }
 0x561   :  { %v12226_v36 = vpop.permute.xlu1 %3378  ;;  %v3868_v5 = vadd.f32 %v3826_v26, %v3772_v19  ;;  %v4199_v37 = vmul.f32 %v8195_v15, %v4183_v59 }
 0x562   :  { %v3952_v63 = vpop.permute.xlu0 %3951 }
 0x563   :  { %3618 = vrot.lane.b32.xlu1 %v3571_v45, %s8478_s1  ;;  %3845 = vrot.lane.b32.xlu0 %v3798_v61, %s8479_s29  ;;  %v3995_v33 = vadd.f32 %v3952_v63, %v3867_v24  ;;  %v8199_v63 = vpop.eup %8198 }
 0x564   :  { %v4185_v26 = vadd.f32 2.0, %v8199_v63 }
 0x565   :  { %v12235_v30 = vpop.permute.xlu1 %3504 }
 0x566   :  { %v3954_v38 = vpop.permute.xlu0 %3953 }
 0x567   :  { %3843 = vrot.lane.b32.xlu1 %v3797_v7, %s8479_s29  ;;  %3841 = vrot.lane.b32.xlu0 %v3796_v46, %s8479_s29  ;;  %v3996_v50 = vadd.f32 %v3954_v38, %v3868_v5  ;;  %v8201_v46 = vpop.eup %8200 }
 0x568   :  { %v4186_v24 = vadd.f32 2.0, %v8201_v46 }
 0x569   :  { %v12244_v51 = vpop.permute.xlu1 %3506 }
 0x56a   :  { %v4080_v18 = vpop.permute.xlu0 %4079  ;;  %v12282_v5 = vmul.f32 %v8201_v46, %v4186_v24 }
 0x56b   :  { %v12246_v58 = vadd.f32 %v4080_v18, %v3995_v33  ;;  %3392 = vrot.lane.b32.xlu1 %v12011_v56, %s8480_s30  ;;  %3745 = vrot.lane.b32.xlu0 %v12014_v6, %s8476_s16  ;;  %v4231_v56 = vadd.f32 2.0, %v4199_v37  ;;  %v4200_v6 = vmul.f32 %v8197_v25, %v4184_v52  ;;  %v15768_v25 = vld [vmem:[#allocation135_spill] sm:$0xff] }
 0x56c   :  { %v3199_v18 = vadd.f32 %v11774_v44, %v15768_v25 }
 0x56d   :  { %v4139_v45 = vmin.f32 %v12246_v58, 20.0  ;;  %v12253_v61 = vpop.permute.xlu1 %3255  ;;  %vm4283_vm5 = vcmp.gt.f32.partialorder %v12246_v58, 20.0 }
 0x56e   :  { %v4082_v53 = vpop.permute.xlu0 %4081 }
 0x56f   :  { %v4159_v4 = vmul.f32 1.442695, %v4139_v45  ;;  %v12255_v13 = vadd.f32 %v4082_v53, %v3996_v50  ;;  %3394 = vrot.lane.b32.xlu1 %v12017_v34, %s8480_s30  ;;  %3967 = vrot.lane.b32.xlu0 %v12022_v39, %s8482_s2  ;;  %v4232_v34 = vadd.f32 2.0, %v4200_v6  ;;  %v12268_v39 = vmul.f32 %v8199_v63, %v4185_v26  ;;  %v15769_v63 = vld [vmem:[#allocation137_spill] sm:$0xff] }
 0x570   :  { %v3200_v53 = vadd.f32 %v15769_v63, %v11774_v44 }
 0x571   :  { %8202 = vpow2.f32 %v4159_v4  ;;  %v4140_v15 = vmin.f32 %v12255_v13, 20.0  ;;  %v12262_v7 = vpop.permute.xlu1 %3604  ;;  %v4234_v4 = vadd.f32 2.0, %v12282_v5  ;;  %vm4284_vm7 = vcmp.gt.f32.partialorder %v12255_v13, 20.0 }
 0x572   :  { %v3732_v38 = vpop.permute.xlu0 %3731  ;;  %8204 = vrcp.f32 %v4231_v56 }
 0x573   :  { %v4161_v19 = vmul.f32 1.442695, %v4140_v15  ;;  %3520 = vrot.lane.b32.xlu1 %v12027_v9, %s8481_s0  ;;  %3969 = vrot.lane.b32.xlu0 %v12032_v10, %s8482_s2  ;;  %v3290_v9 = vadd.f32 %v12100_v14, %v3199_v18  ;;  %v4233_v10 = vadd.f32 2.0, %v12268_v39  ;;  %v3291_v14 = vadd.f32 %v12161_v43, %v3200_v53 }
 0x575   :  { %8206 = vpow2.f32 %v4161_v19  ;;  %v12270_v59 = vpop.permute.xlu1 %3606 }
 0x576   :  { %v12272_v33 = vpop.permute.xlu0 %3829  ;;  %8208 = vrcp.f32 %v4232_v34 }
 0x577   :  { %3522 = vrot.lane.b32.xlu1 %v12041_v1, %s8481_s0  ;;  %4095 = vrot.lane.b32.xlu0 %v12053_v60, %s8483_s11  ;;  %v3418_v1 = vadd.f32 %v12215_v40, %v3290_v9  ;;  %8210 = vrcp.f32 %v4233_v10  ;;  %v15770_v9 = vld [vmem:[#allocation178_spill] sm:$0xff] }
 0x578   :  { %8212 = vrcp.f32 %v4234_v4 }
 0x579   :  { %v12284_v52 = vpop.permute.xlu1 %3257  ;;  %v3546_v56 = vadd.f32 %v12235_v30, %v3418_v1  ;;  %v4216_v1 = vmul.f32 %v4200_v6, %v12182_v17 }
 0x57a   :  { %v12286_v50 = vpop.permute.xlu0 %3831 }
 0x57b   :  { %v8203_v45 = vpop.eup %8202  ;;  %3747 = vrot.lane.b32.xlu1 %v12059_v11, %s8476_s16  ;;  %4097 = vrot.lane.b32.xlu0 %v12062_v20, %s8483_s11  ;;  %v3419_v11 = vadd.f32 %v12226_v36, %v3291_v14  ;;  %v4215_v20 = vmul.f32 %v4199_v37, %v12164_v12  ;;  %v3642_v24 = vadd.f32 %v12172_v49, %v3546_v56  ;;  %v4440_v37 = vld [vmem:[%s14715_s5] sm:$0xff] }
 0x57c   :  { %v4187_v60 = vadd.f32 2.0, %v8203_v45  ;;  %v8205_v15 = vpop.eup %8204 }
 0x57d   :  { %v12298_v26 = vpop.permute.xlu1 %3380  ;;  %v3547_v30 = vadd.f32 %v12244_v51, %v3419_v11  ;;  %v4441_v51 = vld [vmem:[%s14715_s5 + $0x8] sm:$0xf]  ;;  %v3773_v63 = vadd.f32 %v3732_v38, %v3642_v24 }
 0x57e   :  { %v12300_v46 = vmul.f32 %v8203_v45, %v4187_v60  ;;  %v3734_v40 = vpop.permute.xlu0 %3733  ;;  %v4263_v45 = vmul.f32 %v8205_v15, %v4215_v20  ;;  %v7876_v53 = vpack.c.bf16 %v4441_v51, %v4440_v37  ;;  %v15774_v15 = vld [vmem:[#allocation179_spill] sm:$0xff] }
 0x57f   :  { %v8207_v19 = vpop.eup %8206  ;;  %3971 = vrot.lane.b32.xlu1 %v12046_v23, %s8482_s2  ;;  %3749 = vrot.lane.b32.xlu0 %v12065_v3, %s8476_s16  ;;  %v15771_v23 = vld [vmem:[#allocation152_spill] sm:$0xff]  ;;  %v3643_v14 = vadd.f32 %v12185_v22, %v3547_v30 }
 0x580   :  { %v4188_v43 = vadd.f32 2.0, %v8207_v19  ;;  %v4235_v34 = vadd.f32 2.0, %v12300_v46  ;;  %v15772_v10 = vrot.slane %v15771_v23, 1  ;;  %v8209_v49 = vpop.eup %8208  ;;  %7878 = vmatprep.subr.msk.bf16.mxu0 %vm11038_vm13, %v7876_v53 }
 0x581   :  { %v12311_v25 = vpop.permute.xlu1 %3382  ;;  %v4264_v11 = vmul.f32 %v8209_v49, %v4216_v1  ;;  %7881 = vmatpush3.bf16.msk.msra.mxu0 %vm11038_vm13, %v7876_v53  ;;  %v8211_v22 = vpop.eup %8210  ;;  %v3774_v20 = vadd.f32 %v3734_v40, %v3643_v14  ;;  %vm4281_vm13 = vcmp.gt.f32.partialorder %v12195_v41, 20.0  ;;  %v15777_v1 = vld [vmem:[#allocation5_spill] sm:$0xff] }
 0x582   :  { %v12313_v18 = vmul.f32 %v8207_v19, %v4188_v43  ;;  %v3956_v36 = vpop.permute.xlu0 %3955  ;;  %v3942_v3 = vsel %vm1127_vm4, %v15772_v10, %v15770_v9  ;;  %8214 = vrcp.f32 %v4235_v34  ;;  %v15775_v19 = vrot.slane %v12004_v31, 2 }
 0x583   :  { %4099 = vrot.lane.b32.xlu1 %v12070_v29, %s8483_s11  ;;  %3973 = vrot.lane.b32.xlu0 %v3942_v3, %s8482_s2  ;;  %v12337_v29 = vsel %vm4279_vm15, %v12164_v12, %v4263_v45  ;;  %v3869_v43 = vadd.f32 %v12202_v47, %v3773_v63  ;;  %v4217_v12 = vmul.f32 %v12268_v39, %v12195_v41  ;;  %v8213_v47 = vpop.eup %8212  ;;  %v15776_v39 = vld [vmem:[#allocation12_spill] sm:$0xff] }
 0x584   :  { %v4236_v60 = vadd.f32 2.0, %v12313_v18  ;;  %v4070_v6 = vsel %vm533_vm6, %v15775_v19, %v15774_v15  ;;  %v12355_v24 = vsel %vm4280_vm0, %v12182_v17, %v4264_v11  ;;  %v3870_v23 = vadd.f32 %v12272_v33, %v3774_v20  ;;  %v15778_v11 = vld [vmem:[#allocation14_spill] sm:$0xff] }
 0x585   :  { %v12331_v4 = vpop.permute.xlu1 %3508  ;;  %v3997_v31 = vadd.f32 %v3956_v36, %v3869_v43  ;;  %v4265_v40 = vmul.f32 %v8211_v22, %v4217_v12  ;;  %v4218_v36 = vmul.f32 %v12282_v5, %v12211_v2  ;;  %v4219_v5 = vmul.f32 %v12300_v46, %v12246_v58  ;;  %v15779_v12 = vld [vmem:[#allocation80_spill] sm:$0xff]  ;;  %v15992_v15 = vld [vmem:[#allocation158_spill] sm:$0xff] }
 0x586   :  { %v3958_v38 = vpop.permute.xlu0 %3957  ;;  %8216 = vrcp.f32 %v4236_v60  ;;  %v4220_v46 = vmul.f32 %v12313_v18, %v12255_v13 }
 0x587   :  { %4327 = vrot.lane.b32.xlu1 %v12337_v29, %s8483_s11  ;;  %4101 = vrot.lane.b32.xlu0 %v4070_v6, %s8483_s11  ;;  %v3998_v3 = vadd.f32 %v3958_v38, %v3870_v23  ;;  %v12371_v33 = vsel %vm4281_vm13, %v12195_v41, %v4265_v40  ;;  %v4266_v51 = vmul.f32 %v8213_v47, %v4218_v36  ;;  %v15781_v36 = vld [vmem:[#allocation67_spill] sm:$0xff] }
 0x589   :  { %v12351_v30 = vpop.permute.xlu1 %3510  ;;  %v12386_v56 = vsel %vm4282_vm3, %v12211_v2, %v4266_v51 }
 0x58a   :  { %v4084_v34 = vpop.permute.xlu0 %4083 }
 0x58b   :  { %v12358_v10 = vadd.f32 %v4084_v34, %v3997_v31  ;;  %4329 = vrot.lane.b32.xlu1 %v12355_v24, %s8483_s11  ;;  %4375 = vrot.lane.b32.xlu0 %v15776_v39, %s8479_s29  ;;  %v3201_v31 = vadd.f32 %v11774_v44, %v15779_v12  ;;  %v15780_v34 = vld [vmem:[#allocation6_spill] sm:$0xff] }
 0x58c   :  { %v8215_v49 = vpop.eup %8214 }
 0x58d   :  { %v4141_v45 = vmin.f32 %v12358_v10, 20.0  ;;  %v12367_v17 = vpop.permute.xlu1 %3259  ;;  %v4267_v38 = vmul.f32 %v8215_v49, %v4219_v5  ;;  %v3292_v18 = vadd.f32 %v12198_v62, %v3201_v31  ;;  %vm4285_vm8 = vcmp.gt.f32.partialorder %v12358_v10, 20.0 }
 0x58e   :  { %v4086_v37 = vpop.permute.xlu0 %4085 }
 0x58f   :  { %v4163_v63 = vmul.f32 1.442695, %v4141_v45  ;;  %v12373_v53 = vadd.f32 %v4086_v37, %v3998_v3  ;;  %4377 = vrot.lane.b32.xlu0 %v15777_v1, %s8479_s29  ;;  %4331 = vrot.lane.b32.xlu1 %v12371_v33, %s8483_s11  ;;  %v12398_v2 = vsel %vm4283_vm5, %v12246_v58, %v4267_v38  ;;  %v3202_v3 = vadd.f32 %v15781_v36, %v11774_v44  ;;  %v15782_v37 = vld [vmem:[#allocation15_spill] sm:$0xff] }
 0x590   :  { %v8217_v19 = vpop.eup %8216  ;;  %v3420_v45 = vadd.f32 %v12298_v26, %v3292_v18  ;;  %v15783_v26 = vld [vmem:[#allocation7_spill] sm:$0xff]  ;;  %v15784_v18 = vld [vmem:[#allocation16_spill] sm:$0xff] }
 0x591   :  { %8218 = vpow2.f32 %v4163_v63  ;;  %v4142_v60 = vmin.f32 %v12373_v53, 20.0  ;;  %v12382_v14 = vpop.permute.xlu1 %3608  ;;  %v4268_v43 = vmul.f32 %v8217_v19, %v4220_v46  ;;  %v3293_v51 = vadd.f32 %v12253_v61, %v3202_v3 }
 0x592   :  { %v3736_v41 = vpop.permute.xlu0 %3735  ;;  %v3548_v49 = vadd.f32 %v12331_v4, %v3420_v45  ;;  %vm4286_vm10 = vcmp.gt.f32.partialorder %v12373_v53, 20.0 }
 0x593   :  { %v4165_v6 = vmul.f32 1.442695, %v4142_v60  ;;  %4379 = vrot.lane.b32.xlu0 %v15778_v11, %s8479_s29  ;;  %4333 = vrot.lane.b32.xlu1 %v12386_v56, %s8483_s11  ;;  %v12413_v58 = vsel %vm4284_vm7, %v12255_v13, %v4268_v43  ;;  %v3421_v38 = vadd.f32 %v12311_v25, %v3293_v51 }
 0x594   :  { %v3644_v43 = vadd.f32 %v12262_v7, %v3548_v49  ;;  %v15785_v7 = vld [vmem:[#allocation8_spill] sm:$0xff] }
 0x595   :  { %8220 = vpow2.f32 %v4165_v6  ;;  %v12394_v22 = vpop.permute.xlu1 %3610  ;;  %v3549_v46 = vadd.f32 %v12351_v30, %v3421_v38 }
 0x596   :  { %v3834_v20 = vpop.permute.xlu0 %3833  ;;  %v3775_v31 = vadd.f32 %v3736_v41, %v3644_v43 }
 0x597   :  { %4381 = vrot.lane.b32.xlu0 %v15780_v34, %s8479_s29  ;;  %4335 = vrot.lane.b32.xlu1 %v12398_v2, %s8483_s11  ;;  %v3645_v25 = vadd.f32 %v12270_v59, %v3549_v46 }
 0x598   :  { %v3871_v30 = vadd.f32 %v12286_v50, %v3775_v31 }
 0x599   :  { %v12407_v40 = vpop.permute.xlu1 %3261 }
 0x59a   :  { %v12410_v47 = vpop.permute.xlu0 %3835 }
 0x59b   :  { %v8219_v23 = vpop.eup %8218  ;;  %4383 = vrot.lane.b32.xlu0 %v15782_v37, %s8479_s29  ;;  %4337 = vrot.lane.b32.xlu1 %v12413_v58, %s8483_s11 }
 0x59c   :  { %v4189_v62 = vadd.f32 2.0, %v8219_v23 }
 0x59d   :  { %v12424_v63 = vpop.permute.xlu1 %3384 }
 0x59e   :  { %v4205_v13 = vmul.f32 %v8219_v23, %v4189_v62  ;;  %v3738_v5 = vpop.permute.xlu0 %3737 }
 0x59f   :  { %v8221_v60 = vpop.eup %8220  ;;  %4385 = vrot.lane.b32.xlu0 %v15783_v26, %s8479_s29  ;;  %v3776_v45 = vadd.f32 %v3738_v5, %v3645_v25 }
 0x5a0   :  { %v4237_v19 = vadd.f32 2.0, %v4205_v13  ;;  %v4190_v6 = vadd.f32 2.0, %v8221_v60  ;;  %v4221_v41 = vmul.f32 %v4205_v13, %v12358_v10 }
 0x5a1   :  { %v12431_v12 = vpop.permute.xlu1 %3386 }
 0x5a2   :  { %8222 = vrcp.f32 %v4237_v19  ;;  %v4206_v61 = vmul.f32 %v8221_v60, %v4190_v6  ;;  %v3960_v4 = vpop.permute.xlu0 %3959  ;;  %v3872_v60 = vadd.f32 %v3834_v20, %v3776_v45  ;;  %v15786_v19 = vld [vmem:[#allocation17_spill] sm:$0xff] }
 0x5a3   :  { %4387 = vrot.lane.b32.xlu0 %v15784_v18, %s8479_s29  ;;  %v3999_v62 = vadd.f32 %v3960_v4, %v3871_v30  ;;  %v15787_v20 = vld [vmem:[#allocation9_spill] sm:$0xff] }
 0x5a4   :  { %v4238_v23 = vadd.f32 2.0, %v4206_v61  ;;  %v4222_v4 = vmul.f32 %v4206_v61, %v12373_v53 }
 0x5a5   :  { %v3513_v36 = vpop.permute.xlu1 %3512 }
 0x5a6   :  { %8224 = vrcp.f32 %v4238_v23  ;;  %v3962_v3 = vpop.permute.xlu0 %3961 }
 0x5a7   :  { %4389 = vrot.lane.b32.xlu0 %v15785_v7, %s8479_s29  ;;  %v4000_v6 = vadd.f32 %v3962_v3, %v3872_v60  ;;  %v15794_v7 = vld [vmem:[#allocation11_spill] sm:$0xff] }
 0x5a9   :  { %v3515_v51 = vpop.permute.xlu1 %3514 }
 0x5aa   :  { %v4088_v49 = vpop.permute.xlu0 %4087 }
 0x5ab   :  { %v12440_v38 = vadd.f32 %v4088_v49, %v3999_v62  ;;  %4391 = vrot.lane.b32.xlu0 %v15786_v19, %s8479_s29  ;;  %v15788_v49 = vld [vmem:[#allocation18_spill] sm:$0xff] }
 0x5ac   :  { %v8223_v59 = vpop.eup %8222 }
 0x5ad   :  { %v4143_v5 = vmin.f32 %v12440_v38, 20.0  ;;  %v12445_v46 = vpop.permute.xlu1 %3263  ;;  %v4269_v50 = vmul.f32 %v8223_v59, %v4221_v41  ;;  %v15790_v59 = vld [vmem:[#allocation65_spill] sm:$0xff]  ;;  %vm4287_vm11 = vcmp.gt.f32.partialorder %v12440_v38, 20.0 }
 0x5ae   :  { %v4090_v43 = vpop.permute.xlu0 %4089 }
 0x5af   :  { %v4167_v31 = vmul.f32 1.442695, %v4143_v5  ;;  %v12449_v13 = vadd.f32 %v4090_v43, %v4000_v6  ;;  %4393 = vrot.lane.b32.xlu0 %v15787_v20, %s8479_s29  ;;  %v12454_v23 = vsel %vm4285_vm8, %v12358_v10, %v4269_v50  ;;  %v3203_v6 = vadd.f32 %v11774_v44, %v15790_v59  ;;  %v15791_v5 = vld [vmem:[#allocation10_spill] sm:$0xff] }
 0x5b0   :  { %v8225_v25 = vpop.eup %8224  ;;  %4339 = vrot.lane.b32.xlu1 %v12454_v23, %s8483_s11 }
 0x5b1   :  { %8226 = vpow2.f32 %v4167_v31  ;;  %v4144_v3 = vmin.f32 %v12449_v13, 20.0  ;;  %v12459_v45 = vpop.permute.xlu1 %3612  ;;  %v4270_v30 = vmul.f32 %v8225_v25, %v4222_v4  ;;  %v3294_v50 = vadd.f32 %v12284_v52, %v3203_v6  ;;  %v15792_v31 = vld [vmem:[#allocation166_spill] sm:$0xff] }
 0x5b2   :  { %v3740_v61 = vpop.permute.xlu0 %3739  ;;  %v3204_v25 = vadd.f32 %v15792_v31, %v11774_v44  ;;  %vm4288_vm12 = vcmp.gt.f32.partialorder %v12449_v13, 20.0 }
 0x5b3   :  { %v4169_v62 = vmul.f32 1.442695, %v4144_v3  ;;  %4395 = vrot.lane.b32.xlu0 %v15788_v49, %s8479_s29  ;;  %v12465_v10 = vsel %vm4286_vm10, %v12373_v53, %v4270_v30  ;;  %v3422_v3 = vadd.f32 %v12424_v63, %v3294_v50  ;;  %v15793_v30 = vld [vmem:[#allocation19_spill] sm:$0xff] }
 0x5b4   :  { %15789 = vst [vmem:[#allocation156_spill] sm:$0xff] %v12465_v10  ;;  %4341 = vrot.lane.b32.xlu1 %v12465_v10, %s8483_s11  ;;  %v3295_v59 = vadd.f32 %v12367_v17, %v3204_v25  ;;  %v15895_v10 = vld [vmem:[#allocation132_spill] sm:$0xff] }
 0x5b5   :  { %8228 = vpow2.f32 %v4169_v62  ;;  %v12469_v41 = vpop.permute.xlu1 %3614  ;;  %v3550_v49 = vadd.f32 %v3513_v36, %v3422_v3 }
 0x5b6   :  { %v3838_v60 = vpop.permute.xlu0 %3837  ;;  %v3423_v19 = vadd.f32 %v12431_v12, %v3295_v59 }
 0x5b7   :  { %4397 = vrot.lane.b32.xlu0 %v15791_v5, %s8479_s29  ;;  %v3646_v50 = vadd.f32 %v12382_v14, %v3550_v49  ;;  %v15796_v14 = vld [vmem:[#allocation13_spill] sm:$0xff] }
 0x5b8   :  { %v3551_v63 = vadd.f32 %v3515_v51, %v3423_v19 }
 0x5b9   :  { %v12476_v43 = vpop.permute.xlu1 %3265  ;;  %v3777_v25 = vadd.f32 %v3740_v61, %v3646_v50  ;;  %v15797_v50 = vld [vmem:[#allocation78_spill] sm:$0xff] }
 0x5ba   :  { %v12478_v4 = vpop.permute.xlu0 %3839  ;;  %v3647_v12 = vadd.f32 %v12394_v22, %v3551_v63 }
 0x5bb   :  { %v8227_v53 = vpop.eup %8226  ;;  %4399 = vrot.lane.b32.xlu0 %v15793_v30, %s8479_s29  ;;  %v3873_v51 = vadd.f32 %v12410_v47, %v3777_v25 }
 0x5bc   :  { %v4191_v62 = vadd.f32 2.0, %v8227_v53 }
 0x5bd   :  { %v12486_v5 = vpop.permute.xlu1 %3388 }
 0x5be   :  { %v4207_v52 = vmul.f32 %v8227_v53, %v4191_v62  ;;  %v3742_v6 = vpop.permute.xlu0 %3741  ;;  %v15795_v53 = vld [vmem:[#allocation21_spill] sm:$0xff] }
 0x5bf   :  { %v8229_v20 = vpop.eup %8228  ;;  %4401 = vrot.lane.b32.xlu0 %v15794_v7, %s8479_s29  ;;  %v3778_v7 = vadd.f32 %v3742_v6, %v3647_v12 }
 0x5c0   :  { %v4239_v31 = vadd.f32 2.0, %v4207_v52  ;;  %v4192_v26 = vadd.f32 2.0, %v8229_v20 }
 0x5c1   :  { %v12492_v30 = vpop.permute.xlu1 %3390  ;;  %v3874_v61 = vadd.f32 %v3838_v60, %v3778_v7 }
 0x5c2   :  { %8230 = vrcp.f32 %v4239_v31  ;;  %v4208_v17 = vmul.f32 %v8229_v20, %v4192_v26  ;;  %v3964_v36 = vpop.permute.xlu0 %3963  ;;  %v4223_v20 = vmul.f32 %v4207_v52, %v12440_v38 }
 0x5c3   :  { %4403 = vrot.lane.b32.xlu0 %v15795_v53, %s8479_s29  ;;  %v4001_v19 = vadd.f32 %v3964_v36, %v3873_v51 }
 0x5c4   :  { %v4240_v3 = vadd.f32 2.0, %v4208_v17  ;;  %v4224_v36 = vmul.f32 %v4208_v17, %v12449_v13 }
 0x5c5   :  { %v3517_v62 = vpop.permute.xlu1 %3516 }
 0x5c6   :  { %8232 = vrcp.f32 %v4240_v3  ;;  %v3966_v59 = vpop.permute.xlu0 %3965 }
 0x5c7   :  { %4405 = vrot.lane.b32.xlu0 %v15796_v14, %s8479_s29  ;;  %v4002_v63 = vadd.f32 %v3966_v59, %v3874_v61 }
 0x5c9   :  { %v3519_v49 = vpop.permute.xlu1 %3518 }
 0x5ca   :  { %v4092_v26 = vpop.permute.xlu0 %4091 }
 0x5cb   :  { %v12501_v31 = vadd.f32 %v4092_v26, %v4001_v19  ;;  %5656 = vrot.lane.b32.xlu0 %v15797_v50, %s8482_s2  ;;  %v15801_v50 = vld [vmem:[#allocation210_spill] sm:$0xff] }
 0x5cc   :  { %v8231_v22 = vpop.eup %8230 }
 0x5cd   :  { %v4145_v6 = vmin.f32 %v12501_v31, 20.0  ;;  %v12506_v3 = vpop.permute.xlu1 %3267  ;;  %v4271_v47 = vmul.f32 %v8231_v22, %v4223_v20  ;;  %v15799_v20 = vld [vmem:[#allocation191_spill] sm:$0xff]  ;;  %v3205_v22 = vadd.f32 %v11774_v44, %v15801_v50  ;;  %vm4289_vm14 = vcmp.gt.f32.partialorder %v12501_v31, 20.0 }
 0x5ce   :  { %v4094_v25 = vpop.permute.xlu0 %4093 }
 0x5cf   :  { %v4171_v12 = vmul.f32 1.442695, %v4145_v6  ;;  %v12510_v52 = vadd.f32 %v4094_v25, %v4002_v63  ;;  %5704 = vrot.lane.b32.xlu0 %v12355_v24, %s8479_s29  ;;  %v12515_v7 = vsel %vm4287_vm11, %v12440_v38, %v4271_v47  ;;  %v3296_v63 = vadd.f32 %v12407_v40, %v3205_v22  ;;  %v15802_v25 = vld [vmem:[#allocation209_spill] sm:$0xff] }
 0x5d0   :  { %15798 = vst [vmem:[#allocation155_spill] sm:$0xff] %v12515_v7  ;;  %v8233_v60 = vpop.eup %8232  ;;  %4343 = vrot.lane.b32.xlu1 %v12515_v7, %s8483_s11 }
 0x5d1   :  { %8234 = vpow2.f32 %v4171_v12  ;;  %v4146_v59 = vmin.f32 %v12510_v52, 20.0  ;;  %v3617_v51 = vpop.permute.xlu1 %3616  ;;  %v4272_v19 = vmul.f32 %v8233_v60, %v4224_v36  ;;  %v3206_v36 = vadd.f32 %v15802_v25, %v11774_v44  ;;  %v15803_v60 = vld [vmem:[#allocation194_spill] sm:$0xff] }
 0x5d2   :  { %v3744_v26 = vpop.permute.xlu0 %3743  ;;  %v3424_v12 = vadd.f32 %v12486_v5, %v3296_v63  ;;  %vm4290_vm15 = vcmp.gt.f32.partialorder %v12510_v52, 20.0 }
 0x5d3   :  { %v4173_v17 = vmul.f32 1.442695, %v4146_v59  ;;  %5660 = vrot.lane.b32.xlu0 %v15799_v20, %s8482_s2  ;;  %v12524_v24 = vsel %vm4288_vm12, %v12449_v13, %v4272_v19  ;;  %v3297_v19 = vadd.f32 %v12445_v46, %v3206_v36  ;;  %v15805_v36 = vld [vmem:[#allocation196_spill] sm:$0xff] }
 0x5d4   :  { %15800 = vst [vmem:[#allocation160_spill] sm:$0xff] %v12524_v24  ;;  %4345 = vrot.lane.b32.xlu1 %v12524_v24, %s8483_s11 }
 0x5d5   :  { %8236 = vpow2.f32 %v4173_v17  ;;  %v12528_v38 = vpop.permute.xlu1 %3618  ;;  %v3552_v17 = vadd.f32 %v3517_v62, %v3424_v12  ;;  %v3425_v40 = vadd.f32 %v12492_v30, %v3297_v19  ;;  %v15806_v19 = vld [vmem:[#allocation157_spill] sm:$0xff] }
 0x5d6   :  { %v12530_v61 = vpop.permute.xlu0 %3845 }
 0x5d7   :  { %5708 = vrot.lane.b32.xlu0 %v12386_v56, %s8479_s29  ;;  %v3553_v53 = vadd.f32 %v3519_v49, %v3425_v40  ;;  %v3648_v5 = vadd.f32 %v12459_v45, %v3552_v17  ;;  %v3208_v17 = vadd.f32 %v15806_v19, %v11774_v44 }
 0x5d9   :  { %v3844_v6 = vpop.permute.xlu1 %3843 }
 0x5da   :  { %v3842_v47 = vpop.permute.xlu0 %3841 }
 0x5db   :  { %v8235_v13 = vpop.eup %8234  ;;  %5664 = vrot.lane.b32.xlu0 %v15803_v60, %s8482_s2  ;;  %v15804_v60 = vld [vmem:[#allocation213_spill] sm:$0xff] }
 0x5dc   :  { %v4193_v59 = vadd.f32 2.0, %v8235_v13  ;;  %v3207_v18 = vadd.f32 %v11774_v44, %v15804_v60 }
 0x5dd   :  { %v3393_v20 = vpop.permute.xlu1 %3392 }
 0x5de   :  { %v4209_v50 = vmul.f32 %v8235_v13, %v4193_v59  ;;  %v3746_v56 = vpop.permute.xlu0 %3745  ;;  %v3779_v13 = vadd.f32 %v3744_v26, %v3648_v5  ;;  %v3298_v30 = vadd.f32 %v12476_v43, %v3207_v18  ;;  %v3299_v26 = vadd.f32 %v12506_v3, %v3208_v17 }
 0x5df   :  { %v8237_v14 = vpop.eup %8236  ;;  %5712 = vrot.lane.b32.xlu0 %v12413_v58, %s8479_s29  ;;  %v3649_v58 = vadd.f32 %v12469_v41, %v3553_v53 }
 0x5e0   :  { %v4241_v22 = vadd.f32 2.0, %v4209_v50  ;;  %v4194_v25 = vadd.f32 2.0, %v8237_v14  ;;  %v3426_v49 = vadd.f32 %v3393_v20, %v3298_v30  ;;  %v4225_v18 = vmul.f32 %v4209_v50, %v12501_v31 }
 0x5e1   :  { %v3395_v63 = vpop.permute.xlu1 %3394  ;;  %v3780_v40 = vadd.f32 %v3746_v56, %v3649_v58 }
 0x5e2   :  { %8238 = vrcp.f32 %v4241_v22  ;;  %v4210_v46 = vmul.f32 %v8237_v14, %v4194_v25  ;;  %v3968_v62 = vpop.permute.xlu0 %3967  ;;  %v3875_v14 = vadd.f32 %v12478_v4, %v3779_v13  ;;  %v3427_v43 = vadd.f32 %v3395_v63, %v3299_v26 }
 0x5e3   :  { %5668 = vrot.lane.b32.xlu0 %v15805_v36, %s8482_s2  ;;  %v3876_v41 = vadd.f32 %v3842_v47, %v3780_v40 }
 0x5e4   :  { %v4242_v12 = vadd.f32 2.0, %v4210_v46  ;;  %v4003_v25 = vadd.f32 %v3968_v62, %v3875_v14  ;;  %v4226_v3 = vmul.f32 %v4210_v46, %v12510_v52 }
 0x5e5   :  { %v3521_v59 = vpop.permute.xlu1 %3520 }
 0x5e6   :  { %8240 = vrcp.f32 %v4242_v12  ;;  %v3970_v45 = vpop.permute.xlu0 %3969  ;;  %v3554_v22 = vadd.f32 %v3521_v59, %v3426_v49 }
 0x5e7   :  { %v4004_v30 = vadd.f32 %v3970_v45, %v3876_v41 }
 0x5e8   :  { %v3650_v36 = vadd.f32 %v3617_v51, %v3554_v22 }
 0x5e9   :  { %v3523_v5 = vpop.permute.xlu1 %3522 }
 0x5ea   :  { %v4096_v60 = vpop.permute.xlu0 %4095  ;;  %v3555_v12 = vadd.f32 %v3523_v5, %v3427_v43 }
 0x5eb   :  { %v12558_v53 = vadd.f32 %v4096_v60, %v4003_v25 }
 0x5ec   :  { %v8239_v20 = vpop.eup %8238  ;;  %v3651_v45 = vadd.f32 %v12528_v38, %v3555_v12 }
 0x5ed   :  { %v4147_v44 = vmin.f32 %v12558_v53, 20.0  ;;  %v3748_v56 = vpop.permute.xlu1 %3747  ;;  %v4273_v4 = vmul.f32 %v8239_v20, %v4225_v18  ;;  %vm4291_vm0 = vcmp.gt.f32.partialorder %v12558_v53, 20.0 }
 0x5ee   :  { %v3781_v13 = vadd.f32 %v3748_v56, %v3650_v36  ;;  %v4098_v58 = vpop.permute.xlu0 %4097 }
 0x5ef   :  { %v4175_v62 = vmul.f32 1.442695, %v4147_v44  ;;  %v12563_v50 = vadd.f32 %v4098_v58, %v4004_v30  ;;  %v12566_v47 = vsel %vm4289_vm14, %v12501_v31, %v4273_v4 }
 0x5f0   :  { %15807 = vst [vmem:[#allocation159_spill] sm:$0xff] %v12566_v47  ;;  %v8241_v63 = vpop.eup %8240  ;;  %4347 = vrot.lane.b32.xlu1 %v12566_v47, %s8483_s11  ;;  %v3877_v51 = vadd.f32 %v3844_v6, %v3781_v13 }
 0x5f1   :  { %8242 = vpow2.f32 %v4175_v62  ;;  %v4148_v59 = vmin.f32 %v12563_v50, 20.0  ;;  %v3972_v49 = vpop.permute.xlu1 %3971  ;;  %v4274_v19 = vmul.f32 %v8241_v63, %v4226_v3  ;;  %vm4292_vm13 = vcmp.gt.f32.partialorder %v12563_v50, 20.0 }
 0x5f2   :  { %v3750_v17 = vpop.permute.xlu0 %3749  ;;  %v4005_v14 = vadd.f32 %v3972_v49, %v3877_v51 }
 0x5f3   :  { %v4177_v46 = vmul.f32 1.442695, %v4148_v59  ;;  %v3782_v40 = vadd.f32 %v3750_v17, %v3651_v45  ;;  %v12574_v31 = vsel %vm4290_vm15, %v12510_v52, %v4274_v19 }
 0x5f4   :  { %15808 = vst [vmem:[#allocation34_spill] sm:$0xff] %v12574_v31  ;;  %4349 = vrot.lane.b32.xlu1 %v12574_v31, %s8483_s11 }
 0x5f5   :  { %8244 = vpow2.f32 %v4177_v46  ;;  %v4100_v6 = vpop.permute.xlu1 %4099  ;;  %v3878_v22 = vadd.f32 %v12530_v61, %v3782_v40 }
 0x5f6   :  { %v12579_v26 = vadd.f32 %v4100_v6, %v4005_v14  ;;  %v3974_v38 = vpop.permute.xlu0 %3973 }
 0x5f7   :  { %v4006_v5 = vadd.f32 %v3974_v38, %v3878_v22 }
 0x5f8   :  { %v4149_v25 = vmin.f32 %v12579_v26, 20.0  ;;  %vm4293_vm3 = vcmp.gt.f32.partialorder %v12579_v26, 20.0 }
 0x5f9   :  { %v4328_v60 = vpop.permute.xlu1 %4327 }
 0x5fa   :  { %v4179_v18 = vmul.f32 1.442695, %v4149_v25  ;;  %v4102_v43 = vpop.permute.xlu0 %4101 }
 0x5fb   :  { %v8243_v41 = vpop.eup %8242  ;;  %v12582_v52 = vadd.f32 %v4102_v43, %v4006_v5 }
 0x5fc   :  { %v4195_v20 = vadd.f32 2.0, %v8243_v41  ;;  %8246 = vpow2.f32 %v4179_v18 }
 0x5fd   :  { %v4150_v36 = vmin.f32 %v12582_v52, 20.0  ;;  %v4330_v30 = vpop.permute.xlu1 %4329  ;;  %vm4294_vm5 = vcmp.gt.f32.partialorder %v12582_v52, 20.0 }
 0x5fe   :  { %v4211_v12 = vmul.f32 %v8243_v41, %v4195_v20  ;;  %v4376_v44 = vpop.permute.xlu0 %4375 }
 0x5ff   :  { %v8245_v61 = vpop.eup %8244  ;;  %v4181_v56 = vmul.f32 1.442695, %v4150_v36  ;;  %v4423_v4 = vsel %vm500_vm1, %v4328_v60, %v4376_v44 }
 0x600   :  { %v4243_v13 = vadd.f32 2.0, %v4211_v12  ;;  %v4196_v58 = vadd.f32 2.0, %v8245_v61  ;;  %7704 = vmatprep.mubr.msk.f32.mxu0 %vm2921_vm9, %v4423_v4  ;;  %v4227_v22 = vmul.f32 %v4211_v12, %v12558_v53 }
 0x601   :  { %8248 = vpow2.f32 %v4181_v56  ;;  %v4332_v3 = vpop.permute.xlu1 %4331 }
 0x602   :  { %8250 = vrcp.f32 %v4243_v13  ;;  %v4212_v62 = vmul.f32 %v8245_v61, %v4196_v58  ;;  %v4378_v63 = vpop.permute.xlu0 %4377 }
 0x603   :  { %v4424_v51 = vsel %vm500_vm1, %v4330_v30, %v4378_v63 }
 0x604   :  { %v4244_v59 = vadd.f32 2.0, %v4212_v62  ;;  %7705 = vmatmul.mubr.msk.f32.vlgmr.msra.gmra.mrb[12].mxu0 %vm2921_vm9, %v4424_v51  ;;  %v4228_v36 = vmul.f32 %v4212_v62, %v12563_v50 }
 0x605   :  { %v4334_v45 = vpop.permute.xlu1 %4333 }
 0x606   :  { %v8247_v49 = vpop.eup %8246  ;;  %8252 = vrcp.f32 %v4244_v59  ;;  %v4380_v19 = vpop.permute.xlu0 %4379 }
 0x607   :  { %v4197_v17 = vadd.f32 2.0, %v8247_v49  ;;  %v4425_v46 = vsel %vm500_vm1, %v4332_v3, %v4380_v19 }
 0x608   :  { %7707 = vmatprep.mubr.msk.f32.mxu0 %vm2921_vm9, %v4425_v46 }
 0x609   :  { %v4213_v40 = vmul.f32 %v8247_v49, %v4197_v17  ;;  %v4336_v18 = vpop.permute.xlu1 %4335 }
 0x60a   :  { %v4382_v14 = vpop.permute.xlu0 %4381 }
 0x60b   :  { %v8249_v6 = vpop.eup %8248  ;;  %v4245_v38 = vadd.f32 2.0, %v4213_v40  ;;  %v4426_v25 = vsel %vm500_vm1, %v4334_v45, %v4382_v14 }
 0x60c   :  { %v8251_v5 = vpop.eup %8250  ;;  %v4198_v60 = vadd.f32 2.0, %v8249_v6  ;;  %7708 = vmatmul.mubr.msk.f32.gmra.mrb[14].mxu0 %vm2921_vm9, %v4426_v25 }
 0x60d   :  { %8254 = vrcp.f32 %v4245_v38  ;;  %v4275_v43 = vmul.f32 %v8251_v5, %v4227_v22  ;;  %v4338_v4 = vpop.permute.xlu1 %4337  ;;  %v15814_v22 = vld [vmem:[#allocation189_spill] sm:$0xff]  ;;  %v15816_v5 = vld [vmem:[#allocation195_spill] sm:$0xff] }
 0x60e   :  { %v4214_v41 = vmul.f32 %v8249_v6, %v4198_v60  ;;  %v4384_v20 = vpop.permute.xlu0 %4383  ;;  %v15813_v6 = vld [vmem:[#allocation184_spill] sm:$0xff]  ;;  %v15815_v38 = vld [vmem:[#allocation149_spill] sm:$0xff] }
 0x60f   :  { %v4427_v30 = vsel %vm500_vm1, %v4336_v18, %v4384_v20  ;;  %v12598_v12 = vsel %vm4291_vm0, %v12558_v53, %v4275_v43  ;;  %v4229_v53 = vmul.f32 %v4213_v40, %v12579_v26 }
 0x610   :  { %15809 = vst [vmem:[#allocation36_spill] sm:$0xff] %v12598_v12  ;;  %v8253_v44 = vpop.eup %8252  ;;  %v4246_v61 = vadd.f32 2.0, %v4214_v41  ;;  %4351 = vrot.lane.b32.xlu1 %v12598_v12, %s8483_s11  ;;  %7710 = vmatprep.mubr.msk.f32.mxu0 %vm2921_vm9, %v4427_v30  ;;  %v4230_v59 = vmul.f32 %v4214_v41, %v12582_v52 }
 0x611   :  { %v4276_v56 = vmul.f32 %v8253_v44, %v4228_v36 }
 0x612   :  { %8256 = vrcp.f32 %v4246_v61  ;;  %v4386_v13 = vpop.permute.xlu0 %4385 }
 0x613   :  { %v4428_v58 = vsel %vm500_vm1, %v4338_v4, %v4386_v13  ;;  %v12606_v3 = vsel %vm4292_vm13, %v12563_v50, %v4276_v56 }
 0x614   :  { %15810 = vst [vmem:[#allocation28_spill] sm:$0xff] %v12606_v3  ;;  %4353 = vrot.lane.b32.xlu1 %v12606_v3, %s8483_s11  ;;  %7711 = vmatmul.mubr.msk.f32.gmra.mrb[16].mxu0 %vm2921_vm9, %v4428_v58 }
 0x616   :  { %v4388_v19 = vpop.permute.xlu0 %4387 }
 0x617   :  { %v8255_v62 = vpop.eup %8254 }
 0x618   :  { %v4277_v63 = vmul.f32 %v8255_v62, %v4229_v53 }
 0x61a   :  { %v12614_v51 = vsel %vm4293_vm3, %v12579_v26, %v4277_v63  ;;  %v7440_v26 = vld [vmem:[%s14718_s8 + $0x2] ss:$0 sm:$0xff]  ;;  %v4390_v40 = vpop.permute.xlu0 %4389 }
 0x61b   :  { %15811 = vst [vmem:[#allocation38_spill] sm:$0xff] %v12614_v51  ;;  %4355 = vrot.lane.b32.xlu1 %v12614_v51, %s8483_s11  ;;  %v15858_v51 = vld [vmem:[#allocation115_spill] sm:$0xff] }
 0x61c   :  { %v8257_v50 = vpop.eup %8256 }
 0x61d   :  { %v4278_v49 = vmul.f32 %v8257_v50, %v4230_v59 }
 0x61e   :  { %v4392_v25 = vpop.permute.xlu0 %4391 }
 0x61f   :  { %v12621_v45 = vsel %vm4294_vm5, %v12582_v52, %v4278_v49 }
 0x620   :  { %15812 = vst [vmem:[#allocation30_spill] sm:$0xff] %v12621_v45  ;;  %4357 = vrot.lane.b32.xlu1 %v12621_v45, %s8483_s11  ;;  %v15852_v45 = vld [vmem:[#allocation104_spill] sm:$0xff] }
 0x622   :  { %v4340_v17 = vpop.permute.xlu1 %4339 }
 0x623   :  { %v4429_v46 = vsel %vm500_vm1, %v4340_v17, %v4388_v19 }
 0x624   :  { %4709 = vrot.lane.b32.xlu1 %v7440_v26, %s8477_s28  ;;  %7713 = vmatprep.mubr.msk.f32.mxu0 %vm2921_vm9, %v4429_v46 }
 0x626   :  { %v4342_v14 = vpop.permute.xlu1 %4341 }
 0x627   :  { %v4430_v52 = vsel %vm500_vm1, %v4342_v14, %v4390_v40 }
 0x628   :  { %5654 = vrot.lane.b32.xlu1 %v15813_v6, %s8482_s2  ;;  %7714 = vmatmul.mubr.msk.f32.gmra.mrb[18].mxu0 %vm2921_vm9, %v4430_v52  ;;  %v15819_v52 = vld [vmem:[#allocation23_spill] sm:$0xff] }
 0x62c   :  { %5702 = vrot.lane.b32.xlu1 %v12337_v29, %s8479_s29  ;;  %v4394_v29 = vpop.permute.xlu0 %4393 }
 0x630   :  { %5658 = vrot.lane.b32.xlu1 %v15814_v22, %s8482_s2  ;;  %v4396_v41 = vpop.permute.xlu0 %4395  ;;  %v15820_v22 = vld [vmem:[#allocation20_spill] sm:$0xff] }
 0x634   :  { %5706 = vrot.lane.b32.xlu1 %v12371_v33, %s8479_s29  ;;  %v4398_v36 = vpop.permute.xlu0 %4397 }
 0x638   :  { %5662 = vrot.lane.b32.xlu1 %v15815_v38, %s8482_s2 }
 0x63c   :  { %5710 = vrot.lane.b32.xlu1 %v12398_v2, %s8479_s29 }
 0x640   :  { %5666 = vrot.lane.b32.xlu1 %v15816_v5, %s8482_s2 }
 0x642   :  { %v4344_v60 = vpop.permute.xlu1 %4343 }
 0x643   :  { %v4431_v18 = vsel %vm500_vm1, %v4344_v60, %v4392_v25  ;;  %v15821_v25 = vld [vmem:[#allocation81_spill] sm:$0xff]  ;;  %v15822_v60 = vld [vmem:[#allocation83_spill] sm:$0xff] }
 0x644   :  { %5714 = vrot.lane.b32.xlu1 %v12454_v23, %s8479_s29  ;;  %7716 = vmatprep.mubr.msk.f32.mxu0 %vm2921_vm9, %v4431_v18  ;;  %v4400_v23 = vpop.permute.xlu0 %4399 }
 0x646   :  { %v4346_v33 = vpop.permute.xlu1 %4345 }
 0x647   :  { %v4432_v43 = vsel %vm500_vm1, %v4346_v33, %v4394_v29  ;;  %v15823_v29 = vld [vmem:[#allocation84_spill] sm:$0xff] }
 0x648   :  { %7717 = vmatmul.mubr.msk.f32.gmra.mrb[20].mxu0 %vm2921_vm9, %v4432_v43  ;;  %v4402_v4 = vpop.permute.xlu0 %4401  ;;  %v15824_v43 = vld [vmem:[#allocation87_spill] sm:$0xff] }
 0x64c   :  { %v4404_v53 = vpop.permute.xlu0 %4403 }
 0x650   :  { %v4406_v59 = vpop.permute.xlu0 %4405 }
 0x662   :  { %v4348_v2 = vpop.permute.xlu1 %4347 }
 0x663   :  { %v4433_v20 = vsel %vm500_vm1, %v4348_v2, %v4396_v41  ;;  %v15825_v2 = vld [vmem:[#allocation85_spill] sm:$0xff] }
 0x664   :  { %7719 = vmatprep.mubr.msk.f32.mxu0 %vm2921_vm9, %v4433_v20 }
 0x666   :  { %v4350_v30 = vpop.permute.xlu1 %4349 }
 0x667   :  { %v4434_v44 = vsel %vm500_vm1, %v4350_v30, %v4398_v36  ;;  %v15826_v36 = vld [vmem:[#allocation90_spill] sm:$0xff] }
 0x668   :  { %7720 = vmatmul.mubr.msk.f32.gmra.mrb[22].mxu0 %vm2921_vm9, %v4434_v44 }
 0x682   :  { %v4352_v61 = vpop.permute.xlu1 %4351 }
 0x683   :  { %v4435_v56 = vsel %vm500_vm1, %v4352_v61, %v4400_v23  ;;  %v15828_v23 = vld [vmem:[#allocation24_spill] sm:$0xff] }
 0x684   :  { %7722 = vmatprep.mubr.msk.f32.mxu0 %vm2921_vm9, %v4435_v56 }
 0x686   :  { %v4354_v13 = vpop.permute.xlu1 %4353 }
 0x687   :  { %v4436_v58 = vsel %vm500_vm1, %v4354_v13, %v4402_v4 }
 0x688   :  { %7723 = vmatmul.mubr.msk.f32.gmra.mrb[24].mxu0 %vm2921_vm9, %v4436_v58 }
 0x68d   :  { %v4356_v62 = vpop.permute.xlu1 %4355 }
 0x68e   :  { %v4437_v63 = vsel %vm500_vm1, %v4356_v62, %v4404_v53  ;;  %v15830_v62 = vld [vmem:[#allocation22_spill] sm:$0xff] }
 0x68f   :  { %7725 = vmatprep.mubr.msk.f32.mxu0 %vm2921_vm9, %v4437_v63 }
 0x692   :  { %v4358_v50 = vpop.permute.xlu1 %4357 }
 0x693   :  { %v4438_v49 = vsel %vm500_vm1, %v4358_v50, %v4406_v59 }
 0x694   :  { %7726 = vmatmul.mubr.msk.f32.gmra.mrb[26].mxu0 %vm2921_vm9, %v4438_v49 }
 0x6d7   :  { %v12665_v19 = vpop.f32.mrb[12].mxu0 }
 0x6d8   :  { %15817 = vst [vmem:[#allocation31_spill] sm:$0xff] %v12665_v19  ;;  %v4655_v26 = vrot.slane %v12665_v19, 7  ;;  %v12668_v17 = vpop.f32.mrb[13].mxu0  ;;  %v15986_v19 = vld [vmem:[#allocation180_spill] sm:$0xff] }
 0x6d9   :  { %15818 = vst [vmem:[#allocation40_spill] sm:$0xff] %v12668_v17  ;;  %v4654_v46 = vrot.slane %v12668_v17, 7  ;;  %v15991_v17 = vld [vmem:[#allocation190_spill] sm:$0xff] }
 0x6db   :  { %v4656_v40 = vsel %vm698_vm2, %v4654_v46, %v4655_v26  ;;  %v4702_v14 = vsel %vm698_vm2, 0.0, %v4654_v46 }
 0x6dc   :  { %v5075_v6 = vmul.f32 %v4702_v14, %v15819_v52  ;;  %v4728_v38 = vmul.f32 %v4702_v14, %v15820_v22  ;;  %v4819_v5 = vmul.f32 %v4702_v14, %v15821_v25  ;;  %v4820_v18 = vmul.f32 %v4656_v40, %v15822_v60 }
 0x6dd   :  { %v4947_v33 = vmul.f32 %v4702_v14, %v15823_v29  ;;  %v4948_v41 = vmul.f32 %v4656_v40, %v15824_v43  ;;  %v5171_v20 = vmul.f32 %v4702_v14, %v15825_v2  ;;  %v5172_v30 = vmul.f32 %v4656_v40, %v15826_v36  ;;  %v15833_v29 = vld [vmem:[#allocation82_spill] sm:$0xff]  ;;  %v15835_v2 = vld [vmem:[#allocation92_spill] sm:$0xff]  ;;  %v15836_v36 = vld [vmem:[#allocation97_spill] sm:$0xff] }
 0x6de   :  { %5107 = vrot.lane.b32.xlu1 %v5075_v6, %s8478_s1  ;;  %4758 = vrot.lane.b32.xlu0 %v4728_v38, %s8477_s28  ;;  %v5076_v61 = vmul.f32 %v4656_v40, %v15828_v23  ;;  %v4851_v56 = vrot.slane %v4819_v5, 1  ;;  %v4853_v4 = vrot.slane %v4820_v18, 1  ;;  %v4729_v63 = vmul.f32 %v4656_v40, %v15830_v62  ;;  %v15831_v6 = vld [vmem:[#allocation91_spill] sm:$0xff]  ;;  %v15832_v5 = vld [vmem:[#allocation26_spill] sm:$0xff] }
 0x6df   :  { %v12683_v44 = vpop.f32.mrb[14].mxu0  ;;  %v4979_v13 = vrot.slane %v4947_v33, 2  ;;  %v4981_v59 = vrot.slane %v4948_v41, 2  ;;  %v5205_v50 = vrot.slane %v5171_v20, 2  ;;  %v5206_v52 = vrot.slane %v5172_v30, 2  ;;  %v15834_v43 = vld [vmem:[#allocation86_spill] sm:$0xff] }
 0x6e0   :  { %15827 = vst [vmem:[#allocation33_spill] sm:$0xff] %v12683_v44  ;;  %v4659_v58 = vrot.slane %v12683_v44, 7  ;;  %v12687_v53 = vpop.f32.mrb[15].mxu0  ;;  %v4854_v46 = vsel %vm1127_vm4, %v4851_v56, %v4853_v4  ;;  %v5398_v22 = vmul.f32 %v4656_v40, %v15831_v6  ;;  %v5302_v60 = vmul.f32 %v4656_v40, %v15832_v5  ;;  %v15962_v44 = vld [vmem:[#allocation165_spill] sm:$0xff] }
 0x6e1   :  { %15829 = vst [vmem:[#allocation42_spill] sm:$0xff] %v12687_v53  ;;  %v4657_v49 = vrot.slane %v12687_v53, 7  ;;  %v4982_v14 = vsel %vm533_vm6, %v4979_v13, %v4981_v59  ;;  %v5207_v18 = vsel %vm533_vm6, %v5205_v50, %v5206_v52  ;;  %v4852_v33 = vsel %vm1127_vm4, %v15833_v29, %v4851_v56  ;;  %v15839_v50 = vld [vmem:[#allocation89_spill] sm:$0xff]  ;;  %v15975_v53 = vld [vmem:[#allocation162_spill] sm:$0xff] }
 0x6e2   :  { %5109 = vrot.lane.b32.xlu0 %v5076_v61, %s8478_s1  ;;  %4760 = vrot.lane.b32.xlu1 %v4729_v63, %s8477_s28  ;;  %v4980_v41 = vsel %vm533_vm6, %v15834_v43, %v4979_v13  ;;  %v5526_v30 = vmul.f32 %v4656_v40, %v15836_v36  ;;  %v15838_v61 = vld [vmem:[#allocation96_spill] sm:$0xff]  ;;  %v5430_v63 = vrot.slane %v5398_v22, 1  ;;  %v15841_v13 = vld [vmem:[#allocation99_spill] sm:$0xff]  ;;  %v15842_v29 = vld [vmem:[#allocation93_spill] sm:$0xff] }
 0x6e3   :  { %v4658_v38 = vsel %vm698_vm2, %v4655_v26, %v4657_v49  ;;  %v12698_v25 = vsel %vm698_vm2, %v4657_v49, %v4659_v58  ;;  %v15837_v26 = vld [vmem:[#allocation88_spill] sm:$0xff]  ;;  %v15843_v43 = vld [vmem:[#allocation102_spill] sm:$0xff]  ;;  %v15845_v36 = vld [vmem:[#allocation25_spill] sm:$0xff] }
 0x6e4   :  { %v5173_v20 = vmul.f32 %v4658_v38, %v15835_v2  ;;  %v4821_v23 = vmul.f32 %v4658_v38, %v15837_v26  ;;  %v5399_v62 = vmul.f32 %v4658_v38, %v15838_v61  ;;  %v4822_v49 = vmul.f32 %v12698_v25, %v15839_v50 }
 0x6e5   :  { %v5400_v5 = vmul.f32 %v12698_v25, %v15841_v13  ;;  %v4949_v40 = vmul.f32 %v4658_v38, %v15842_v29  ;;  %v4730_v26 = vmul.f32 %v4658_v38, %v15845_v36  ;;  %v5558_v37 = vrot.slane %v5526_v30, 2  ;;  %v15848_v36 = vld [vmem:[#allocation100_spill] sm:$0xff] }
 0x6e6   :  { %5334 = vrot.lane.b32.xlu0 %v5302_v60, %s8479_s29  ;;  %4883 = vrot.lane.b32.xlu1 %v4852_v33, %s8480_s30  ;;  %v5208_v6 = vrot.slane %v5173_v20, 2  ;;  %v5527_v60 = vmul.f32 %v4658_v38, %v15843_v43  ;;  %v4855_v22 = vrot.slane %v4821_v23, 1  ;;  %v5431_v61 = vrot.slane %v5399_v62, 1 }
 0x6e7   :  { %v12714_v56 = vpop.f32.mrb[16].mxu0  ;;  %v4857_v20 = vrot.slane %v4822_v49, 1  ;;  %v5433_v43 = vrot.slane %v5400_v5, 1  ;;  %v4983_v23 = vrot.slane %v4949_v40, 2 }
 0x6e8   :  { %15840 = vst [vmem:[#allocation35_spill] sm:$0xff] %v12714_v56  ;;  %v15046_v33 = vrot.slane %v12714_v56, 7  ;;  %v12721_v2 = vpop.f32.mrb[17].mxu0  ;;  %v12726_v34 = vsel %vm533_vm6, %v5206_v52, %v5208_v6  ;;  %v12731_v13 = vsel %vm1127_vm4, %v4853_v4, %v4855_v22  ;;  %v12734_v29 = vsel %vm1127_vm4, %v5430_v63, %v5431_v61  ;;  %v15846_v63 = vld [vmem:[#allocation94_spill] sm:$0xff] }
 0x6e9   :  { %15844 = vst [vmem:[#allocation44_spill] sm:$0xff] %v12721_v2  ;;  %v4661_v50 = vrot.slane %v12721_v2, 7  ;;  %v12748_v4 = vsel %vm1127_vm4, %v5431_v61, %v5433_v43  ;;  %v12751_v30 = vsel %vm533_vm6, %v4981_v59, %v4983_v23  ;;  %v4950_v49 = vmul.f32 %v12698_v25, %v15846_v63  ;;  %v15851_v63 = vld [vmem:[#allocation43_spill] sm:$0xff] }
 0x6ea   :  { %4885 = vrot.lane.b32.xlu0 %v4854_v46, %s8480_s30  ;;  %5011 = vrot.lane.b32.xlu1 %v4980_v41, %s8481_s0  ;;  %v12745_v46 = vsel %vm1127_vm4, %v4855_v22, %v4857_v20  ;;  %v5559_v41 = vrot.slane %v5527_v60, 2  ;;  %v5174_v22 = vmul.f32 %v12698_v25, %v15848_v36  ;;  %v15849_v60 = vld [vmem:[#allocation29_spill] sm:$0xff]  ;;  %v5078_v11 = vmul.f32 %v12698_v25, %v15851_v63 }
 0x6eb   :  { %v12737_v62 = vsel %vm698_vm2, %v4659_v58, %v4661_v50  ;;  %v12742_v52 = vsel %vm698_vm2, %v4661_v50, %v15046_v33  ;;  %v15847_v58 = vld [vmem:[#allocation103_spill] sm:$0xff]  ;;  %v5077_v61 = vmul.f32 %v4658_v38, %v15849_v60  ;;  %v4985_v59 = vrot.slane %v4950_v49, 2  ;;  %v15854_v49 = vld [vmem:[#allocation106_spill] sm:$0xff] }
 0x6ec   :  { %v5528_v5 = vmul.f32 %v12698_v25, %v15847_v58  ;;  %v12758_v40 = vsel %vm533_vm6, %v5558_v37, %v5559_v41  ;;  %v15850_v33 = vld [vmem:[#allocation27_spill] sm:$0xff]  ;;  %v5210_v58 = vrot.slane %v5174_v22, 2  ;;  %v5175_v37 = vmul.f32 %v12737_v62, %v15852_v45  ;;  %v15855_v22 = vld [vmem:[#allocation105_spill] sm:$0xff]  ;;  %v15856_v45 = vld [vmem:[#allocation114_spill] sm:$0xff] }
 0x6ed   :  { %v5303_v1 = vmul.f32 %v4658_v38, %v15850_v33  ;;  %v12771_v39 = vsel %vm533_vm6, %v4983_v23, %v4985_v59  ;;  %v4824_v60 = vmul.f32 %v12742_v52, %v15855_v22  ;;  %v12787_v23 = vmul.f32 %v12742_v52, %v15856_v45  ;;  %v15859_v45 = vld [vmem:[#allocation108_spill] sm:$0xff] }
 0x6ee   :  { %5013 = vrot.lane.b32.xlu0 %v4982_v14, %s8481_s0  ;;  %4762 = vrot.lane.b32.xlu1 %v4730_v26, %s8477_s28  ;;  %v5561_v50 = vrot.slane %v5528_v5, 2  ;;  %v15853_v26 = vld [vmem:[#allocation101_spill] sm:$0xff]  ;;  %v5401_v5 = vmul.f32 %v12737_v62, %v15854_v49  ;;  %v12781_v38 = vsel %vm533_vm6, %v5208_v6, %v5210_v58  ;;  %v5212_v33 = vrot.slane %v5175_v37, 2 }
 0x6ef   :  { %v4823_v36 = vmul.f32 %v12737_v62, %v15853_v26  ;;  %v15857_v26 = vld [vmem:[#allocation107_spill] sm:$0xff]  ;;  %v5529_v6 = vmul.f32 %v12737_v62, %v15858_v51  ;;  %v4861_v22 = vrot.slane %v4824_v60, 1  ;;  %v5437_v3 = vrot.slane %v12787_v23, 1  ;;  %v15860_v60 = vld [vmem:[#allocation116_spill] sm:$0xff] }
 0x6f0   :  { %v12774_v14 = vsel %vm533_vm6, %v5559_v41, %v5561_v50  ;;  %v5435_v63 = vrot.slane %v5401_v5, 1  ;;  %v4951_v49 = vmul.f32 %v12737_v62, %v15857_v26  ;;  %v12796_v37 = vsel %vm533_vm6, %v5210_v58, %v5212_v33 }
 0x6f1   :  { %v4859_v41 = vrot.slane %v4823_v36, 1  ;;  %v4952_v12 = vmul.f32 %v12742_v52, %v15859_v45  ;;  %v5563_v5 = vrot.slane %v5529_v6, 2  ;;  %v5530_v23 = vmul.f32 %v12742_v52, %v15860_v60  ;;  %v15862_v6 = vld [vmem:[#allocation49_spill] sm:$0xff]  ;;  %v15863_v60 = vld [vmem:[#allocation32_spill] sm:$0xff] }
 0x6f2   :  { %5238 = vrot.lane.b32.xlu0 %v5207_v18, %s8476_s16  ;;  %5111 = vrot.lane.b32.xlu1 %v5077_v61, %s8478_s1  ;;  %v12805_v61 = vsel %vm1127_vm4, %v5433_v43, %v5435_v63  ;;  %v4987_v36 = vrot.slane %v4951_v49, 2  ;;  %v12811_v51 = vsel %vm1127_vm4, %v5435_v63, %v5437_v3  ;;  %v15861_v49 = vld [vmem:[#allocation110_spill] sm:$0xff]  ;;  %v5304_v45 = vmul.f32 %v12698_v25, %v15862_v6 }
 0x6f3   :  { %v12802_v18 = vsel %vm1127_vm4, %v4857_v20, %v4859_v41  ;;  %v12808_v26 = vsel %vm1127_vm4, %v4859_v41, %v4861_v22  ;;  %v4989_v58 = vrot.slane %v4952_v12, 2  ;;  %v12821_v43 = vsel %vm533_vm6, %v5561_v50, %v5563_v5 }
 0x6f4   :  { %v12818_v20 = vsel %vm533_vm6, %v4985_v59, %v4987_v36  ;;  %v5176_v41 = vmul.f32 %v12742_v52, %v15861_v49  ;;  %v5565_v12 = vrot.slane %v5530_v23, 2 }
 0x6f5   :  { %v12826_v63 = vsel %vm533_vm6, %v4987_v36, %v4989_v58 }
 0x6f6   :  { %5336 = vrot.lane.b32.xlu0 %v5303_v1, %s8479_s29  ;;  %5113 = vrot.lane.b32.xlu1 %v5078_v11, %s8478_s1  ;;  %v4731_v1 = vmul.f32 %v12698_v25, %v15863_v60  ;;  %v5214_v11 = vrot.slane %v5176_v41, 2  ;;  %v12833_v59 = vsel %vm533_vm6, %v5563_v5, %v5565_v12  ;;  %v15866_v25 = vrot.slane %v12714_v56, 7  ;;  %v15867_v41 = vld [vmem:[#allocation111_spill] sm:$0xff]  ;;  %v15868_v60 = vld [vmem:[#allocation112_spill] sm:$0xff] }
 0x6f7   :  { %v15874_v56 = vld [vmem:[#allocation120_spill] sm:$0xff] }
 0x6f8   :  { %v12838_v50 = vsel %vm533_vm6, %v5212_v33, %v5214_v11 }
 0x6fa   :  { %5338 = vrot.lane.b32.xlu0 %v5304_v45, %s8479_s29  ;;  %4764 = vrot.lane.b32.xlu1 %v4731_v1, %s8477_s28 }
 0x6fb   :  { %v12840_v36 = vpop.f32.mrb[18].mxu0 }
 0x6fc   :  { %15864 = vst [vmem:[#allocation37_spill] sm:$0xff] %v12840_v36  ;;  %v15052_v23 = vrot.slane %v12840_v36, 7  ;;  %v12843_v49 = vpop.f32.mrb[19].mxu0 }
 0x6fd   :  { %15865 = vst [vmem:[#allocation46_spill] sm:$0xff] %v12843_v49  ;;  %v4665_v6 = vrot.slane %v12843_v49, 7 }
 0x6fe   :  { %5240 = vrot.lane.b32.xlu0 %v12726_v34, %s8476_s16  ;;  %4887 = vrot.lane.b32.xlu1 %v12731_v13, %s8480_s30  ;;  %v15869_v34 = vld [vmem:[#allocation122_spill] sm:$0xff] }
 0x6ff   :  { %v12853_v5 = vsel %vm698_vm2, %v15866_v25, %v4665_v6  ;;  %v12858_v33 = vsel %vm698_vm2, %v4665_v6, %v15052_v23  ;;  %v15870_v25 = vld [vmem:[#allocation113_spill] sm:$0xff]  ;;  %v15871_v6 = vld [vmem:[#allocation123_spill] sm:$0xff] }
 0x700   :  { %v5177_v45 = vmul.f32 %v12853_v5, %v15867_v41  ;;  %v4825_v1 = vmul.f32 %v12853_v5, %v15868_v60  ;;  %v5403_v13 = vmul.f32 %v12853_v5, %v15869_v34  ;;  %v12872_v31 = vmul.f32 %v12858_v33, %v15870_v25  ;;  %v15872_v60 = vld [vmem:[#allocation119_spill] sm:$0xff] }
 0x701   :  { %v12876_v23 = vmul.f32 %v12858_v33, %v15871_v6  ;;  %v4953_v24 = vmul.f32 %v12853_v5, %v15872_v60  ;;  %v12886_v25 = vmul.f32 %v12858_v33, %v15874_v56 }
 0x702   :  { %5462 = vrot.lane.b32.xlu0 %v12734_v29, %s8482_s2  ;;  %4889 = vrot.lane.b32.xlu1 %v12745_v46, %s8480_s30  ;;  %v5216_v41 = vrot.slane %v5177_v45, 2  ;;  %v4863_v47 = vrot.slane %v4825_v1, 1  ;;  %v15873_v29 = vld [vmem:[#allocation117_spill] sm:$0xff]  ;;  %v5439_v46 = vrot.slane %v5403_v13, 1  ;;  %v15058_v49 = vrot.slane %v12872_v31, 1 }
 0x703   :  { %v5531_v7 = vmul.f32 %v12853_v5, %v15873_v29  ;;  %v15060_v34 = vrot.slane %v12876_v23, 1  ;;  %v4991_v1 = vrot.slane %v4953_v24, 2 }
 0x704   :  { %v12889_v6 = vsel %vm533_vm6, %v5214_v11, %v5216_v41  ;;  %v12892_v45 = vsel %vm1127_vm4, %v4861_v22, %v4863_v47  ;;  %v12899_v13 = vsel %vm1127_vm4, %v5437_v3, %v5439_v46  ;;  %v12904_v56 = vsel %vm1127_vm4, %v4863_v47, %v15058_v49  ;;  %v15875_v3 = vld [vmem:[#allocation118_spill] sm:$0xff]  ;;  %v15876_v11 = vld [vmem:[#allocation124_spill] sm:$0xff] }
 0x705   :  { %v5567_v60 = vrot.slane %v5531_v7, 2  ;;  %v12909_v22 = vsel %vm1127_vm4, %v5439_v46, %v15060_v34  ;;  %v4993_v7 = vrot.slane %v12886_v25, 2  ;;  %v12913_v24 = vsel %vm533_vm6, %v4989_v58, %v4991_v1  ;;  %v15877_v25 = vld [vmem:[#allocation45_spill] sm:$0xff]  ;;  %v15893_v34 = vld [vmem:[#allocation131_spill] sm:$0xff] }
 0x706   :  { %5464 = vrot.lane.b32.xlu0 %v12748_v4, %s8482_s2  ;;  %5015 = vrot.lane.b32.xlu1 %v12751_v30, %s8481_s0  ;;  %v5532_v30 = vmul.f32 %v12858_v33, %v15875_v3  ;;  %v5178_v47 = vmul.f32 %v12858_v33, %v15876_v11  ;;  %v4732_v3 = vmul.f32 %v12737_v62, %v15877_v25 }
 0x707   :  { %v12916_v4 = vsel %vm533_vm6, %v5565_v12, %v5567_v60  ;;  %v12923_v29 = vsel %vm533_vm6, %v4991_v1, %v4993_v7  ;;  %v15878_v1 = vld [vmem:[#allocation48_spill] sm:$0xff] }
 0x708   :  { %v5569_v49 = vrot.slane %v5532_v30, 2  ;;  %v5218_v46 = vrot.slane %v5178_v47, 2  ;;  %v15882_v47 = vld [vmem:[#allocation53_spill] sm:$0xff] }
 0x709   :  { %v4733_v25 = vmul.f32 %v12742_v52, %v15882_v47 }
 0x70a   :  { %5590 = vrot.lane.b32.xlu0 %v12758_v40, %s8483_s11  ;;  %5017 = vrot.lane.b32.xlu1 %v12771_v39, %s8481_s0  ;;  %v12930_v58 = vsel %vm533_vm6, %v5567_v60, %v5569_v49  ;;  %v12933_v12 = vsel %vm533_vm6, %v5216_v41, %v5218_v46  ;;  %v5079_v40 = vmul.f32 %v12737_v62, %v15878_v1  ;;  %v15879_v39 = vld [vmem:[#allocation50_spill] sm:$0xff]  ;;  %v15880_v60 = vld [vmem:[#allocation52_spill] sm:$0xff] }
 0x70b   :  { %v5305_v41 = vmul.f32 %v12737_v62, %v15879_v39  ;;  %v5080_v30 = vmul.f32 %v12742_v52, %v15880_v60  ;;  %v12959_v62 = vpop.permute.xlu1 %4709  ;;  %v15887_v60 = vld [vmem:[#allocation126_spill] sm:$0xff] }
 0x70c   :  { %15884 = vst [vmem:[#allocation47_spill] sm:$0xff] %v12959_v62  ;;  %v15990_v62 = vld [vmem:[#allocation95_spill] sm:$0xff] }
 0x70e   :  { %5592 = vrot.lane.b32.xlu0 %v12774_v14, %s8483_s11  ;;  %4766 = vrot.lane.b32.xlu1 %v4732_v3, %s8477_s28  ;;  %v15881_v14 = vld [vmem:[#allocation51_spill] sm:$0xff] }
 0x70f   :  { %v5306_v11 = vmul.f32 %v12742_v52, %v15881_v14  ;;  %v15886_v52 = vrot.slane %v12840_v36, 7  ;;  %v15888_v14 = vld [vmem:[#allocation128_spill] sm:$0xff] }
 0x712   :  { %5242 = vrot.lane.b32.xlu0 %v12781_v38, %s8476_s16  ;;  %5115 = vrot.lane.b32.xlu1 %v5079_v40, %s8478_s1 }
 0x716   :  { %5340 = vrot.lane.b32.xlu0 %v5305_v41, %s8479_s29  ;;  %5117 = vrot.lane.b32.xlu1 %v5080_v30, %s8478_s1 }
 0x71a   :  { %5342 = vrot.lane.b32.xlu0 %v5306_v11, %s8479_s29  ;;  %4768 = vrot.lane.b32.xlu1 %v4733_v25, %s8477_s28  ;;  %v15891_v25 = vld [vmem:[#allocation129_spill] sm:$0xff] }
 0x71b   :  { %v12957_v38 = vpop.f32.mrb[20].mxu0 }
 0x71c   :  { %15883 = vst [vmem:[#allocation39_spill] sm:$0xff] %v12957_v38  ;;  %v15059_v3 = vrot.slane %v12957_v38, 7  ;;  %v12962_v1 = vpop.f32.mrb[21].mxu0 }
 0x71d   :  { %15885 = vst [vmem:[#allocation41_spill] sm:$0xff] %v12962_v1  ;;  %v4669_v40 = vrot.slane %v12962_v1, 7 }
 0x71e   :  { %5244 = vrot.lane.b32.xlu0 %v12796_v37, %s8476_s16  ;;  %4891 = vrot.lane.b32.xlu1 %v12802_v18, %s8480_s30  ;;  %v12983_v37 = vpop.permute.xlu1 %5654  ;;  %v15890_v18 = vld [vmem:[#allocation71_spill] sm:$0xff] }
 0x71f   :  { %v12972_v39 = vsel %vm698_vm2, %v15886_v52, %v4669_v40  ;;  %v12977_v41 = vsel %vm698_vm2, %v4669_v40, %v15059_v3  ;;  %15889 = vst [vmem:[#allocation62_spill] sm:$0xff] %v12983_v37  ;;  %v15892_v52 = vld [vmem:[#allocation134_spill] sm:$0xff] }
 0x720   :  { %v5179_v30 = vmul.f32 %v12972_v39, %v15887_v60  ;;  %v4827_v11 = vmul.f32 %v12972_v39, %v15888_v14  ;;  %v5405_v47 = vmul.f32 %v12972_v39, %v15890_v18  ;;  %v12993_v40 = vmul.f32 %v12977_v41, %v15891_v25 }
 0x721   :  { %v12997_v60 = vmul.f32 %v12977_v41, %v15892_v52  ;;  %v4955_v37 = vmul.f32 %v12972_v39, %v15893_v34  ;;  %v13007_v25 = vmul.f32 %v12977_v41, %v15895_v10 }
 0x722   :  { %5466 = vrot.lane.b32.xlu0 %v12805_v61, %s8482_s2  ;;  %4893 = vrot.lane.b32.xlu1 %v12808_v26, %s8480_s30  ;;  %v5220_v14 = vrot.slane %v5179_v30, 2  ;;  %v4867_v3 = vrot.slane %v4827_v11, 1  ;;  %v15894_v61 = vld [vmem:[#allocation125_spill] sm:$0xff]  ;;  %v5443_v26 = vrot.slane %v5405_v47, 1  ;;  %v15068_v36 = vrot.slane %v12993_v40, 1 }
 0x723   :  { %v5533_v1 = vmul.f32 %v12972_v39, %v15894_v61  ;;  %v15065_v18 = vrot.slane %v12997_v60, 1  ;;  %v15896_v30 = vrot.slane %v12872_v31, 1  ;;  %v4995_v34 = vrot.slane %v4955_v37, 2  ;;  %v15899_v61 = vld [vmem:[#allocation66_spill] sm:$0xff] }
 0x724   :  { %v13010_v52 = vsel %vm533_vm6, %v5218_v46, %v5220_v14  ;;  %v15897_v47 = vrot.slane %v12876_v23, 1  ;;  %v13029_v31 = vsel %vm1127_vm4, %v4867_v3, %v15068_v36  ;;  %v15898_v23 = vld [vmem:[#allocation127_spill] sm:$0xff]  ;;  %v15909_v36 = vld [vmem:[#allocation57_spill] sm:$0xff] }
 0x725   :  { %v13015_v11 = vsel %vm1127_vm4, %v15896_v30, %v4867_v3  ;;  %v5571_v2 = vrot.slane %v5533_v1, 2  ;;  %v13034_v46 = vsel %vm1127_vm4, %v5443_v26, %v15065_v18  ;;  %v13038_v1 = vsel %vm533_vm6, %v4993_v7, %v4995_v34  ;;  %v13049_v30 = vpop.permute.xlu0 %5656  ;;  %v15902_v18 = vld [vmem:[#allocation55_spill] sm:$0xff] }
 0x726   :  { %5468 = vrot.lane.b32.xlu0 %v12811_v51, %s8482_s2  ;;  %5019 = vrot.lane.b32.xlu1 %v12818_v20, %s8481_s0  ;;  %v13024_v10 = vsel %vm1127_vm4, %v15897_v47, %v5443_v26  ;;  %v15066_v51 = vrot.slane %v13007_v25, 2  ;;  %v13045_v37 = vmul.f32 %v12977_v41, %v15898_v23  ;;  %v5180_v3 = vmul.f32 %v12977_v41, %v15899_v61  ;;  %v13051_v47 = vpop.permute.xlu1 %5702 }
 0x727   :  { %v13041_v20 = vsel %vm533_vm6, %v5569_v49, %v5571_v2  ;;  %15900 = vst [vmem:[#allocation211_spill] sm:$0xff] %v13049_v30  ;;  %15901 = vst [vmem:[#allocation169_spill] sm:$0xff] %v13051_v47  ;;  %v15924_v30 = vld [vmem:[#allocation145_spill] sm:$0xff] }
 0x728   :  { %v13056_v26 = vsel %vm533_vm6, %v4995_v34, %v15066_v51  ;;  %v15067_v7 = vrot.slane %v13045_v37, 2  ;;  %v5222_v49 = vrot.slane %v5180_v3, 2  ;;  %v4734_v34 = vmul.f32 %v12853_v5, %v15902_v18  ;;  %v15908_v18 = vld [vmem:[#allocation54_spill] sm:$0xff] }
 0x729   :  { %v13073_v51 = vpop.permute.xlu0 %5704 }
 0x72a   :  { %5594 = vrot.lane.b32.xlu0 %v12821_v43, %s8483_s11  ;;  %5021 = vrot.lane.b32.xlu1 %v12826_v63, %s8481_s0  ;;  %v13066_v23 = vsel %vm533_vm6, %v5571_v2, %v15067_v7  ;;  %v13069_v61 = vsel %vm533_vm6, %v5220_v14, %v5222_v49  ;;  %15903 = vst [vmem:[#allocation63_spill] sm:$0xff] %v13073_v51  ;;  %v13075_v3 = vpop.permute.xlu1 %5658  ;;  %v15905_v43 = vld [vmem:[#allocation56_spill] sm:$0xff] }
 0x72b   :  { %15904 = vst [vmem:[#allocation167_spill] sm:$0xff] %v13075_v3  ;;  %v5081_v63 = vmul.f32 %v12853_v5, %v15905_v43  ;;  %v5307_v7 = vmul.f32 %v12853_v5, %v15908_v18 }
 0x72d   :  { %v13085_v2 = vpop.permute.xlu0 %5660 }
 0x72e   :  { %5596 = vrot.lane.b32.xlu0 %v12833_v59, %s8483_s11  ;;  %4770 = vrot.lane.b32.xlu1 %v4734_v34, %s8477_s28  ;;  %15906 = vst [vmem:[#allocation214_spill] sm:$0xff] %v13085_v2  ;;  %v13087_v14 = vpop.permute.xlu1 %5706  ;;  %v5082_v59 = vmul.f32 %v12858_v33, %v15909_v36  ;;  %v15910_v34 = vld [vmem:[#allocation60_spill] sm:$0xff] }
 0x72f   :  { %15907 = vst [vmem:[#allocation204_spill] sm:$0xff] %v13087_v14  ;;  %v5308_v43 = vmul.f32 %v12858_v33, %v15910_v34 }
 0x731   :  { %v13099_v51 = vpop.permute.xlu0 %5708 }
 0x732   :  { %5246 = vrot.lane.b32.xlu0 %v12838_v50, %s8476_s16  ;;  %5119 = vrot.lane.b32.xlu1 %v5081_v63, %s8478_s1  ;;  %v15911_v50 = vld [vmem:[#allocation58_spill] sm:$0xff]  ;;  %15912 = vst [vmem:[#allocation212_spill] sm:$0xff] %v13099_v51  ;;  %v13101_v2 = vpop.permute.xlu1 %5662 }
 0x733   :  { %v4735_v63 = vmul.f32 %v12858_v33, %v15911_v50  ;;  %15913 = vst [vmem:[#allocation148_spill] sm:$0xff] %v13101_v2  ;;  %v15916_v33 = vrot.slane %v12957_v38, 7  ;;  %v15920_v51 = vld [vmem:[#allocation138_spill] sm:$0xff]  ;;  %v15927_v38 = vrot.slane %v12993_v40, 1 }
 0x736   :  { %5344 = vrot.lane.b32.xlu0 %v5307_v7, %s8479_s29  ;;  %5121 = vrot.lane.b32.xlu1 %v5082_v59, %s8478_s1  ;;  %v13127_v50 = vpop.permute.xlu1 %5710 }
 0x737   :  { %15918 = vst [vmem:[#allocation201_spill] sm:$0xff] %v13127_v50  ;;  %v15923_v50 = vld [vmem:[#allocation142_spill] sm:$0xff] }
 0x73a   :  { %5346 = vrot.lane.b32.xlu0 %v5308_v43, %s8479_s29  ;;  %4772 = vrot.lane.b32.xlu1 %v4735_v63, %s8477_s28  ;;  %v13125_v43 = vpop.permute.xlu0 %5664  ;;  %v15919_v63 = vld [vmem:[#allocation140_spill] sm:$0xff] }
 0x73b   :  { %v13105_v5 = vpop.f32.mrb[22].mxu0  ;;  %15917 = vst [vmem:[#allocation177_spill] sm:$0xff] %v13125_v43 }
 0x73c   :  { %15914 = vst [vmem:[#allocation77_spill] sm:$0xff] %v13105_v5  ;;  %v15069_v36 = vrot.slane %v13105_v5, 7  ;;  %v13108_v7 = vpop.f32.mrb[23].mxu0 }
 0x73d   :  { %15915 = vst [vmem:[#allocation215_spill] sm:$0xff] %v13108_v7  ;;  %v4673_v18 = vrot.slane %v13108_v7, 7  ;;  %v15926_v7 = vld [vmem:[#allocation136_spill] sm:$0xff] }
 0x73e   :  { %5248 = vrot.lane.b32.xlu0 %v12889_v6, %s8476_s16  ;;  %4895 = vrot.lane.b32.xlu1 %v12892_v45, %s8480_s30 }
 0x73f   :  { %v13118_v59 = vsel %vm698_vm2, %v15916_v33, %v4673_v18  ;;  %v13123_v34 = vsel %vm698_vm2, %v4673_v18, %v15069_v36  ;;  %v15921_v33 = vld [vmem:[#allocation141_spill] sm:$0xff]  ;;  %v15922_v36 = vld [vmem:[#allocation144_spill] sm:$0xff] }
 0x740   :  { %v4829_v6 = vmul.f32 %v13118_v59, %v15919_v63  ;;  %v5181_v45 = vmul.f32 %v13118_v59, %v15920_v51  ;;  %v13139_v18 = vmul.f32 %v13123_v34, %v15921_v33  ;;  %v5407_v43 = vmul.f32 %v13118_v59, %v15922_v36 }
 0x741   :  { %v4957_v2 = vmul.f32 %v13118_v59, %v15923_v50  ;;  %v13147_v51 = vmul.f32 %v13123_v34, %v15924_v30  ;;  %v5535_v36 = vmul.f32 %v13118_v59, %v15926_v7  ;;  %v15932_v7 = vrot.slane %v13007_v25, 2 }
 0x742   :  { %5470 = vrot.lane.b32.xlu0 %v12899_v13, %s8482_s2  ;;  %4897 = vrot.lane.b32.xlu1 %v12904_v56, %s8480_s30  ;;  %v4871_v63 = vrot.slane %v4829_v6, 1  ;;  %v5224_v14 = vrot.slane %v5181_v45, 2  ;;  %v15925_v13 = vld [vmem:[#allocation143_spill] sm:$0xff]  ;;  %v5447_v33 = vrot.slane %v5407_v43, 1  ;;  %v13168_v56 = vpop.permute.xlu1 %5666 }
 0x743   :  { %v13151_v3 = vmul.f32 %v13123_v34, %v15925_v13  ;;  %v4999_v47 = vrot.slane %v4957_v2, 2  ;;  %v15072_v30 = vrot.slane %v13147_v51, 1  ;;  %v13166_v13 = vpop.permute.xlu0 %5712  ;;  %15929 = vst [vmem:[#allocation74_spill] sm:$0xff] %v13168_v56  ;;  %v5575_v45 = vrot.slane %v5535_v36, 2 }
 0x744   :  { %v13159_v50 = vsel %vm1127_vm4, %v15927_v38, %v4871_v63  ;;  %v13162_v6 = vsel %vm533_vm6, %v5222_v49, %v5224_v14  ;;  %15928 = vst [vmem:[#allocation216_spill] sm:$0xff] %v13166_v13  ;;  %v15930_v38 = vrot.slane %v13139_v18, 1  ;;  %v15931_v49 = vrot.slane %v12997_v60, 1  ;;  %v15934_v60 = vld [vmem:[#allocation139_spill] sm:$0xff] }
 0x745   :  { %v13187_v43 = vsel %vm533_vm6, %v15932_v7, %v4999_v47  ;;  %v15936_v36 = vrot.slane %v13045_v37, 2 }
 0x746   :  { %5472 = vrot.lane.b32.xlu0 %v12909_v22, %s8482_s2  ;;  %5023 = vrot.lane.b32.xlu1 %v12913_v24, %s8481_s0  ;;  %v13177_v40 = vsel %vm1127_vm4, %v4871_v63, %v15930_v38  ;;  %v13182_v2 = vsel %vm1127_vm4, %v15931_v49, %v5447_v33  ;;  %v13192_v22 = vsel %vm1127_vm4, %v5447_v33, %v15072_v30  ;;  %v15933_v24 = vrot.slane %v13151_v3, 2  ;;  %v15935_v49 = vld [vmem:[#allocation146_spill] sm:$0xff] }
 0x747   :  { %v13201_v38 = vmul.f32 %v13123_v34, %v15934_v60  ;;  %v13205_v25 = vmul.f32 %v13123_v34, %v15935_v49  ;;  %v13210_v7 = vsel %vm533_vm6, %v15936_v36, %v5575_v45  ;;  %v13228_v60 = vpop.permute.xlu1 %5714  ;;  %v15939_v49 = vld [vmem:[#allocation59_spill] sm:$0xff] }
 0x748   :  { %v13197_v63 = vsel %vm533_vm6, %v4999_v47, %v15933_v24  ;;  %v13226_v24 = vpop.permute.xlu0 %5668  ;;  %15938 = vst [vmem:[#allocation130_spill] sm:$0xff] %v13228_v60  ;;  %v15950_v60 = vld [vmem:[#allocation70_spill] sm:$0xff] }
 0x749   :  { %v15073_v33 = vrot.slane %v13201_v38, 2  ;;  %v5226_v30 = vrot.slane %v13205_v25, 2  ;;  %15937 = vst [vmem:[#allocation150_spill] sm:$0xff] %v13226_v24  ;;  %v4736_v25 = vmul.f32 %v12972_v39, %v15939_v49  ;;  %v4737_v56 = vmul.f32 %v12977_v41, %v15950_v60 }
 0x74a   :  { %5598 = vrot.lane.b32.xlu0 %v12916_v4, %s8483_s11  ;;  %5025 = vrot.lane.b32.xlu1 %v12923_v29, %s8481_s0 }
 0x74b   :  { %v13221_v47 = vsel %vm533_vm6, %v5575_v45, %v15073_v33  ;;  %v13224_v37 = vsel %vm533_vm6, %v5224_v14, %v5226_v30  ;;  %v15942_v45 = vld [vmem:[#allocation64_spill] sm:$0xff]  ;;  %v15945_v33 = vld [vmem:[#allocation61_spill] sm:$0xff] }
 0x74c   :  { %v5083_v14 = vmul.f32 %v12972_v39, %v15942_v45 }
 0x74e   :  { %5600 = vrot.lane.b32.xlu0 %v12930_v58, %s8483_s11  ;;  %4774 = vrot.lane.b32.xlu1 %v4736_v25, %s8477_s28  ;;  %v5309_v58 = vmul.f32 %v12972_v39, %v15945_v33  ;;  %v15946_v25 = vld [vmem:[#allocation69_spill] sm:$0xff] }
 0x74f   :  { %v5084_v24 = vmul.f32 %v12977_v41, %v15946_v25 }
 0x750   :  { %v13235_v4 = vpop.permute.xlu1 %5107  ;;  %v13237_v29 = vpop.permute.xlu0 %4758 }
 0x751   :  { %15940 = vst [vmem:[#allocation217_spill] sm:$0xff] %v13235_v4  ;;  %15941 = vst [vmem:[#allocation207_spill] sm:$0xff] %v13237_v29  ;;  %v15965_v4 = vld [vmem:[#allocation168_spill] sm:$0xff] }
 0x752   :  { %5250 = vrot.lane.b32.xlu0 %v12933_v12, %s8476_s16  ;;  %5123 = vrot.lane.b32.xlu1 %v5083_v14, %s8478_s1  ;;  %v15949_v12 = vld [vmem:[#allocation73_spill] sm:$0xff] }
 0x753   :  { %v5310_v14 = vmul.f32 %v12977_v41, %v15949_v12  ;;  %v15955_v41 = vrot.slane %v13105_v5, 7 }
 0x754   :  { %v13244_v36 = vpop.permute.xlu1 %4760  ;;  %v13246_v49 = vpop.permute.xlu0 %5109 }
 0x755   :  { %15943 = vst [vmem:[#allocation208_spill] sm:$0xff] %v13244_v36  ;;  %15944 = vst [vmem:[#allocation172_spill] sm:$0xff] %v13246_v49 }
 0x756   :  { %5348 = vrot.lane.b32.xlu0 %v5309_v58, %s8479_s29  ;;  %5125 = vrot.lane.b32.xlu1 %v5084_v24, %s8478_s1 }
 0x758   :  { %v13254_v45 = vpop.permute.xlu1 %4883  ;;  %v13256_v13 = vpop.permute.xlu0 %5334 }
 0x759   :  { %15947 = vst [vmem:[#allocation133_spill] sm:$0xff] %v13254_v45  ;;  %15948 = vst [vmem:[#allocation218_spill] sm:$0xff] %v13256_v13  ;;  %v15988_v45 = vld [vmem:[#allocation206_spill] sm:$0xff] }
 0x75a   :  { %5350 = vrot.lane.b32.xlu0 %v5310_v14, %s8479_s29  ;;  %4776 = vrot.lane.b32.xlu1 %v4737_v56, %s8477_s28 }
 0x75b   :  { %v13264_v39 = vpop.f32.mrb[24].mxu0 }
 0x75c   :  { %15951 = vst [vmem:[#allocation147_spill] sm:$0xff] %v13264_v39  ;;  %v4679_v33 = vrot.slane %v13264_v39, 7  ;;  %v13267_v58 = vpop.permute.xlu1 %5011  ;;  %v13269_v24 = vpop.f32.mrb[25].mxu0  ;;  %v15958_v39 = vld [vmem:[#allocation163_spill] sm:$0xff] }
 0x75d   :  { %15952 = vst [vmem:[#allocation76_spill] sm:$0xff] %v13267_v58  ;;  %15953 = vst [vmem:[#allocation173_spill] sm:$0xff] %v13269_v24  ;;  %v4677_v25 = vrot.slane %v13269_v24, 7  ;;  %v13272_v49 = vpop.permute.xlu0 %4885  ;;  %v15987_v58 = vld [vmem:[#allocation187_spill] sm:$0xff] }
 0x75e   :  { %15954 = vst [vmem:[#allocation175_spill] sm:$0xff] %v13272_v49  ;;  %5252 = vrot.lane.b32.xlu0 %v13010_v52, %s8476_s16  ;;  %4899 = vrot.lane.b32.xlu1 %v13015_v11, %s8480_s30  ;;  %v15959_v52 = vld [vmem:[#allocation98_spill] sm:$0xff] }
 0x75f   :  { %v13281_v56 = vsel %vm698_vm2, %v15955_v41, %v4677_v25  ;;  %v13284_v60 = vsel %vm698_vm2, %v4677_v25, %v4679_v33  ;;  %v15960_v41 = vld [vmem:[#allocation164_spill] sm:$0xff] }
 0x760   :  { %v13286_v12 = vpop.permute.xlu1 %4762  ;;  %v4831_v24 = vmul.f32 %v13281_v56, %v15958_v39  ;;  %v5183_v11 = vmul.f32 %v13281_v56, %v15959_v52  ;;  %v13300_v25 = vmul.f32 %v13284_v60, %v15960_v41  ;;  %v4959_v39 = vmul.f32 %v13281_v56, %v15962_v44 }
 0x761   :  { %15956 = vst [vmem:[#allocation174_spill] sm:$0xff] %v13286_v12  ;;  %v13288_v14 = vpop.permute.xlu0 %5013  ;;  %v15961_v12 = vld [vmem:[#allocation170_spill] sm:$0xff]  ;;  %v13315_v41 = vmul.f32 %v13284_v60, %v15965_v4 }
 0x762   :  { %15957 = vst [vmem:[#allocation135_spill] sm:$0xff] %v13288_v14  ;;  %5474 = vrot.lane.b32.xlu0 %v13024_v10, %s8482_s2  ;;  %4901 = vrot.lane.b32.xlu1 %v13029_v31, %s8480_s30  ;;  %v4875_v5 = vrot.slane %v4831_v24, 1  ;;  %v5409_v13 = vmul.f32 %v13281_v56, %v15961_v12  ;;  %v15963_v14 = vld [vmem:[#allocation171_spill] sm:$0xff]  ;;  %v5228_v31 = vrot.slane %v5183_v11, 2  ;;  %v4877_v52 = vrot.slane %v13300_v25, 1 }
 0x763   :  { %v13308_v10 = vmul.f32 %v13284_v60, %v15963_v14  ;;  %v15967_v12 = vrot.slane %v13139_v18, 1  ;;  %v5003_v29 = vrot.slane %v4959_v39, 2  ;;  %v5005_v18 = vrot.slane %v13315_v41, 2 }
 0x764   :  { %v13310_v49 = vpop.permute.xlu1 %5111  ;;  %v5451_v44 = vrot.slane %v5409_v13, 1  ;;  %v13330_v4 = vsel %vm533_vm6, %v5226_v30, %v5228_v31  ;;  %v13333_v11 = vsel %vm1127_vm4, %v4875_v5, %v4877_v52  ;;  %v15969_v13 = vrot.slane %v13147_v51, 1 }
 0x765   :  { %15964 = vst [vmem:[#allocation137_spill] sm:$0xff] %v13310_v49  ;;  %v13317_v24 = vpop.permute.xlu0 %5238  ;;  %v13322_v36 = vsel %vm1127_vm4, %v15967_v12, %v4875_v5  ;;  %v15079_v14 = vrot.slane %v13308_v10, 1  ;;  %v15971_v5 = vld [vmem:[#allocation161_spill] sm:$0xff] }
 0x766   :  { %15966 = vst [vmem:[#allocation152_spill] sm:$0xff] %v13317_v24  ;;  %5476 = vrot.lane.b32.xlu0 %v13034_v46, %s8482_s2  ;;  %5027 = vrot.lane.b32.xlu1 %v13038_v1, %s8481_s0  ;;  %v13341_v39 = vsel %vm1127_vm4, %v15969_v13, %v5451_v44  ;;  %v15970_v46 = vrot.slane %v13151_v3, 2  ;;  %v5537_v30 = vmul.f32 %v13281_v56, %v15971_v5  ;;  %v15976_v5 = vld [vmem:[#allocation185_spill] sm:$0xff] }
 0x767   :  { %v13336_v25 = vpop.f32.mrb[26].mxu0  ;;  %v13351_v1 = vsel %vm1127_vm4, %v5451_v44, %v15079_v14  ;;  %v13361_v13 = vsel %vm533_vm6, %v5003_v29, %v5005_v18  ;;  %v13368_v44 = vmul.f32 %v13284_v60, %v15975_v53  ;;  %v5184_v14 = vmul.f32 %v13284_v60, %v15976_v5 }
 0x768   :  { %15968 = vst [vmem:[#allocation193_spill] sm:$0xff] %v13336_v25  ;;  %v13346_v12 = vsel %vm533_vm6, %v15970_v46, %v5003_v29  ;;  %v4683_v41 = vrot.slane %v13336_v25, 7  ;;  %v13356_v49 = vpop.permute.xlu1 %5113  ;;  %v13358_v51 = vpop.f32.mrb[27].mxu0  ;;  %v5579_v24 = vrot.slane %v5537_v30, 2 }
 0x769   :  { %15972 = vst [vmem:[#allocation80_spill] sm:$0xff] %v13356_v49  ;;  %15973 = vst [vmem:[#allocation67_spill] sm:$0xff] %v13358_v51  ;;  %v4681_v3 = vrot.slane %v13358_v51, 7  ;;  %v13364_v46 = vpop.permute.xlu0 %5336  ;;  %v15978_v51 = vld [vmem:[#allocation72_spill] sm:$0xff]  ;;  %v15979_v49 = vrot.slane %v13201_v38, 2  ;;  %v5230_v5 = vrot.slane %v5184_v14, 2 }
 0x76a   :  { %15974 = vst [vmem:[#allocation65_spill] sm:$0xff] %v13364_v46  ;;  %5602 = vrot.lane.b32.xlu0 %v13041_v20, %s8483_s11  ;;  %5029 = vrot.lane.b32.xlu1 %v13056_v26, %s8481_s0  ;;  %v4738_v53 = vmul.f32 %v13118_v59, %v15978_v51  ;;  %v5581_v26 = vrot.slane %v13368_v44, 2  ;;  %v15982_v44 = vld [vmem:[#allocation151_spill] sm:$0xff] }
 0x76b   :  { %v13377_v29 = vsel %vm698_vm2, %v4679_v33, %v4681_v3  ;;  %v13380_v25 = vsel %vm698_vm2, %v4681_v3, %v4683_v41  ;;  %v13389_v20 = vsel %vm533_vm6, %v15979_v49, %v5579_v24  ;;  %v13395_v33 = vsel %vm698_vm2, %v4683_v41, 0.0  ;;  %v15981_v49 = vld [vmem:[#allocation188_spill] sm:$0xff]  ;;  %v15984_v41 = vld [vmem:[#allocation79_spill] sm:$0xff] }
 0x76c   :  { %v13382_v30 = vpop.permute.xlu1 %4764  ;;  %v13401_v51 = vsel %vm533_vm6, %v5579_v24, %v5581_v26  ;;  %v13404_v38 = vsel %vm533_vm6, %v5228_v31, %v5230_v5  ;;  %v4833_v3 = vmul.f32 %v13377_v29, %v15981_v49  ;;  %v4834_v14 = vmul.f32 %v13380_v25, %v15982_v44 }
 0x76d   :  { %15977 = vst [vmem:[#allocation166_spill] sm:$0xff] %v13382_v30  ;;  %v13392_v46 = vpop.permute.xlu0 %5338  ;;  %v5085_v30 = vmul.f32 %v13118_v59, %v15984_v41  ;;  %v4961_v24 = vmul.f32 %v13377_v29, %v15986_v19  ;;  %v5185_v31 = vmul.f32 %v13377_v29, %v15987_v58  ;;  %v13422_v49 = vmul.f32 %v13395_v33, %v15988_v45 }
 0x76e   :  { %15980 = vst [vmem:[#allocation78_spill] sm:$0xff] %v13392_v46  ;;  %5604 = vrot.lane.b32.xlu0 %v13066_v23, %s8483_s11  ;;  %4778 = vrot.lane.b32.xlu1 %v4738_v53, %s8477_s28  ;;  %v15985_v23 = vld [vmem:[#allocation109_spill] sm:$0xff]  ;;  %v4879_v44 = vrot.slane %v4833_v3, 1  ;;  %v4962_v41 = vmul.f32 %v13380_v25, %v15990_v62  ;;  %v13432_v19 = vmul.f32 %v13395_v33, %v15992_v15  ;;  %v15995_v15 = vld [vmem:[#allocation75_spill] sm:$0xff] }
 0x76f   :  { %v5086_v53 = vmul.f32 %v13123_v34, %v15985_v23  ;;  %v5187_v23 = vmul.f32 %v13395_v33, %v15991_v17  ;;  %v5007_v45 = vrot.slane %v4961_v24, 2  ;;  %v5232_v58 = vrot.slane %v5185_v31, 2 }
 0x770   :  { %v13410_v46 = vpop.permute.xlu1 %4887  ;;  %v13438_v3 = vsel %vm1127_vm4, %v4877_v52, %v4879_v44  ;;  %v5009_v62 = vrot.slane %v4962_v41, 2  ;;  %v15997_v52 = vld [vmem:[#allocation200_spill] sm:$0xff]  ;;  %v16000_v41 = vld [vmem:[#allocation182_spill] sm:$0xff] }
 0x771   :  { %15983 = vst [vmem:[#allocation191_spill] sm:$0xff] %v13410_v46  ;;  %v13424_v27 = vpop.permute.xlu0 %5240  ;;  %v4881_v46 = vrot.slane %v4834_v14, 1  ;;  %v13450_v28 = vsel %vm533_vm6, %v5005_v18, %v5007_v45  ;;  %v5186_v24 = vmul.f32 %v13380_v25, %v15997_v52  ;;  %v16001_v18 = vld [vmem:[#allocation121_spill] sm:$0xff]  ;;  %v16002_v52 = vld [vmem:[#allocation183_spill] sm:$0xff] }
 0x772   :  { %15989 = vst [vmem:[#allocation210_spill] sm:$0xff] %v13424_v27  ;;  %5127 = vrot.lane.b32.xlu1 %v5085_v30, %s8478_s1  ;;  %5254 = vrot.lane.b32.xlu0 %v13069_v61, %s8476_s16  ;;  %v15993_v27 = vld [vmem:[#allocation181_spill] sm:$0xff]  ;;  %v5311_v30 = vmul.f32 %v13118_v59, %v15995_v15  ;;  %v13453_v61 = vsel %vm533_vm6, %v5230_v5, %v5232_v58 }
 0x773   :  { %v13441_v14 = vsel %vm1127_vm4, %v4879_v44, %v4881_v46  ;;  %v5411_v17 = vmul.f32 %v13377_v29, %v15993_v27  ;;  %15996 = vst [vmem:[#allocation194_spill] sm:$0xff] %v13453_v61  ;;  %v13461_v27 = vsel %vm533_vm6, %v5007_v45, %v5009_v62  ;;  %v5412_v59 = vmul.f32 %v13380_v25, %v16000_v41 }
 0x774   :  { %v13445_v9 = vpop.permute.xlu1 %4889  ;;  %15999 = vst [vmem:[#allocation196_spill] sm:$0xff] %v13461_v27  ;;  %v4739_v5 = vmul.f32 %v13123_v34, %v16001_v18  ;;  %v5234_v15 = vrot.slane %v5186_v24, 2  ;;  %v16004_v62 = vrot.slane %v13308_v10, 1  ;;  %v5236_v41 = vrot.slane %v5187_v23, 2  ;;  %v16005_v27 = vld [vmem:[#allocation68_spill] sm:$0xff] }
 0x775   :  { %15994 = vst [vmem:[#allocation209_spill] sm:$0xff] %v13445_v9  ;;  %v13457_v46 = vpop.permute.xlu0 %5462  ;;  %v5455_v44 = vrot.slane %v5411_v17, 1  ;;  %v5539_v9 = vmul.f32 %v13377_v29, %v16002_v52  ;;  %v5312_v24 = vmul.f32 %v13123_v34, %v16005_v27  ;;  %v16006_v10 = vrot.slane %v13422_v49, 1 }
 0x776   :  { %15998 = vst [vmem:[#allocation213_spill] sm:$0xff] %v13457_v46  ;;  %5129 = vrot.lane.b32.xlu1 %v5086_v53, %s8478_s1  ;;  %5352 = vrot.lane.b32.xlu0 %v5311_v30, %s8479_s29  ;;  %v16003_v46 = vld [vmem:[#allocation186_spill] sm:$0xff]  ;;  %v5457_v53 = vrot.slane %v5412_v59, 1  ;;  %v13484_v18 = vsel %vm533_vm6, %v5232_v58, %v5234_v15  ;;  %v13497_v23 = vsel %vm533_vm6, %v5234_v15, %v5236_v41  ;;  %v16007_v58 = vrot.slane %v13432_v19, 2 }
 0x777   :  { %v5540_v31 = vmul.f32 %v13380_v25, %v16003_v46  ;;  %v13477_v17 = vsel %vm1127_vm4, %v16004_v62, %v5455_v44  ;;  %v5583_v52 = vrot.slane %v5539_v9, 2  ;;  %v4741_v41 = vmul.f32 %v13284_v60, %v15493_v32 }
 0x778   :  { %v13479_v30 = vpop.permute.xlu1 %5015  ;;  %v13489_v45 = vsel %vm1127_vm4, %v5455_v44, %v5457_v53  ;;  %v13494_v59 = vsel %vm1127_vm4, %v5457_v53, %v16006_v10 }
 0x779   :  { %v5585_v61 = vrot.slane %v5540_v31, 2  ;;  %v13486_v46 = vpop.permute.xlu0 %5464  ;;  %v13502_v9 = vsel %vm533_vm6, %v5581_v26, %v5583_v52 }
 0x77a   :  { %4780 = vrot.lane.b32.xlu1 %v4739_v5, %s8477_s28  ;;  %5354 = vrot.lane.b32.xlu0 %v5312_v24, %s8479_s29 }
 0x77b   :  { %v13505_v34 = vsel %vm533_vm6, %v5583_v52, %v5585_v61  ;;  %v13510_v31 = vsel %vm533_vm6, %v5585_v61, %v16007_v58  ;;  %v5316_v58 = vmul.f32 %v13380_v25, %v15766_v35 }
 0x77c   :  { %v13512_v27 = vpop.permute.xlu1 %5017 }
 0x77d   :  { %v13514_v44 = vpop.permute.xlu0 %5590 }
 0x77e   :  { %4903 = vrot.lane.b32.xlu1 %v13159_v50, %s8480_s30  ;;  %5256 = vrot.lane.b32.xlu0 %v13162_v6, %s8476_s16 }
 0x780   :  { %v13520_v26 = vpop.permute.xlu1 %4766 }
 0x781   :  { %v13522_v5 = vpop.permute.xlu0 %5592 }
 0x782   :  { %4905 = vrot.lane.b32.xlu1 %v13177_v40, %s8480_s30  ;;  %5478 = vrot.lane.b32.xlu0 %v13182_v2, %s8482_s2  ;;  %v4740_v2 = vmul.f32 %v13281_v56, %v15738_v55 }
 0x784   :  { %v13528_v61 = vpop.permute.xlu1 %5115 }
 0x785   :  { %v13530_v15 = vpop.permute.xlu0 %5242 }
 0x786   :  { %5031 = vrot.lane.b32.xlu1 %v13187_v43, %s8481_s0  ;;  %5480 = vrot.lane.b32.xlu0 %v13192_v22, %s8482_s2  ;;  %v5087_v22 = vmul.f32 %v13281_v56, %v15490_v54 }
 0x788   :  { %v13536_v50 = vpop.permute.xlu1 %5117 }
 0x789   :  { %v13538_v6 = vpop.permute.xlu0 %5340 }
 0x78a   :  { %5033 = vrot.lane.b32.xlu1 %v13197_v63, %s8481_s0  ;;  %5606 = vrot.lane.b32.xlu0 %v13210_v7, %s8483_s11  ;;  %v5088_v7 = vmul.f32 %v13284_v60, %v15491_v57 }
 0x78c   :  { %v13544_v40 = vpop.permute.xlu1 %4768 }
 0x78d   :  { %v13548_v62 = vpop.permute.xlu0 %5342 }
 0x78e   :  { %4782 = vrot.lane.b32.xlu1 %v4740_v2, %s8477_s28  ;;  %5608 = vrot.lane.b32.xlu0 %v13221_v47, %s8483_s11  ;;  %v5313_v47 = vmul.f32 %v13281_v56, %v15489_v16 }
 0x790   :  { %v13553_v43 = vpop.permute.xlu1 %4891 }
 0x791   :  { %v13557_v63 = vpop.permute.xlu0 %5244 }
 0x792   :  { %5131 = vrot.lane.b32.xlu1 %v5087_v22, %s8478_s1  ;;  %5258 = vrot.lane.b32.xlu0 %v13224_v37, %s8476_s16  ;;  %v5314_v37 = vmul.f32 %v13284_v60, %v10592_v48 }
 0x794   :  { %v13562_v55 = vpop.permute.xlu1 %4893 }
 0x795   :  { %v13568_v53 = vpop.permute.xlu0 %5466 }
 0x796   :  { %5133 = vrot.lane.b32.xlu1 %v5088_v7, %s8478_s1  ;;  %5356 = vrot.lane.b32.xlu0 %v5313_v47, %s8479_s29  ;;  %v16010_v7 = vrot.slane %v13422_v49, 1 }
 0x798   :  { %v13572_v54 = vpop.permute.xlu1 %5019 }
 0x799   :  { %v13578_v24 = vpop.permute.xlu0 %5468 }
 0x79a   :  { %4784 = vrot.lane.b32.xlu1 %v4741_v41, %s8477_s28  ;;  %5358 = vrot.lane.b32.xlu0 %v5314_v37, %s8479_s29  ;;  %v16012_v41 = vrot.slane %v13432_v19, 2 }
 0x79c   :  { %v13582_v16 = vpop.permute.xlu1 %5021 }
 0x79d   :  { %v13584_v57 = vpop.permute.xlu0 %5594 }
 0x79e   :  { %4907 = vrot.lane.b32.xlu1 %v13322_v36, %s8480_s30  ;;  %5260 = vrot.lane.b32.xlu0 %v13330_v4, %s8476_s16 }
 0x7a0   :  { %v13590_v32 = vpop.permute.xlu1 %4770 }
 0x7a1   :  { %v13592_v56 = vpop.permute.xlu0 %5596 }
 0x7a2   :  { %4909 = vrot.lane.b32.xlu1 %v13333_v11, %s8480_s30  ;;  %5482 = vrot.lane.b32.xlu0 %v13341_v39, %s8482_s2  ;;  %v4742_v39 = vmul.f32 %v13377_v29, %v15759_v42 }
 0x7a4   :  { %v13598_v48 = vpop.permute.xlu1 %5119 }
 0x7a5   :  { %v13600_v60 = vpop.permute.xlu0 %5246 }
 0x7a6   :  { %5035 = vrot.lane.b32.xlu1 %v13346_v12, %s8481_s0  ;;  %5484 = vrot.lane.b32.xlu0 %v13351_v1, %s8482_s2  ;;  %v5089_v1 = vmul.f32 %v13377_v29, %v15762_v0 }
 0x7a8   :  { %v13606_v36 = vpop.permute.xlu1 %5121 }
 0x7a9   :  { %v13608_v4 = vpop.permute.xlu0 %5344 }
 0x7aa   :  { %5037 = vrot.lane.b32.xlu1 %v13361_v13, %s8481_s0  ;;  %5610 = vrot.lane.b32.xlu0 %v13389_v20, %s8483_s11  ;;  %v5090_v20 = vmul.f32 %v13380_v25, %v15764_v8 }
 0x7ac   :  { %v13614_v11 = vpop.permute.xlu1 %4772 }
 0x7ad   :  { %v13618_v52 = vpop.permute.xlu0 %5346 }
 0x7ae   :  { %4786 = vrot.lane.b32.xlu1 %v4742_v39, %s8477_s28  ;;  %5612 = vrot.lane.b32.xlu0 %v13401_v51, %s8483_s11  ;;  %v5317_v51 = vmul.f32 %v13395_v33, %v15765_v21  ;;  %v16009_v33 = vld [vmem:[#allocation178_spill] sm:$0xff] }
 0x7af   :  { %v5461_v47 = vsel %vm1127_vm4, %v16010_v7, %v16009_v33  ;;  %v16021_v33 = vld [vmem:[#allocation133_spill] sm:$0xff]  ;;  %vm6091_vm4 = vcmask 195584  }
 0x7b0   :  { %v13623_v12 = vpop.permute.xlu1 %4895 }
 0x7b1   :  { %v13627_v13 = vpop.permute.xlu0 %5248 }
 0x7b2   :  { %5135 = vrot.lane.b32.xlu1 %v5089_v1, %s8478_s1  ;;  %5262 = vrot.lane.b32.xlu0 %v13404_v38, %s8476_s16  ;;  %v16008_v38 = vld [vmem:[#allocation192_spill] sm:$0xff]  ;;  %v16015_v1 = vld [vmem:[#allocation47_spill] sm:$0xff] }
 0x7b3   :  { %v5315_v2 = vmul.f32 %v13377_v29, %v16008_v38  ;;  %v16011_v29 = vld [vmem:[#allocation179_spill] sm:$0xff] }
 0x7b4   :  { %v13632_v42 = vpop.permute.xlu1 %4897  ;;  %v5589_v37 = vsel %vm533_vm6, %v16012_v41, %v16011_v29  ;;  %v16024_v29 = vld [vmem:[#allocation76_spill] sm:$0xff]  ;;  %vm5846_vm6 = vcmask 146432  }
 0x7b5   :  { %v13638_v10 = vpop.permute.xlu0 %5470 }
 0x7b6   :  { %5137 = vrot.lane.b32.xlu1 %v5090_v20, %s8478_s1  ;;  %5364 = vrot.lane.b32.xlu0 %v5317_v51, %s8479_s29  ;;  %v16016_v51 = vld [vmem:[#allocation194_spill] sm:$0xff] }
 0x7b8   :  { %v13642_v0 = vpop.permute.xlu1 %5023 }
 0x7b9   :  { %v13648_v22 = vpop.permute.xlu0 %5472 }
 0x7ba   :  { %5362 = vrot.lane.b32.xlu1 %v5316_v58, %s8479_s29  ;;  %5360 = vrot.lane.b32.xlu0 %v5315_v2, %s8479_s29  ;;  %v16020_v2 = vld [vmem:[#allocation196_spill] sm:$0xff] }
 0x7bc   :  { %v13652_v8 = vpop.permute.xlu1 %5025 }
 0x7bd   :  { %v13654_v21 = vpop.permute.xlu0 %5598 }
 0x7be   :  { %4911 = vrot.lane.b32.xlu1 %v13438_v3, %s8480_s30  ;;  %5492 = vrot.lane.b32.xlu0 %v5461_v47, %s8482_s2  ;;  %v16014_v3 = vld [vmem:[#allocation40_spill] sm:$0xff] }
 0x7bf   :  { %v4712_v20 = vadd.f32 %v16015_v1, %v16014_v3 }
 0x7c0   :  { %v13663_v35 = vpop.permute.xlu1 %4774 }
 0x7c1   :  { %v13665_v25 = vpop.permute.xlu0 %5600 }
 0x7c2   :  { %4913 = vrot.lane.b32.xlu1 %v13441_v14, %s8480_s30  ;;  %5620 = vrot.lane.b32.xlu0 %v5589_v37, %s8483_s11  ;;  %v16019_v14 = vld [vmem:[#allocation176_spill] sm:$0xff]  ;;  %v16025_v37 = vld [vmem:[#allocation31_spill] sm:$0xff] }
 0x7c3   :  { %v4803_v38 = vadd.f32 %v4712_v20, %v16019_v14  ;;  %v4713_v3 = vadd.f32 %v16025_v37, %v16015_v1  ;;  %v16026_v20 = vld [vmem:[#allocation42_spill] sm:$0xff]  ;;  %v16027_v14 = vld [vmem:[#allocation207_spill] sm:$0xff] }
 0x7c4   :  { %v13674_v49 = vpop.permute.xlu1 %5123 }
 0x7c5   :  { %16013 = vst [vmem:[#allocation157_spill] sm:$0xff] %v13674_v49  ;;  %v13676_v39 = vpop.permute.xlu0 %5250  ;;  %v4931_v7 = vadd.f32 %v16021_v33, %v4803_v38  ;;  %v4804_v38 = vadd.f32 %v16027_v14, %v4713_v3  ;;  %v16029_v33 = vld [vmem:[#allocation208_spill] sm:$0xff]  ;;  %v16036_v3 = vld [vmem:[#allocation135_spill] sm:$0xff] }
 0x7c6   :  { %5039 = vrot.lane.b32.xlu1 %v13450_v28, %s8481_s0  ;;  %5264 = vrot.lane.b32.xlu0 %v16016_v51, %s8476_s16 }
 0x7c7   :  { %v5059_v41 = vadd.f32 %v16024_v29, %v4931_v7  ;;  %v16030_v29 = vld [vmem:[#allocation217_spill] sm:$0xff] }
 0x7c8   :  { %v13684_v19 = vpop.permute.xlu1 %5125 }
 0x7c9   :  { %16017 = vst [vmem:[#allocation184_spill] sm:$0xff] %v13684_v19  ;;  %v13686_v58 = vpop.permute.xlu0 %5348  ;;  %v16034_v19 = vld [vmem:[#allocation191_spill] sm:$0xff] }
 0x7ca   :  { %16018 = vst [vmem:[#allocation189_spill] sm:$0xff] %v13686_v58  ;;  %5041 = vrot.lane.b32.xlu1 %v16020_v2, %s8481_s0  ;;  %5486 = vrot.lane.b32.xlu0 %v13477_v17, %s8482_s2  ;;  %v4714_v17 = vadd.f32 %v16015_v1, %v16026_v20  ;;  %s8485_s0 = smov 125  }
 0x7cc   :  { %v13694_v47 = vpop.permute.xlu1 %4776  ;;  %v4805_v7 = vadd.f32 %v16029_v33, %v4714_v17 }
 0x7cd   :  { %16022 = vst [vmem:[#allocation149_spill] sm:$0xff] %v13694_v47  ;;  %v13696_v28 = vpop.permute.xlu0 %5350  ;;  %v5155_v47 = vadd.f32 %v16030_v29, %v5059_v41 }
 0x7ce   :  { %16023 = vst [vmem:[#allocation195_spill] sm:$0xff] %v13696_v28  ;;  %5266 = vrot.lane.b32.xlu1 %v13484_v18, %s8476_s16  ;;  %5488 = vrot.lane.b32.xlu0 %v13489_v45, %s8482_s2  ;;  %v16031_v18 = vld [vmem:[#allocation197_spill] sm:$0xff]  ;;  %v16032_v45 = vld [vmem:[#allocation175_spill] sm:$0xff]  ;;  %v16033_v28 = vld [vmem:[#allocation152_spill] sm:$0xff]  ;;  %v4933_v58 = vadd.f32 %v16034_v19, %v4805_v7 }
 0x7cf   :  { %v4932_v37 = vadd.f32 %v16032_v45, %v4804_v38  ;;  %v5286_v20 = vadd.f32 %v16033_v28, %v5155_v47  ;;  %v16038_v47 = vld [vmem:[#allocation44_spill] sm:$0xff]  ;;  %v16039_v28 = vld [vmem:[#allocation218_spill] sm:$0xff] }
 0x7d0   :  { %v13707_v51 = vpop.permute.xlu1 %4899  ;;  %v5061_v41 = vadd.f32 %v13479_v30, %v4933_v58  ;;  %v4716_v19 = vadd.f32 %v16015_v1, %v16038_v47  ;;  %v16040_v7 = vld [vmem:[#allocation174_spill] sm:$0xff]  ;;  %v16046_v47 = vld [vmem:[#allocation209_spill] sm:$0xff] }
 0x7d1   :  { %v13710_v2 = vpop.permute.xlu0 %5252  ;;  %v5060_v14 = vadd.f32 %v16036_v3, %v4932_v37  ;;  %v5382_v38 = vadd.f32 %v16039_v28, %v5286_v20  ;;  %v16043_v37 = vld [vmem:[#allocation213_spill] sm:$0xff]  ;;  %v16045_v20 = vld [vmem:[#allocation210_spill] sm:$0xff] }
 0x7d2   :  { %16028 = vst [vmem:[#allocation23_spill] sm:$0xff] %v13710_v2  ;;  %5670 = vrot.lane.b32.xlu1 %v16031_v18, %s8482_s2  ;;  %5614 = vrot.lane.b32.xlu0 %v13502_v9, %s8483_s11  ;;  %v16037_v9 = vld [vmem:[#allocation33_spill] sm:$0xff]  ;;  %v16041_v18 = vld [vmem:[#allocation172_spill] sm:$0xff] }
 0x7d3   :  { %v4715_v17 = vadd.f32 %v16037_v9, %v16015_v1  ;;  %v5156_v30 = vadd.f32 %v16041_v18, %v5060_v14  ;;  %v16044_v3 = vld [vmem:[#allocation137_spill] sm:$0xff] }
 0x7d4   :  { %v13721_v49 = vpop.permute.xlu1 %4901  ;;  %v16049_v18 = vld [vmem:[#allocation65_spill] sm:$0xff] }
 0x7d5   :  { %16035 = vst [vmem:[#allocation20_spill] sm:$0xff] %v13721_v49  ;;  %v13724_v2 = vpop.permute.xlu0 %5474  ;;  %v4806_v29 = vadd.f32 %v16040_v7, %v4715_v17  ;;  %v5157_v49 = vadd.f32 %v16044_v3, %v5061_v41  ;;  %v5287_v9 = vadd.f32 %v16045_v20, %v5156_v30  ;;  %v16051_v30 = vld [vmem:[#allocation78_spill] sm:$0xff] }
 0x7d6   :  { %5490 = vrot.lane.b32.xlu1 %v13494_v59, %s8482_s2  ;;  %5616 = vrot.lane.b32.xlu0 %v13505_v34, %s8483_s11  ;;  %v16042_v59 = vld [vmem:[#allocation166_spill] sm:$0xff]  ;;  %v5510_v34 = vadd.f32 %v16043_v37, %v5382_v38  ;;  %v16052_v37 = vld [vmem:[#allocation80_spill] sm:$0xff] }
 0x7d7   :  { %v4807_v45 = vadd.f32 %v16042_v59, %v4716_v19  ;;  %v4934_v17 = vadd.f32 %v16046_v47, %v4806_v29  ;;  %v5288_v28 = vadd.f32 %v13530_v15, %v5157_v49  ;;  %v16048_v29 = vld [vmem:[#allocation35_spill] sm:$0xff]  ;;  %v5383_v15 = vadd.f32 %v16049_v18, %v5287_v9  ;;  %v16050_v49 = vld [vmem:[#allocation46_spill] sm:$0xff] }
 0x7d8   :  { %v13736_v33 = vpop.permute.xlu1 %5027  ;;  %v5638_v14 = vadd.f32 %v13514_v44, %v5510_v34  ;;  %v4717_v44 = vadd.f32 %v16048_v29, %v16015_v1 }
 0x7d9   :  { %v13740_v58 = vpop.permute.xlu0 %5476  ;;  %v4935_v19 = vadd.f32 %v13553_v43, %v4807_v45  ;;  %v5062_v41 = vadd.f32 %v13512_v27, %v4934_v17  ;;  %v4718_v43 = vadd.f32 %v16015_v1, %v16050_v49  ;;  %v5384_v59 = vadd.f32 %v16051_v30, %v5288_v28  ;;  %v16053_v17 = vld [vmem:[#allocation155_spill] sm:$0xff]  ;;  %v16057_v49 = vld [vmem:[#allocation160_spill] sm:$0xff] }
 0x7da   :  { %5618 = vrot.lane.b32.xlu1 %v13510_v31, %s8483_s11  ;;  %5268 = vrot.lane.b32.xlu0 %v13497_v23, %s8476_s16  ;;  %v16047_v23 = vld [vmem:[#allocation156_spill] sm:$0xff]  ;;  %v5511_v45 = vadd.f32 %v13486_v46, %v5383_v15 }
 0x7db   :  { %v5063_v31 = vadd.f32 %v13572_v54, %v4935_v19  ;;  %v4808_v54 = vadd.f32 %v13520_v26, %v4717_v44  ;;  %v5158_v34 = vadd.f32 %v16052_v37, %v5062_v41  ;;  %v4809_v20 = vadd.f32 %v13544_v40, %v4718_v43 }
 0x7dc   :  { %v13754_v7 = vpop.permute.xlu1 %5029  ;;  %v5512_v47 = vadd.f32 %v13568_v53, %v5384_v59  ;;  %v5639_v28 = vadd.f32 %v13522_v5, %v5511_v45  ;;  %v16055_v5 = vld [vmem:[#allocation37_spill] sm:$0xff] }
 0x7dd   :  { %v13757_v38 = vpop.permute.xlu0 %5602  ;;  %v5159_v9 = vadd.f32 %v13528_v61, %v5063_v31  ;;  %v5289_v46 = vadd.f32 %v13557_v63, %v5158_v34  ;;  %v4936_v26 = vadd.f32 %v13562_v55, %v4808_v54  ;;  %v4937_v53 = vadd.f32 %v13623_v12, %v4809_v20  ;;  %v16056_v12 = vld [vmem:[#allocation41_spill] sm:$0xff] }
 0x7de   :  { %5766 = vrot.lane.b32.xlu1 %v5638_v14, %s8476_s16  ;;  %5716 = vrot.lane.b32.xlu0 %v16047_v23, %s8479_s29  ;;  %v16054_v14 = vld [vmem:[#allocation198_spill] sm:$0xff]  ;;  %v5640_v19 = vadd.f32 %v13584_v57, %v5512_v47  ;;  %v4719_v55 = vadd.f32 %v16055_v5, %v16015_v1  ;;  %v4720_v29 = vadd.f32 %v16015_v1, %v16056_v12 }
 0x7df   :  { %v5290_v40 = vadd.f32 %v13600_v60, %v5159_v9  ;;  %v5064_v61 = vadd.f32 %v13582_v16, %v4936_v26  ;;  %v5065_v23 = vadd.f32 %v13642_v0, %v4937_v53  ;;  %v5385_v63 = vadd.f32 %v13538_v6, %v5289_v46  ;;  %v16060_v47 = vld [vmem:[#allocation202_spill] sm:$0xff]  ;;  %v16062_v9 = vld [vmem:[#allocation23_spill] sm:$0xff]  ;;  %v16064_v46 = vld [vmem:[#allocation157_spill] sm:$0xff] }
 0x7e0   :  { %v13769_v27 = vpop.permute.xlu1 %4778  ;;  %v4810_v18 = vadd.f32 %v13590_v32, %v4719_v55  ;;  %v16068_v55 = vld [vmem:[#allocation34_spill] sm:$0xff] }
 0x7e1   :  { %v13774_v3 = vpop.permute.xlu0 %5604  ;;  %v5386_v57 = vadd.f32 %v13548_v62, %v5290_v40  ;;  %v5513_v16 = vadd.f32 %v13578_v24, %v5385_v63  ;;  %v5160_v0 = vadd.f32 %v13536_v50, %v5064_v61  ;;  %v5161_v6 = vadd.f32 %v13598_v48, %v5065_v23  ;;  %v16058_v62 = vld [vmem:[#allocation199_spill] sm:$0xff]  ;;  %v16066_v23 = vld [vmem:[#allocation184_spill] sm:$0xff] }
 0x7e2   :  { %5718 = vrot.lane.b32.xlu1 %v16053_v17, %s8479_s29  ;;  %5672 = vrot.lane.b32.xlu0 %v16054_v14, %s8482_s2  ;;  %v4811_v24 = vadd.f32 %v13614_v11, %v4720_v29  ;;  %v4938_v50 = vadd.f32 %v13632_v42, %v4810_v18  ;;  %v16059_v11 = vld [vmem:[#allocation39_spill] sm:$0xff]  ;;  %v16063_v17 = vld [vmem:[#allocation20_spill] sm:$0xff] }
 0x7e3   :  { %v5514_v15 = vadd.f32 %v13638_v10, %v5386_v57  ;;  %v5641_v43 = vadd.f32 %v13592_v56, %v5513_v16  ;;  %v5291_v30 = vadd.f32 %v13627_v13, %v5160_v0  ;;  %v5292_v10 = vadd.f32 %v13676_v39, %v5161_v6 }
 0x7e4   :  { %v13789_v41 = vpop.permute.xlu1 %5127  ;;  %v5066_v45 = vadd.f32 %v13652_v8, %v4938_v50  ;;  %v4939_v54 = vadd.f32 %v13707_v51, %v4811_v24  ;;  %v4721_v13 = vadd.f32 %v16059_v11, %v16015_v1  ;;  %v16073_v11 = vld [vmem:[#allocation28_spill] sm:$0xff] }
 0x7e5   :  { %v5255_v31 = vpop.permute.xlu0 %5254  ;;  %v5642_v32 = vadd.f32 %v13654_v21, %v5514_v15  ;;  %v5387_v56 = vadd.f32 %v13608_v4, %v5291_v30  ;;  %v5388_v42 = vadd.f32 %v13618_v52, %v5292_v10  ;;  %v16061_v4 = vld [vmem:[#allocation159_spill] sm:$0xff] }
 0x7e6   :  { %5768 = vrot.lane.b32.xlu0 %v5639_v28, %s8476_s16  ;;  %5770 = vrot.lane.b32.xlu1 %v5640_v19, %s8476_s16  ;;  %v5067_v21 = vadd.f32 %v13736_v33, %v4939_v54  ;;  %v4812_v8 = vadd.f32 %v13663_v35, %v4721_v13  ;;  %v5162_v51 = vadd.f32 %v13606_v36, %v5066_v45  ;;  %v16065_v19 = vld [vmem:[#allocation189_spill] sm:$0xff]  ;;  %v16072_v54 = vld [vmem:[#allocation215_spill] sm:$0xff] }
 0x7e7   :  { %v5515_v37 = vadd.f32 %v13648_v22, %v5387_v56  ;;  %v5516_v20 = vadd.f32 %v13724_v2, %v5388_v42  ;;  %v4722_v56 = vadd.f32 %v16015_v1, %v16072_v54  ;;  %v16074_v13 = vld [vmem:[#allocation149_spill] sm:$0xff] }
 0x7e8   :  { %v13799_v60 = vpop.permute.xlu1 %5129  ;;  %v5293_v33 = vadd.f32 %v16062_v9, %v5162_v51  ;;  %v4940_v14 = vadd.f32 %v16063_v17, %v4812_v8  ;;  %v5163_v35 = vadd.f32 %v16064_v46, %v5067_v21 }
 0x7e9   :  { %v5353_v44 = vpop.permute.xlu0 %5352  ;;  %v5643_v52 = vadd.f32 %v13665_v25, %v5515_v37  ;;  %v5644_v22 = vadd.f32 %v13757_v38, %v5516_v20  ;;  %v16067_v38 = vld [vmem:[#allocation195_spill] sm:$0xff]  ;;  %v4813_v42 = vadd.f32 %v16074_v13, %v4722_v56 }
 0x7ea   :  { %5720 = vrot.lane.b32.xlu0 %v16057_v49, %s8479_s29  ;;  %5674 = vrot.lane.b32.xlu1 %v16058_v62, %s8482_s2  ;;  %v5068_v2 = vadd.f32 %v13754_v7, %v4940_v14  ;;  %v5294_v28 = vadd.f32 %v5255_v31, %v5163_v35  ;;  %v5389_v40 = vadd.f32 %v16065_v19, %v5293_v33  ;;  %v16069_v7 = vld [vmem:[#allocation153_spill] sm:$0xff]  ;;  %v16070_v49 = vld [vmem:[#allocation154_spill] sm:$0xff] }
 0x7eb   :  { %v6082_v62 = vld [vmem:[%s14716_s6 + $0x8] sm:$0xff] }
 0x7ec   :  { %v13818_v59 = vpop.permute.xlu1 %4780  ;;  %v5517_v61 = vadd.f32 %v13740_v58, %v5389_v40  ;;  %v5164_v63 = vadd.f32 %v16066_v23, %v5068_v2  ;;  %v5390_v5 = vadd.f32 %v16067_v38, %v5294_v28 }
 0x7ed   :  { %v13820_v48 = vpop.permute.xlu0 %5354 }
 0x7ee   :  { %5772 = vrot.lane.b32.xlu0 %v5641_v43, %s8476_s16  ;;  %5774 = vrot.lane.b32.xlu1 %v5642_v32, %s8476_s16  ;;  %v5645_v31 = vadd.f32 %v13774_v3, %v5517_v61  ;;  %v6081_v3 = vld [vmem:[%s14716_s6] sm:$0xff]  ;;  %v6083_v32 = vld [vmem:[%s14716_s6 + $0x10] sm:$0xff] }
 0x7ef   :  { %v7882_v24 = vpack.c.bf16 %v6082_v62, %v6081_v3 }
 0x7f0   :  { %v4904_v39 = vpop.permute.xlu1 %4903 }
 0x7f1   :  { %v5257_v34 = vpop.permute.xlu0 %5256  ;;  %7883 = vmatprep.subr.bf16.mxu1 %v7882_v24  ;;  %v4941_v51 = vadd.f32 %v4904_v39, %v4813_v42 }
 0x7f2   :  { %5676 = vrot.lane.b32.xlu0 %v16060_v47, %s8482_s2  ;;  %5722 = vrot.lane.b32.xlu1 %v16061_v4, %s8479_s29  ;;  %v5295_v57 = vadd.f32 %v5257_v34, %v5164_v63  ;;  %v16075_v34 = vld [vmem:[#allocation77_spill] sm:$0xff]  ;;  %v16076_v63 = vld [vmem:[#allocation203_spill] sm:$0xff] }
 0x7f3   :  { %7885 = vmatpush3.bf16.msra.mxu1 %v7882_v24  ;;  %v4723_v8 = vadd.f32 %v16075_v34, %v16015_v1  ;;  %v16080_v24 = vld [vmem:[#allocation67_spill] sm:$0xff] }
 0x7f4   :  { %v4906_v26 = vpop.permute.xlu1 %4905  ;;  %v5391_v58 = vadd.f32 %v5353_v44, %v5295_v57  ;;  %v16071_v44 = vld [vmem:[#allocation36_spill] sm:$0xff]  ;;  %7732 = vmatprep.subr.mxu1 %v6083_v32 }
 0x7f5   :  { %v5479_v36 = vpop.permute.xlu0 %5478  ;;  %v4814_v20 = vadd.f32 %v13769_v27, %v4723_v8 }
 0x7f6   :  { %5776 = vrot.lane.b32.xlu0 %v5643_v52, %s8476_s16  ;;  %5778 = vrot.lane.b32.xlu1 %v5644_v22, %s8476_s16  ;;  %v5518_v12 = vadd.f32 %v5479_v36, %v5390_v5 }
 0x7f7   :  { %7733 = vmatpush3.msra.mxu1 %v6083_v32  ;;  %v4942_v9 = vadd.f32 %v4906_v26, %v4814_v20 }
 0x7f8   :  { %v5032_v25 = vpop.permute.xlu1 %5031 }
 0x7f9   :  { %v5481_v53 = vpop.permute.xlu0 %5480  ;;  %v5069_v47 = vadd.f32 %v5032_v25, %v4941_v51 }
 0x7fa   :  { %5724 = vrot.lane.b32.xlu0 %v16068_v55, %s8479_s29  ;;  %5678 = vrot.lane.b32.xlu1 %v16069_v7, %s8482_s2  ;;  %v5519_v6 = vadd.f32 %v5481_v53, %v5391_v58 }
 0x7fb   :  { %v5165_v17 = vadd.f32 %v13789_v41, %v5069_v47  ;;  %v16081_v47 = vld [vmem:[#allocation193_spill] sm:$0xff] }
 0x7fc   :  { %v5034_v29 = vpop.permute.xlu1 %5033 }
 0x7fd   :  { %v5607_v16 = vpop.permute.xlu0 %5606  ;;  %v5070_v33 = vadd.f32 %v5034_v29, %v4942_v9  ;;  %v16078_v29 = vld [vmem:[#allocation173_spill] sm:$0xff] }
 0x7fe   :  { %v5646_v0 = vadd.f32 %v5607_v16, %v5518_v12  ;;  %5780 = vrot.lane.b32.xlu0 %v5645_v31, %s8476_s16  ;;  %v4724_v16 = vadd.f32 %v16015_v1, %v16078_v29 }
 0x7ff   :  { %v5166_v35 = vadd.f32 %v13799_v60, %v5070_v33 }
 0x800   :  { %5782 = vrot.lane.b32.xlu1 %v5646_v0, %s8476_s16  ;;  %v13858_v18 = vpop.permute.xlu1 %4782  ;;  %v4815_v0 = vadd.f32 %v13818_v59, %v4724_v16 }
 0x801   :  { %v5609_v15 = vpop.permute.xlu0 %5608 }
 0x802   :  { %5680 = vrot.lane.b32.xlu0 %v16070_v49, %s8482_s2  ;;  %v5647_v43 = vadd.f32 %v5609_v15, %v5519_v6  ;;  %v16079_v6 = vld [vmem:[#allocation147_spill] sm:$0xff] }
 0x803   :  { %v4725_v49 = vadd.f32 %v16079_v6, %v16015_v1 }
 0x804   :  { %5726 = vrot.lane.b32.xlu1 %v16071_v44, %s8479_s29  ;;  %v13870_v30 = vpop.permute.xlu1 %5131 }
 0x805   :  { %v5259_v50 = vpop.permute.xlu0 %5258  ;;  %v4816_v62 = vadd.f32 %v13858_v18, %v4725_v49 }
 0x806   :  { %5784 = vrot.lane.b32.xlu0 %v5647_v43, %s8476_s16  ;;  %v5296_v46 = vadd.f32 %v5259_v50, %v5165_v17  ;;  %v4726_v50 = vadd.f32 %v16015_v1, %v16080_v24 }
 0x808   :  { %v13876_v10 = vpop.permute.xlu1 %5133  ;;  %v5392_v19 = vadd.f32 %v13820_v48, %v5296_v46  ;;  %v16077_v48 = vld [vmem:[#allocation205_spill] sm:$0xff] }
 0x809   :  { %v5357_v45 = vpop.permute.xlu0 %5356 }
 0x80a   :  { %5728 = vrot.lane.b32.xlu0 %v16073_v11, %s8479_s29 }
 0x80c   :  { %v4785_v21 = vpop.permute.xlu1 %4784 }
 0x80d   :  { %v13883_v37 = vpop.permute.xlu0 %5358  ;;  %v4817_v54 = vadd.f32 %v4785_v21, %v4726_v50  ;;  %v16089_v50 = vld [vmem:[#allocation211_spill] sm:$0xff] }
 0x810   :  { %v4908_v4 = vpop.permute.xlu1 %4907 }
 0x811   :  { %v5261_v52 = vpop.permute.xlu0 %5260  ;;  %v4943_v3 = vadd.f32 %v4908_v4, %v4815_v0  ;;  %v4727_v4 = vadd.f32 %v16081_v47, %v16015_v1 }
 0x812   :  { %v5297_v28 = vadd.f32 %v5261_v52, %v5166_v35 }
 0x814   :  { %v4910_v14 = vpop.permute.xlu1 %4909  ;;  %v5393_v25 = vadd.f32 %v5357_v45, %v5297_v28 }
 0x815   :  { %v5483_v22 = vpop.permute.xlu0 %5482  ;;  %v4944_v45 = vadd.f32 %v4910_v14, %v4816_v62 }
 0x816   :  { %v5520_v39 = vadd.f32 %v5483_v22, %v5392_v19 }
 0x818   :  { %v5036_v36 = vpop.permute.xlu1 %5035 }
 0x819   :  { %v5485_v2 = vpop.permute.xlu0 %5484  ;;  %v5071_v43 = vadd.f32 %v5036_v36, %v4943_v3 }
 0x81a   :  { %v5521_v61 = vadd.f32 %v5485_v2, %v5393_v25 }
 0x81b   :  { %v5167_v11 = vadd.f32 %v13870_v30, %v5071_v43  ;;  %v16087_v43 = vld [vmem:[#allocation167_spill] sm:$0xff] }
 0x81c   :  { %v5038_v40 = vpop.permute.xlu1 %5037 }
 0x81d   :  { %v5611_v27 = vpop.permute.xlu0 %5610  ;;  %v5072_v56 = vadd.f32 %v5038_v40, %v4944_v45 }
 0x81e   :  { %v5648_v53 = vadd.f32 %v5611_v27, %v5520_v39 }
 0x81f   :  { %v5168_v51 = vadd.f32 %v13876_v10, %v5072_v56 }
 0x820   :  { %5786 = vrot.lane.b32.xlu1 %v5648_v53, %s8476_s16  ;;  %v4787_v26 = vpop.permute.xlu1 %4786 }
 0x821   :  { %v5613_v41 = vpop.permute.xlu0 %5612  ;;  %v4818_v21 = vadd.f32 %v4787_v26, %v4727_v4 }
 0x822   :  { %v5649_v23 = vadd.f32 %v5613_v41, %v5521_v61  ;;  %v16083_v41 = vld [vmem:[#allocation62_spill] sm:$0xff] }
 0x824   :  { %5682 = vrot.lane.b32.xlu1 %v16076_v63, %s8482_s2  ;;  %5788 = vrot.lane.b32.xlu0 %v5649_v23, %s8476_s16  ;;  %v5136_v60 = vpop.permute.xlu1 %5135  ;;  %v16084_v23 = vld [vmem:[#allocation12_spill] sm:$0xff] }
 0x825   :  { %v5263_v38 = vpop.permute.xlu0 %5262  ;;  %v5814_v63 = vsel %vm500_vm1, %v16084_v23, %v16083_v41 }
 0x826   :  { %v5298_v34 = vadd.f32 %v5263_v38, %v5167_v11  ;;  %v16085_v38 = vld [vmem:[#allocation169_spill] sm:$0xff]  ;;  %v16092_v11 = vld [vmem:[#allocation63_spill] sm:$0xff] }
 0x828   :  { %5684 = vrot.lane.b32.xlu0 %v16077_v48, %s8482_s2  ;;  %v5138_v5 = vpop.permute.xlu1 %5137  ;;  %v5394_v9 = vadd.f32 %v13883_v37, %v5298_v34  ;;  %v16082_v37 = vld [vmem:[#allocation38_spill] sm:$0xff]  ;;  %v5830_v48 = vsel %vm2921_vm9, %v5814_v63, %v16085_v38 }
 0x829   :  { %v5365_v55 = vpop.permute.xlu0 %5364 }
 0x82c   :  { %v5363_v7 = vpop.permute.xlu1 %5362 }
 0x82d   :  { %v5361_v31 = vpop.permute.xlu0 %5360 }
 0x830   :  { %v4912_v57 = vpop.permute.xlu1 %4911 }
 0x831   :  { %v5493_v12 = vpop.permute.xlu0 %5492  ;;  %v4945_v13 = vadd.f32 %v4912_v57, %v4817_v54  ;;  %v13932_v57 = vld [vmem:[%s14717_s7 + $0x2] ss:$0 sm:$0xff] }
 0x834   :  { %v4914_v58 = vpop.permute.xlu1 %4913 }
 0x835   :  { %v5621_v15 = vpop.permute.xlu0 %5620  ;;  %v4946_v46 = vadd.f32 %v4914_v58, %v4818_v21 }
 0x838   :  { %v5040_v44 = vpop.permute.xlu1 %5039 }
 0x839   :  { %v5265_v32 = vpop.permute.xlu0 %5264  ;;  %v5073_v8 = vadd.f32 %v5040_v44, %v4945_v13  ;;  %v16088_v44 = vld [vmem:[#allocation14_spill] sm:$0xff] }
 0x83a   :  { %v5299_v52 = vadd.f32 %v5265_v32, %v5168_v51  ;;  %v5816_v24 = vsel %vm500_vm1, %v16088_v44, %v16087_v43 }
 0x83b   :  { %v5169_v33 = vadd.f32 %v5136_v60, %v5073_v8  ;;  %v13922_v60 = vld [vmem:[%s14717_s7 + $0x1] ss:$0 sm:$0xff] }
 0x83c   :  { %v5042_v59 = vpop.permute.xlu1 %5041  ;;  %v5395_v35 = vadd.f32 %v5361_v31, %v5299_v52 }
 0x83d   :  { %v5487_v42 = vpop.permute.xlu0 %5486  ;;  %v5074_v2 = vadd.f32 %v5042_v59, %v4946_v46 }
 0x83e   :  { %v5522_v17 = vadd.f32 %v5487_v42, %v5394_v9  ;;  %v16093_v9 = vld [vmem:[#allocation148_spill] sm:$0xff] }
 0x83f   :  { %v5170_v25 = vadd.f32 %v5138_v5, %v5074_v2  ;;  %v16086_v5 = vld [vmem:[#allocation30_spill] sm:$0xff] }
 0x840   :  { %v5267_v20 = vpop.permute.xlu1 %5266 }
 0x841   :  { %v5489_v18 = vpop.permute.xlu0 %5488  ;;  %v5300_v30 = vadd.f32 %v5267_v20, %v5169_v33  ;;  %v16094_v33 = vld [vmem:[#allocation15_spill] sm:$0xff] }
 0x842   :  { %v5523_v10 = vadd.f32 %v5489_v18, %v5395_v35  ;;  %v5818_v21 = vsel %vm500_vm1, %v16094_v33, %v16093_v9  ;;  %v16097_v35 = vld [vmem:[#allocation201_spill] sm:$0xff] }
 0x843   :  { %v5396_v19 = vadd.f32 %v5363_v7, %v5300_v30  ;;  %v16095_v30 = vld [vmem:[#allocation214_spill] sm:$0xff] }
 0x844   :  { %v13910_v14 = vpop.permute.xlu1 %5670 }
 0x845   :  { %v5615_v22 = vpop.permute.xlu0 %5614 }
 0x846   :  { %v5650_v36 = vadd.f32 %v5615_v22, %v5522_v17  ;;  %v16096_v22 = vld [vmem:[#allocation6_spill] sm:$0xff] }
 0x847   :  { %v5817_v46 = vsel %vm500_vm1, %v16096_v22, %v16095_v30  ;;  %v16105_v22 = vld [vmem:[#allocation150_spill] sm:$0xff] }
 0x848   :  { %5790 = vrot.lane.b32.xlu1 %v5650_v36, %s8476_s16  ;;  %v5491_v28 = vpop.permute.xlu1 %5490  ;;  %v5834_v36 = vsel %vm2921_vm9, %v5818_v21, %v16097_v35 }
 0x849   :  { %v5617_v1 = vpop.permute.xlu0 %5616  ;;  %v5524_v40 = vadd.f32 %v5491_v28, %v5396_v19  ;;  %v16098_v28 = vld [vmem:[#allocation212_spill] sm:$0xff] }
 0x84a   :  { %v5651_v39 = vadd.f32 %v5617_v1, %v5523_v10  ;;  %v5833_v19 = vsel %vm2921_vm9, %v5817_v46, %v16098_v28  ;;  %v16106_v46 = vld [vmem:[#allocation8_spill] sm:$0xff] }
 0x84b   :  { %v5821_v35 = vsel %vm500_vm1, %v16106_v46, %v16105_v22 }
 0x84c   :  { %5730 = vrot.lane.b32.xlu1 %v16082_v37, %s8479_s29  ;;  %5792 = vrot.lane.b32.xlu0 %v5651_v39, %s8476_s16  ;;  %v5619_v27 = vpop.permute.xlu1 %5618 }
 0x84d   :  { %v5652_v53 = vadd.f32 %v5619_v27, %v5524_v40  ;;  %v5269_v61 = vpop.permute.xlu0 %5268 }
 0x84e   :  { %v5301_v26 = vadd.f32 %v5269_v61, %v5170_v25 }
 0x850   :  { %v5397_v7 = vadd.f32 %v5365_v55, %v5301_v26  ;;  %5794 = vrot.lane.b32.xlu1 %v5652_v53, %s8476_s16  ;;  %5732 = vrot.lane.b32.xlu0 %v16086_v5, %s8479_s29  ;;  %v5767_v31 = vpop.permute.xlu1 %5766 }
 0x851   :  { %v5847_v29 = vsel %vm5846_vm6, %v5830_v48, %v5767_v31  ;;  %v13935_v16 = vpop.permute.xlu0 %5716  ;;  %v16099_v48 = vld [vmem:[#allocation74_spill] sm:$0xff] }
 0x852   :  { %v5525_v0 = vadd.f32 %v5493_v12, %v5397_v7  ;;  %v5868_v58 = vmul.f32 %v13922_v60, %v5847_v29  ;;  %v16090_v12 = vld [vmem:[#allocation5_spill] sm:$0xff]  ;;  %v16100_v7 = vld [vmem:[#allocation16_spill] sm:$0xff] }
 0x853   :  { %v5815_v32 = vsel %vm500_vm1, %v16090_v12, %v16089_v50  ;;  %v5820_v5 = vsel %vm500_vm1, %v16100_v7, %v16099_v48  ;;  %v16104_v50 = vld [vmem:[#allocation216_spill] sm:$0xff] }
 0x854   :  { %v5653_v6 = vadd.f32 %v5621_v15, %v5525_v0  ;;  %v13939_v55 = vadd.f32 %v13932_v57, %v5868_v58  ;;  %v13941_v49 = vpop.permute.xlu1 %5718  ;;  %v16091_v15 = vld [vmem:[#allocation204_spill] sm:$0xff]  ;;  %v5831_v59 = vsel %vm2921_vm9, %v5815_v32, %v16092_v11  ;;  %v16101_v0 = vld [vmem:[#allocation177_spill] sm:$0xff]  ;;  %v16102_v58 = vld [vmem:[#allocation7_spill] sm:$0xff] }
 0x855   :  { %v13943_v3 = vpop.permute.xlu0 %5672  ;;  %v5832_v45 = vsel %vm2921_vm9, %v5816_v24, %v16091_v15 }
 0x856   :  { %v5905_v62 = vmin.f32 %v13939_v55, 20.0  ;;  %5796 = vrot.lane.b32.xlu0 %v5653_v6, %s8476_s16  ;;  %v5819_v6 = vsel %vm500_vm1, %v16102_v58, %v16101_v0  ;;  %vm6049_vm7 = vcmp.gt.f32.partialorder %v13939_v55, 20.0 }
 0x857   :  { %v5835_v12 = vsel %vm2921_vm9, %v5819_v6, %v16104_v50 }
 0x858   :  { %v5921_v54 = vmul.f32 1.442695, %v5905_v62  ;;  %v5771_v56 = vpop.permute.xlu1 %5770  ;;  %v16103_v62 = vld [vmem:[#allocation130_spill] sm:$0xff] }
 0x859   :  { %v5849_v13 = vsel %vm5846_vm6, %v5832_v45, %v5771_v56  ;;  %v5769_v42 = vpop.permute.xlu0 %5768  ;;  %v5836_v43 = vsel %vm2921_vm9, %v5820_v5, %v16103_v62 }
 0x85a   :  { %8258 = vpow2.f32 %v5921_v54  ;;  %v5870_v34 = vmul.f32 %v13922_v60, %v5849_v13  ;;  %v5848_v8 = vsel %vm5846_vm6, %v5831_v59, %v5769_v42 }
 0x85b   :  { %v5869_v51 = vmul.f32 %v13922_v60, %v5848_v8 }
 0x85c   :  { %v13962_v20 = vadd.f32 %v13932_v57, %v5870_v34  ;;  %v13964_v18 = vpop.permute.xlu1 %5674 }
 0x85d   :  { %v13967_v47 = vadd.f32 %v13932_v57, %v5869_v51  ;;  %v13969_v4 = vpop.permute.xlu0 %5720 }
 0x85e   :  { %v5907_v52 = vmin.f32 %v13962_v20, 20.0  ;;  %vm6051_vm10 = vcmp.gt.f32.partialorder %v13962_v20, 20.0 }
 0x85f   :  { %v5906_v17 = vmin.f32 %v13967_v47, 20.0  ;;  %vm6050_vm8 = vcmp.gt.f32.partialorder %v13967_v47, 20.0 }
 0x860   :  { %v5925_v2 = vmul.f32 1.442695, %v5907_v52  ;;  %v5775_v10 = vpop.permute.xlu1 %5774 }
 0x861   :  { %v5923_v1 = vmul.f32 1.442695, %v5906_v17  ;;  %v5851_v39 = vsel %vm5846_vm6, %v5834_v36, %v5775_v10  ;;  %v5773_v40 = vpop.permute.xlu0 %5772  ;;  %v16107_v10 = vld [vmem:[#allocation17_spill] sm:$0xff] }
 0x862   :  { %8260 = vpow2.f32 %v5925_v2  ;;  %v5872_v37 = vmul.f32 %v13922_v60, %v5851_v39  ;;  %v5850_v27 = vsel %vm5846_vm6, %v5833_v19, %v5773_v40  ;;  %v5822_v28 = vsel %vm500_vm1, %v16107_v10, %v13910_v14 }
 0x863   :  { %8262 = vpow2.f32 %v5923_v1  ;;  %v5871_v25 = vmul.f32 %v13922_v60, %v5850_v27  ;;  %v5837_v19 = vsel %vm2921_vm9, %v5821_v35, %v13935_v16 }
 0x864   :  { %v8259_v53 = vpop.eup %8258  ;;  %v13988_v61 = vadd.f32 %v13932_v57, %v5872_v37  ;;  %v13990_v26 = vpop.permute.xlu1 %5722  ;;  %v5838_v37 = vsel %vm2921_vm9, %v5822_v28, %v13941_v49 }
 0x865   :  { %v13993_v41 = vadd.f32 %v13932_v57, %v5871_v25  ;;  %v13995_v23 = vpop.permute.xlu0 %5676  ;;  %v5953_v63 = vadd.f32 2.0, %v8259_v53 }
 0x866   :  { %v5909_v38 = vmin.f32 %v13988_v61, 20.0  ;;  %vm6053_vm12 = vcmp.gt.f32.partialorder %v13988_v61, 20.0 }
 0x867   :  { %v5908_v31 = vmin.f32 %v13993_v41, 20.0  ;;  %v5969_v29 = vmul.f32 %v8259_v53, %v5953_v63  ;;  %vm6052_vm11 = vcmp.gt.f32.partialorder %v13993_v41, 20.0 }
 0x868   :  { %v5929_v44 = vmul.f32 1.442695, %v5909_v38  ;;  %v5779_v24 = vpop.permute.xlu1 %5778 }
 0x869   :  { %v5927_v32 = vmul.f32 1.442695, %v5908_v31  ;;  %v5853_v15 = vsel %vm5846_vm6, %v5836_v43, %v5779_v24  ;;  %v5777_v45 = vpop.permute.xlu0 %5776  ;;  %v6001_v54 = vadd.f32 2.0, %v5969_v29  ;;  %v5985_v49 = vmul.f32 %v5969_v29, %v13939_v55  ;;  %v16108_v24 = vld [vmem:[#allocation9_spill] sm:$0xff] }
 0x86a   :  { %8264 = vpow2.f32 %v5929_v44  ;;  %v5874_v56 = vmul.f32 %v13922_v60, %v5853_v15  ;;  %v5852_v11 = vsel %vm5846_vm6, %v5835_v12, %v5777_v45  ;;  %v5823_v50 = vsel %vm500_vm1, %v16108_v24, %v13943_v3 }
 0x86b   :  { %8266 = vpow2.f32 %v5927_v32  ;;  %v5873_v59 = vmul.f32 %v13922_v60, %v5852_v11  ;;  %v5839_v32 = vsel %vm2921_vm9, %v5823_v50, %v13969_v4 }
 0x86c   :  { %v8261_v13 = vpop.eup %8260  ;;  %v14014_v42 = vadd.f32 %v13932_v57, %v5874_v56  ;;  %v14016_v34 = vpop.permute.xlu1 %5678  ;;  %8268 = vrcp.f32 %v6001_v54 }
 0x86d   :  { %v8263_v8 = vpop.eup %8262  ;;  %v14019_v51 = vadd.f32 %v13932_v57, %v5873_v59  ;;  %v14021_v52 = vpop.permute.xlu0 %5724  ;;  %v5955_v9 = vadd.f32 2.0, %v8261_v13 }
 0x86e   :  { %v5954_v33 = vadd.f32 2.0, %v8263_v8  ;;  %v5911_v21 = vmin.f32 %v14014_v42, 20.0  ;;  %vm6055_vm15 = vcmp.gt.f32.partialorder %v14014_v42, 20.0 }
 0x86f   :  { %v5910_v17 = vmin.f32 %v14019_v51, 20.0  ;;  %v5971_v30 = vmul.f32 %v8261_v13, %v5955_v9  ;;  %vm6054_vm14 = vcmp.gt.f32.partialorder %v14019_v51, 20.0 }
 0x870   :  { %v5970_v36 = vmul.f32 %v8263_v8, %v5954_v33  ;;  %v5933_v2 = vmul.f32 1.442695, %v5911_v21 }
 0x871   :  { %v5931_v1 = vmul.f32 1.442695, %v5910_v17  ;;  %v5781_v39 = vpop.permute.xlu0 %5780  ;;  %v6003_v40 = vadd.f32 2.0, %v5971_v30  ;;  %v5987_v17 = vmul.f32 %v5971_v30, %v13962_v20 }
 0x872   :  { %v6002_v27 = vadd.f32 2.0, %v5970_v36  ;;  %8270 = vpow2.f32 %v5933_v2  ;;  %v5854_v25 = vsel %vm5846_vm6, %v5837_v19, %v5781_v39  ;;  %v5783_v53 = vpop.permute.xlu1 %5782  ;;  %v5986_v4 = vmul.f32 %v5970_v36, %v13967_v47 }
 0x873   :  { %8272 = vpow2.f32 %v5931_v1  ;;  %v5875_v63 = vmul.f32 %v13922_v60, %v5854_v25  ;;  %v5855_v38 = vsel %vm5846_vm6, %v5838_v37, %v5783_v53 }
 0x874   :  { %v8265_v14 = vpop.eup %8264  ;;  %8274 = vrcp.f32 %v6002_v27  ;;  %v5876_v16 = vmul.f32 %v13922_v60, %v5855_v38 }
 0x875   :  { %v8267_v48 = vpop.eup %8266  ;;  %v14040_v7 = vadd.f32 %v13932_v57, %v5875_v63  ;;  %v14042_v5 = vpop.permute.xlu0 %5680  ;;  %8276 = vrcp.f32 %v6003_v40  ;;  %v5957_v31 = vadd.f32 2.0, %v8265_v14 }
 0x876   :  { %v8269_v0 = vpop.eup %8268  ;;  %v14046_v58 = vadd.f32 %v13932_v57, %v5876_v16  ;;  %v5956_v6 = vadd.f32 2.0, %v8267_v48  ;;  %v14096_v24 = vpop.permute.xlu1 %5726 }
 0x877   :  { %v5912_v62 = vmin.f32 %v14040_v7, 20.0  ;;  %v6033_v43 = vmul.f32 %v8269_v0, %v5985_v49  ;;  %v5973_v44 = vmul.f32 %v8265_v14, %v5957_v31  ;;  %vm6056_vm0 = vcmp.gt.f32.partialorder %v14040_v7, 20.0 }
 0x878   :  { %v5913_v12 = vmin.f32 %v14046_v58, 20.0  ;;  %v5972_v29 = vmul.f32 %v8267_v48, %v5956_v6  ;;  %vm6057_vm13 = vcmp.gt.f32.partialorder %v14046_v58, 20.0 }
 0x879   :  { %v5935_v15 = vmul.f32 1.442695, %v5912_v62  ;;  %v5785_v45 = vpop.permute.xlu0 %5784  ;;  %v14057_v54 = vsel %vm6049_vm7, %v13939_v55, %v6033_v43  ;;  %v6005_v59 = vadd.f32 2.0, %v5973_v44  ;;  %v5989_v63 = vmul.f32 %v5973_v44, %v13988_v61 }
 0x87a   :  { %v5937_v56 = vmul.f32 1.442695, %v5913_v12  ;;  %v5856_v11 = vsel %vm5846_vm6, %v5839_v32, %v5785_v45  ;;  %7734 = vmatprep.mubr.msk.f32.mxu1 %vm6091_vm4, %v14057_v54  ;;  %v6004_v3 = vadd.f32 2.0, %v5972_v29  ;;  %v16109_v45 = vld [vmem:[#allocation18_spill] sm:$0xff] }
 0x87b   :  { %8278 = vpow2.f32 %v5935_v15  ;;  %v5877_v13 = vmul.f32 %v13922_v60, %v5856_v11 }
 0x87c   :  { %v8271_v8 = vpop.eup %8270  ;;  %8280 = vpow2.f32 %v5937_v56  ;;  %v5824_v56 = vsel %vm500_vm1, %v16109_v45, %v13964_v18 }
 0x87d   :  { %v8273_v9 = vpop.eup %8272  ;;  %v14065_v33 = vadd.f32 %v13932_v57, %v5877_v13  ;;  %8282 = vrcp.f32 %v6004_v3  ;;  %v5959_v55 = vadd.f32 2.0, %v8271_v8  ;;  %v5840_v3 = vsel %vm2921_vm9, %v5824_v56, %v13990_v26  ;;  %v16110_v26 = vld [vmem:[#allocation10_spill] sm:$0xff] }
 0x87e   :  { %v8275_v21 = vpop.eup %8274  ;;  %8284 = vrcp.f32 %v6005_v59  ;;  %v5958_v22 = vadd.f32 2.0, %v8273_v9  ;;  %v14109_v59 = vpop.permute.xlu0 %5728 }
 0x87f   :  { %v8277_v46 = vpop.eup %8276  ;;  %v5914_v35 = vmin.f32 %v14065_v33, 20.0  ;;  %v6034_v2 = vmul.f32 %v8275_v21, %v5986_v4  ;;  %v5975_v10 = vmul.f32 %v8271_v8, %v5959_v55  ;;  %v5825_v4 = vsel %vm500_vm1, %v16110_v26, %v13995_v23 }
 0x880   :  { %v6035_v28 = vmul.f32 %v8277_v46, %v5987_v17  ;;  %v5974_v19 = vmul.f32 %v8273_v9, %v5958_v22  ;;  %vm6058_vm3 = vcmp.gt.f32.partialorder %v14065_v33, 20.0 }
 0x881   :  { %v5939_v36 = vmul.f32 1.442695, %v5914_v35  ;;  %v14071_v1 = vsel %vm6050_vm8, %v13967_v47, %v6034_v2  ;;  %v6007_v39 = vadd.f32 2.0, %v5975_v10  ;;  %v5988_v47 = vmul.f32 %v5972_v29, %v13993_v41 }
 0x882   :  { %7735 = vmatmul.mubr.msk.f32.vlgmr.msra.gmra.mrb[20].mxu1 %vm6091_vm4, %v14071_v1  ;;  %v14077_v30 = vsel %vm6051_vm10, %v13962_v20, %v6035_v28  ;;  %v6006_v40 = vadd.f32 2.0, %v5974_v19  ;;  %v5990_v44 = vmul.f32 %v5974_v19, %v14019_v51  ;;  %v5991_v50 = vmul.f32 %v5975_v10, %v14014_v42 }
 0x883   :  { %8286 = vpow2.f32 %v5939_v36  ;;  %7737 = vmatprep.mubr.msk.f32.mxu1 %vm6091_vm4, %v14077_v30  ;;  %vm6311_vm10 = vcmask 23552  }
 0x884   :  { %8288 = vrcp.f32 %v6006_v40 }
 0x885   :  { %v8279_v37 = vpop.eup %8278  ;;  %8290 = vrcp.f32 %v6007_v39 }
 0x886   :  { %v8281_v27 = vpop.eup %8280  ;;  %v5960_v25 = vadd.f32 2.0, %v8279_v37 }
 0x887   :  { %v8283_v53 = vpop.eup %8282  ;;  %v5961_v38 = vadd.f32 2.0, %v8281_v27 }
 0x888   :  { %v8285_v14 = vpop.eup %8284  ;;  %v6036_v16 = vmul.f32 %v8283_v53, %v5988_v47  ;;  %v5976_v20 = vmul.f32 %v8279_v37, %v5960_v25 }
 0x889   :  { %v6037_v48 = vmul.f32 %v8285_v14, %v5989_v63  ;;  %v5977_v49 = vmul.f32 %v8281_v27, %v5961_v38 }
 0x88a   :  { %v14085_v31 = vsel %vm6052_vm11, %v13993_v41, %v6036_v16  ;;  %v6008_v0 = vadd.f32 2.0, %v5976_v20  ;;  %v5992_v55 = vmul.f32 %v5976_v20, %v14040_v7  ;;  %vm14275_vm11 = vmpackc.low %vm6311_vm10, %vm6311_vm10 }
 0x88b   :  { %7738 = vmatmul.mubr.msk.f32.gmra.mrb[22].mxu1 %vm6091_vm4, %v14085_v31  ;;  %v14091_v6 = vsel %vm6053_vm12, %v13988_v61, %v6037_v48  ;;  %v6009_v62 = vadd.f32 2.0, %v5977_v49  ;;  %v5993_v46 = vmul.f32 %v5977_v49, %v14046_v58  ;;  %vm6449_vm12 = vcmask 523264  }
 0x88c   :  { %7740 = vmatprep.mubr.msk.f32.mxu1 %vm6091_vm4, %v14091_v6  ;;  %8292 = vrcp.f32 %v6008_v0 }
 0x88d   :  { %v8287_v43 = vpop.eup %8286  ;;  %8294 = vrcp.f32 %v6009_v62 }
 0x88e   :  { %v8289_v41 = vpop.eup %8288  ;;  %v5962_v12 = vadd.f32 2.0, %v8287_v43 }
 0x88f   :  { %v8291_v29 = vpop.eup %8290  ;;  %v6038_v32 = vmul.f32 %v8289_v41, %v5990_v44 }
 0x890   :  { %v6039_v61 = vmul.f32 %v8291_v29, %v5991_v50  ;;  %v5978_v15 = vmul.f32 %v8287_v43, %v5962_v12 }
 0x891   :  { %v14104_v11 = vsel %vm6054_vm14, %v14019_v51, %v6038_v32 }
 0x892   :  { %v5787_v13 = vpop.permute.xlu1 %5786  ;;  %7741 = vmatmul.mubr.msk.f32.gmra.mrb[24].mxu1 %vm6091_vm4, %v14104_v11  ;;  %v14114_v8 = vsel %vm6055_vm15, %v14014_v42, %v6039_v61  ;;  %v6010_v9 = vadd.f32 2.0, %v5978_v15  ;;  %v5841_v42 = vsel %vm2921_vm9, %v5825_v4, %v14021_v52  ;;  %v5994_v27 = vmul.f32 %v5978_v15, %v14065_v33 }
 0x893   :  { %v5857_v18 = vsel %vm5846_vm6, %v5840_v3, %v5787_v13  ;;  %7743 = vmatprep.mubr.msk.f32.mxu1 %vm6091_vm4, %v14114_v8 }
 0x894   :  { %v5878_v51 = vmul.f32 %v13922_v60, %v5857_v18  ;;  %8296 = vrcp.f32 %v6010_v9 }
 0x896   :  { %v8293_v21 = vpop.eup %8292  ;;  %v5899_v17 = vadd.f32 %v13932_v57, %v5878_v51  ;;  %v5789_v22 = vpop.permute.xlu0 %5788 }
 0x897   :  { %v8295_v35 = vpop.eup %8294  ;;  %v5858_v2 = vsel %vm5846_vm6, %v5841_v42, %v5789_v22  ;;  %v6040_v10 = vmul.f32 %v8293_v21, %v5992_v55  ;;  %v5683_v0 = vpop.permute.xlu1 %5682  ;;  %v16113_v42 = vld [vmem:[#allocation21_spill] sm:$0xff] }
 0x898   :  { %v5915_v28 = vmin.f32 %v5899_v17, 20.0  ;;  %v5879_v19 = vmul.f32 %v13922_v60, %v5858_v2  ;;  %v6041_v23 = vmul.f32 %v8295_v35, %v5993_v46  ;;  %vm6059_vm5 = vcmp.gt.f32.partialorder %v5899_v17, 20.0 }
 0x899   :  { %v14132_v36 = vsel %vm6056_vm0, %v14040_v7, %v6040_v10 }
 0x89a   :  { %v5941_v52 = vmul.f32 1.442695, %v5915_v28  ;;  %v5900_v39 = vadd.f32 %v13932_v57, %v5879_v19  ;;  %7744 = vmatmul.mubr.msk.f32.gmra.mrb[26].mxu1 %vm6091_vm4, %v14132_v36  ;;  %v14139_v40 = vsel %vm6057_vm13, %v14046_v58, %v6041_v23  ;;  %v5685_v12 = vpop.permute.xlu0 %5684 }
 0x89b   :  { %7746 = vmatprep.mubr.msk.f32.mxu1 %vm6091_vm4, %v14139_v40 }
 0x89c   :  { %8298 = vpow2.f32 %v5941_v52  ;;  %v5916_v37 = vmin.f32 %v5900_v39, 20.0  ;;  %vm6060_vm7 = vcmp.gt.f32.partialorder %v5900_v39, 20.0  ;;  %v16114_v52 = vld [vmem:[#allocation13_spill] sm:$0xff] }
 0x89e   :  { %v8297_v7 = vpop.eup %8296  ;;  %v5943_v47 = vmul.f32 1.442695, %v5916_v37 }
 0x89f   :  { %v6042_v25 = vmul.f32 %v8297_v7, %v5994_v27 }
 0x8a0   :  { %8300 = vpow2.f32 %v5943_v47 }
 0x8a1   :  { %v14146_v53 = vsel %vm6058_vm3, %v14065_v33, %v6042_v25  ;;  %v16111_v33 = vld [vmem:[#allocation19_spill] sm:$0xff] }
 0x8a2   :  { %7747 = vmatmul.mubr.msk.f32.gmra.mrb[28].mxu1 %vm6091_vm4, %v14146_v53  ;;  %v5826_v41 = vsel %vm500_vm1, %v16111_v33, %v14016_v34  ;;  %v16112_v34 = vld [vmem:[#allocation11_spill] sm:$0xff] }
 0x8a3   :  { %v5842_v50 = vsel %vm2921_vm9, %v5826_v41, %v14096_v24  ;;  %v5827_v13 = vsel %vm500_vm1, %v16112_v34, %v14042_v5  ;;  %v5828_v5 = vsel %vm500_vm1, %v16113_v42, %v5683_v0 }
 0x8a4   :  { %v5843_v24 = vsel %vm2921_vm9, %v5827_v13, %v14109_v59 }
 0x8a6   :  { %v8299_v58 = vpop.eup %8298 }
 0x8a7   :  { %v5963_v63 = vadd.f32 2.0, %v8299_v58 }
 0x8a9   :  { %v5979_v38 = vmul.f32 %v8299_v58, %v5963_v63 }
 0x8aa   :  { %v8301_v14 = vpop.eup %8300 }
 0x8ab   :  { %v6011_v16 = vadd.f32 2.0, %v5979_v38  ;;  %v5964_v20 = vadd.f32 2.0, %v8301_v14  ;;  %v5995_v62 = vmul.f32 %v5979_v38, %v5899_v17 }
 0x8ad   :  { %8302 = vrcp.f32 %v6011_v16  ;;  %v5980_v48 = vmul.f32 %v8301_v14, %v5964_v20 }
 0x8af   :  { %v6012_v49 = vadd.f32 2.0, %v5980_v48  ;;  %v5996_v61 = vmul.f32 %v5980_v48, %v5900_v39 }
 0x8b1   :  { %8304 = vrcp.f32 %v6012_v49 }
 0x8b7   :  { %v8303_v43 = vpop.eup %8302 }
 0x8b8   :  { %v6043_v44 = vmul.f32 %v8303_v43, %v5995_v62 }
 0x8ba   :  { %v5791_v29 = vpop.permute.xlu1 %5790  ;;  %v14155_v32 = vsel %vm6059_vm5, %v5899_v17, %v6043_v44 }
 0x8bb   :  { %v8305_v15 = vpop.eup %8304  ;;  %v5859_v45 = vsel %vm5846_vm6, %v5842_v50, %v5791_v29  ;;  %7749 = vmatprep.mubr.msk.f32.mxu1 %vm6091_vm4, %v14155_v32 }
 0x8bc   :  { %v5880_v56 = vmul.f32 %v13922_v60, %v5859_v45  ;;  %v6044_v3 = vmul.f32 %v8305_v15, %v5996_v61 }
 0x8be   :  { %v5901_v9 = vadd.f32 %v13932_v57, %v5880_v56  ;;  %v5731_v18 = vpop.permute.xlu1 %5730  ;;  %v5793_v51 = vpop.permute.xlu0 %5792  ;;  %v14167_v26 = vsel %vm6060_vm7, %v5900_v39, %v6044_v3  ;;  %v5829_v39 = vsel %vm500_vm1, %v16114_v52, %v5685_v12 }
 0x8bf   :  { %v5860_v4 = vsel %vm5846_vm6, %v5843_v24, %v5793_v51  ;;  %7750 = vmatmul.mubr.msk.f32.gmra.mrb[30].mxu1 %vm6091_vm4, %v14167_v26  ;;  %v5844_v59 = vsel %vm2921_vm9, %v5828_v5, %v5731_v18 }
 0x8c0   :  { %v5917_v55 = vmin.f32 %v5901_v9, 20.0  ;;  %v5881_v21 = vmul.f32 %v13922_v60, %v5860_v4  ;;  %vm6061_vm1 = vcmp.gt.f32.partialorder %v5901_v9, 20.0 }
 0x8c2   :  { %v5945_v17 = vmul.f32 1.442695, %v5917_v55  ;;  %v5902_v22 = vadd.f32 %v13932_v57, %v5881_v21  ;;  %v5795_v46 = vpop.permute.xlu1 %5794  ;;  %v5733_v28 = vpop.permute.xlu0 %5732 }
 0x8c3   :  { %v5861_v35 = vsel %vm5846_vm6, %v5844_v59, %v5795_v46  ;;  %v5845_v27 = vsel %vm2921_vm9, %v5829_v39, %v5733_v28  ;;  %v7443_v59 = vld [vmem:[%s14719_s9] ss:$0 sm:$0xff] }
 0x8c4   :  { %8306 = vpow2.f32 %v5945_v17  ;;  %v5918_v2 = vmin.f32 %v5902_v22, 20.0  ;;  %v5882_v10 = vmul.f32 %v13922_v60, %v5861_v35  ;;  %vm6062_vm9 = vcmp.gt.f32.partialorder %v5902_v22, 20.0 }
 0x8c6   :  { %v5947_v19 = vmul.f32 1.442695, %v5918_v2  ;;  %v5903_v23 = vadd.f32 %v13932_v57, %v5882_v10 }
 0x8c8   :  { %8308 = vpow2.f32 %v5947_v19  ;;  %v5919_v37 = vmin.f32 %v5903_v23, 20.0  ;;  %v5797_v7 = vpop.permute.xlu0 %5796 }
 0x8c9   :  { %v5862_v47 = vsel %vm5846_vm6, %v5845_v27, %v5797_v7  ;;  %vm6063_vm6 = vcmp.gt.f32.partialorder %v5903_v23, 20.0 }
 0x8ca   :  { %v5949_v25 = vmul.f32 1.442695, %v5919_v37  ;;  %v5883_v58 = vmul.f32 %v13922_v60, %v5862_v47 }
 0x8cc   :  { %8310 = vpow2.f32 %v5949_v25  ;;  %v5904_v63 = vadd.f32 %v13932_v57, %v5883_v58 }
 0x8ce   :  { %v8307_v38 = vpop.eup %8306  ;;  %v5920_v14 = vmin.f32 %v5904_v63, 20.0  ;;  %vm6064_vm8 = vcmp.gt.f32.partialorder %v5904_v63, 20.0 }
 0x8cf   :  { %v5965_v16 = vadd.f32 2.0, %v8307_v38 }
 0x8d0   :  { %v5951_v20 = vmul.f32 1.442695, %v5920_v14 }
 0x8d1   :  { %v5981_v48 = vmul.f32 %v8307_v38, %v5965_v16 }
 0x8d2   :  { %v8309_v49 = vpop.eup %8308  ;;  %8312 = vpow2.f32 %v5951_v20 }
 0x8d3   :  { %v6013_v0 = vadd.f32 2.0, %v5981_v48  ;;  %v5966_v62 = vadd.f32 2.0, %v8309_v49  ;;  %v5997_v29 = vmul.f32 %v5981_v48, %v5901_v9 }
 0x8d5   :  { %8314 = vrcp.f32 %v6013_v0  ;;  %v5982_v43 = vmul.f32 %v8309_v49, %v5966_v62 }
 0x8d6   :  { %v8311_v44 = vpop.eup %8310 }
 0x8d7   :  { %v6014_v33 = vadd.f32 2.0, %v5982_v43  ;;  %v5967_v41 = vadd.f32 2.0, %v8311_v44  ;;  %v5998_v34 = vmul.f32 %v5982_v43, %v5902_v22 }
 0x8d9   :  { %8316 = vrcp.f32 %v6014_v33  ;;  %v5983_v50 = vmul.f32 %v8311_v44, %v5967_v41 }
 0x8db   :  { %v6015_v60 = vadd.f32 2.0, %v5983_v50  ;;  %v5999_v51 = vmul.f32 %v5983_v50, %v5903_v23 }
 0x8dc   :  { %v8313_v12 = vpop.eup %8312 }
 0x8dd   :  { %8318 = vrcp.f32 %v6015_v60  ;;  %v5968_v57 = vadd.f32 2.0, %v8313_v12 }
 0x8df   :  { %v8315_v61 = vpop.eup %8314  ;;  %v5984_v15 = vmul.f32 %v8313_v12, %v5968_v57 }
 0x8e0   :  { %v6045_v45 = vmul.f32 %v8315_v61, %v5997_v29 }
 0x8e1   :  { %v6016_v56 = vadd.f32 2.0, %v5984_v15 }
 0x8e2   :  { %v14186_v3 = vsel %vm6061_vm1, %v5901_v9, %v6045_v45  ;;  %v6000_v9 = vmul.f32 %v5984_v15, %v5904_v63 }
 0x8e3   :  { %v8317_v13 = vpop.eup %8316  ;;  %7752 = vmatprep.mubr.msk.f32.mxu1 %vm6091_vm4, %v14186_v3  ;;  %8320 = vrcp.f32 %v6016_v56 }
 0x8e4   :  { %v6046_v24 = vmul.f32 %v8317_v13, %v5998_v34 }
 0x8e6   :  { %v14190_v18 = vsel %vm6062_vm9, %v5902_v22, %v6046_v24 }
 0x8e7   :  { %v8319_v4 = vpop.eup %8318  ;;  %7753 = vmatmul.mubr.msk.f32.gmra.mrb[32].mxu1 %vm6091_vm4, %v14190_v18 }
 0x8e8   :  { %v6047_v55 = vmul.f32 %v8319_v4, %v5999_v51 }
 0x8ea   :  { %v14194_v21 = vsel %vm6063_vm6, %v5903_v23, %v6047_v55 }
 0x8eb   :  { %7755 = vmatprep.mubr.msk.f32.mxu1 %vm6091_vm4, %v14194_v21 }
 0x8ed   :  { %v8321_v42 = vpop.eup %8320 }
 0x8ee   :  { %v6048_v5 = vmul.f32 %v8321_v42, %v6000_v9 }
 0x8f0   :  { %v14198_v17 = vsel %vm6064_vm8, %v5904_v63, %v6048_v5 }
 0x8f1   :  { %7756 = vmatmul.mubr.msk.f32.gmra.mrb[34].mxu1 %vm6091_vm4, %v14198_v17 }
 0x955   :  { %v7736_v22 = vpop.f32.mrb[20].mxu1 }
 0x956   :  { %v14205_v46 = vadd.f32 %v7736_v22, %v7443_v59  ;;  %v6206_v35 = vpop.f32.mrb[21].mxu1 }
 0x957   :  { %v6207_v2 = vadd.f32 %v7443_v59, %v6206_v35 }
 0x959   :  { %v7986_v10 = vpack.i.bf16 %v14205_v46, %v6207_v2  ;;  %7774 = vmatprep.mubr.msk.f32.mxu0 %vm6311_vm10, %v6207_v2 }
 0x95b   :  { %7987 = vrot.lane.b32.xlu1 %v7986_v10, %s8485_s0 }
 0x95e   :  { %v7739_v28 = vpop.f32.mrb[22].mxu1 }
 0x95f   :  { %v14210_v19 = vadd.f32 %v7739_v28, %v7443_v59  ;;  %v6216_v23 = vpop.f32.mrb[23].mxu1 }
 0x960   :  { %v14212_v52 = vadd.f32 %v7443_v59, %v6216_v23 }
 0x962   :  { %v7991_v39 = vpack.i.bf16 %v14210_v19, %v14212_v52 }
 0x964   :  { %7992 = vrot.lane.b32.xlu0 %v7991_v39, %s8485_s0 }
 0x965   :  { %v7742_v37 = vpop.f32.mrb[24].mxu1 }
 0x966   :  { %v14217_v27 = vadd.f32 %v7742_v37, %v7443_v59  ;;  %v6226_v7 = vpop.f32.mrb[25].mxu1 }
 0x967   :  { %v14219_v47 = vadd.f32 %v7443_v59, %v6226_v7 }
 0x969   :  { %v7996_v25 = vpack.i.bf16 %v14217_v27, %v14219_v47 }
 0x96b   :  { %7997 = vrot.lane.b32.xlu1 %v7996_v25, %s8485_s0 }
 0x96d   :  { %v7745_v58 = vpop.f32.mrb[26].mxu1 }
 0x96e   :  { %v14224_v63 = vadd.f32 %v7745_v58, %v7443_v59  ;;  %v6236_v38 = vpop.f32.mrb[27].mxu1 }
 0x96f   :  { %v14226_v14 = vadd.f32 %v7443_v59, %v6236_v38 }
 0x971   :  { %v14230_v16 = vpack.i.bf16 %v14224_v63, %v14226_v14 }
 0x973   :  { %8002 = vrot.lane.b32.xlu0 %v14230_v16, %s8485_s0 }
 0x975   :  { %v7748_v20 = vpop.f32.mrb[28].mxu1 }
 0x976   :  { %v14234_v48 = vadd.f32 %v7748_v20, %v7443_v59  ;;  %v6246_v49 = vpop.f32.mrb[29].mxu1 }
 0x977   :  { %v6247_v0 = vadd.f32 %v7443_v59, %v6246_v49 }
 0x979   :  { %v14237_v62 = vpack.i.bf16 %v14234_v48, %v6247_v0 }
 0x97b   :  { %8007 = vrot.lane.b32.xlu1 %v14237_v62, %s8485_s0 }
 0x992   :  { %v7751_v43 = vpop.f32.mrb[30].mxu1 }
 0x993   :  { %v14241_v44 = vadd.f32 %v7751_v43, %v7443_v59  ;;  %v6256_v33 = vpop.f32.mrb[31].mxu1 }
 0x994   :  { %v14243_v41 = vadd.f32 %v7443_v59, %v6256_v33 }
 0x996   :  { %v14247_v50 = vpack.i.bf16 %v14241_v44, %v14243_v41 }
 0x998   :  { %8012 = vrot.lane.b32.xlu0 %v14247_v50, %s8485_s0 }
 0x9ba   :  { %v7754_v60 = vpop.f32.mrb[32].mxu1 }
 0x9bb   :  { %v14251_v12 = vadd.f32 %v7754_v60, %v7443_v59  ;;  %v6266_v57 = vpop.f32.mrb[33].mxu1 }
 0x9bc   :  { %v14253_v29 = vadd.f32 %v7443_v59, %v6266_v57 }
 0x9be   :  { %v14257_v61 = vpack.i.bf16 %v14251_v12, %v14253_v29 }
 0x9c0   :  { %8017 = vrot.lane.b32.xlu1 %v14257_v61, %s8485_s0 }
 0x9c4   :  { %8032 = vrot.lane.b32.xlu1 %v7991_v39, %s8476_s16  ;;  %v7757_v15 = vpop.f32.mrb[34].mxu1 }
 0x9c5   :  { %v14262_v45 = vadd.f32 %v7757_v15, %v7443_v59  ;;  %v6276_v56 = vpop.f32.mrb[35].mxu1 }
 0x9c6   :  { %v14264_v34 = vadd.f32 %v7443_v59, %v6276_v56 }
 0x9c8   :  { %v14268_v13 = vpack.i.bf16 %v14262_v45, %v14264_v34 }
 0x9ca   :  { %8022 = vrot.lane.b32.xlu0 %v14268_v13, %s8485_s0 }
 0x9cd   :  { %v7988_v24 = vpop.permute.xlu1 %7987 }
 0x9ce   :  { %v7990_v51 = vunpack.i.h.bf16 %v7988_v24  ;;  %v7989_v4 = vunpack.i.l.bf16 %v7988_v24  ;;  %8027 = vrot.lane.b32.xlu0 %v7986_v10, %s8476_s16 }
 0x9d0   :  { %v7886_v9 = vpack.c.bf16 %v7990_v51, %v7989_v4 }
 0x9d2   :  { %7888 = vmatprep.subr.msk.bf16.mxu0 %vm14275_vm11, %v7886_v9  ;;  %8037 = vrot.lane.b32.xlu0 %v7996_v25, %s8476_s16 }
 0x9d3   :  { %7891 = vmatpush3.bf16.xpose.msk.msra.mxu0 %vm14275_vm11, %v7886_v9 }
 0x9d6   :  { %v7993_v42 = vpop.permute.xlu0 %7992 }
 0x9d7   :  { %v7995_v5 = vunpack.i.h.bf16 %v7993_v42  ;;  %v7994_v59 = vunpack.i.l.bf16 %v7993_v42 }
 0x9d9   :  { %v7892_v22 = vpack.c.bf16 %v7995_v5, %v7994_v59 }
 0x9db   :  { %7894 = vmatprep.subr.msk.bf16.mxu0 %vm14275_vm11, %v7892_v22 }
 0x9dc   :  { %7897 = vmatpush3.bf16.xpose.msk.msra.mxu0 %vm14275_vm11, %v7892_v22 }
 0x9dd   :  { %v7998_v35 = vpop.permute.xlu1 %7997 }
 0x9de   :  { %v8000_v2 = vunpack.i.h.bf16 %v7998_v35  ;;  %v7999_v10 = vunpack.i.l.bf16 %v7998_v35 }
 0x9e0   :  { %v7898_v28 = vpack.c.bf16 %v8000_v2, %v7999_v10 }
 0x9e2   :  { %7900 = vmatprep.subr.msk.bf16.mxu0 %vm14275_vm11, %v7898_v28 }
 0x9e4   :  { %7903 = vmatpush3.bf16.xpose.msk.msra.mxu0 %vm14275_vm11, %v7898_v28 }
 0x9e5   :  { %v8003_v23 = vpop.permute.xlu0 %8002 }
 0x9e6   :  { %v8005_v39 = vunpack.i.h.bf16 %v8003_v23  ;;  %v8004_v37 = vunpack.i.l.bf16 %v8003_v23 }
 0x9e8   :  { %v7904_v7 = vpack.c.bf16 %v8005_v39, %v8004_v37 }
 0x9ea   :  { %7906 = vmatprep.subr.msk.bf16.mxu0 %vm14275_vm11, %v7904_v7 }
 0x9ec   :  { %7909 = vmatpush3.bf16.xpose.msk.msra.mxu0 %vm14275_vm11, %v7904_v7 }
 0x9ed   :  { %v8008_v25 = vpop.permute.xlu1 %8007 }
 0x9ee   :  { %v8010_v58 = vunpack.i.h.bf16 %v8008_v25  ;;  %v8009_v38 = vunpack.i.l.bf16 %v8008_v25 }
 0x9f0   :  { %v7926_v20 = vpack.c.bf16 %v8010_v58, %v8009_v38 }
 0x9f2   :  { %7928 = vmatprep.subr.msk.bf16.mxu0 %vm14275_vm11, %v7926_v20 }
 0x9f3   :  { %7775 = vmatmul.mubr.msk.f32.vlgmr.msra.gmra.mrb[28].mxu0 %vm6311_vm10, %v14205_v46 }
 0x9f4   :  { %7777 = vmatprep.mubr.msk.f32.mxu0 %vm6311_vm10, %v14212_v52  ;;  %7931 = vmatpush3.bf16.xpose.msk.msra.mxu0 %vm14275_vm11, %v7926_v20 }
 0x9f7   :  { %7778 = vmatmul.mubr.msk.f32.gmra.mrb[30].mxu0 %vm6311_vm10, %v14210_v19 }
 0x9f8   :  { %7780 = vmatprep.mubr.msk.f32.mxu0 %vm6311_vm10, %v14219_v47 }
 0x9fb   :  { %7781 = vmatmul.mubr.msk.f32.gmra.mrb[32].mxu0 %vm6311_vm10, %v14217_v27 }
 0x9fc   :  { %7783 = vmatprep.mubr.msk.f32.mxu0 %vm6311_vm10, %v14226_v14 }
 0x9ff   :  { %7784 = vmatmul.mubr.msk.f32.gmra.mrb[34].mxu0 %vm6311_vm10, %v14224_v63 }
 0xa00   :  { %7830 = vmatprep.mubr.msk.f32.mxu0 %vm6311_vm10, %v6247_v0 }
 0xa0a   :  { %v8013_v46 = vpop.permute.xlu0 %8012 }
 0xa0b   :  { %v8015_v52 = vunpack.i.h.bf16 %v8013_v46  ;;  %v8014_v49 = vunpack.i.l.bf16 %v8013_v46 }
 0xa0d   :  { %v7932_v43 = vpack.c.bf16 %v8015_v52, %v8014_v49 }
 0xa0f   :  { %7934 = vmatprep.subr.msk.bf16.mxu0 %vm14275_vm11, %v7932_v43 }
 0xa10   :  { %7937 = vmatpush3.bf16.xpose.msk.msra.mxu0 %vm14275_vm11, %v7932_v43 }
 0xa32   :  { %v8018_v19 = vpop.permute.xlu1 %8017 }
 0xa33   :  { %v8020_v27 = vunpack.i.h.bf16 %v8018_v19  ;;  %v8019_v47 = vunpack.i.l.bf16 %v8018_v19 }
 0xa35   :  { %v7938_v33 = vpack.c.bf16 %v8020_v27, %v8019_v47 }
 0xa36   :  { %v8033_v60 = vpop.permute.xlu1 %8032 }
 0xa37   :  { %7940 = vmatprep.subr.msk.bf16.mxu0 %vm14275_vm11, %v7938_v33  ;;  %v8035_v56 = vunpack.i.h.bf16 %v8033_v60  ;;  %v8034_v24 = vunpack.i.l.bf16 %v8033_v60 }
 0xa38   :  { %7943 = vmatpush3.bf16.xpose.msk.msra.mxu0 %vm14275_vm11, %v7938_v33 }
 0xa39   :  { %v7914_v5 = vpack.c.bf16 %v8035_v56, %v8034_v24 }
 0xa3c   :  { %v8023_v63 = vpop.permute.xlu0 %8022 }
 0xa3d   :  { %v8025_v14 = vunpack.i.h.bf16 %v8023_v63  ;;  %v8024_v0 = vunpack.i.l.bf16 %v8023_v63 }
 0xa3f   :  { %v7944_v57 = vpack.c.bf16 %v8025_v14, %v8024_v0 }
 0xa40   :  { %v8028_v15 = vpop.permute.xlu0 %8027 }
 0xa41   :  { %v8030_v51 = vunpack.i.h.bf16 %v8028_v15  ;;  %v8029_v4 = vunpack.i.l.bf16 %v8028_v15  ;;  %7946 = vmatprep.subr.msk.bf16.mxu0 %vm14275_vm11, %v7944_v57 }
 0xa42   :  { %7949 = vmatpush3.bf16.xpose.msk.msra.mxu0 %vm14275_vm11, %v7944_v57 }
 0xa43   :  { %v7910_v9 = vpack.c.bf16 %v8030_v51, %v8029_v4 }
 0xa44   :  { %v8038_v42 = vpop.permute.xlu0 %8037 }
 0xa45   :  { %v8040_v59 = vunpack.i.h.bf16 %v8038_v42  ;;  %v8039_v22 = vunpack.i.l.bf16 %v8038_v42  ;;  %7911 = vmatprep.subr.bf16.mxu1 %v7910_v9 }
 0xa46   :  { %7913 = vmatpush3.bf16.msra.mxu1 %v7910_v9 }
 0xa47   :  { %7915 = vmatprep.subr.bf16.mxu1 %v7914_v5  ;;  %v7918_v35 = vpack.c.bf16 %v8040_v59, %v8039_v22 }
 0xa49   :  { %7831 = vmatmul.mubr.msk.f32.vlgmr.msra.gmra.mrb[36].mxu0 %vm6311_vm10, %v14234_v48 }
 0xa4a   :  { %7917 = vmatpush3.bf16.msra.mxu1 %v7914_v5  ;;  %7833 = vmatprep.mubr.msk.f32.mxu0 %vm6311_vm10, %v14243_v41 }
 0xa4b   :  { %7919 = vmatprep.subr.bf16.mxu1 %v7918_v35 }
 0xa4d   :  { %7834 = vmatmul.mubr.msk.f32.gmra.mrb[38].mxu0 %vm6311_vm10, %v14241_v44 }
 0xa4e   :  { %7921 = vmatpush3.bf16.msra.mxu1 %v7918_v35  ;;  %7836 = vmatprep.mubr.msk.f32.mxu0 %vm6311_vm10, %v14253_v29 }
 0xa51   :  { %7837 = vmatmul.mubr.msk.f32.gmra.mrb[40].mxu0 %vm6311_vm10, %v14251_v12 }
 0xa52   :  { %7839 = vmatprep.mubr.msk.f32.mxu0 %vm6311_vm10, %v14264_v34 }
 0xa55   :  { %7840 = vmatmul.mubr.msk.f32.gmra.mrb[42].mxu0 %vm6311_vm10, %v14262_v45 }
 0xac6   :  { %v7776_v48 = vpop.f32.mrb[28].mxu0 }
 0xac7   :  { %v14341_v41 = vpop.f32.mrb[29].mxu0  ;;  %v6453_v55 = vsel %vm6449_vm12, %v7776_v48, -inf }
 0xac8   :  { %6454 = vmax.xlane.f32.xlu0 %v6453_v55  ;;  %v6450_v44 = vsel %vm6449_vm12, %v14341_v41, -inf }
 0xac9   :  { %6451 = vmax.xlane.f32.xlu1 %v6450_v44 }
 0xaca   :  { %v7779_v29 = vpop.f32.mrb[30].mxu0 }
 0xacb   :  { %v14346_v2 = vpop.f32.mrb[31].mxu0  ;;  %v6459_v12 = vsel %vm6449_vm12, %v7779_v29, -inf }
 0xacc   :  { %v6456_v34 = vsel %vm6449_vm12, %v14346_v2, -inf }
 0xacd   :  { %6460 = vmax.xlane.f32.xlu1 %v6459_v12  ;;  %6457 = vmax.xlane.f32.xlu0 %v6456_v34 }
 0xace   :  { %v7782_v45 = vpop.f32.mrb[32].mxu0 }
 0xacf   :  { %v14351_v10 = vpop.f32.mrb[33].mxu0  ;;  %v6465_v28 = vsel %vm6449_vm12, %v7782_v45, -inf }
 0xad0   :  { %v6462_v23 = vsel %vm6449_vm12, %v14351_v10, -inf }
 0xad1   :  { %6466 = vmax.xlane.f32.xlu1 %v6465_v28  ;;  %6463 = vmax.xlane.f32.xlu0 %v6462_v23 }
 0xad2   :  { %v7785_v39 = vpop.f32.mrb[34].mxu0 }
 0xad3   :  { %v6440_v37 = vpop.f32.mrb[35].mxu0  ;;  %v6471_v7 = vsel %vm6449_vm12, %v7785_v39, -inf }
 0xad4   :  { %v6468_v25 = vsel %vm6449_vm12, %v6440_v37, -inf }
 0xad5   :  { %6472 = vmax.xlane.f32.xlu1 %v6471_v7  ;;  %6469 = vmax.xlane.f32.xlu0 %v6468_v25 }
 0xb1c   :  { %v14358_v58 = vpop.f32.mrb[36].mxu0 }
 0xb1d   :  { %v14360_v38 = vpop.f32.mrb[37].mxu0  ;;  %v6997_v20 = vsel %vm6449_vm12, %v14358_v58, -inf }
 0xb1e   :  { %6998 = vmax.xlane.f32.xlu1 %v6997_v20  ;;  %v6994_v46 = vsel %vm6449_vm12, %v14360_v38, -inf }
 0xb1f   :  { %6995 = vmax.xlane.f32.xlu0 %v6994_v46 }
 0xb20   :  { %v14366_v52 = vpop.f32.mrb[38].mxu0 }
 0xb21   :  { %v14368_v49 = vpop.f32.mrb[39].mxu0  ;;  %v7003_v43 = vsel %vm6449_vm12, %v14366_v52, -inf }
 0xb22   :  { %7004 = vmax.xlane.f32.xlu1 %v7003_v43  ;;  %v7000_v19 = vsel %vm6449_vm12, %v14368_v49, -inf }
 0xb23   :  { %7001 = vmax.xlane.f32.xlu0 %v7000_v19 }
 0xb24   :  { %v14374_v27 = vpop.f32.mrb[40].mxu0 }
 0xb25   :  { %v14376_v47 = vpop.f32.mrb[41].mxu0  ;;  %v7009_v33 = vsel %vm6449_vm12, %v14374_v27, -inf }
 0xb26   :  { %7010 = vmax.xlane.f32.xlu1 %v7009_v33  ;;  %v7006_v63 = vsel %vm6449_vm12, %v14376_v47, -inf }
 0xb27   :  { %7007 = vmax.xlane.f32.xlu0 %v7006_v63 }
 0xb28   :  { %v14382_v14 = vpop.f32.mrb[42].mxu0 }
 0xb29   :  { %v14384_v0 = vpop.f32.mrb[43].mxu0  ;;  %v7015_v60 = vsel %vm6449_vm12, %v14382_v14, -inf }
 0xb2a   :  { %7016 = vmax.xlane.f32.xlu1 %v7015_v60  ;;  %v7012_v9 = vsel %vm6449_vm12, %v14384_v0, -inf }
 0xb3b   :  { %8042 = vrot.lane.b32.xlu1 %v14230_v16, %s8476_s16 }
 0xb3d   :  { %8047 = vrot.lane.b32.xlu0 %v14237_v62, %s8476_s16 }
 0xb55   :  { %v6455_v57 = vpop.xlane.xlu0 %6454 }
 0xb56   :  { %v6475_v15 = vsub.f32 %v7776_v48, %v6455_v57  ;;  %v6452_v56 = vpop.xlane.xlu1 %6451 }
 0xb57   :  { %v6474_v43 = vsub.f32 %v14341_v41, %v6452_v56 }
 0xb58   :  { %v6484_v24 = vmul.f32 1.442695, %v6475_v15 }
 0xb59   :  { %v6482_v19 = vmul.f32 1.442695, %v6474_v43 }
 0xb5a   :  { %8322 = vpow2.f32 %v6484_v24  ;;  %v6461_v51 = vpop.xlane.xlu1 %6460  ;;  %v6458_v4 = vpop.xlane.xlu0 %6457 }
 0xb5b   :  { %v6477_v42 = vsub.f32 %v7779_v29, %v6461_v51  ;;  %v6476_v33 = vsub.f32 %v14346_v2, %v6458_v4 }
 0xb5c   :  { %7013 = vmax.xlane.f32.xlu0 %v7012_v9 }
 0xb5d   :  { %v6488_v5 = vmul.f32 1.442695, %v6477_v42  ;;  %v6486_v63 = vmul.f32 1.442695, %v6476_v33 }
 0xb5e   :  { %v6467_v59 = vpop.xlane.xlu1 %6466  ;;  %v6464_v22 = vpop.xlane.xlu0 %6463 }
 0xb5f   :  { %8324 = vpow2.f32 %v6488_v5  ;;  %v6479_v16 = vsub.f32 %v7782_v45, %v6467_v59  ;;  %v6478_v60 = vsub.f32 %v14351_v10, %v6464_v22 }
 0xb61   :  { %v6492_v35 = vmul.f32 1.442695, %v6479_v16  ;;  %v6490_v57 = vmul.f32 1.442695, %v6478_v60 }
 0xb62   :  { %v6473_v55 = vpop.xlane.xlu1 %6472  ;;  %v6470_v62 = vpop.xlane.xlu0 %6469 }
 0xb63   :  { %8326 = vpow2.f32 %v6492_v35  ;;  %v6481_v48 = vsub.f32 %v7785_v39, %v6473_v55  ;;  %v6480_v44 = vsub.f32 %v6440_v37, %v6470_v62 }
 0xb64   :  { %v14394_v12 = vpop.eup %8322 }
 0xb65   :  { %v6496_v34 = vmul.f32 1.442695, %v6481_v48  ;;  %v6494_v28 = vmul.f32 1.442695, %v6480_v44  ;;  %v6501_v23 = vsel %vm6449_vm12, %v14394_v12, 0.0 }
 0xb66   :  { %6502 = vadd.xlane.f32.xlu1 %v6501_v23 }
 0xb67   :  { %8328 = vpow2.f32 %v6496_v34 }
 0xb68   :  { %8330 = vpow2.f32 %v6494_v28 }
 0xb69   :  { %v14398_v29 = vpop.eup %8324  ;;  %8332 = vpow2.f32 %v6482_v19 }
 0xb6a   :  { %v6507_v45 = vsel %vm6449_vm12, %v14398_v29, 0.0  ;;  %8334 = vpow2.f32 %v6486_v63 }
 0xb6b   :  { %6508 = vadd.xlane.f32.xlu1 %v6507_v45  ;;  %8336 = vpow2.f32 %v6490_v57 }
 0xb6d   :  { %v14402_v7 = vpop.eup %8326 }
 0xb6e   :  { %v6513_v39 = vsel %vm6449_vm12, %v14402_v7, 0.0 }
 0xb6f   :  { %6514 = vadd.xlane.f32.xlu1 %v6513_v39 }
 0xb71   :  { %v14406_v37 = vpop.eup %8328 }
 0xb72   :  { %v6519_v25 = vsel %vm6449_vm12, %v14406_v37, 0.0  ;;  %8052 = vrot.lane.b32.xlu0 %v14247_v50, %s8476_s16  ;;  %v14412_v20 = vpop.eup %8330 }
 0xb73   :  { %6520 = vadd.xlane.f32.xlu1 %v6519_v25  ;;  %v6516_v46 = vsel %vm6449_vm12, %v14412_v20, 0.0  ;;  %v14419_v50 = vpop.eup %8332 }
 0xb74   :  { %v6498_v15 = vsel %vm6449_vm12, %v14419_v50, 0.0  ;;  %v14423_v24 = vpop.eup %8334 }
 0xb75   :  { %v6504_v41 = vsel %vm6449_vm12, %v14423_v24, 0.0  ;;  %v14427_v56 = vpop.eup %8336 }
 0xb76   :  { %v6510_v2 = vsel %vm6449_vm12, %v14427_v56, 0.0 }
 0xb77   :  { %6517 = vadd.xlane.f32.xlu1 %v6516_v46 }
 0xb91   :  { %6499 = vadd.xlane.f32.xlu0 %v6498_v15 }
 0xb95   :  { %6505 = vadd.xlane.f32.xlu0 %v6504_v41 }
 0xb99   :  { %6511 = vadd.xlane.f32.xlu0 %v6510_v2 }
 0xbab   :  { %v6999_v10 = vpop.xlane.xlu1 %6998 }
 0xbac   :  { %v7019_v51 = vsub.f32 %v14358_v58, %v6999_v10  ;;  %v6996_v4 = vpop.xlane.xlu0 %6995 }
 0xbad   :  { %v7018_v9 = vsub.f32 %v14360_v38, %v6996_v4 }
 0xbae   :  { %v7028_v42 = vmul.f32 1.442695, %v7019_v51 }
 0xbaf   :  { %v7026_v5 = vmul.f32 1.442695, %v7018_v9  ;;  %v7005_v59 = vpop.xlane.xlu1 %7004 }
 0xbb0   :  { %8338 = vpow2.f32 %v7028_v42  ;;  %v7021_v22 = vsub.f32 %v14366_v52, %v7005_v59  ;;  %v7002_v16 = vpop.xlane.xlu0 %7001 }
 0xbb1   :  { %8340 = vpow2.f32 %v7026_v5  ;;  %v7020_v35 = vsub.f32 %v14368_v49, %v7002_v16 }
 0xbb2   :  { %v7032_v55 = vmul.f32 1.442695, %v7021_v22 }
 0xbb3   :  { %v7030_v62 = vmul.f32 1.442695, %v7020_v35  ;;  %v7011_v48 = vpop.xlane.xlu1 %7010 }
 0xbb4   :  { %8342 = vpow2.f32 %v7032_v55  ;;  %v7023_v44 = vsub.f32 %v14374_v27, %v7011_v48  ;;  %v7008_v58 = vpop.xlane.xlu0 %7007 }
 0xbb5   :  { %v7022_v34 = vsub.f32 %v14376_v47, %v7008_v58  ;;  %8344 = vpow2.f32 %v7030_v62 }
 0xbb6   :  { %v7036_v38 = vmul.f32 1.442695, %v7023_v44 }
 0xbb7   :  { %v7034_v28 = vmul.f32 1.442695, %v7022_v34  ;;  %v7017_v23 = vpop.xlane.xlu1 %7016 }
 0xbb8   :  { %v7025_v45 = vsub.f32 %v14382_v14, %v7017_v23  ;;  %v8048_v52 = vpop.permute.xlu0 %8047 }
 0xbb9   :  { %8346 = vpow2.f32 %v7034_v28  ;;  %v8050_v46 = vunpack.i.h.bf16 %v8048_v52  ;;  %v8049_v47 = vunpack.i.l.bf16 %v8048_v52 }
 0xbba   :  { %v14438_v39 = vpop.eup %8338  ;;  %8348 = vpow2.f32 %v7036_v38  ;;  %v7040_v49 = vmul.f32 1.442695, %v7025_v45 }
 0xbbb   :  { %v14440_v25 = vpop.eup %8340  ;;  %v8043_v43 = vpop.permute.xlu1 %8042  ;;  %v7045_v27 = vsel %vm6449_vm12, %v14438_v39, 0.0  ;;  %v7950_v41 = vpack.c.bf16 %v8050_v46, %v8049_v47 }
 0xbbc   :  { %v8045_v19 = vunpack.i.h.bf16 %v8043_v43  ;;  %v8044_v33 = vunpack.i.l.bf16 %v8043_v43  ;;  %7046 = vadd.xlane.f32.xlu1 %v7045_v27  ;;  %v7042_v14 = vsel %vm6449_vm12, %v14440_v25, 0.0  ;;  %8350 = vpow2.f32 %v7040_v49 }
 0xbbd   :  { %7043 = vadd.xlane.f32.xlu0 %v7042_v14 }
 0xbbe   :  { %v14446_v63 = vpop.eup %8342  ;;  %v7922_v60 = vpack.c.bf16 %v8045_v19, %v8044_v33 }
 0xbbf   :  { %v7051_v57 = vsel %vm6449_vm12, %v14446_v63, 0.0  ;;  %v14450_v15 = vpop.eup %8344 }
 0xbc0   :  { %7923 = vmatprep.subr.bf16.mxu1 %v7922_v60  ;;  %7052 = vadd.xlane.f32.xlu1 %v7051_v57  ;;  %v7048_v10 = vsel %vm6449_vm12, %v14450_v15, 0.0 }
 0xbc1   :  { %7925 = vmatpush3.bf16.msra.mxu1 %v7922_v60 }
 0xbc2   :  { %7951 = vmatprep.subr.bf16.mxu1 %v7950_v41 }
 0xbc3   :  { %v14452_v2 = vpop.eup %8346 }
 0xbc4   :  { %v14456_v51 = vpop.eup %8348  ;;  %7049 = vadd.xlane.f32.xlu1 %v7048_v10  ;;  %v7054_v4 = vsel %vm6449_vm12, %v14452_v2, 0.0 }
 0xbc5   :  { %7055 = vadd.xlane.f32.xlu0 %v7054_v4  ;;  %v7057_v9 = vsel %vm6449_vm12, %v14456_v51, 0.0 }
 0xbc6   :  { %v14462_v42 = vpop.eup %8350 }
 0xbc7   :  { %v7063_v5 = vsel %vm6449_vm12, %v14462_v42, 0.0 }
 0xbc8   :  { %7058 = vadd.xlane.f32.xlu1 %v7057_v9 }
 0xbcc   :  { %7064 = vadd.xlane.f32.xlu1 %v7063_v5 }
 0xbdb   :  { %8062 = vrot.lane.b32.xlu0 %v14268_v13, %s8476_s16 }
 0xbe9   :  { %v7014_v59 = vpop.xlane.xlu0 %7013 }
 0xbea   :  { %v7024_v22 = vsub.f32 %v14384_v0, %v7014_v59 }
 0xbec   :  { %v7038_v16 = vmul.f32 1.442695, %v7024_v22 }
 0xbed   :  { %v8053_v58 = vpop.permute.xlu0 %8052 }
 0xbee   :  { %8352 = vpow2.f32 %v7038_v16  ;;  %v8055_v52 = vunpack.i.h.bf16 %v8053_v58  ;;  %v8054_v49 = vunpack.i.l.bf16 %v8053_v58 }
 0xbf0   :  { %v7954_v47 = vpack.c.bf16 %v8055_v52, %v8054_v49 }
 0xbf3   :  { %v6503_v62 = vpop.xlane.xlu1 %6502 }
 0xbf4   :  { %8354 = vrcp.f32 %v6503_v62 }
 0xbf8   :  { %v14469_v35 = vpop.eup %8352  ;;  %v6509_v48 = vpop.xlane.xlu1 %6508 }
 0xbf9   :  { %v7060_v55 = vsel %vm6449_vm12, %v14469_v35, 0.0 }
 0xbfa   :  { %7061 = vadd.xlane.f32.xlu1 %v7060_v55 }
 0xbfc   :  { %v6515_v44 = vpop.xlane.xlu1 %6514 }
 0xbfe   :  { %v8355_v23 = vpop.eup %8354 }
 0xbff   :  { %v6531_v46 = vmul.f32 %v8355_v23, %v14394_v12 }
 0xc00   :  { %v6521_v34 = vpop.xlane.xlu1 %6520 }
 0xc04   :  { %v6518_v38 = vpop.xlane.xlu1 %6517 }
 0xc0b   :  { %8057 = vrot.lane.b32.xlu1 %v14257_v61, %s8476_s16 }
 0xc1e   :  { %v6500_v13 = vpop.xlane.xlu0 %6499 }
 0xc1f   :  { %8356 = vrcp.f32 %v6500_v13 }
 0xc20   :  { %8358 = vrcp.f32 %v6509_v48 }
 0xc22   :  { %v6506_v0 = vpop.xlane.xlu0 %6505 }
 0xc23   :  { %8360 = vrcp.f32 %v6506_v0 }
 0xc24   :  { %8362 = vrcp.f32 %v6515_v44 }
 0xc25   :  { %8364 = vrcp.f32 %v6518_v38 }
 0xc26   :  { %v6512_v28 = vpop.xlane.xlu0 %6511 }
 0xc27   :  { %8366 = vrcp.f32 %v6512_v28 }
 0xc28   :  { %8368 = vrcp.f32 %v6521_v34 }
 0xc29   :  { %v8357_v45 = vpop.eup %8356 }
 0xc2a   :  { %v6530_v61 = vmul.f32 %v8357_v45, %v14419_v50  ;;  %v8359_v43 = vpop.eup %8358 }
 0xc2b   :  { %v6533_v14 = vmul.f32 %v8359_v43, %v14398_v29 }
 0xc2c   :  { %7802 = vmatprep.mubr.msk.f32.mxu1 %vm6449_vm12, %v6530_v61 }
 0xc2d   :  { %v8361_v27 = vpop.eup %8360  ;;  %7803 = vmatmul.mubr.msk.f32.vlgmr.msra.gmra.mrb[36].mxu1 %vm6449_vm12, %v6531_v46 }
 0xc2e   :  { %7953 = vmatpush3.bf16.msra.mxu1 %v7950_v41  ;;  %v6532_v19 = vmul.f32 %v8361_v27, %v14423_v24  ;;  %v8363_v33 = vpop.eup %8362 }
 0xc2f   :  { %7955 = vmatprep.subr.bf16.mxu1 %v7954_v47  ;;  %v8365_v60 = vpop.eup %8364  ;;  %v6535_v57 = vmul.f32 %v8363_v33, %v14402_v7  ;;  %v14518_v33 = vld [vmem:[%s14717_s7 + $0x4] ss:$0 sm:$0xff] }
 0xc30   :  { %7805 = vmatprep.mubr.msk.f32.mxu1 %vm6449_vm12, %v6532_v19  ;;  %v6536_v24 = vmul.f32 %v8365_v60, %v14412_v20  ;;  %v14511_v19 = vld [vmem:[%s14717_s7 + $0x3] ss:$0 sm:$0xff]  ;;  %s8486_s7 = smov [#allocation2]  }
 0xc31   :  { %v8367_v50 = vpop.eup %8366  ;;  %7806 = vmatmul.mubr.msk.f32.gmra.mrb[38].mxu1 %vm6449_vm12, %v6533_v14  ;;  %s7378_s12 = sshll.u32 %s8486_s7, 4  ;;  %s7379_s12 = int_to_ptr.vmem [resolvable:$true] %s7378_s12 }
 0xc32   :  { %7957 = vmatpush3.bf16.msra.mxu1 %v7954_v47  ;;  %v6534_v12 = vmul.f32 %v8367_v50, %v14427_v56  ;;  %v8369_v10 = vpop.eup %8368  ;;  %s8450_s13 = scalar_lea.vmem %s7379_s12, 32  ;;  %p8455_p1 = scmp.lt.s32.totalorder %s7379_s12, %s7379_s12 }
 0xc33   :  { %v6537_v29 = vmul.f32 %v8369_v10, %v14406_v37  ;;  %p8451_p0 = scmp.ne.s32.totalorder %s7379_s12, %s8450_s13  ;;  %p8456_p2 = scmp.lt.s32.totalorder %s8450_s13, %s8450_s13 }
 0xc34   :  { %7808 = vmatprep.mubr.msk.f32.mxu1 %vm6449_vm12, %v6534_v12 }
 0xc35   :  { %7809 = vmatmul.mubr.msk.f32.gmra.mrb[40].mxu1 %vm6449_vm12, %v6535_v57  ;;  %p8457_p3 = por %p8456_p2, %p8455_p1 }
 0xc36   :  { %7811 = vmatprep.mubr.msk.f32.mxu1 %vm6449_vm12, %v6536_v24 }
 0xc37   :  { %p8458_p4 = pnand %p8457_p3, %p8451_p0 }
 0xc39   :  { %7812 = vmatmul.mubr.msk.f32.gmra.mrb[42].mxu1 %vm6449_vm12, %v6537_v29 }
 0xc49   :  { %v7047_v7 = vpop.xlane.xlu1 %7046 }
 0xc4a   :  { %v7044_v41 = vpop.xlane.xlu0 %7043 }
 0xc4b   :  { %8370 = vrcp.f32 %v7044_v41 }
 0xc4c   :  { %8372 = vrcp.f32 %v7047_v7 }
 0xc4d   :  { %v7053_v9 = vpop.xlane.xlu1 %7052 }
 0xc51   :  { %v7050_v5 = vpop.xlane.xlu1 %7049 }
 0xc52   :  { %v7056_v20 = vpop.xlane.xlu0 %7055  ;;  %8374 = vrcp.f32 %v7050_v5 }
 0xc53   :  { %8376 = vrcp.f32 %v7053_v9 }
 0xc54   :  { %8378 = vrcp.f32 %v7056_v20 }
 0xc55   :  { %v8371_v4 = vpop.eup %8370  ;;  %v7059_v59 = vpop.xlane.xlu1 %7058 }
 0xc56   :  { %v7074_v56 = vmul.f32 %v8371_v4, %v14440_v25  ;;  %v8063_v55 = vpop.permute.xlu0 %8062  ;;  %8380 = vrcp.f32 %v7059_v59  ;;  %v8373_v13 = vpop.eup %8372 }
 0xc57   :  { %v8065_v62 = vunpack.i.h.bf16 %v8063_v55  ;;  %v8064_v48 = vunpack.i.l.bf16 %v8063_v55  ;;  %v7075_v38 = vmul.f32 %v8373_v13, %v14438_v39 }
 0xc58   :  { %7858 = vmatprep.mubr.msk.f32.mxu1 %vm6449_vm12, %v7074_v56 }
 0xc59   :  { %v7065_v22 = vpop.xlane.xlu1 %7064  ;;  %v7962_v34 = vpack.c.bf16 %v8065_v62, %v8064_v48 }
 0xc5c   :  { %v8375_v0 = vpop.eup %8374 }
 0xc5d   :  { %v8377_v28 = vpop.eup %8376  ;;  %v7076_v23 = vmul.f32 %v8375_v0, %v14450_v15 }
 0xc5e   :  { %v8379_v45 = vpop.eup %8378  ;;  %v7077_v52 = vmul.f32 %v8377_v28, %v14446_v63 }
 0xc5f   :  { %v7078_v61 = vmul.f32 %v8379_v45, %v14452_v2 }
 0xc60   :  { %v8381_v49 = vpop.eup %8380 }
 0xc61   :  { %v7079_v39 = vmul.f32 %v8381_v49, %v14456_v51 }
 0xc87   :  { %v7062_v16 = vpop.xlane.xlu1 %7061 }
 0xc88   :  { %8382 = vrcp.f32 %v7062_v16 }
 0xc89   :  { %8384 = vrcp.f32 %v7065_v22 }
 0xc8b   :  { %v8058_v37 = vpop.permute.xlu1 %8057 }
 0xc8c   :  { %v8060_v44 = vunpack.i.h.bf16 %v8058_v37  ;;  %v8059_v58 = vunpack.i.l.bf16 %v8058_v37 }
 0xc8e   :  { %v7958_v25 = vpack.c.bf16 %v8060_v44, %v8059_v58 }
 0xc90   :  { %7959 = vmatprep.subr.bf16.mxu1 %v7958_v25 }
 0xc91   :  { %7961 = vmatpush3.bf16.msra.mxu1 %v7958_v25 }
 0xc92   :  { %7963 = vmatprep.subr.bf16.mxu1 %v7962_v34  ;;  %v8383_v46 = vpop.eup %8382 }
 0xc93   :  { %v8385_v43 = vpop.eup %8384  ;;  %v7080_v15 = vmul.f32 %v8383_v46, %v14469_v35 }
 0xc94   :  { %v7081_v27 = vmul.f32 %v8385_v43, %v14462_v42 }
 0xc95   :  { %7965 = vmatpush3.bf16.msra.mxu1 %v7962_v34 }
 0xc98   :  { %7859 = vmatmul.mubr.msk.f32.vlgmr.msra.gmra.mrb[44].mxu1 %vm6449_vm12, %v7075_v38 }
 0xc99   :  { %7861 = vmatprep.mubr.msk.f32.mxu1 %vm6449_vm12, %v7076_v23 }
 0xc9c   :  { %7862 = vmatmul.mubr.msk.f32.gmra.mrb[46].mxu1 %vm6449_vm12, %v7077_v52 }
 0xc9d   :  { %7864 = vmatprep.mubr.msk.f32.mxu1 %vm6449_vm12, %v7078_v61 }
 0xca0   :  { %7865 = vmatmul.mubr.msk.f32.gmra.mrb[48].mxu1 %vm6449_vm12, %v7079_v39 }
 0xca1   :  { %7867 = vmatprep.mubr.msk.f32.mxu1 %vm6449_vm12, %v7080_v15 }
 0xca4   :  { %7868 = vmatmul.mubr.msk.f32.gmra.mrb[50].mxu1 %vm6449_vm12, %v7081_v27 }
 0xd00   :  { %v7804_v63 = vpop.f32.mrb[36].mxu1 }
 0xd01   :  { %v6658_v2 = vadd.f32 %v7804_v63, %v14071_v1  ;;  %v6652_v47 = vpop.f32.mrb[37].mxu1 }
 0xd02   :  { %v6653_v51 = vadd.f32 %v6652_v47, %v14057_v54 }
 0xd03   :  { %v6692_v35 = vmul.f32 %v6658_v2, %v14071_v1 }
 0xd04   :  { %v6691_v42 = vmul.f32 %v6653_v51, %v14057_v54  ;;  %v7807_v14 = vpop.f32.mrb[38].mxu1 }
 0xd05   :  { %v6704_v60 = vmul.f32 %v14511_v19, %v6692_v35  ;;  %v6668_v50 = vadd.f32 %v7807_v14, %v14085_v31  ;;  %v6662_v12 = vpop.f32.mrb[39].mxu1 }
 0xd06   :  { %v6703_v57 = vmul.f32 %v14511_v19, %v6691_v42  ;;  %v6663_v10 = vadd.f32 %v6662_v12, %v14077_v30 }
 0xd07   :  { %v14526_v24 = vadd.f32 %v14518_v33, %v6704_v60  ;;  %v6694_v1 = vmul.f32 %v6668_v50, %v14085_v31 }
 0xd08   :  { %v14530_v29 = vadd.f32 %v14518_v33, %v6703_v57  ;;  %v6693_v54 = vmul.f32 %v6663_v10, %v14077_v30  ;;  %v7810_v41 = vpop.f32.mrb[40].mxu1 }
 0xd09   :  { %v6724_v4 = vmin.f32 %v14526_v24, 20.0  ;;  %v6706_v56 = vmul.f32 %v14511_v19, %v6694_v1  ;;  %v6678_v7 = vadd.f32 %v7810_v41, %v14104_v11  ;;  %v6672_v9 = vpop.f32.mrb[41].mxu1  ;;  %vm6796_vm14 = vcmp.gt.f32.partialorder %v14526_v24, 20.0 }
 0xd0a   :  { %v6723_v5 = vmin.f32 %v14530_v29, 20.0  ;;  %v6705_v59 = vmul.f32 %v14511_v19, %v6693_v54  ;;  %v6673_v20 = vadd.f32 %v6672_v9, %v14091_v6  ;;  %vm6795_vm15 = vcmp.gt.f32.partialorder %v14530_v29, 20.0 }
 0xd0b   :  { %v6733_v31 = vmul.f32 1.442695, %v6724_v4  ;;  %v14540_v22 = vadd.f32 %v14518_v33, %v6706_v56  ;;  %v6696_v30 = vmul.f32 %v6678_v7, %v14104_v11 }
 0xd0c   :  { %v6731_v16 = vmul.f32 1.442695, %v6723_v5  ;;  %v14544_v55 = vadd.f32 %v14518_v33, %v6705_v59  ;;  %v6695_v37 = vmul.f32 %v6673_v20, %v14091_v6  ;;  %v7813_v62 = vpop.f32.mrb[42].mxu1 }
 0xd0d   :  { %8386 = vpow2.f32 %v6733_v31  ;;  %v6726_v48 = vmin.f32 %v14540_v22, 20.0  ;;  %v6708_v44 = vmul.f32 %v14511_v19, %v6696_v30  ;;  %v6682_v58 = vpop.f32.mrb[43].mxu1  ;;  %v6688_v0 = vadd.f32 %v7813_v62, %v14132_v36 }
 0xd0e   :  { %8388 = vpow2.f32 %v6731_v16  ;;  %v6725_v25 = vmin.f32 %v14544_v55, 20.0  ;;  %v6707_v34 = vmul.f32 %v14511_v19, %v6695_v37  ;;  %v6683_v6 = vadd.f32 %v6682_v58, %v14114_v8 }
 0xd0f   :  { %v6737_v13 = vmul.f32 1.442695, %v6726_v48  ;;  %v14552_v11 = vadd.f32 %v14518_v33, %v6708_v44  ;;  %v6698_v45 = vmul.f32 %v6688_v0, %v14132_v36  ;;  %vm6798_vm0 = vcmp.gt.f32.partialorder %v14540_v22, 20.0 }
 0xd10   :  { %v6735_v38 = vmul.f32 1.442695, %v6725_v25  ;;  %v14557_v28 = vadd.f32 %v14518_v33, %v6707_v34  ;;  %v6697_v49 = vmul.f32 %v6683_v6, %v14114_v8  ;;  %vm6797_vm13 = vcmp.gt.f32.partialorder %v14544_v55, 20.0 }
 0xd11   :  { %8390 = vpow2.f32 %v6737_v13  ;;  %v6728_v23 = vmin.f32 %v14552_v11, 20.0  ;;  %v6710_v46 = vmul.f32 %v14511_v19, %v6698_v45  ;;  %vm6800_vm3 = vcmp.gt.f32.partialorder %v14552_v11, 20.0 }
 0xd12   :  { %8392 = vpow2.f32 %v6735_v38  ;;  %v6727_v52 = vmin.f32 %v14557_v28, 20.0  ;;  %v6709_v43 = vmul.f32 %v14511_v19, %v6697_v49  ;;  %vm6799_vm5 = vcmp.gt.f32.partialorder %v14557_v28, 20.0 }
 0xd13   :  { %v6741_v61 = vmul.f32 1.442695, %v6728_v23  ;;  %v14566_v15 = vadd.f32 %v14518_v33, %v6710_v46 }
 0xd14   :  { %v6739_v39 = vmul.f32 1.442695, %v6727_v52  ;;  %v14569_v27 = vadd.f32 %v14518_v33, %v6709_v43 }
 0xd15   :  { %8394 = vpow2.f32 %v6741_v61  ;;  %v6730_v63 = vmin.f32 %v14566_v15, 20.0  ;;  %vm6802_vm7 = vcmp.gt.f32.partialorder %v14566_v15, 20.0 }
 0xd16   :  { %8396 = vpow2.f32 %v6739_v39  ;;  %v6729_v8 = vmin.f32 %v14569_v27, 20.0  ;;  %vm6801_vm1 = vcmp.gt.f32.partialorder %v14569_v27, 20.0 }
 0xd17   :  { %v8387_v36 = vpop.eup %8386  ;;  %v6745_v35 = vmul.f32 1.442695, %v6730_v63 }
 0xd18   :  { %v8389_v2 = vpop.eup %8388  ;;  %v6748_v47 = vadd.f32 2.0, %v8387_v36  ;;  %v6743_v14 = vmul.f32 1.442695, %v6729_v8 }
 0xd19   :  { %v6747_v51 = vadd.f32 2.0, %v8389_v2  ;;  %8398 = vpow2.f32 %v6745_v35 }
 0xd1a   :  { %v6756_v42 = vmul.f32 %v8387_v36, %v6748_v47  ;;  %8400 = vpow2.f32 %v6743_v14 }
 0xd1b   :  { %v8391_v60 = vpop.eup %8390  ;;  %v6755_v50 = vmul.f32 %v8389_v2, %v6747_v51 }
 0xd1c   :  { %v8393_v12 = vpop.eup %8392  ;;  %v6772_v57 = vadd.f32 2.0, %v6756_v42  ;;  %v6750_v10 = vadd.f32 2.0, %v8391_v60  ;;  %v6764_v58 = vmul.f32 %v6756_v42, %v14526_v24 }
 0xd1d   :  { %v6771_v1 = vadd.f32 2.0, %v6755_v50  ;;  %v6749_v54 = vadd.f32 2.0, %v8393_v12  ;;  %v6763_v13 = vmul.f32 %v6755_v50, %v14530_v29 }
 0xd1e   :  { %8402 = vrcp.f32 %v6772_v57  ;;  %v6758_v41 = vmul.f32 %v8391_v60, %v6750_v10 }
 0xd1f   :  { %v8395_v4 = vpop.eup %8394  ;;  %8404 = vrcp.f32 %v6771_v1  ;;  %v6757_v56 = vmul.f32 %v8393_v12, %v6749_v54 }
 0xd20   :  { %v8397_v7 = vpop.eup %8396  ;;  %v6774_v9 = vadd.f32 2.0, %v6758_v41  ;;  %v6752_v5 = vadd.f32 2.0, %v8395_v4  ;;  %v6766_v61 = vmul.f32 %v6758_v41, %v14540_v22 }
 0xd21   :  { %v6773_v59 = vadd.f32 2.0, %v6757_v56  ;;  %v6751_v20 = vadd.f32 2.0, %v8397_v7  ;;  %v6765_v63 = vmul.f32 %v6757_v56, %v14544_v55 }
 0xd22   :  { %8406 = vrcp.f32 %v6774_v9  ;;  %v6760_v31 = vmul.f32 %v8395_v4, %v6752_v5 }
 0xd23   :  { %8408 = vrcp.f32 %v6773_v59  ;;  %v6759_v30 = vmul.f32 %v8397_v7, %v6751_v20  ;;  %v8399_v37 = vpop.eup %8398 }
 0xd24   :  { %v6776_v16 = vadd.f32 2.0, %v6760_v31  ;;  %v8401_v48 = vpop.eup %8400  ;;  %v6754_v44 = vadd.f32 2.0, %v8399_v37  ;;  %v6768_v35 = vmul.f32 %v6760_v31, %v14552_v11 }
 0xd25   :  { %v6775_v62 = vadd.f32 2.0, %v6759_v30  ;;  %v6753_v25 = vadd.f32 2.0, %v8401_v48  ;;  %v6767_v60 = vmul.f32 %v6759_v30, %v14557_v28 }
 0xd26   :  { %8410 = vrcp.f32 %v6776_v16  ;;  %v6762_v0 = vmul.f32 %v8399_v37, %v6754_v44 }
 0xd27   :  { %8412 = vrcp.f32 %v6775_v62  ;;  %v6761_v23 = vmul.f32 %v8401_v48, %v6753_v25 }
 0xd28   :  { %v8403_v34 = vpop.eup %8402  ;;  %v6778_v52 = vadd.f32 2.0, %v6762_v0  ;;  %v6770_v56 = vmul.f32 %v6762_v0, %v14566_v15 }
 0xd29   :  { %v8405_v6 = vpop.eup %8404  ;;  %v6788_v38 = vmul.f32 %v8403_v34, %v6764_v58  ;;  %v6777_v46 = vadd.f32 2.0, %v6761_v23  ;;  %v6769_v5 = vmul.f32 %v6761_v23, %v14569_v27 }
 0xd2a   :  { %v6787_v45 = vmul.f32 %v8405_v6, %v6763_v13  ;;  %8414 = vrcp.f32 %v6778_v52 }
 0xd2b   :  { %v6804_v49 = vsel %vm6796_vm14, %v14526_v24, %v6788_v38  ;;  %8416 = vrcp.f32 %v6777_v46 }
 0xd2c   :  { %v8407_v39 = vpop.eup %8406  ;;  %v6812_v43 = vsel %vm6091_vm4, %v6804_v49, 0.0  ;;  %v6803_v36 = vsel %vm6795_vm15, %v14530_v29, %v6787_v45 }
 0xd2d   :  { %v8409_v2 = vpop.eup %8408  ;;  %v6811_v47 = vsel %vm6091_vm4, %v6803_v36, 0.0  ;;  %v6790_v8 = vmul.f32 %v8407_v39, %v6766_v61 }
 0xd2e   :  { %v6813_v51 = vadd.f32 %v6812_v43, %v6811_v47  ;;  %v6789_v24 = vmul.f32 %v8409_v2, %v6765_v63 }
 0xd2f   :  { %v6806_v14 = vsel %vm6798_vm0, %v14540_v22, %v6790_v8  ;;  %vm7370_vm0 = vcmask 189440  }
 0xd30   :  { %v8411_v42 = vpop.eup %8410  ;;  %v6805_v29 = vsel %vm6797_vm13, %v14544_v55, %v6789_v24  ;;  %v6816_v54 = vsel %vm6091_vm4, %v6806_v14, 0.0 }
 0xd31   :  { %v8413_v50 = vpop.eup %8412  ;;  %v6814_v12 = vsel %vm6091_vm4, %v6805_v29, 0.0  ;;  %v6792_v57 = vmul.f32 %v8411_v42, %v6768_v35 }
 0xd32   :  { %v6815_v10 = vadd.f32 %v6814_v12, %v6813_v51  ;;  %v6791_v1 = vmul.f32 %v8413_v50, %v6767_v60 }
 0xd33   :  { %v6808_v41 = vsel %vm6800_vm3, %v14552_v11, %v6792_v57 }
 0xd34   :  { %v6807_v22 = vsel %vm6799_vm5, %v14557_v28, %v6791_v1  ;;  %v6817_v4 = vadd.f32 %v6816_v54, %v6815_v10  ;;  %v8415_v7 = vpop.eup %8414  ;;  %v6820_v20 = vsel %vm6091_vm4, %v6808_v41, 0.0 }
 0xd35   :  { %v6818_v55 = vsel %vm6091_vm4, %v6807_v22, 0.0  ;;  %v8417_v59 = vpop.eup %8416  ;;  %v6794_v31 = vmul.f32 %v8415_v7, %v6770_v56 }
 0xd36   :  { %v6819_v9 = vadd.f32 %v6818_v55, %v6817_v4  ;;  %v6793_v30 = vmul.f32 %v8417_v59, %v6769_v5 }
 0xd37   :  { %v6810_v11 = vsel %vm6802_vm7, %v14566_v15, %v6794_v31 }
 0xd38   :  { %v6821_v16 = vadd.f32 %v6820_v20, %v6819_v9  ;;  %v6809_v28 = vsel %vm6801_vm1, %v14569_v27, %v6793_v30  ;;  %v6824_v48 = vsel %vm6091_vm4, %v6810_v11, 0.0 }
 0xd39   :  { %v6822_v37 = vsel %vm6091_vm4, %v6809_v28, 0.0 }
 0xd3a   :  { %v6823_v62 = vadd.f32 %v6822_v37, %v6821_v16 }
 0xd3c   :  { %v14605_v44 = vadd.f32 %v6824_v48, %v6823_v62 }
 0xd6b   :  { %v7860_v58 = vpop.f32.mrb[44].mxu1 }
 0xd6c   :  { %v7202_v25 = vadd.f32 %v7860_v58, %v14146_v53  ;;  %v7196_v34 = vpop.f32.mrb[45].mxu1 }
 0xd6d   :  { %v7197_v13 = vadd.f32 %v7196_v34, %v14139_v40 }
 0xd6e   :  { %v7236_v0 = vmul.f32 %v7202_v25, %v14146_v53 }
 0xd6f   :  { %v7235_v6 = vmul.f32 %v7197_v13, %v14139_v40  ;;  %v7863_v15 = vpop.f32.mrb[46].mxu1 }
 0xd70   :  { %v7244_v27 = vmul.f32 %v14511_v19, %v7236_v0  ;;  %v7212_v38 = vadd.f32 %v7863_v15, %v14167_v26  ;;  %v7206_v23 = vpop.f32.mrb[47].mxu1 }
 0xd71   :  { %v7243_v45 = vmul.f32 %v14511_v19, %v7235_v6  ;;  %v7207_v52 = vadd.f32 %v7206_v23, %v14155_v32 }
 0xd72   :  { %v14616_v49 = vadd.f32 %v14518_v33, %v7244_v27  ;;  %v7238_v61 = vmul.f32 %v7212_v38, %v14167_v26 }
 0xd73   :  { %v14620_v46 = vadd.f32 %v14518_v33, %v7243_v45  ;;  %v7237_v40 = vmul.f32 %v7207_v52, %v14155_v32  ;;  %v7866_v53 = vpop.f32.mrb[48].mxu1 }
 0xd74   :  { %v7260_v39 = vmin.f32 %v14616_v49, 20.0  ;;  %v7246_v43 = vmul.f32 %v14511_v19, %v7238_v61  ;;  %v7222_v36 = vadd.f32 %v7866_v53, %v14190_v18  ;;  %v7216_v63 = vpop.f32.mrb[49].mxu1  ;;  %vm7332_vm9 = vcmp.gt.f32.partialorder %v14616_v49, 20.0 }
 0xd75   :  { %v7259_v2 = vmin.f32 %v14620_v46, 20.0  ;;  %v7245_v47 = vmul.f32 %v14511_v19, %v7237_v40  ;;  %v7217_v8 = vadd.f32 %v7216_v63, %v14186_v3  ;;  %vm7331_vm6 = vcmp.gt.f32.partialorder %v14620_v46, 20.0 }
 0xd76   :  { %v7269_v26 = vmul.f32 1.442695, %v7260_v39  ;;  %v14630_v51 = vadd.f32 %v14518_v33, %v7246_v43  ;;  %v7240_v32 = vmul.f32 %v7222_v36, %v14190_v18 }
 0xd77   :  { %v7267_v24 = vmul.f32 1.442695, %v7259_v2  ;;  %v14634_v35 = vadd.f32 %v14518_v33, %v7245_v47  ;;  %v7239_v42 = vmul.f32 %v7217_v8, %v14186_v3  ;;  %v7869_v14 = vpop.f32.mrb[50].mxu1 }
 0xd78   :  { %8418 = vpow2.f32 %v7269_v26  ;;  %v7262_v29 = vmin.f32 %v14630_v51, 20.0  ;;  %v7248_v60 = vmul.f32 %v14511_v19, %v7240_v32  ;;  %v7226_v50 = vpop.f32.mrb[51].mxu1  ;;  %v7232_v1 = vadd.f32 %v7869_v14, %v14198_v17 }
 0xd79   :  { %8420 = vpow2.f32 %v7267_v24  ;;  %v7261_v12 = vmin.f32 %v14634_v35, 20.0  ;;  %v7247_v57 = vmul.f32 %v14511_v19, %v7239_v42  ;;  %v7227_v3 = vadd.f32 %v7226_v50, %v14194_v21 }
 0xd7a   :  { %v7273_v10 = vmul.f32 1.442695, %v7262_v29  ;;  %v14642_v18 = vadd.f32 %v14518_v33, %v7248_v60  ;;  %v7242_v4 = vmul.f32 %v7232_v1, %v14198_v17  ;;  %vm7334_vm8 = vcmp.gt.f32.partialorder %v14630_v51, 20.0 }
 0xd7b   :  { %v7271_v54 = vmul.f32 1.442695, %v7261_v12  ;;  %v14647_v41 = vadd.f32 %v14518_v33, %v7247_v57  ;;  %v7241_v56 = vmul.f32 %v7227_v3, %v14194_v21  ;;  %vm7333_vm10 = vcmp.gt.f32.partialorder %v14634_v35, 20.0 }
 0xd7c   :  { %8422 = vpow2.f32 %v7273_v10  ;;  %v7264_v22 = vmin.f32 %v14642_v18, 20.0  ;;  %v7250_v9 = vmul.f32 %v14511_v19, %v7242_v4  ;;  %vm7336_vm11 = vcmp.gt.f32.partialorder %v14642_v18, 20.0 }
 0xd7d   :  { %8424 = vpow2.f32 %v7271_v54  ;;  %v7263_v55 = vmin.f32 %v14647_v41, 20.0  ;;  %v7249_v59 = vmul.f32 %v14511_v19, %v7241_v56  ;;  %vm7335_vm12 = vcmp.gt.f32.partialorder %v14647_v41, 20.0 }
 0xd7e   :  { %v7277_v7 = vmul.f32 1.442695, %v7264_v22  ;;  %v14656_v20 = vadd.f32 %v14518_v33, %v7250_v9 }
 0xd7f   :  { %v7275_v5 = vmul.f32 1.442695, %v7263_v55  ;;  %v14659_v31 = vadd.f32 %v14518_v33, %v7249_v59 }
 0xd80   :  { %8426 = vpow2.f32 %v7277_v7  ;;  %v7266_v30 = vmin.f32 %v14656_v20, 20.0  ;;  %vm7338_vm14 = vcmp.gt.f32.partialorder %v14656_v20, 20.0 }
 0xd81   :  { %8428 = vpow2.f32 %v7275_v5  ;;  %v7265_v21 = vmin.f32 %v14659_v31, 20.0  ;;  %vm7337_vm15 = vcmp.gt.f32.partialorder %v14659_v31, 20.0 }
 0xd82   :  { %v8419_v17 = vpop.eup %8418  ;;  %v7281_v37 = vmul.f32 1.442695, %v7266_v30 }
 0xd83   :  { %v8421_v16 = vpop.eup %8420  ;;  %v7284_v11 = vadd.f32 2.0, %v8419_v17  ;;  %v7279_v48 = vmul.f32 1.442695, %v7265_v21 }
 0xd84   :  { %v7283_v28 = vadd.f32 2.0, %v8421_v16  ;;  %8430 = vpow2.f32 %v7281_v37 }
 0xd85   :  { %v7292_v62 = vmul.f32 %v8419_v17, %v7284_v11  ;;  %8432 = vpow2.f32 %v7279_v48 }
 0xd86   :  { %v8423_v19 = vpop.eup %8422  ;;  %v7291_v58 = vmul.f32 %v8421_v16, %v7283_v28 }
 0xd87   :  { %v8425_v25 = vpop.eup %8424  ;;  %v7308_v34 = vadd.f32 2.0, %v7292_v62  ;;  %v7286_v13 = vadd.f32 2.0, %v8423_v19  ;;  %v7300_v47 = vmul.f32 %v7292_v62, %v14616_v49 }
 0xd88   :  { %v7307_v33 = vadd.f32 2.0, %v7291_v58  ;;  %v7285_v0 = vadd.f32 2.0, %v8425_v25  ;;  %v7299_v32 = vmul.f32 %v7291_v58, %v14620_v46 }
 0xd89   :  { %8434 = vrcp.f32 %v7308_v34  ;;  %v7294_v6 = vmul.f32 %v8423_v19, %v7286_v13 }
 0xd8a   :  { %v8427_v15 = vpop.eup %8426  ;;  %8436 = vrcp.f32 %v7307_v33  ;;  %v7293_v27 = vmul.f32 %v8425_v25, %v7285_v0 }
 0xd8b   :  { %v8429_v38 = vpop.eup %8428  ;;  %v7310_v23 = vadd.f32 2.0, %v7294_v6  ;;  %v7288_v45 = vadd.f32 2.0, %v8427_v15  ;;  %v7302_v57 = vmul.f32 %v7294_v6, %v14630_v51 }
 0xd8c   :  { %v7309_v52 = vadd.f32 2.0, %v7293_v27  ;;  %v7287_v61 = vadd.f32 2.0, %v8429_v38  ;;  %v7301_v22 = vmul.f32 %v7293_v27, %v14634_v35 }
 0xd8d   :  { %8438 = vrcp.f32 %v7310_v23  ;;  %v7296_v40 = vmul.f32 %v8427_v15, %v7288_v45 }
 0xd8e   :  { %8440 = vrcp.f32 %v7309_v52  ;;  %v7295_v53 = vmul.f32 %v8429_v38, %v7287_v61  ;;  %v8431_v43 = vpop.eup %8430 }
 0xd8f   :  { %v7312_v39 = vadd.f32 2.0, %v7296_v40  ;;  %v8433_v63 = vpop.eup %8432  ;;  %v7290_v2 = vadd.f32 2.0, %v8431_v43  ;;  %v7304_v9 = vmul.f32 %v7296_v40, %v14642_v18 }
 0xd90   :  { %v7311_v36 = vadd.f32 2.0, %v7295_v53  ;;  %v7289_v8 = vadd.f32 2.0, %v8433_v63  ;;  %v7303_v17 = vmul.f32 %v7295_v53, %v14647_v41 }
 0xd91   :  { %8442 = vrcp.f32 %v7312_v39  ;;  %v7298_v24 = vmul.f32 %v8431_v43, %v7290_v2 }
 0xd92   :  { %8444 = vrcp.f32 %v7311_v36  ;;  %v7297_v29 = vmul.f32 %v8433_v63, %v7289_v8 }
 0xd93   :  { %v8435_v26 = vpop.eup %8434  ;;  %v7314_v50 = vadd.f32 2.0, %v7298_v24  ;;  %v7306_v58 = vmul.f32 %v7298_v24, %v14656_v20 }
 0xd94   :  { %v8437_v42 = vpop.eup %8436  ;;  %v7324_v14 = vmul.f32 %v8435_v26, %v7300_v47  ;;  %v7313_v10 = vadd.f32 2.0, %v7297_v29  ;;  %v7305_v13 = vmul.f32 %v7297_v29, %v14659_v31 }
 0xd95   :  { %v7323_v60 = vmul.f32 %v8437_v42, %v7299_v32  ;;  %8446 = vrcp.f32 %v7314_v50 }
 0xd96   :  { %v7340_v12 = vsel %vm7332_vm9, %v14616_v49, %v7324_v14  ;;  %8448 = vrcp.f32 %v7313_v10 }
 0xd97   :  { %v8439_v1 = vpop.eup %8438  ;;  %v7348_v3 = vsel %vm6091_vm4, %v7340_v12, 0.0  ;;  %v7339_v54 = vsel %vm7331_vm6, %v14620_v46, %v7323_v60 }
 0xd98   :  { %v8441_v4 = vpop.eup %8440  ;;  %v7347_v55 = vsel %vm6091_vm4, %v7339_v54, 0.0  ;;  %v7326_v56 = vmul.f32 %v8439_v1, %v7302_v57 }
 0xd99   :  { %v7349_v7 = vadd.f32 %v7348_v3, %v7347_v55  ;;  %v7325_v49 = vmul.f32 %v8441_v4, %v7301_v22 }
 0xd9a   :  { %v7342_v59 = vsel %vm7334_vm8, %v14630_v51, %v7326_v56 }
 0xd9b   :  { %v8443_v5 = vpop.eup %8442  ;;  %v7341_v46 = vsel %vm7333_vm10, %v14634_v35, %v7325_v49  ;;  %v7352_v37 = vsel %vm6091_vm4, %v7342_v59, 0.0  ;;  %v6826_v35 = vrot.slane %v14605_v44, 4 }
 0xd9c   :  { %v8445_v30 = vpop.eup %8444  ;;  %v7350_v16 = vsel %vm6091_vm4, %v7341_v46, 0.0  ;;  %v7328_v11 = vmul.f32 %v8443_v5, %v7304_v9 }
 0xd9d   :  { %v7351_v21 = vadd.f32 %v7350_v16, %v7349_v7  ;;  %v7327_v28 = vmul.f32 %v8445_v30, %v7303_v17 }
 0xd9e   :  { %v7344_v62 = vsel %vm7336_vm11, %v14642_v18, %v7328_v11  ;;  %v6827_v18 = vadd.f32 %v6826_v35, %v14605_v44 }
 0xd9f   :  { %v7343_v51 = vsel %vm7335_vm12, %v14647_v41, %v7327_v28  ;;  %v7353_v48 = vadd.f32 %v7352_v37, %v7351_v21  ;;  %v8447_v25 = vpop.eup %8446  ;;  %v7356_v0 = vsel %vm6091_vm4, %v7344_v62, 0.0 }
 0xda0   :  { %v7354_v19 = vsel %vm6091_vm4, %v7343_v51, 0.0  ;;  %v8449_v33 = vpop.eup %8448  ;;  %v7330_v6 = vmul.f32 %v8447_v25, %v7306_v58  ;;  %v6828_v45 = vrot.slane %v6827_v18, 2 }
 0xda1   :  { %v7355_v34 = vadd.f32 %v7354_v19, %v7353_v48  ;;  %v7329_v15 = vmul.f32 %v8449_v33, %v7305_v13 }
 0xda2   :  { %v7346_v41 = vsel %vm7338_vm14, %v14656_v20, %v7330_v6  ;;  %v6829_v53 = vadd.f32 %v6828_v45, %v6827_v18 }
 0xda3   :  { %v7357_v27 = vadd.f32 %v7356_v0, %v7355_v34  ;;  %v7345_v38 = vsel %vm7337_vm15, %v14659_v31, %v7329_v15  ;;  %v7360_v61 = vsel %vm6091_vm4, %v7346_v41, 0.0 }
 0xda4   :  { %v7358_v23 = vsel %vm6091_vm4, %v7345_v38, 0.0  ;;  %v6830_v44 = vrot.slane %v6829_v53, 1 }
 0xda5   :  { %v7359_v52 = vadd.f32 %v7358_v23, %v7357_v27 }
 0xda6   :  { %v6831_v2 = vadd.f32 %v6830_v44, %v6829_v53 }
 0xda7   :  { %v7361_v40 = vadd.f32 %v7360_v61, %v7359_v52 }
 0xda8   :  { %v6832_v20 = vmul.f32 0.015625, %v6831_v2 }
 0xda9   :  { %v7362_v39 = vrot.slane %v7361_v40, 4 }
 0xdab   :  { %v7363_v43 = vadd.f32 %v7362_v39, %v7361_v40 }
 0xdad   :  { %v7364_v36 = vrot.slane %v7363_v43, 2 }
 0xdaf   :  { %v7365_v63 = vadd.f32 %v7364_v36, %v7363_v43 }
 0xdb1   :  { %v7366_v47 = vrot.slane %v7365_v63, 1 }
 0xdb3   :  { %v7367_v8 = vadd.f32 %v7366_v47, %v7365_v63 }
 0xdb5   :  { %v7368_v31 = vmul.f32 0.015625, %v7367_v8 }
 0xdb7   :  { %v7369_v26 = vsel %vm698_vm2, %v6832_v20, %v7368_v31 }
 0xdb8   :  { %7371 = vst.msk [vmem:[#allocation2] sm:$0x3] %vm7370_vm0, %v7369_v26 }
 0xdb9   :  { %8461 = shalt.err (!%p8458_p4)
}
 0xdba   :  { %s8462_s4 = scalar_lea.hbm %s14720_s10, 32 }
 0xdbb   :  { %p8463_p5 = scmp.ne.s32.totalorder %s14720_s10, %s8462_s4  ;;  %p8466_p6 = scmp.lt.u32.totalorder %s8462_s4, %s14720_s10 }
 0xdbd   :  { %p8468_p7 = pnand %p8466_p6, %p8463_p5 }
 0xdbf   :  { %8471 = shalt.err (!%p8468_p7)
}
 0xdc0   :  { %7381 = dma.vmem_to_hbm [thread:$0]  %s7379_s12, 32, %s14720_s10, [#allocation3]  }
 0xdc1   :  { %8472 = dma.done.wait [#allocation3], 32  }
 0xdc2   :  { %8473 = vsyncadd [#allocation3], 4294967264 }
 0xdc3   :  { %7385 = vsyncpa [#allocation3], 1 }

</bundles_post_ra>
